<compile_context>
chip_gen: v7x
topology: tpu7x:2x2x1
jax: 0.10.0
libtpu: 0.0.40
codegen_flags: <defaults>
</compile_context>

<pallas_src>
import functools

import jax
import jax.numpy as jnp
from jax.experimental import pallas as pl
from jax.experimental.pallas import tpu as pltpu


def _round_up(x, m):
    return ((x + m - 1) // m) * m


# ----------------------------------------------------------------------------- kernel
def _main_rnn_kernel(
    s_ref,      # (Bt*S, Dp)   meta @ Wlc   (row = b*S + s), per batch tile
    uh_ref,     # (Bt*S, Dp)   (meta @ Wlc) @ Wu
    xp_ref,     # (Tb, Bt, 3*Dp)  precomputed x @ W_ih + b_ih (time-major)
    h0_ref,     # (Bt, Dp)     initial hidden state (padded)
    P_ref,      # (Bt, Bt*S)   0/1 segment-sum matrix
    Pt_ref,     # (Bt*S, Bt)   0/1 repeat matrix (P^T)
    Wh_ref,     # (Dp, Dp+Zp+3*Dp)  fused [Wlq@Wq | Wlq@Wo_q@Wz | W_hh gates]
    WcZ_ref,    # (Dp, Zp)     folded Wo_c @ Wz
    Wz_ref,     # (Zp, 9*Dp)   fused [ZW_ih | ZW_hh | ZB]
    bq_ref,     # (1, Dp)
    v_ref,      # (1, Dp)
    bZ_ref,     # (1, Zp)      folded bo @ Wz + bz
    bhh_ref,    # (1, 3*Dp)
    out_ref,    # (Tb, Bt, Dp)
    z_out_ref,  # (Tb, Bt, Zp)
    h_scr,      # VMEM (Bt, Dp) f32  hidden state carried across time blocks
    *,
    tb,         # static: time steps per block
    d_pad,      # static: padded hidden dim
    z_pad,      # static: padded latent dim
):
    f32 = jnp.float32
    Dp, Zp = d_pad, z_pad

    # ---- per-batch-tile init: load h0 at the first time block ----
    @pl.when(pl.program_id(1) == 0)
    def _():
        h_scr[...] = h0_ref[...].astype(f32)

    # ---- hoisted, time-invariant loads (once per time block) ----
    s_p = s_ref[...]                      # (Bt*S, Dp)
    uh = uh_ref[...]                      # (Bt*S, Dp)
    P = P_ref[...]                        # (Bt, Bt*S)
    Pt = Pt_ref[...]                      # (Bt*S, Bt)
    Wh = Wh_ref[...]
    WcZ = WcZ_ref[...]
    Wz = Wz_ref[...]
    bq = bq_ref[...]
    v = v_ref[...]
    bZ = bZ_ref[...]
    bhh = bhh_ref[...]

    h = h_scr[...]                        # (Bt, Dp)

    for i in range(tb):  # static unroll of the time block
        # ---- fused h-projection: [wq-part | h@WhZ | GRU hidden proj] ----
        hW = jnp.dot(h, Wh, preferred_element_type=f32)        # (Bt, Dp+Zp+3Dp)
        wq = hW[:, :Dp] + bq                                   # (Bt, Dp)
        hZ = hW[:, Dp:Dp + Zp]                                 # (Bt, Zp)
        hp = hW[:, Dp + Zp:] + bhh                             # (Bt, 3Dp)

        # ---- mlp attention; group ops on the MXU, everything rank-2 ----
        wq_rep = jnp.dot(Pt, wq, preferred_element_type=f32)   # (Bt*S, Dp)
        wquh = jnp.tanh(wq_rep + uh)                           # (Bt*S, Dp)
        score = jnp.sum(wquh * v, axis=-1, keepdims=True)      # (Bt*S, 1)
        # global shift is constant within each batch group -> softmax-invariant
        score = score - jnp.max(score, axis=0, keepdims=True)
        e = jnp.exp(score)
        num = jnp.dot(P, e * s_p, preferred_element_type=f32)  # (Bt, Dp)  sum_s e*s
        den = jnp.dot(P, e, preferred_element_type=f32)        # (Bt, 1)   sum_s e
        c = num * pl.reciprocal(den, approx=True)              # context vector

        # ---- z (folded linear chain: Wo/ Wz collapsed at trace time) ----
        z = jnp.dot(c, WcZ, preferred_element_type=f32) + hZ + bZ   # (Bt, Zp)

        # ---- MainGRUCell with fused z-conditioned Hadamard weights ----
        zW = jnp.dot(z, Wz, preferred_element_type=f32)        # (Bt, 9Dp)
        wih = zW[:, :3 * Dp]
        whh = zW[:, 3 * Dp:6 * Dp]
        zb = zW[:, 6 * Dp:]

        xp = xp_ref[i]                                         # (Bt, 3Dp) = x@W_ih + b_ih
        gi = xp * wih + zb          # HadamardLinear(inputs, weight_ih, bias)
        gh = hp * whh               # HadamardLinear(h_, weight_hh)

        r = jax.nn.sigmoid(gi[:, :Dp] + gh[:, :Dp])
        zg = jax.nn.sigmoid(gi[:, Dp:2 * Dp] + gh[:, Dp:2 * Dp])
        n = jnp.tanh(r * gh[:, 2 * Dp:] + gi[:, 2 * Dp:])
        h = (1.0 - zg) * h + zg * n

        # direct lane-dense per-row stores (no concatenate / no extra live values)
        out_ref[i] = h.astype(out_ref.dtype)
        z_out_ref[i] = z.astype(z_out_ref.dtype)

    h_scr[...] = h


# ----------------------------------------------------------------------------- wrapper
def main_rnn_pallas(params, meta_outputs, h0, main_inputs, *,
                    time_block=32, batch_block=8):
    assert time_block % 8 == 0 and batch_block % 8 == 0
    f32 = jnp.float32

    B, S, M = meta_outputs.shape
    _, T, I = main_inputs.shape
    D = h0.shape[1]
    Z = params["Wz"].shape[1]

    Dp = _round_up(D, 128)
    Zp = _round_up(Z, 128)
    Bt = batch_block
    Bp = _round_up(B, Bt)
    Tb = min(time_block, _round_up(T, 8))
    Tp = _round_up(T, Tb)

    def pad2(w, rows, cols):
        w = jnp.asarray(w, f32)
        return jnp.pad(w, ((0, rows - w.shape[0]), (0, cols - w.shape[1])))

    def fuse_gates(w3, rows):
        # (3, in, D) -> (rows, 3*Dp); gate boundaries land on lane-tile multiples.
        return jnp.concatenate([pad2(w3[g], rows, Dp) for g in range(3)], axis=1)

    # ---- trace-time algebraic folding (exact up to f32 reassociation) ----
    Wwq = params["Wlq"] @ params["Wq"]                        # (D, D)
    WcZ = params["Wo_c"] @ params["Wz"]                       # (D, Z)
    WhZ = params["Wlq"] @ params["Wo_q"] @ params["Wz"]       # (D, Z)
    bZ = params["bo"] @ params["Wz"] + params["bz"]           # (1, Z)

    # ---- fused same-LHS weight matrices ----
    Wh_fused = jnp.concatenate([pad2(Wwq, Dp, Dp),
                                pad2(WhZ, Dp, Zp),
                                fuse_gates(params["Whh"], Dp)], axis=1)   # (Dp, Dp+Zp+3Dp)
    Wz_fused = jnp.concatenate([fuse_gates(params["ZW_ih"], Zp),
                                fuse_gates(params["ZW_hh"], Zp),
                                fuse_gates(params["ZB"], Zp)], axis=1)    # (Zp, 9Dp)
    Wih_fused = fuse_gates(params["Wih"], I)                              # (I, 3Dp)
    bih_fused = fuse_gates(params["bih"], 1)                              # (1, 3Dp)

    weights = [
        Wh_fused,
        pad2(WcZ, Dp, Zp),
        Wz_fused,
        pad2(params["bq"], 1, Dp),
        pad2(params["v"], 1, Dp),
        pad2(bZ, 1, Zp),
        fuse_gates(params["bhh"], 1),
    ]

    # ---- time-invariant attention projections computed once in XLA ----
    meta = jnp.asarray(meta_outputs, f32)                                  # (B, S, M)
    s_big = jnp.einsum("bsm,md->bsd", meta, jnp.asarray(params["Wlc"], f32))
    uh_big = jnp.einsum("bsd,de->bse", s_big, jnp.asarray(params["Wu"], f32))
    s_in = jnp.pad(s_big, ((0, Bp - B), (0, 0), (0, Dp - D))).reshape(Bp * S, Dp)
    uh_in = jnp.pad(uh_big, ((0, Bp - B), (0, 0), (0, Dp - D))).reshape(Bp * S, Dp)

    # ---- GRU input projection hoisted out of the recurrence (time-major) ----
    x_tm = jnp.transpose(jnp.asarray(main_inputs, f32), (1, 0, 2))         # (T, B, I)
    xp_full = jnp.einsum("tbi,ij->tbj", x_tm, Wih_fused) + bih_fused       # (T, B, 3Dp)
    xp_in = jnp.pad(xp_full, ((0, Tp - T), (0, Bp - B), (0, 0)))           # (Tp, Bp, 3Dp)

    h0_in = jnp.pad(jnp.asarray(h0, f32), ((0, Bp - B), (0, Dp - D)))      # (Bp, Dp)

    # segment-sum / repeat matrices for the attention group reductions
    P = jnp.kron(jnp.eye(Bt, dtype=f32), jnp.ones((1, S), f32))            # (Bt, Bt*S)
    Pt = P.T                                                               # (Bt*S, Bt)

    grid = (Bp // Bt, Tp // Tb)

    in_specs = [
        pl.BlockSpec((Bt * S, Dp), lambda b, t: (b, 0)),       # s     (resident per b)
        pl.BlockSpec((Bt * S, Dp), lambda b, t: (b, 0)),       # uh    (resident per b)
        pl.BlockSpec((Tb, Bt, 3 * Dp), lambda b, t: (t, b, 0)),  # xp block
        pl.BlockSpec((Bt, Dp), lambda b, t: (b, 0)),           # h0
        pl.BlockSpec((Bt, Bt * S), lambda b, t: (0, 0)),       # P
        pl.BlockSpec((Bt * S, Bt), lambda b, t: (0, 0)),       # P^T
    ] + [pl.BlockSpec(w.shape, lambda b, t: (0, 0)) for w in weights]

    # outputs emitted directly in (T, B, D) layout -> no post-kernel transpose
    out_shape = (jax.ShapeDtypeStruct((Tp, Bp, Dp), f32),
                 jax.ShapeDtypeStruct((Tp, Bp, Zp), f32))
    out_specs = (pl.BlockSpec((Tb, Bt, Dp), lambda b, t: (t, b, 0)),
                 pl.BlockSpec((Tb, Bt, Zp), lambda b, t: (t, b, 0)))

    kernel = functools.partial(_main_rnn_kernel, tb=Tb, d_pad=Dp, z_pad=Zp)

    fn = pl.pallas_call(
        kernel,
        out_shape=out_shape,
        grid_spec=pltpu.PrefetchScalarGridSpec(
            num_scalar_prefetch=0,
            grid=grid,
            in_specs=in_specs,
            out_specs=out_specs,
            scratch_shapes=[pltpu.VMEM((Bt, Dp), f32)],   # hidden-state carry
        ),
        compiler_params=pltpu.CompilerParams(
            # batch tiles are independent recurrences -> shard across TCs on v7x;
            # time axis is the sequential recurrence.
            dimension_semantics=("parallel", "arbitrary")),
    )
    out_p, z_p = fn(s_in, uh_in, xp_in, h0_in, P, Pt, *weights)

    # strip time / batch / lane padding; already time-major (T, B, D)
    outs = out_p[:T, :B, :D]
    zs = z_p[:T, :B, :Z]
    return outs, zs


# ----------------------------------------------------------------------------- params
def make_params(key, meta_dim, main_input_dim, main_dim, z_dim):
    M, I, D, Z = meta_dim, main_input_dim, main_dim, z_dim
    keys = iter(jax.random.split(key, 32))

    def lin(shape, fan_in):
        s = 1.0 / (fan_in ** 0.5)
        return jax.random.uniform(next(keys), shape, jnp.float32, -s, s)

    return dict(
        Wlc=lin((M, D), M),                 # AttentionLayer.linear_context (no bias)
        Wlq=lin((D, D), D),                 # AttentionLayer.linear_query (no bias)
        Wu=lin((D, D), D),                  # GlobalAttention.linear_context (no bias)
        Wq=lin((D, D), D), bq=lin((1, D), D),   # GlobalAttention.linear_query (bias)
        v=lin((1, D), D),                   # GlobalAttention.v (Linear(D,1,no bias))
        Wo_c=lin((D, D), 2 * D), Wo_q=lin((D, D), 2 * D), bo=lin((1, D), 2 * D),
        Wz=lin((D, Z), D), bz=lin((1, Z), D),
        ZW_ih=lin((3, Z, D), Z), ZW_hh=lin((3, Z, D), Z), ZB=lin((3, Z, D), Z),
        Wih=lin((3, I, D), I), bih=lin((3, 1, D), I),
        Whh=lin((3, D, D), D), bhh=lin((3, 1, D), D),
    )


# ----------------------------------------------------------------------------- reference
def main_rnn_reference(params, meta_outputs, h0, main_inputs):
    """Pure-JAX reference mirroring the PyTorch forward semantics (unfolded)."""
    x = jnp.transpose(main_inputs, (1, 0, 2))
    T = x.shape[0]
    h = h0
    outs, zs = [], []
    for t in range(T):
        q = h @ params["Wlq"]
        s = jnp.einsum("bsm,md->bsd", meta_outputs, params["Wlc"])
        wq = q @ params["Wq"] + params["bq"]
        uh = jnp.einsum("bsd,de->bse", s, params["Wu"])
        wquh = jnp.tanh(wq[:, None, :] + uh)
        score = jnp.sum(wquh * params["v"], axis=-1)          # (B, S)
        attn = jax.nn.softmax(score, axis=-1)[..., None]      # (B, S, 1)
        c = jnp.sum(attn * s, axis=1)                         # (B, D)
        attn_h = c @ params["Wo_c"] + q @ params["Wo_q"] + params["bo"]
        z = attn_h @ params["Wz"] + params["bz"]
        x_t = x[t]
        gi, gh = [], []
        for g in range(3):
            w_ih = z @ params["ZW_ih"][g]
            w_hh = z @ params["ZW_hh"][g]
            bias = z @ params["ZB"][g]
            xp = x_t @ params["Wih"][g] + params["bih"][g]
            hp = h @ params["Whh"][g] + params["bhh"][g]
            gi.append(xp * w_ih + bias)
            gh.append(hp * w_hh)
        r = jax.nn.sigmoid(gi[0] + gh[0])
        zg = jax.nn.sigmoid(gi[1] + gh[1])
        n = jnp.tanh(r * gh[2] + gi[2])
        h = (1.0 - zg) * h + zg * n
        outs.append(h)
        zs.append(z)
    return jnp.stack(outs), jnp.stack(zs)


if __name__ == "__main__":
    B, S, T = 2, 5, 4
    meta_dim, main_input_dim, main_dim, z_dim = 8, 6, 16, 12

    key = jax.random.PRNGKey(0)
    kp, k1, k2, k3 = jax.random.split(key, 4)
    params = make_params(kp, meta_dim, main_input_dim, main_dim, z_dim)

    meta_outputs = jax.random.normal(k1, (B, S, meta_dim), jnp.float32)
    h0 = jax.random.normal(k2, (B, main_dim), jnp.float32)
    main_inputs = jax.random.normal(k3, (B, T, main_input_dim), jnp.float32)

    outs, zs = main_rnn_pallas(params, meta_outputs, h0, main_inputs)
    outs = jax.block_until_ready(outs)
    zs = jax.block_until_ready(zs)

    ref_outs, ref_zs = main_rnn_reference(params, meta_outputs, h0, main_inputs)
    assert outs.shape == (T, B, main_dim) and zs.shape == (T, B, z_dim)
    assert jnp.allclose(outs, ref_outs, atol=2e-2, rtol=2e-2)
    assert jnp.allclose(zs, ref_zs, atol=2e-2, rtol=2e-2)
    print("KERNEL_OK")
</pallas_src>

<mosaic_0001>
module attributes {stable_mosaic.version = 11 : i64} {
  func.func @_main_rnn_kernel(%arg0: i32, %arg1: i32, %arg2: memref<40x128xf32, #tpu.memory_space<vmem>>, %arg3: memref<40x128xf32, #tpu.memory_space<vmem>>, %arg4: memref<8x8x384xf32, #tpu.memory_space<vmem>>, %arg5: memref<8x128xf32, #tpu.memory_space<vmem>>, %arg6: memref<8x40xf32, #tpu.memory_space<vmem>>, %arg7: memref<40x8xf32, #tpu.memory_space<vmem>>, %arg8: memref<128x640xf32, #tpu.memory_space<vmem>>, %arg9: memref<128x128xf32, #tpu.memory_space<vmem>>, %arg10: memref<128x1152xf32, #tpu.memory_space<vmem>>, %arg11: memref<1x128xf32, #tpu.memory_space<vmem>>, %arg12: memref<1x128xf32, #tpu.memory_space<vmem>>, %arg13: memref<1x128xf32, #tpu.memory_space<vmem>>, %arg14: memref<1x384xf32, #tpu.memory_space<vmem>>, %arg15: memref<8x8x128xf32, #tpu.memory_space<vmem>>, %arg16: memref<8x8x128xf32, #tpu.memory_space<vmem>>, %arg17: memref<8x128xf32, #tpu.memory_space<vmem>>) attributes {dimension_semantics = [#tpu.dimension_semantics<parallel>, #tpu.dimension_semantics<arbitrary>], iteration_bounds = array<i64: 1, 1>, scalar_prefetch = 0 : i64, scratch_operands = 1 : i64, tpu.core_type = #tpu.core_type<tc>, window_params = [{transform_indices = @transform_0, window_bounds = array<i64: 40, 128>}, {transform_indices = @transform_1, window_bounds = array<i64: 40, 128>}, {transform_indices = @transform_2, window_bounds = array<i64: 8, 8, 384>}, {transform_indices = @transform_3, window_bounds = array<i64: 8, 128>}, {pipeline_mode = #tpu.pipeline_mode<synchronous>, transform_indices = @transform_4, window_bounds = array<i64: 8, 40>}, {pipeline_mode = #tpu.pipeline_mode<synchronous>, transform_indices = @transform_5, window_bounds = array<i64: 40, 8>}, {pipeline_mode = #tpu.pipeline_mode<synchronous>, transform_indices = @transform_6, window_bounds = array<i64: 128, 640>}, {pipeline_mode = #tpu.pipeline_mode<synchronous>, transform_indices = @transform_7, window_bounds = array<i64: 128, 128>}, {pipeline_mode = #tpu.pipeline_mode<synchronous>, transform_indices = @transform_8, window_bounds = array<i64: 128, 1152>}, {pipeline_mode = #tpu.pipeline_mode<synchronous>, transform_indices = @transform_9, window_bounds = array<i64: 1, 128>}, {pipeline_mode = #tpu.pipeline_mode<synchronous>, transform_indices = @transform_10, window_bounds = array<i64: 1, 128>}, {pipeline_mode = #tpu.pipeline_mode<synchronous>, transform_indices = @transform_11, window_bounds = array<i64: 1, 128>}, {pipeline_mode = #tpu.pipeline_mode<synchronous>, transform_indices = @transform_12, window_bounds = array<i64: 1, 384>}, {transform_indices = @transform_13, window_bounds = array<i64: 8, 8, 128>}, {transform_indices = @transform_14, window_bounds = array<i64: 8, 8, 128>}]} {
    %c0_i32 = arith.constant 0 : i32
    %0 = arith.cmpi eq, %arg1, %c0_i32 : i32
    %1 = arith.extui %0 : i1 to i32
    %c0_i32_0 = arith.constant 0 : i32
    %2 = arith.cmpi ne, %1, %c0_i32_0 : i32
    scf.if %2 {
      %c0_178 = arith.constant 0 : index
      %c0_179 = arith.constant 0 : index
      %592 = vector.load %arg5[%c0_178, %c0_179] : memref<8x128xf32, #tpu.memory_space<vmem>>, vector<8x128xf32>
      %c0_180 = arith.constant 0 : index
      %c0_181 = arith.constant 0 : index
      %593 = vector.load %arg17[%c0_180, %c0_181] : memref<8x128xf32, #tpu.memory_space<vmem>>, vector<8x128xf32>
      tpu.vector_store %arg17[%c0_180, %c0_181], %592 {strides = array<i32>} : memref<8x128xf32, #tpu.memory_space<vmem>>, vector<8x128xf32>,
    } else {
    }
    %c0 = arith.constant 0 : index
    %c0_1 = arith.constant 0 : index
    %3 = vector.load %arg2[%c0, %c0_1] : memref<40x128xf32, #tpu.memory_space<vmem>>, vector<40x128xf32>
    %c0_2 = arith.constant 0 : index
    %c0_3 = arith.constant 0 : index
    %4 = vector.load %arg3[%c0_2, %c0_3] : memref<40x128xf32, #tpu.memory_space<vmem>>, vector<40x128xf32>
    %c0_4 = arith.constant 0 : index
    %c0_5 = arith.constant 0 : index
    %5 = vector.load %arg6[%c0_4, %c0_5] : memref<8x40xf32, #tpu.memory_space<vmem>>, vector<8x40xf32>
    %c0_6 = arith.constant 0 : index
    %c0_7 = arith.constant 0 : index
    %6 = vector.load %arg7[%c0_6, %c0_7] : memref<40x8xf32, #tpu.memory_space<vmem>>, vector<40x8xf32>
    %c0_8 = arith.constant 0 : index
    %c0_9 = arith.constant 0 : index
    %7 = vector.load %arg8[%c0_8, %c0_9] : memref<128x640xf32, #tpu.memory_space<vmem>>, vector<128x640xf32>
    %c0_10 = arith.constant 0 : index
    %c0_11 = arith.constant 0 : index
    %8 = vector.load %arg9[%c0_10, %c0_11] : memref<128x128xf32, #tpu.memory_space<vmem>>, vector<128x128xf32>
    %c0_12 = arith.constant 0 : index
    %c0_13 = arith.constant 0 : index
    %9 = vector.load %arg10[%c0_12, %c0_13] : memref<128x1152xf32, #tpu.memory_space<vmem>>, vector<128x1152xf32>
    %c0_14 = arith.constant 0 : index
    %c0_15 = arith.constant 0 : index
    %10 = vector.load %arg11[%c0_14, %c0_15] : memref<1x128xf32, #tpu.memory_space<vmem>>, vector<1x128xf32>
    %c0_16 = arith.constant 0 : index
    %c0_17 = arith.constant 0 : index
    %11 = vector.load %arg12[%c0_16, %c0_17] : memref<1x128xf32, #tpu.memory_space<vmem>>, vector<1x128xf32>
    %c0_18 = arith.constant 0 : index
    %c0_19 = arith.constant 0 : index
    %12 = vector.load %arg13[%c0_18, %c0_19] : memref<1x128xf32, #tpu.memory_space<vmem>>, vector<1x128xf32>
    %c0_20 = arith.constant 0 : index
    %c0_21 = arith.constant 0 : index
    %13 = vector.load %arg14[%c0_20, %c0_21] : memref<1x384xf32, #tpu.memory_space<vmem>>, vector<1x384xf32>
    %c0_22 = arith.constant 0 : index
    %c0_23 = arith.constant 0 : index
    %14 = vector.load %arg17[%c0_22, %c0_23] : memref<8x128xf32, #tpu.memory_space<vmem>>, vector<8x128xf32>
    %cst = arith.constant dense<0.000000e+00> : vector<8x640xf32>
    %15 = tpu.matmul %14, %7, %cst {dimension_numbers = #tpu.dot_dimension_numbers<[1], [0], [0], [1], [0, 0, 1, 1], [], []>} : vector<8x128xf32>, vector<128x640xf32>, vector<8x640xf32> -> vector<8x640xf32>
    %16 = vector.extract_strided_slice %15 {offsets = [0, 0], sizes = [8, 128], strides = [1, 1]} : vector<8x640xf32> to vector<8x128xf32>
    %17 = vector.broadcast %10 : vector<1x128xf32> to vector<8x128xf32>
    %18 = arith.addf %16, %17 : vector<8x128xf32>
    %19 = vector.extract_strided_slice %15 {offsets = [0, 128], sizes = [8, 128], strides = [1, 1]} : vector<8x640xf32> to vector<8x128xf32>
    %20 = vector.extract_strided_slice %15 {offsets = [0, 256], sizes = [8, 384], strides = [1, 1]} : vector<8x640xf32> to vector<8x384xf32>
    %21 = vector.broadcast %13 : vector<1x384xf32> to vector<8x384xf32>
    %22 = arith.addf %20, %21 : vector<8x384xf32>
    %cst_24 = arith.constant dense<0.000000e+00> : vector<40x128xf32>
    %23 = tpu.matmul %6, %18, %cst_24 {dimension_numbers = #tpu.dot_dimension_numbers<[1], [0], [0], [1], [0, 0, 1, 1], [], []>} : vector<40x8xf32>, vector<8x128xf32>, vector<40x128xf32> -> vector<40x128xf32>
    %24 = arith.addf %23, %4 : vector<40x128xf32>
    %25 = math.tanh %24 : vector<40x128xf32>
    %26 = vector.broadcast %11 : vector<1x128xf32> to vector<40x128xf32>
    %27 = arith.mulf %25, %26 : vector<40x128xf32>
    %cst_25 = arith.constant dense<0.000000e+00> : vector<40xf32>
    %28 = vector.multi_reduction <add>, %27, %cst_25 [1] : vector<40x128xf32> to vector<40xf32>
    %29 = vector.shape_cast %28 : vector<40xf32> to vector<40x1xf32>
    %cst_26 = arith.constant dense<0xFF800000> : vector<1xf32>
    %30 = vector.multi_reduction <maximumf>, %29, %cst_26 [0] : vector<40x1xf32> to vector<1xf32>
    %31 = vector.shape_cast %30 : vector<1xf32> to vector<1x1xf32>
    %32 = vector.broadcast %31 : vector<1x1xf32> to vector<40x1xf32>
    %33 = arith.subf %29, %32 : vector<40x1xf32>
    %34 = math.exp %33 : vector<40x1xf32>
    %35 = vector.broadcast %34 : vector<40x1xf32> to vector<40x128xf32>
    %36 = arith.mulf %35, %3 : vector<40x128xf32>
    %cst_27 = arith.constant dense<0.000000e+00> : vector<8x128xf32>
    %37 = tpu.matmul %5, %36, %cst_27 {dimension_numbers = #tpu.dot_dimension_numbers<[1], [0], [0], [1], [0, 0, 1, 1], [], []>} : vector<8x40xf32>, vector<40x128xf32>, vector<8x128xf32> -> vector<8x128xf32>
    %cst_28 = arith.constant dense<0.000000e+00> : vector<8x1xf32>
    %38 = tpu.matmul %5, %34, %cst_28 {dimension_numbers = #tpu.dot_dimension_numbers<[1], [0], [0], [1], [0, 0, 1, 1], [], []>} : vector<8x40xf32>, vector<40x1xf32>, vector<8x1xf32> -> vector<8x1xf32>
    %39 = tpu.reciprocal %38 {approx = true} : vector<8x1xf32> -> vector<8x1xf32>
    %40 = vector.broadcast %39 : vector<8x1xf32> to vector<8x128xf32>
    %41 = arith.mulf %37, %40 : vector<8x128xf32>
    %cst_29 = arith.constant dense<0.000000e+00> : vector<8x128xf32>
    %42 = tpu.matmul %41, %8, %cst_29 {dimension_numbers = #tpu.dot_dimension_numbers<[1], [0], [0], [1], [0, 0, 1, 1], [], []>} : vector<8x128xf32>, vector<128x128xf32>, vector<8x128xf32> -> vector<8x128xf32>
    %43 = arith.addf %42, %19 : vector<8x128xf32>
    %44 = vector.broadcast %12 : vector<1x128xf32> to vector<8x128xf32>
    %45 = arith.addf %43, %44 : vector<8x128xf32>
    %cst_30 = arith.constant dense<0.000000e+00> : vector<8x1152xf32>
    %46 = tpu.matmul %45, %9, %cst_30 {dimension_numbers = #tpu.dot_dimension_numbers<[1], [0], [0], [1], [0, 0, 1, 1], [], []>} : vector<8x128xf32>, vector<128x1152xf32>, vector<8x1152xf32> -> vector<8x1152xf32>
    %47 = vector.extract_strided_slice %46 {offsets = [0, 0], sizes = [8, 384], strides = [1, 1]} : vector<8x1152xf32> to vector<8x384xf32>
    %48 = vector.extract_strided_slice %46 {offsets = [0, 384], sizes = [8, 384], strides = [1, 1]} : vector<8x1152xf32> to vector<8x384xf32>
    %49 = vector.extract_strided_slice %46 {offsets = [0, 768], sizes = [8, 384], strides = [1, 1]} : vector<8x1152xf32> to vector<8x384xf32>
    %c0_31 = arith.constant 0 : index
    %c0_32 = arith.constant 0 : index
    %c0_33 = arith.constant 0 : index
    %50 = vector.load %arg4[%c0_31, %c0_32, %c0_33] : memref<8x8x384xf32, #tpu.memory_space<vmem>>, vector<1x8x384xf32>
    %51 = vector.shape_cast %50 : vector<1x8x384xf32> to vector<8x384xf32>
    %52 = arith.mulf %51, %47 : vector<8x384xf32>
    %53 = arith.addf %52, %49 : vector<8x384xf32>
    %54 = arith.mulf %22, %48 : vector<8x384xf32>
    %55 = vector.extract_strided_slice %53 {offsets = [0, 0], sizes = [8, 128], strides = [1, 1]} : vector<8x384xf32> to vector<8x128xf32>
    %56 = vector.extract_strided_slice %54 {offsets = [0, 0], sizes = [8, 128], strides = [1, 1]} : vector<8x384xf32> to vector<8x128xf32>
    %57 = arith.addf %55, %56 : vector<8x128xf32>
    %58 = arith.negf %57 : vector<8x128xf32>
    %59 = math.exp %58 : vector<8x128xf32>
    %cst_34 = arith.constant 1.000000e+00 : f32
    %60 = vector.broadcast %cst_34 : f32 to vector<8x128xf32>
    %61 = arith.addf %60, %59 : vector<8x128xf32>
    %62 = arith.divf %60, %61 : vector<8x128xf32>
    %63 = vector.extract_strided_slice %53 {offsets = [0, 128], sizes = [8, 128], strides = [1, 1]} : vector<8x384xf32> to vector<8x128xf32>
    %64 = vector.extract_strided_slice %54 {offsets = [0, 128], sizes = [8, 128], strides = [1, 1]} : vector<8x384xf32> to vector<8x128xf32>
    %65 = arith.addf %63, %64 : vector<8x128xf32>
    %66 = arith.negf %65 : vector<8x128xf32>
    %67 = math.exp %66 : vector<8x128xf32>
    %cst_35 = arith.constant 1.000000e+00 : f32
    %68 = vector.broadcast %cst_35 : f32 to vector<8x128xf32>
    %69 = arith.addf %68, %67 : vector<8x128xf32>
    %70 = arith.divf %68, %69 : vector<8x128xf32>
    %71 = vector.extract_strided_slice %54 {offsets = [0, 256], sizes = [8, 128], strides = [1, 1]} : vector<8x384xf32> to vector<8x128xf32>
    %72 = arith.mulf %62, %71 : vector<8x128xf32>
    %73 = vector.extract_strided_slice %53 {offsets = [0, 256], sizes = [8, 128], strides = [1, 1]} : vector<8x384xf32> to vector<8x128xf32>
    %74 = arith.addf %72, %73 : vector<8x128xf32>
    %75 = math.tanh %74 : vector<8x128xf32>
    %cst_36 = arith.constant 1.000000e+00 : f32
    %76 = vector.broadcast %cst_36 : f32 to vector<8x128xf32>
    %77 = arith.subf %76, %70 : vector<8x128xf32>
    %78 = arith.mulf %77, %14 : vector<8x128xf32>
    %79 = arith.mulf %70, %75 : vector<8x128xf32>
    %80 = arith.addf %78, %79 : vector<8x128xf32>
    %c0_37 = arith.constant 0 : index
    %c0_38 = arith.constant 0 : index
    %c0_39 = arith.constant 0 : index
    %81 = vector.load %arg15[%c0_37, %c0_38, %c0_39] : memref<8x8x128xf32, #tpu.memory_space<vmem>>, vector<1x8x128xf32>
    %82 = vector.shape_cast %81 : vector<1x8x128xf32> to vector<8x128xf32>
    %83 = vector.shape_cast %80 : vector<8x128xf32> to vector<1x8x128xf32>
    tpu.vector_store %arg15[%c0_37, %c0_38, %c0_39], %83 {strides = array<i32>} : memref<8x8x128xf32, #tpu.memory_space<vmem>>, vector<1x8x128xf32>,
    %c0_40 = arith.constant 0 : index
    %c0_41 = arith.constant 0 : index
    %c0_42 = arith.constant 0 : index
    %84 = vector.load %arg16[%c0_40, %c0_41, %c0_42] : memref<8x8x128xf32, #tpu.memory_space<vmem>>, vector<1x8x128xf32>
    %85 = vector.shape_cast %84 : vector<1x8x128xf32> to vector<8x128xf32>
    %86 = vector.shape_cast %45 : vector<8x128xf32> to vector<1x8x128xf32>
    tpu.vector_store %arg16[%c0_40, %c0_41, %c0_42], %86 {strides = array<i32>} : memref<8x8x128xf32, #tpu.memory_space<vmem>>, vector<1x8x128xf32>,
    %cst_43 = arith.constant dense<0.000000e+00> : vector<8x640xf32>
    %87 = tpu.matmul %80, %7, %cst_43 {dimension_numbers = #tpu.dot_dimension_numbers<[1], [0], [0], [1], [0, 0, 1, 1], [], []>} : vector<8x128xf32>, vector<128x640xf32>, vector<8x640xf32> -> vector<8x640xf32>
    %88 = vector.extract_strided_slice %87 {offsets = [0, 0], sizes = [8, 128], strides = [1, 1]} : vector<8x640xf32> to vector<8x128xf32>
    %89 = vector.broadcast %10 : vector<1x128xf32> to vector<8x128xf32>
    %90 = arith.addf %88, %89 : vector<8x128xf32>
    %91 = vector.extract_strided_slice %87 {offsets = [0, 128], sizes = [8, 128], strides = [1, 1]} : vector<8x640xf32> to vector<8x128xf32>
    %92 = vector.extract_strided_slice %87 {offsets = [0, 256], sizes = [8, 384], strides = [1, 1]} : vector<8x640xf32> to vector<8x384xf32>
    %93 = vector.broadcast %13 : vector<1x384xf32> to vector<8x384xf32>
    %94 = arith.addf %92, %93 : vector<8x384xf32>
    %cst_44 = arith.constant dense<0.000000e+00> : vector<40x128xf32>
    %95 = tpu.matmul %6, %90, %cst_44 {dimension_numbers = #tpu.dot_dimension_numbers<[1], [0], [0], [1], [0, 0, 1, 1], [], []>} : vector<40x8xf32>, vector<8x128xf32>, vector<40x128xf32> -> vector<40x128xf32>
    %96 = arith.addf %95, %4 : vector<40x128xf32>
    %97 = math.tanh %96 : vector<40x128xf32>
    %98 = vector.broadcast %11 : vector<1x128xf32> to vector<40x128xf32>
    %99 = arith.mulf %97, %98 : vector<40x128xf32>
    %cst_45 = arith.constant dense<0.000000e+00> : vector<40xf32>
    %100 = vector.multi_reduction <add>, %99, %cst_45 [1] : vector<40x128xf32> to vector<40xf32>
    %101 = vector.shape_cast %100 : vector<40xf32> to vector<40x1xf32>
    %cst_46 = arith.constant dense<0xFF800000> : vector<1xf32>
    %102 = vector.multi_reduction <maximumf>, %101, %cst_46 [0] : vector<40x1xf32> to vector<1xf32>
    %103 = vector.shape_cast %102 : vector<1xf32> to vector<1x1xf32>
    %104 = vector.broadcast %103 : vector<1x1xf32> to vector<40x1xf32>
    %105 = arith.subf %101, %104 : vector<40x1xf32>
    %106 = math.exp %105 : vector<40x1xf32>
    %107 = vector.broadcast %106 : vector<40x1xf32> to vector<40x128xf32>
    %108 = arith.mulf %107, %3 : vector<40x128xf32>
    %cst_47 = arith.constant dense<0.000000e+00> : vector<8x128xf32>
    %109 = tpu.matmul %5, %108, %cst_47 {dimension_numbers = #tpu.dot_dimension_numbers<[1], [0], [0], [1], [0, 0, 1, 1], [], []>} : vector<8x40xf32>, vector<40x128xf32>, vector<8x128xf32> -> vector<8x128xf32>
    %cst_48 = arith.constant dense<0.000000e+00> : vector<8x1xf32>
    %110 = tpu.matmul %5, %106, %cst_48 {dimension_numbers = #tpu.dot_dimension_numbers<[1], [0], [0], [1], [0, 0, 1, 1], [], []>} : vector<8x40xf32>, vector<40x1xf32>, vector<8x1xf32> -> vector<8x1xf32>
    %111 = tpu.reciprocal %110 {approx = true} : vector<8x1xf32> -> vector<8x1xf32>
    %112 = vector.broadcast %111 : vector<8x1xf32> to vector<8x128xf32>
    %113 = arith.mulf %109, %112 : vector<8x128xf32>
    %cst_49 = arith.constant dense<0.000000e+00> : vector<8x128xf32>
    %114 = tpu.matmul %113, %8, %cst_49 {dimension_numbers = #tpu.dot_dimension_numbers<[1], [0], [0], [1], [0, 0, 1, 1], [], []>} : vector<8x128xf32>, vector<128x128xf32>, vector<8x128xf32> -> vector<8x128xf32>
    %115 = arith.addf %114, %91 : vector<8x128xf32>
    %116 = vector.broadcast %12 : vector<1x128xf32> to vector<8x128xf32>
    %117 = arith.addf %115, %116 : vector<8x128xf32>
    %cst_50 = arith.constant dense<0.000000e+00> : vector<8x1152xf32>
    %118 = tpu.matmul %117, %9, %cst_50 {dimension_numbers = #tpu.dot_dimension_numbers<[1], [0], [0], [1], [0, 0, 1, 1], [], []>} : vector<8x128xf32>, vector<128x1152xf32>, vector<8x1152xf32> -> vector<8x1152xf32>
    %119 = vector.extract_strided_slice %118 {offsets = [0, 0], sizes = [8, 384], strides = [1, 1]} : vector<8x1152xf32> to vector<8x384xf32>
    %120 = vector.extract_strided_slice %118 {offsets = [0, 384], sizes = [8, 384], strides = [1, 1]} : vector<8x1152xf32> to vector<8x384xf32>
    %121 = vector.extract_strided_slice %118 {offsets = [0, 768], sizes = [8, 384], strides = [1, 1]} : vector<8x1152xf32> to vector<8x384xf32>
    %c1 = arith.constant 1 : index
    %c0_51 = arith.constant 0 : index
    %c0_52 = arith.constant 0 : index
    %122 = vector.load %arg4[%c1, %c0_51, %c0_52] : memref<8x8x384xf32, #tpu.memory_space<vmem>>, vector<1x8x384xf32>
    %123 = vector.shape_cast %122 : vector<1x8x384xf32> to vector<8x384xf32>
    %124 = arith.mulf %123, %119 : vector<8x384xf32>
    %125 = arith.addf %124, %121 : vector<8x384xf32>
    %126 = arith.mulf %94, %120 : vector<8x384xf32>
    %127 = vector.extract_strided_slice %125 {offsets = [0, 0], sizes = [8, 128], strides = [1, 1]} : vector<8x384xf32> to vector<8x128xf32>
    %128 = vector.extract_strided_slice %126 {offsets = [0, 0], sizes = [8, 128], strides = [1, 1]} : vector<8x384xf32> to vector<8x128xf32>
    %129 = arith.addf %127, %128 : vector<8x128xf32>
    %130 = arith.negf %129 : vector<8x128xf32>
    %131 = math.exp %130 : vector<8x128xf32>
    %cst_53 = arith.constant 1.000000e+00 : f32
    %132 = vector.broadcast %cst_53 : f32 to vector<8x128xf32>
    %133 = arith.addf %132, %131 : vector<8x128xf32>
    %134 = arith.divf %132, %133 : vector<8x128xf32>
    %135 = vector.extract_strided_slice %125 {offsets = [0, 128], sizes = [8, 128], strides = [1, 1]} : vector<8x384xf32> to vector<8x128xf32>
    %136 = vector.extract_strided_slice %126 {offsets = [0, 128], sizes = [8, 128], strides = [1, 1]} : vector<8x384xf32> to vector<8x128xf32>
    %137 = arith.addf %135, %136 : vector<8x128xf32>
    %138 = arith.negf %137 : vector<8x128xf32>
    %139 = math.exp %138 : vector<8x128xf32>
    %cst_54 = arith.constant 1.000000e+00 : f32
    %140 = vector.broadcast %cst_54 : f32 to vector<8x128xf32>
    %141 = arith.addf %140, %139 : vector<8x128xf32>
    %142 = arith.divf %140, %141 : vector<8x128xf32>
    %143 = vector.extract_strided_slice %126 {offsets = [0, 256], sizes = [8, 128], strides = [1, 1]} : vector<8x384xf32> to vector<8x128xf32>
    %144 = arith.mulf %134, %143 : vector<8x128xf32>
    %145 = vector.extract_strided_slice %125 {offsets = [0, 256], sizes = [8, 128], strides = [1, 1]} : vector<8x384xf32> to vector<8x128xf32>
    %146 = arith.addf %144, %145 : vector<8x128xf32>
    %147 = math.tanh %146 : vector<8x128xf32>
    %cst_55 = arith.constant 1.000000e+00 : f32
    %148 = vector.broadcast %cst_55 : f32 to vector<8x128xf32>
    %149 = arith.subf %148, %142 : vector<8x128xf32>
    %150 = arith.mulf %149, %80 : vector<8x128xf32>
    %151 = arith.mulf %142, %147 : vector<8x128xf32>
    %152 = arith.addf %150, %151 : vector<8x128xf32>
    %c1_56 = arith.constant 1 : index
    %c0_57 = arith.constant 0 : index
    %c0_58 = arith.constant 0 : index
    %153 = vector.load %arg15[%c1_56, %c0_57, %c0_58] : memref<8x8x128xf32, #tpu.memory_space<vmem>>, vector<1x8x128xf32>
    %154 = vector.shape_cast %153 : vector<1x8x128xf32> to vector<8x128xf32>
    %155 = vector.shape_cast %152 : vector<8x128xf32> to vector<1x8x128xf32>
    tpu.vector_store %arg15[%c1_56, %c0_57, %c0_58], %155 {strides = array<i32>} : memref<8x8x128xf32, #tpu.memory_space<vmem>>, vector<1x8x128xf32>,
    %c1_59 = arith.constant 1 : index
    %c0_60 = arith.constant 0 : index
    %c0_61 = arith.constant 0 : index
    %156 = vector.load %arg16[%c1_59, %c0_60, %c0_61] : memref<8x8x128xf32, #tpu.memory_space<vmem>>, vector<1x8x128xf32>
    %157 = vector.shape_cast %156 : vector<1x8x128xf32> to vector<8x128xf32>
    %158 = vector.shape_cast %117 : vector<8x128xf32> to vector<1x8x128xf32>
    tpu.vector_store %arg16[%c1_59, %c0_60, %c0_61], %158 {strides = array<i32>} : memref<8x8x128xf32, #tpu.memory_space<vmem>>, vector<1x8x128xf32>,
    %cst_62 = arith.constant dense<0.000000e+00> : vector<8x640xf32>
    %159 = tpu.matmul %152, %7, %cst_62 {dimension_numbers = #tpu.dot_dimension_numbers<[1], [0], [0], [1], [0, 0, 1, 1], [], []>} : vector<8x128xf32>, vector<128x640xf32>, vector<8x640xf32> -> vector<8x640xf32>
    %160 = vector.extract_strided_slice %159 {offsets = [0, 0], sizes = [8, 128], strides = [1, 1]} : vector<8x640xf32> to vector<8x128xf32>
    %161 = vector.broadcast %10 : vector<1x128xf32> to vector<8x128xf32>
    %162 = arith.addf %160, %161 : vector<8x128xf32>
    %163 = vector.extract_strided_slice %159 {offsets = [0, 128], sizes = [8, 128], strides = [1, 1]} : vector<8x640xf32> to vector<8x128xf32>
    %164 = vector.extract_strided_slice %159 {offsets = [0, 256], sizes = [8, 384], strides = [1, 1]} : vector<8x640xf32> to vector<8x384xf32>
    %165 = vector.broadcast %13 : vector<1x384xf32> to vector<8x384xf32>
    %166 = arith.addf %164, %165 : vector<8x384xf32>
    %cst_63 = arith.constant dense<0.000000e+00> : vector<40x128xf32>
    %167 = tpu.matmul %6, %162, %cst_63 {dimension_numbers = #tpu.dot_dimension_numbers<[1], [0], [0], [1], [0, 0, 1, 1], [], []>} : vector<40x8xf32>, vector<8x128xf32>, vector<40x128xf32> -> vector<40x128xf32>
    %168 = arith.addf %167, %4 : vector<40x128xf32>
    %169 = math.tanh %168 : vector<40x128xf32>
    %170 = vector.broadcast %11 : vector<1x128xf32> to vector<40x128xf32>
    %171 = arith.mulf %169, %170 : vector<40x128xf32>
    %cst_64 = arith.constant dense<0.000000e+00> : vector<40xf32>
    %172 = vector.multi_reduction <add>, %171, %cst_64 [1] : vector<40x128xf32> to vector<40xf32>
    %173 = vector.shape_cast %172 : vector<40xf32> to vector<40x1xf32>
    %cst_65 = arith.constant dense<0xFF800000> : vector<1xf32>
    %174 = vector.multi_reduction <maximumf>, %173, %cst_65 [0] : vector<40x1xf32> to vector<1xf32>
    %175 = vector.shape_cast %174 : vector<1xf32> to vector<1x1xf32>
    %176 = vector.broadcast %175 : vector<1x1xf32> to vector<40x1xf32>
    %177 = arith.subf %173, %176 : vector<40x1xf32>
    %178 = math.exp %177 : vector<40x1xf32>
    %179 = vector.broadcast %178 : vector<40x1xf32> to vector<40x128xf32>
    %180 = arith.mulf %179, %3 : vector<40x128xf32>
    %cst_66 = arith.constant dense<0.000000e+00> : vector<8x128xf32>
    %181 = tpu.matmul %5, %180, %cst_66 {dimension_numbers = #tpu.dot_dimension_numbers<[1], [0], [0], [1], [0, 0, 1, 1], [], []>} : vector<8x40xf32>, vector<40x128xf32>, vector<8x128xf32> -> vector<8x128xf32>
    %cst_67 = arith.constant dense<0.000000e+00> : vector<8x1xf32>
    %182 = tpu.matmul %5, %178, %cst_67 {dimension_numbers = #tpu.dot_dimension_numbers<[1], [0], [0], [1], [0, 0, 1, 1], [], []>} : vector<8x40xf32>, vector<40x1xf32>, vector<8x1xf32> -> vector<8x1xf32>
    %183 = tpu.reciprocal %182 {approx = true} : vector<8x1xf32> -> vector<8x1xf32>
    %184 = vector.broadcast %183 : vector<8x1xf32> to vector<8x128xf32>
    %185 = arith.mulf %181, %184 : vector<8x128xf32>
    %cst_68 = arith.constant dense<0.000000e+00> : vector<8x128xf32>
    %186 = tpu.matmul %185, %8, %cst_68 {dimension_numbers = #tpu.dot_dimension_numbers<[1], [0], [0], [1], [0, 0, 1, 1], [], []>} : vector<8x128xf32>, vector<128x128xf32>, vector<8x128xf32> -> vector<8x128xf32>
    %187 = arith.addf %186, %163 : vector<8x128xf32>
    %188 = vector.broadcast %12 : vector<1x128xf32> to vector<8x128xf32>
    %189 = arith.addf %187, %188 : vector<8x128xf32>
    %cst_69 = arith.constant dense<0.000000e+00> : vector<8x1152xf32>
    %190 = tpu.matmul %189, %9, %cst_69 {dimension_numbers = #tpu.dot_dimension_numbers<[1], [0], [0], [1], [0, 0, 1, 1], [], []>} : vector<8x128xf32>, vector<128x1152xf32>, vector<8x1152xf32> -> vector<8x1152xf32>
    %191 = vector.extract_strided_slice %190 {offsets = [0, 0], sizes = [8, 384], strides = [1, 1]} : vector<8x1152xf32> to vector<8x384xf32>
    %192 = vector.extract_strided_slice %190 {offsets = [0, 384], sizes = [8, 384], strides = [1, 1]} : vector<8x1152xf32> to vector<8x384xf32>
    %193 = vector.extract_strided_slice %190 {offsets = [0, 768], sizes = [8, 384], strides = [1, 1]} : vector<8x1152xf32> to vector<8x384xf32>
    %c2 = arith.constant 2 : index
    %c0_70 = arith.constant 0 : index
    %c0_71 = arith.constant 0 : index
    %194 = vector.load %arg4[%c2, %c0_70, %c0_71] : memref<8x8x384xf32, #tpu.memory_space<vmem>>, vector<1x8x384xf32>
    %195 = vector.shape_cast %194 : vector<1x8x384xf32> to vector<8x384xf32>
    %196 = arith.mulf %195, %191 : vector<8x384xf32>
    %197 = arith.addf %196, %193 : vector<8x384xf32>
    %198 = arith.mulf %166, %192 : vector<8x384xf32>
    %199 = vector.extract_strided_slice %197 {offsets = [0, 0], sizes = [8, 128], strides = [1, 1]} : vector<8x384xf32> to vector<8x128xf32>
    %200 = vector.extract_strided_slice %198 {offsets = [0, 0], sizes = [8, 128], strides = [1, 1]} : vector<8x384xf32> to vector<8x128xf32>
    %201 = arith.addf %199, %200 : vector<8x128xf32>
    %202 = arith.negf %201 : vector<8x128xf32>
    %203 = math.exp %202 : vector<8x128xf32>
    %cst_72 = arith.constant 1.000000e+00 : f32
    %204 = vector.broadcast %cst_72 : f32 to vector<8x128xf32>
    %205 = arith.addf %204, %203 : vector<8x128xf32>
    %206 = arith.divf %204, %205 : vector<8x128xf32>
    %207 = vector.extract_strided_slice %197 {offsets = [0, 128], sizes = [8, 128], strides = [1, 1]} : vector<8x384xf32> to vector<8x128xf32>
    %208 = vector.extract_strided_slice %198 {offsets = [0, 128], sizes = [8, 128], strides = [1, 1]} : vector<8x384xf32> to vector<8x128xf32>
    %209 = arith.addf %207, %208 : vector<8x128xf32>
    %210 = arith.negf %209 : vector<8x128xf32>
    %211 = math.exp %210 : vector<8x128xf32>
    %cst_73 = arith.constant 1.000000e+00 : f32
    %212 = vector.broadcast %cst_73 : f32 to vector<8x128xf32>
    %213 = arith.addf %212, %211 : vector<8x128xf32>
    %214 = arith.divf %212, %213 : vector<8x128xf32>
    %215 = vector.extract_strided_slice %198 {offsets = [0, 256], sizes = [8, 128], strides = [1, 1]} : vector<8x384xf32> to vector<8x128xf32>
    %216 = arith.mulf %206, %215 : vector<8x128xf32>
    %217 = vector.extract_strided_slice %197 {offsets = [0, 256], sizes = [8, 128], strides = [1, 1]} : vector<8x384xf32> to vector<8x128xf32>
    %218 = arith.addf %216, %217 : vector<8x128xf32>
    %219 = math.tanh %218 : vector<8x128xf32>
    %cst_74 = arith.constant 1.000000e+00 : f32
    %220 = vector.broadcast %cst_74 : f32 to vector<8x128xf32>
    %221 = arith.subf %220, %214 : vector<8x128xf32>
    %222 = arith.mulf %221, %152 : vector<8x128xf32>
    %223 = arith.mulf %214, %219 : vector<8x128xf32>
    %224 = arith.addf %222, %223 : vector<8x128xf32>
    %c2_75 = arith.constant 2 : index
    %c0_76 = arith.constant 0 : index
    %c0_77 = arith.constant 0 : index
    %225 = vector.load %arg15[%c2_75, %c0_76, %c0_77] : memref<8x8x128xf32, #tpu.memory_space<vmem>>, vector<1x8x128xf32>
    %226 = vector.shape_cast %225 : vector<1x8x128xf32> to vector<8x128xf32>
    %227 = vector.shape_cast %224 : vector<8x128xf32> to vector<1x8x128xf32>
    tpu.vector_store %arg15[%c2_75, %c0_76, %c0_77], %227 {strides = array<i32>} : memref<8x8x128xf32, #tpu.memory_space<vmem>>, vector<1x8x128xf32>,
    %c2_78 = arith.constant 2 : index
    %c0_79 = arith.constant 0 : index
    %c0_80 = arith.constant 0 : index
    %228 = vector.load %arg16[%c2_78, %c0_79, %c0_80] : memref<8x8x128xf32, #tpu.memory_space<vmem>>, vector<1x8x128xf32>
    %229 = vector.shape_cast %228 : vector<1x8x128xf32> to vector<8x128xf32>
    %230 = vector.shape_cast %189 : vector<8x128xf32> to vector<1x8x128xf32>
    tpu.vector_store %arg16[%c2_78, %c0_79, %c0_80], %230 {strides = array<i32>} : memref<8x8x128xf32, #tpu.memory_space<vmem>>, vector<1x8x128xf32>,
    %cst_81 = arith.constant dense<0.000000e+00> : vector<8x640xf32>
    %231 = tpu.matmul %224, %7, %cst_81 {dimension_numbers = #tpu.dot_dimension_numbers<[1], [0], [0], [1], [0, 0, 1, 1], [], []>} : vector<8x128xf32>, vector<128x640xf32>, vector<8x640xf32> -> vector<8x640xf32>
    %232 = vector.extract_strided_slice %231 {offsets = [0, 0], sizes = [8, 128], strides = [1, 1]} : vector<8x640xf32> to vector<8x128xf32>
    %233 = vector.broadcast %10 : vector<1x128xf32> to vector<8x128xf32>
    %234 = arith.addf %232, %233 : vector<8x128xf32>
    %235 = vector.extract_strided_slice %231 {offsets = [0, 128], sizes = [8, 128], strides = [1, 1]} : vector<8x640xf32> to vector<8x128xf32>
    %236 = vector.extract_strided_slice %231 {offsets = [0, 256], sizes = [8, 384], strides = [1, 1]} : vector<8x640xf32> to vector<8x384xf32>
    %237 = vector.broadcast %13 : vector<1x384xf32> to vector<8x384xf32>
    %238 = arith.addf %236, %237 : vector<8x384xf32>
    %cst_82 = arith.constant dense<0.000000e+00> : vector<40x128xf32>
    %239 = tpu.matmul %6, %234, %cst_82 {dimension_numbers = #tpu.dot_dimension_numbers<[1], [0], [0], [1], [0, 0, 1, 1], [], []>} : vector<40x8xf32>, vector<8x128xf32>, vector<40x128xf32> -> vector<40x128xf32>
    %240 = arith.addf %239, %4 : vector<40x128xf32>
    %241 = math.tanh %240 : vector<40x128xf32>
    %242 = vector.broadcast %11 : vector<1x128xf32> to vector<40x128xf32>
    %243 = arith.mulf %241, %242 : vector<40x128xf32>
    %cst_83 = arith.constant dense<0.000000e+00> : vector<40xf32>
    %244 = vector.multi_reduction <add>, %243, %cst_83 [1] : vector<40x128xf32> to vector<40xf32>
    %245 = vector.shape_cast %244 : vector<40xf32> to vector<40x1xf32>
    %cst_84 = arith.constant dense<0xFF800000> : vector<1xf32>
    %246 = vector.multi_reduction <maximumf>, %245, %cst_84 [0] : vector<40x1xf32> to vector<1xf32>
    %247 = vector.shape_cast %246 : vector<1xf32> to vector<1x1xf32>
    %248 = vector.broadcast %247 : vector<1x1xf32> to vector<40x1xf32>
    %249 = arith.subf %245, %248 : vector<40x1xf32>
    %250 = math.exp %249 : vector<40x1xf32>
    %251 = vector.broadcast %250 : vector<40x1xf32> to vector<40x128xf32>
    %252 = arith.mulf %251, %3 : vector<40x128xf32>
    %cst_85 = arith.constant dense<0.000000e+00> : vector<8x128xf32>
    %253 = tpu.matmul %5, %252, %cst_85 {dimension_numbers = #tpu.dot_dimension_numbers<[1], [0], [0], [1], [0, 0, 1, 1], [], []>} : vector<8x40xf32>, vector<40x128xf32>, vector<8x128xf32> -> vector<8x128xf32>
    %cst_86 = arith.constant dense<0.000000e+00> : vector<8x1xf32>
    %254 = tpu.matmul %5, %250, %cst_86 {dimension_numbers = #tpu.dot_dimension_numbers<[1], [0], [0], [1], [0, 0, 1, 1], [], []>} : vector<8x40xf32>, vector<40x1xf32>, vector<8x1xf32> -> vector<8x1xf32>
    %255 = tpu.reciprocal %254 {approx = true} : vector<8x1xf32> -> vector<8x1xf32>
    %256 = vector.broadcast %255 : vector<8x1xf32> to vector<8x128xf32>
    %257 = arith.mulf %253, %256 : vector<8x128xf32>
    %cst_87 = arith.constant dense<0.000000e+00> : vector<8x128xf32>
    %258 = tpu.matmul %257, %8, %cst_87 {dimension_numbers = #tpu.dot_dimension_numbers<[1], [0], [0], [1], [0, 0, 1, 1], [], []>} : vector<8x128xf32>, vector<128x128xf32>, vector<8x128xf32> -> vector<8x128xf32>
    %259 = arith.addf %258, %235 : vector<8x128xf32>
    %260 = vector.broadcast %12 : vector<1x128xf32> to vector<8x128xf32>
    %261 = arith.addf %259, %260 : vector<8x128xf32>
    %cst_88 = arith.constant dense<0.000000e+00> : vector<8x1152xf32>
    %262 = tpu.matmul %261, %9, %cst_88 {dimension_numbers = #tpu.dot_dimension_numbers<[1], [0], [0], [1], [0, 0, 1, 1], [], []>} : vector<8x128xf32>, vector<128x1152xf32>, vector<8x1152xf32> -> vector<8x1152xf32>
    %263 = vector.extract_strided_slice %262 {offsets = [0, 0], sizes = [8, 384], strides = [1, 1]} : vector<8x1152xf32> to vector<8x384xf32>
    %264 = vector.extract_strided_slice %262 {offsets = [0, 384], sizes = [8, 384], strides = [1, 1]} : vector<8x1152xf32> to vector<8x384xf32>
    %265 = vector.extract_strided_slice %262 {offsets = [0, 768], sizes = [8, 384], strides = [1, 1]} : vector<8x1152xf32> to vector<8x384xf32>
    %c3 = arith.constant 3 : index
    %c0_89 = arith.constant 0 : index
    %c0_90 = arith.constant 0 : index
    %266 = vector.load %arg4[%c3, %c0_89, %c0_90] : memref<8x8x384xf32, #tpu.memory_space<vmem>>, vector<1x8x384xf32>
    %267 = vector.shape_cast %266 : vector<1x8x384xf32> to vector<8x384xf32>
    %268 = arith.mulf %267, %263 : vector<8x384xf32>
    %269 = arith.addf %268, %265 : vector<8x384xf32>
    %270 = arith.mulf %238, %264 : vector<8x384xf32>
    %271 = vector.extract_strided_slice %269 {offsets = [0, 0], sizes = [8, 128], strides = [1, 1]} : vector<8x384xf32> to vector<8x128xf32>
    %272 = vector.extract_strided_slice %270 {offsets = [0, 0], sizes = [8, 128], strides = [1, 1]} : vector<8x384xf32> to vector<8x128xf32>
    %273 = arith.addf %271, %272 : vector<8x128xf32>
    %274 = arith.negf %273 : vector<8x128xf32>
    %275 = math.exp %274 : vector<8x128xf32>
    %cst_91 = arith.constant 1.000000e+00 : f32
    %276 = vector.broadcast %cst_91 : f32 to vector<8x128xf32>
    %277 = arith.addf %276, %275 : vector<8x128xf32>
    %278 = arith.divf %276, %277 : vector<8x128xf32>
    %279 = vector.extract_strided_slice %269 {offsets = [0, 128], sizes = [8, 128], strides = [1, 1]} : vector<8x384xf32> to vector<8x128xf32>
    %280 = vector.extract_strided_slice %270 {offsets = [0, 128], sizes = [8, 128], strides = [1, 1]} : vector<8x384xf32> to vector<8x128xf32>
    %281 = arith.addf %279, %280 : vector<8x128xf32>
    %282 = arith.negf %281 : vector<8x128xf32>
    %283 = math.exp %282 : vector<8x128xf32>
    %cst_92 = arith.constant 1.000000e+00 : f32
    %284 = vector.broadcast %cst_92 : f32 to vector<8x128xf32>
    %285 = arith.addf %284, %283 : vector<8x128xf32>
    %286 = arith.divf %284, %285 : vector<8x128xf32>
    %287 = vector.extract_strided_slice %270 {offsets = [0, 256], sizes = [8, 128], strides = [1, 1]} : vector<8x384xf32> to vector<8x128xf32>
    %288 = arith.mulf %278, %287 : vector<8x128xf32>
    %289 = vector.extract_strided_slice %269 {offsets = [0, 256], sizes = [8, 128], strides = [1, 1]} : vector<8x384xf32> to vector<8x128xf32>
    %290 = arith.addf %288, %289 : vector<8x128xf32>
    %291 = math.tanh %290 : vector<8x128xf32>
    %cst_93 = arith.constant 1.000000e+00 : f32
    %292 = vector.broadcast %cst_93 : f32 to vector<8x128xf32>
    %293 = arith.subf %292, %286 : vector<8x128xf32>
    %294 = arith.mulf %293, %224 : vector<8x128xf32>
    %295 = arith.mulf %286, %291 : vector<8x128xf32>
    %296 = arith.addf %294, %295 : vector<8x128xf32>
    %c3_94 = arith.constant 3 : index
    %c0_95 = arith.constant 0 : index
    %c0_96 = arith.constant 0 : index
    %297 = vector.load %arg15[%c3_94, %c0_95, %c0_96] : memref<8x8x128xf32, #tpu.memory_space<vmem>>, vector<1x8x128xf32>
    %298 = vector.shape_cast %297 : vector<1x8x128xf32> to vector<8x128xf32>
    %299 = vector.shape_cast %296 : vector<8x128xf32> to vector<1x8x128xf32>
    tpu.vector_store %arg15[%c3_94, %c0_95, %c0_96], %299 {strides = array<i32>} : memref<8x8x128xf32, #tpu.memory_space<vmem>>, vector<1x8x128xf32>,
    %c3_97 = arith.constant 3 : index
    %c0_98 = arith.constant 0 : index
    %c0_99 = arith.constant 0 : index
    %300 = vector.load %arg16[%c3_97, %c0_98, %c0_99] : memref<8x8x128xf32, #tpu.memory_space<vmem>>, vector<1x8x128xf32>
    %301 = vector.shape_cast %300 : vector<1x8x128xf32> to vector<8x128xf32>
    %302 = vector.shape_cast %261 : vector<8x128xf32> to vector<1x8x128xf32>
    tpu.vector_store %arg16[%c3_97, %c0_98, %c0_99], %302 {strides = array<i32>} : memref<8x8x128xf32, #tpu.memory_space<vmem>>, vector<1x8x128xf32>,
    %cst_100 = arith.constant dense<0.000000e+00> : vector<8x640xf32>
    %303 = tpu.matmul %296, %7, %cst_100 {dimension_numbers = #tpu.dot_dimension_numbers<[1], [0], [0], [1], [0, 0, 1, 1], [], []>} : vector<8x128xf32>, vector<128x640xf32>, vector<8x640xf32> -> vector<8x640xf32>
    %304 = vector.extract_strided_slice %303 {offsets = [0, 0], sizes = [8, 128], strides = [1, 1]} : vector<8x640xf32> to vector<8x128xf32>
    %305 = vector.broadcast %10 : vector<1x128xf32> to vector<8x128xf32>
    %306 = arith.addf %304, %305 : vector<8x128xf32>
    %307 = vector.extract_strided_slice %303 {offsets = [0, 128], sizes = [8, 128], strides = [1, 1]} : vector<8x640xf32> to vector<8x128xf32>
    %308 = vector.extract_strided_slice %303 {offsets = [0, 256], sizes = [8, 384], strides = [1, 1]} : vector<8x640xf32> to vector<8x384xf32>
    %309 = vector.broadcast %13 : vector<1x384xf32> to vector<8x384xf32>
    %310 = arith.addf %308, %309 : vector<8x384xf32>
    %cst_101 = arith.constant dense<0.000000e+00> : vector<40x128xf32>
    %311 = tpu.matmul %6, %306, %cst_101 {dimension_numbers = #tpu.dot_dimension_numbers<[1], [0], [0], [1], [0, 0, 1, 1], [], []>} : vector<40x8xf32>, vector<8x128xf32>, vector<40x128xf32> -> vector<40x128xf32>
    %312 = arith.addf %311, %4 : vector<40x128xf32>
    %313 = math.tanh %312 : vector<40x128xf32>
    %314 = vector.broadcast %11 : vector<1x128xf32> to vector<40x128xf32>
    %315 = arith.mulf %313, %314 : vector<40x128xf32>
    %cst_102 = arith.constant dense<0.000000e+00> : vector<40xf32>
    %316 = vector.multi_reduction <add>, %315, %cst_102 [1] : vector<40x128xf32> to vector<40xf32>
    %317 = vector.shape_cast %316 : vector<40xf32> to vector<40x1xf32>
    %cst_103 = arith.constant dense<0xFF800000> : vector<1xf32>
    %318 = vector.multi_reduction <maximumf>, %317, %cst_103 [0] : vector<40x1xf32> to vector<1xf32>
    %319 = vector.shape_cast %318 : vector<1xf32> to vector<1x1xf32>
    %320 = vector.broadcast %319 : vector<1x1xf32> to vector<40x1xf32>
    %321 = arith.subf %317, %320 : vector<40x1xf32>
    %322 = math.exp %321 : vector<40x1xf32>
    %323 = vector.broadcast %322 : vector<40x1xf32> to vector<40x128xf32>
    %324 = arith.mulf %323, %3 : vector<40x128xf32>
    %cst_104 = arith.constant dense<0.000000e+00> : vector<8x128xf32>
    %325 = tpu.matmul %5, %324, %cst_104 {dimension_numbers = #tpu.dot_dimension_numbers<[1], [0], [0], [1], [0, 0, 1, 1], [], []>} : vector<8x40xf32>, vector<40x128xf32>, vector<8x128xf32> -> vector<8x128xf32>
    %cst_105 = arith.constant dense<0.000000e+00> : vector<8x1xf32>
    %326 = tpu.matmul %5, %322, %cst_105 {dimension_numbers = #tpu.dot_dimension_numbers<[1], [0], [0], [1], [0, 0, 1, 1], [], []>} : vector<8x40xf32>, vector<40x1xf32>, vector<8x1xf32> -> vector<8x1xf32>
    %327 = tpu.reciprocal %326 {approx = true} : vector<8x1xf32> -> vector<8x1xf32>
    %328 = vector.broadcast %327 : vector<8x1xf32> to vector<8x128xf32>
    %329 = arith.mulf %325, %328 : vector<8x128xf32>
    %cst_106 = arith.constant dense<0.000000e+00> : vector<8x128xf32>
    %330 = tpu.matmul %329, %8, %cst_106 {dimension_numbers = #tpu.dot_dimension_numbers<[1], [0], [0], [1], [0, 0, 1, 1], [], []>} : vector<8x128xf32>, vector<128x128xf32>, vector<8x128xf32> -> vector<8x128xf32>
    %331 = arith.addf %330, %307 : vector<8x128xf32>
    %332 = vector.broadcast %12 : vector<1x128xf32> to vector<8x128xf32>
    %333 = arith.addf %331, %332 : vector<8x128xf32>
    %cst_107 = arith.constant dense<0.000000e+00> : vector<8x1152xf32>
    %334 = tpu.matmul %333, %9, %cst_107 {dimension_numbers = #tpu.dot_dimension_numbers<[1], [0], [0], [1], [0, 0, 1, 1], [], []>} : vector<8x128xf32>, vector<128x1152xf32>, vector<8x1152xf32> -> vector<8x1152xf32>
    %335 = vector.extract_strided_slice %334 {offsets = [0, 0], sizes = [8, 384], strides = [1, 1]} : vector<8x1152xf32> to vector<8x384xf32>
    %336 = vector.extract_strided_slice %334 {offsets = [0, 384], sizes = [8, 384], strides = [1, 1]} : vector<8x1152xf32> to vector<8x384xf32>
    %337 = vector.extract_strided_slice %334 {offsets = [0, 768], sizes = [8, 384], strides = [1, 1]} : vector<8x1152xf32> to vector<8x384xf32>
    %c4 = arith.constant 4 : index
    %c0_108 = arith.constant 0 : index
    %c0_109 = arith.constant 0 : index
    %338 = vector.load %arg4[%c4, %c0_108, %c0_109] : memref<8x8x384xf32, #tpu.memory_space<vmem>>, vector<1x8x384xf32>
    %339 = vector.shape_cast %338 : vector<1x8x384xf32> to vector<8x384xf32>
    %340 = arith.mulf %339, %335 : vector<8x384xf32>
    %341 = arith.addf %340, %337 : vector<8x384xf32>
    %342 = arith.mulf %310, %336 : vector<8x384xf32>
    %343 = vector.extract_strided_slice %341 {offsets = [0, 0], sizes = [8, 128], strides = [1, 1]} : vector<8x384xf32> to vector<8x128xf32>
    %344 = vector.extract_strided_slice %342 {offsets = [0, 0], sizes = [8, 128], strides = [1, 1]} : vector<8x384xf32> to vector<8x128xf32>
    %345 = arith.addf %343, %344 : vector<8x128xf32>
    %346 = arith.negf %345 : vector<8x128xf32>
    %347 = math.exp %346 : vector<8x128xf32>
    %cst_110 = arith.constant 1.000000e+00 : f32
    %348 = vector.broadcast %cst_110 : f32 to vector<8x128xf32>
    %349 = arith.addf %348, %347 : vector<8x128xf32>
    %350 = arith.divf %348, %349 : vector<8x128xf32>
    %351 = vector.extract_strided_slice %341 {offsets = [0, 128], sizes = [8, 128], strides = [1, 1]} : vector<8x384xf32> to vector<8x128xf32>
    %352 = vector.extract_strided_slice %342 {offsets = [0, 128], sizes = [8, 128], strides = [1, 1]} : vector<8x384xf32> to vector<8x128xf32>
    %353 = arith.addf %351, %352 : vector<8x128xf32>
    %354 = arith.negf %353 : vector<8x128xf32>
    %355 = math.exp %354 : vector<8x128xf32>
    %cst_111 = arith.constant 1.000000e+00 : f32
    %356 = vector.broadcast %cst_111 : f32 to vector<8x128xf32>
    %357 = arith.addf %356, %355 : vector<8x128xf32>
    %358 = arith.divf %356, %357 : vector<8x128xf32>
    %359 = vector.extract_strided_slice %342 {offsets = [0, 256], sizes = [8, 128], strides = [1, 1]} : vector<8x384xf32> to vector<8x128xf32>
    %360 = arith.mulf %350, %359 : vector<8x128xf32>
    %361 = vector.extract_strided_slice %341 {offsets = [0, 256], sizes = [8, 128], strides = [1, 1]} : vector<8x384xf32> to vector<8x128xf32>
    %362 = arith.addf %360, %361 : vector<8x128xf32>
    %363 = math.tanh %362 : vector<8x128xf32>
    %cst_112 = arith.constant 1.000000e+00 : f32
    %364 = vector.broadcast %cst_112 : f32 to vector<8x128xf32>
    %365 = arith.subf %364, %358 : vector<8x128xf32>
    %366 = arith.mulf %365, %296 : vector<8x128xf32>
    %367 = arith.mulf %358, %363 : vector<8x128xf32>
    %368 = arith.addf %366, %367 : vector<8x128xf32>
    %c4_113 = arith.constant 4 : index
    %c0_114 = arith.constant 0 : index
    %c0_115 = arith.constant 0 : index
    %369 = vector.load %arg15[%c4_113, %c0_114, %c0_115] : memref<8x8x128xf32, #tpu.memory_space<vmem>>, vector<1x8x128xf32>
    %370 = vector.shape_cast %369 : vector<1x8x128xf32> to vector<8x128xf32>
    %371 = vector.shape_cast %368 : vector<8x128xf32> to vector<1x8x128xf32>
    tpu.vector_store %arg15[%c4_113, %c0_114, %c0_115], %371 {strides = array<i32>} : memref<8x8x128xf32, #tpu.memory_space<vmem>>, vector<1x8x128xf32>,
    %c4_116 = arith.constant 4 : index
    %c0_117 = arith.constant 0 : index
    %c0_118 = arith.constant 0 : index
    %372 = vector.load %arg16[%c4_116, %c0_117, %c0_118] : memref<8x8x128xf32, #tpu.memory_space<vmem>>, vector<1x8x128xf32>
    %373 = vector.shape_cast %372 : vector<1x8x128xf32> to vector<8x128xf32>
    %374 = vector.shape_cast %333 : vector<8x128xf32> to vector<1x8x128xf32>
    tpu.vector_store %arg16[%c4_116, %c0_117, %c0_118], %374 {strides = array<i32>} : memref<8x8x128xf32, #tpu.memory_space<vmem>>, vector<1x8x128xf32>,
    %cst_119 = arith.constant dense<0.000000e+00> : vector<8x640xf32>
    %375 = tpu.matmul %368, %7, %cst_119 {dimension_numbers = #tpu.dot_dimension_numbers<[1], [0], [0], [1], [0, 0, 1, 1], [], []>} : vector<8x128xf32>, vector<128x640xf32>, vector<8x640xf32> -> vector<8x640xf32>
    %376 = vector.extract_strided_slice %375 {offsets = [0, 0], sizes = [8, 128], strides = [1, 1]} : vector<8x640xf32> to vector<8x128xf32>
    %377 = vector.broadcast %10 : vector<1x128xf32> to vector<8x128xf32>
    %378 = arith.addf %376, %377 : vector<8x128xf32>
    %379 = vector.extract_strided_slice %375 {offsets = [0, 128], sizes = [8, 128], strides = [1, 1]} : vector<8x640xf32> to vector<8x128xf32>
    %380 = vector.extract_strided_slice %375 {offsets = [0, 256], sizes = [8, 384], strides = [1, 1]} : vector<8x640xf32> to vector<8x384xf32>
    %381 = vector.broadcast %13 : vector<1x384xf32> to vector<8x384xf32>
    %382 = arith.addf %380, %381 : vector<8x384xf32>
    %cst_120 = arith.constant dense<0.000000e+00> : vector<40x128xf32>
    %383 = tpu.matmul %6, %378, %cst_120 {dimension_numbers = #tpu.dot_dimension_numbers<[1], [0], [0], [1], [0, 0, 1, 1], [], []>} : vector<40x8xf32>, vector<8x128xf32>, vector<40x128xf32> -> vector<40x128xf32>
    %384 = arith.addf %383, %4 : vector<40x128xf32>
    %385 = math.tanh %384 : vector<40x128xf32>
    %386 = vector.broadcast %11 : vector<1x128xf32> to vector<40x128xf32>
    %387 = arith.mulf %385, %386 : vector<40x128xf32>
    %cst_121 = arith.constant dense<0.000000e+00> : vector<40xf32>
    %388 = vector.multi_reduction <add>, %387, %cst_121 [1] : vector<40x128xf32> to vector<40xf32>
    %389 = vector.shape_cast %388 : vector<40xf32> to vector<40x1xf32>
    %cst_122 = arith.constant dense<0xFF800000> : vector<1xf32>
    %390 = vector.multi_reduction <maximumf>, %389, %cst_122 [0] : vector<40x1xf32> to vector<1xf32>
    %391 = vector.shape_cast %390 : vector<1xf32> to vector<1x1xf32>
    %392 = vector.broadcast %391 : vector<1x1xf32> to vector<40x1xf32>
    %393 = arith.subf %389, %392 : vector<40x1xf32>
    %394 = math.exp %393 : vector<40x1xf32>
    %395 = vector.broadcast %394 : vector<40x1xf32> to vector<40x128xf32>
    %396 = arith.mulf %395, %3 : vector<40x128xf32>
    %cst_123 = arith.constant dense<0.000000e+00> : vector<8x128xf32>
    %397 = tpu.matmul %5, %396, %cst_123 {dimension_numbers = #tpu.dot_dimension_numbers<[1], [0], [0], [1], [0, 0, 1, 1], [], []>} : vector<8x40xf32>, vector<40x128xf32>, vector<8x128xf32> -> vector<8x128xf32>
    %cst_124 = arith.constant dense<0.000000e+00> : vector<8x1xf32>
    %398 = tpu.matmul %5, %394, %cst_124 {dimension_numbers = #tpu.dot_dimension_numbers<[1], [0], [0], [1], [0, 0, 1, 1], [], []>} : vector<8x40xf32>, vector<40x1xf32>, vector<8x1xf32> -> vector<8x1xf32>
    %399 = tpu.reciprocal %398 {approx = true} : vector<8x1xf32> -> vector<8x1xf32>
    %400 = vector.broadcast %399 : vector<8x1xf32> to vector<8x128xf32>
    %401 = arith.mulf %397, %400 : vector<8x128xf32>
    %cst_125 = arith.constant dense<0.000000e+00> : vector<8x128xf32>
    %402 = tpu.matmul %401, %8, %cst_125 {dimension_numbers = #tpu.dot_dimension_numbers<[1], [0], [0], [1], [0, 0, 1, 1], [], []>} : vector<8x128xf32>, vector<128x128xf32>, vector<8x128xf32> -> vector<8x128xf32>
    %403 = arith.addf %402, %379 : vector<8x128xf32>
    %404 = vector.broadcast %12 : vector<1x128xf32> to vector<8x128xf32>
    %405 = arith.addf %403, %404 : vector<8x128xf32>
    %cst_126 = arith.constant dense<0.000000e+00> : vector<8x1152xf32>
    %406 = tpu.matmul %405, %9, %cst_126 {dimension_numbers = #tpu.dot_dimension_numbers<[1], [0], [0], [1], [0, 0, 1, 1], [], []>} : vector<8x128xf32>, vector<128x1152xf32>, vector<8x1152xf32> -> vector<8x1152xf32>
    %407 = vector.extract_strided_slice %406 {offsets = [0, 0], sizes = [8, 384], strides = [1, 1]} : vector<8x1152xf32> to vector<8x384xf32>
    %408 = vector.extract_strided_slice %406 {offsets = [0, 384], sizes = [8, 384], strides = [1, 1]} : vector<8x1152xf32> to vector<8x384xf32>
    %409 = vector.extract_strided_slice %406 {offsets = [0, 768], sizes = [8, 384], strides = [1, 1]} : vector<8x1152xf32> to vector<8x384xf32>
    %c5 = arith.constant 5 : index
    %c0_127 = arith.constant 0 : index
    %c0_128 = arith.constant 0 : index
    %410 = vector.load %arg4[%c5, %c0_127, %c0_128] : memref<8x8x384xf32, #tpu.memory_space<vmem>>, vector<1x8x384xf32>
    %411 = vector.shape_cast %410 : vector<1x8x384xf32> to vector<8x384xf32>
    %412 = arith.mulf %411, %407 : vector<8x384xf32>
    %413 = arith.addf %412, %409 : vector<8x384xf32>
    %414 = arith.mulf %382, %408 : vector<8x384xf32>
    %415 = vector.extract_strided_slice %413 {offsets = [0, 0], sizes = [8, 128], strides = [1, 1]} : vector<8x384xf32> to vector<8x128xf32>
    %416 = vector.extract_strided_slice %414 {offsets = [0, 0], sizes = [8, 128], strides = [1, 1]} : vector<8x384xf32> to vector<8x128xf32>
    %417 = arith.addf %415, %416 : vector<8x128xf32>
    %418 = arith.negf %417 : vector<8x128xf32>
    %419 = math.exp %418 : vector<8x128xf32>
    %cst_129 = arith.constant 1.000000e+00 : f32
    %420 = vector.broadcast %cst_129 : f32 to vector<8x128xf32>
    %421 = arith.addf %420, %419 : vector<8x128xf32>
    %422 = arith.divf %420, %421 : vector<8x128xf32>
    %423 = vector.extract_strided_slice %413 {offsets = [0, 128], sizes = [8, 128], strides = [1, 1]} : vector<8x384xf32> to vector<8x128xf32>
    %424 = vector.extract_strided_slice %414 {offsets = [0, 128], sizes = [8, 128], strides = [1, 1]} : vector<8x384xf32> to vector<8x128xf32>
    %425 = arith.addf %423, %424 : vector<8x128xf32>
    %426 = arith.negf %425 : vector<8x128xf32>
    %427 = math.exp %426 : vector<8x128xf32>
    %cst_130 = arith.constant 1.000000e+00 : f32
    %428 = vector.broadcast %cst_130 : f32 to vector<8x128xf32>
    %429 = arith.addf %428, %427 : vector<8x128xf32>
    %430 = arith.divf %428, %429 : vector<8x128xf32>
    %431 = vector.extract_strided_slice %414 {offsets = [0, 256], sizes = [8, 128], strides = [1, 1]} : vector<8x384xf32> to vector<8x128xf32>
    %432 = arith.mulf %422, %431 : vector<8x128xf32>
    %433 = vector.extract_strided_slice %413 {offsets = [0, 256], sizes = [8, 128], strides = [1, 1]} : vector<8x384xf32> to vector<8x128xf32>
    %434 = arith.addf %432, %433 : vector<8x128xf32>
    %435 = math.tanh %434 : vector<8x128xf32>
    %cst_131 = arith.constant 1.000000e+00 : f32
    %436 = vector.broadcast %cst_131 : f32 to vector<8x128xf32>
    %437 = arith.subf %436, %430 : vector<8x128xf32>
    %438 = arith.mulf %437, %368 : vector<8x128xf32>
    %439 = arith.mulf %430, %435 : vector<8x128xf32>
    %440 = arith.addf %438, %439 : vector<8x128xf32>
    %c5_132 = arith.constant 5 : index
    %c0_133 = arith.constant 0 : index
    %c0_134 = arith.constant 0 : index
    %441 = vector.load %arg15[%c5_132, %c0_133, %c0_134] : memref<8x8x128xf32, #tpu.memory_space<vmem>>, vector<1x8x128xf32>
    %442 = vector.shape_cast %441 : vector<1x8x128xf32> to vector<8x128xf32>
    %443 = vector.shape_cast %440 : vector<8x128xf32> to vector<1x8x128xf32>
    tpu.vector_store %arg15[%c5_132, %c0_133, %c0_134], %443 {strides = array<i32>} : memref<8x8x128xf32, #tpu.memory_space<vmem>>, vector<1x8x128xf32>,
    %c5_135 = arith.constant 5 : index
    %c0_136 = arith.constant 0 : index
    %c0_137 = arith.constant 0 : index
    %444 = vector.load %arg16[%c5_135, %c0_136, %c0_137] : memref<8x8x128xf32, #tpu.memory_space<vmem>>, vector<1x8x128xf32>
    %445 = vector.shape_cast %444 : vector<1x8x128xf32> to vector<8x128xf32>
    %446 = vector.shape_cast %405 : vector<8x128xf32> to vector<1x8x128xf32>
    tpu.vector_store %arg16[%c5_135, %c0_136, %c0_137], %446 {strides = array<i32>} : memref<8x8x128xf32, #tpu.memory_space<vmem>>, vector<1x8x128xf32>,
    %cst_138 = arith.constant dense<0.000000e+00> : vector<8x640xf32>
    %447 = tpu.matmul %440, %7, %cst_138 {dimension_numbers = #tpu.dot_dimension_numbers<[1], [0], [0], [1], [0, 0, 1, 1], [], []>} : vector<8x128xf32>, vector<128x640xf32>, vector<8x640xf32> -> vector<8x640xf32>
    %448 = vector.extract_strided_slice %447 {offsets = [0, 0], sizes = [8, 128], strides = [1, 1]} : vector<8x640xf32> to vector<8x128xf32>
    %449 = vector.broadcast %10 : vector<1x128xf32> to vector<8x128xf32>
    %450 = arith.addf %448, %449 : vector<8x128xf32>
    %451 = vector.extract_strided_slice %447 {offsets = [0, 128], sizes = [8, 128], strides = [1, 1]} : vector<8x640xf32> to vector<8x128xf32>
    %452 = vector.extract_strided_slice %447 {offsets = [0, 256], sizes = [8, 384], strides = [1, 1]} : vector<8x640xf32> to vector<8x384xf32>
    %453 = vector.broadcast %13 : vector<1x384xf32> to vector<8x384xf32>
    %454 = arith.addf %452, %453 : vector<8x384xf32>
    %cst_139 = arith.constant dense<0.000000e+00> : vector<40x128xf32>
    %455 = tpu.matmul %6, %450, %cst_139 {dimension_numbers = #tpu.dot_dimension_numbers<[1], [0], [0], [1], [0, 0, 1, 1], [], []>} : vector<40x8xf32>, vector<8x128xf32>, vector<40x128xf32> -> vector<40x128xf32>
    %456 = arith.addf %455, %4 : vector<40x128xf32>
    %457 = math.tanh %456 : vector<40x128xf32>
    %458 = vector.broadcast %11 : vector<1x128xf32> to vector<40x128xf32>
    %459 = arith.mulf %457, %458 : vector<40x128xf32>
    %cst_140 = arith.constant dense<0.000000e+00> : vector<40xf32>
    %460 = vector.multi_reduction <add>, %459, %cst_140 [1] : vector<40x128xf32> to vector<40xf32>
    %461 = vector.shape_cast %460 : vector<40xf32> to vector<40x1xf32>
    %cst_141 = arith.constant dense<0xFF800000> : vector<1xf32>
    %462 = vector.multi_reduction <maximumf>, %461, %cst_141 [0] : vector<40x1xf32> to vector<1xf32>
    %463 = vector.shape_cast %462 : vector<1xf32> to vector<1x1xf32>
    %464 = vector.broadcast %463 : vector<1x1xf32> to vector<40x1xf32>
    %465 = arith.subf %461, %464 : vector<40x1xf32>
    %466 = math.exp %465 : vector<40x1xf32>
    %467 = vector.broadcast %466 : vector<40x1xf32> to vector<40x128xf32>
    %468 = arith.mulf %467, %3 : vector<40x128xf32>
    %cst_142 = arith.constant dense<0.000000e+00> : vector<8x128xf32>
    %469 = tpu.matmul %5, %468, %cst_142 {dimension_numbers = #tpu.dot_dimension_numbers<[1], [0], [0], [1], [0, 0, 1, 1], [], []>} : vector<8x40xf32>, vector<40x128xf32>, vector<8x128xf32> -> vector<8x128xf32>
    %cst_143 = arith.constant dense<0.000000e+00> : vector<8x1xf32>
    %470 = tpu.matmul %5, %466, %cst_143 {dimension_numbers = #tpu.dot_dimension_numbers<[1], [0], [0], [1], [0, 0, 1, 1], [], []>} : vector<8x40xf32>, vector<40x1xf32>, vector<8x1xf32> -> vector<8x1xf32>
    %471 = tpu.reciprocal %470 {approx = true} : vector<8x1xf32> -> vector<8x1xf32>
    %472 = vector.broadcast %471 : vector<8x1xf32> to vector<8x128xf32>
    %473 = arith.mulf %469, %472 : vector<8x128xf32>
    %cst_144 = arith.constant dense<0.000000e+00> : vector<8x128xf32>
    %474 = tpu.matmul %473, %8, %cst_144 {dimension_numbers = #tpu.dot_dimension_numbers<[1], [0], [0], [1], [0, 0, 1, 1], [], []>} : vector<8x128xf32>, vector<128x128xf32>, vector<8x128xf32> -> vector<8x128xf32>
    %475 = arith.addf %474, %451 : vector<8x128xf32>
    %476 = vector.broadcast %12 : vector<1x128xf32> to vector<8x128xf32>
    %477 = arith.addf %475, %476 : vector<8x128xf32>
    %cst_145 = arith.constant dense<0.000000e+00> : vector<8x1152xf32>
    %478 = tpu.matmul %477, %9, %cst_145 {dimension_numbers = #tpu.dot_dimension_numbers<[1], [0], [0], [1], [0, 0, 1, 1], [], []>} : vector<8x128xf32>, vector<128x1152xf32>, vector<8x1152xf32> -> vector<8x1152xf32>
    %479 = vector.extract_strided_slice %478 {offsets = [0, 0], sizes = [8, 384], strides = [1, 1]} : vector<8x1152xf32> to vector<8x384xf32>
    %480 = vector.extract_strided_slice %478 {offsets = [0, 384], sizes = [8, 384], strides = [1, 1]} : vector<8x1152xf32> to vector<8x384xf32>
    %481 = vector.extract_strided_slice %478 {offsets = [0, 768], sizes = [8, 384], strides = [1, 1]} : vector<8x1152xf32> to vector<8x384xf32>
    %c6 = arith.constant 6 : index
    %c0_146 = arith.constant 0 : index
    %c0_147 = arith.constant 0 : index
    %482 = vector.load %arg4[%c6, %c0_146, %c0_147] : memref<8x8x384xf32, #tpu.memory_space<vmem>>, vector<1x8x384xf32>
    %483 = vector.shape_cast %482 : vector<1x8x384xf32> to vector<8x384xf32>
    %484 = arith.mulf %483, %479 : vector<8x384xf32>
    %485 = arith.addf %484, %481 : vector<8x384xf32>
    %486 = arith.mulf %454, %480 : vector<8x384xf32>
    %487 = vector.extract_strided_slice %485 {offsets = [0, 0], sizes = [8, 128], strides = [1, 1]} : vector<8x384xf32> to vector<8x128xf32>
    %488 = vector.extract_strided_slice %486 {offsets = [0, 0], sizes = [8, 128], strides = [1, 1]} : vector<8x384xf32> to vector<8x128xf32>
    %489 = arith.addf %487, %488 : vector<8x128xf32>
    %490 = arith.negf %489 : vector<8x128xf32>
    %491 = math.exp %490 : vector<8x128xf32>
    %cst_148 = arith.constant 1.000000e+00 : f32
    %492 = vector.broadcast %cst_148 : f32 to vector<8x128xf32>
    %493 = arith.addf %492, %491 : vector<8x128xf32>
    %494 = arith.divf %492, %493 : vector<8x128xf32>
    %495 = vector.extract_strided_slice %485 {offsets = [0, 128], sizes = [8, 128], strides = [1, 1]} : vector<8x384xf32> to vector<8x128xf32>
    %496 = vector.extract_strided_slice %486 {offsets = [0, 128], sizes = [8, 128], strides = [1, 1]} : vector<8x384xf32> to vector<8x128xf32>
    %497 = arith.addf %495, %496 : vector<8x128xf32>
    %498 = arith.negf %497 : vector<8x128xf32>
    %499 = math.exp %498 : vector<8x128xf32>
    %cst_149 = arith.constant 1.000000e+00 : f32
    %500 = vector.broadcast %cst_149 : f32 to vector<8x128xf32>
    %501 = arith.addf %500, %499 : vector<8x128xf32>
    %502 = arith.divf %500, %501 : vector<8x128xf32>
    %503 = vector.extract_strided_slice %486 {offsets = [0, 256], sizes = [8, 128], strides = [1, 1]} : vector<8x384xf32> to vector<8x128xf32>
    %504 = arith.mulf %494, %503 : vector<8x128xf32>
    %505 = vector.extract_strided_slice %485 {offsets = [0, 256], sizes = [8, 128], strides = [1, 1]} : vector<8x384xf32> to vector<8x128xf32>
    %506 = arith.addf %504, %505 : vector<8x128xf32>
    %507 = math.tanh %506 : vector<8x128xf32>
    %cst_150 = arith.constant 1.000000e+00 : f32
    %508 = vector.broadcast %cst_150 : f32 to vector<8x128xf32>
    %509 = arith.subf %508, %502 : vector<8x128xf32>
    %510 = arith.mulf %509, %440 : vector<8x128xf32>
    %511 = arith.mulf %502, %507 : vector<8x128xf32>
    %512 = arith.addf %510, %511 : vector<8x128xf32>
    %c6_151 = arith.constant 6 : index
    %c0_152 = arith.constant 0 : index
    %c0_153 = arith.constant 0 : index
    %513 = vector.load %arg15[%c6_151, %c0_152, %c0_153] : memref<8x8x128xf32, #tpu.memory_space<vmem>>, vector<1x8x128xf32>
    %514 = vector.shape_cast %513 : vector<1x8x128xf32> to vector<8x128xf32>
    %515 = vector.shape_cast %512 : vector<8x128xf32> to vector<1x8x128xf32>
    tpu.vector_store %arg15[%c6_151, %c0_152, %c0_153], %515 {strides = array<i32>} : memref<8x8x128xf32, #tpu.memory_space<vmem>>, vector<1x8x128xf32>,
    %c6_154 = arith.constant 6 : index
    %c0_155 = arith.constant 0 : index
    %c0_156 = arith.constant 0 : index
    %516 = vector.load %arg16[%c6_154, %c0_155, %c0_156] : memref<8x8x128xf32, #tpu.memory_space<vmem>>, vector<1x8x128xf32>
    %517 = vector.shape_cast %516 : vector<1x8x128xf32> to vector<8x128xf32>
    %518 = vector.shape_cast %477 : vector<8x128xf32> to vector<1x8x128xf32>
    tpu.vector_store %arg16[%c6_154, %c0_155, %c0_156], %518 {strides = array<i32>} : memref<8x8x128xf32, #tpu.memory_space<vmem>>, vector<1x8x128xf32>,
    %cst_157 = arith.constant dense<0.000000e+00> : vector<8x640xf32>
    %519 = tpu.matmul %512, %7, %cst_157 {dimension_numbers = #tpu.dot_dimension_numbers<[1], [0], [0], [1], [0, 0, 1, 1], [], []>} : vector<8x128xf32>, vector<128x640xf32>, vector<8x640xf32> -> vector<8x640xf32>
    %520 = vector.extract_strided_slice %519 {offsets = [0, 0], sizes = [8, 128], strides = [1, 1]} : vector<8x640xf32> to vector<8x128xf32>
    %521 = vector.broadcast %10 : vector<1x128xf32> to vector<8x128xf32>
    %522 = arith.addf %520, %521 : vector<8x128xf32>
    %523 = vector.extract_strided_slice %519 {offsets = [0, 128], sizes = [8, 128], strides = [1, 1]} : vector<8x640xf32> to vector<8x128xf32>
    %524 = vector.extract_strided_slice %519 {offsets = [0, 256], sizes = [8, 384], strides = [1, 1]} : vector<8x640xf32> to vector<8x384xf32>
    %525 = vector.broadcast %13 : vector<1x384xf32> to vector<8x384xf32>
    %526 = arith.addf %524, %525 : vector<8x384xf32>
    %cst_158 = arith.constant dense<0.000000e+00> : vector<40x128xf32>
    %527 = tpu.matmul %6, %522, %cst_158 {dimension_numbers = #tpu.dot_dimension_numbers<[1], [0], [0], [1], [0, 0, 1, 1], [], []>} : vector<40x8xf32>, vector<8x128xf32>, vector<40x128xf32> -> vector<40x128xf32>
    %528 = arith.addf %527, %4 : vector<40x128xf32>
    %529 = math.tanh %528 : vector<40x128xf32>
    %530 = vector.broadcast %11 : vector<1x128xf32> to vector<40x128xf32>
    %531 = arith.mulf %529, %530 : vector<40x128xf32>
    %cst_159 = arith.constant dense<0.000000e+00> : vector<40xf32>
    %532 = vector.multi_reduction <add>, %531, %cst_159 [1] : vector<40x128xf32> to vector<40xf32>
    %533 = vector.shape_cast %532 : vector<40xf32> to vector<40x1xf32>
    %cst_160 = arith.constant dense<0xFF800000> : vector<1xf32>
    %534 = vector.multi_reduction <maximumf>, %533, %cst_160 [0] : vector<40x1xf32> to vector<1xf32>
    %535 = vector.shape_cast %534 : vector<1xf32> to vector<1x1xf32>
    %536 = vector.broadcast %535 : vector<1x1xf32> to vector<40x1xf32>
    %537 = arith.subf %533, %536 : vector<40x1xf32>
    %538 = math.exp %537 : vector<40x1xf32>
    %539 = vector.broadcast %538 : vector<40x1xf32> to vector<40x128xf32>
    %540 = arith.mulf %539, %3 : vector<40x128xf32>
    %cst_161 = arith.constant dense<0.000000e+00> : vector<8x128xf32>
    %541 = tpu.matmul %5, %540, %cst_161 {dimension_numbers = #tpu.dot_dimension_numbers<[1], [0], [0], [1], [0, 0, 1, 1], [], []>} : vector<8x40xf32>, vector<40x128xf32>, vector<8x128xf32> -> vector<8x128xf32>
    %cst_162 = arith.constant dense<0.000000e+00> : vector<8x1xf32>
    %542 = tpu.matmul %5, %538, %cst_162 {dimension_numbers = #tpu.dot_dimension_numbers<[1], [0], [0], [1], [0, 0, 1, 1], [], []>} : vector<8x40xf32>, vector<40x1xf32>, vector<8x1xf32> -> vector<8x1xf32>
    %543 = tpu.reciprocal %542 {approx = true} : vector<8x1xf32> -> vector<8x1xf32>
    %544 = vector.broadcast %543 : vector<8x1xf32> to vector<8x128xf32>
    %545 = arith.mulf %541, %544 : vector<8x128xf32>
    %cst_163 = arith.constant dense<0.000000e+00> : vector<8x128xf32>
    %546 = tpu.matmul %545, %8, %cst_163 {dimension_numbers = #tpu.dot_dimension_numbers<[1], [0], [0], [1], [0, 0, 1, 1], [], []>} : vector<8x128xf32>, vector<128x128xf32>, vector<8x128xf32> -> vector<8x128xf32>
    %547 = arith.addf %546, %523 : vector<8x128xf32>
    %548 = vector.broadcast %12 : vector<1x128xf32> to vector<8x128xf32>
    %549 = arith.addf %547, %548 : vector<8x128xf32>
    %cst_164 = arith.constant dense<0.000000e+00> : vector<8x1152xf32>
    %550 = tpu.matmul %549, %9, %cst_164 {dimension_numbers = #tpu.dot_dimension_numbers<[1], [0], [0], [1], [0, 0, 1, 1], [], []>} : vector<8x128xf32>, vector<128x1152xf32>, vector<8x1152xf32> -> vector<8x1152xf32>
    %551 = vector.extract_strided_slice %550 {offsets = [0, 0], sizes = [8, 384], strides = [1, 1]} : vector<8x1152xf32> to vector<8x384xf32>
    %552 = vector.extract_strided_slice %550 {offsets = [0, 384], sizes = [8, 384], strides = [1, 1]} : vector<8x1152xf32> to vector<8x384xf32>
    %553 = vector.extract_strided_slice %550 {offsets = [0, 768], sizes = [8, 384], strides = [1, 1]} : vector<8x1152xf32> to vector<8x384xf32>
    %c7 = arith.constant 7 : index
    %c0_165 = arith.constant 0 : index
    %c0_166 = arith.constant 0 : index
    %554 = vector.load %arg4[%c7, %c0_165, %c0_166] : memref<8x8x384xf32, #tpu.memory_space<vmem>>, vector<1x8x384xf32>
    %555 = vector.shape_cast %554 : vector<1x8x384xf32> to vector<8x384xf32>
    %556 = arith.mulf %555, %551 : vector<8x384xf32>
    %557 = arith.addf %556, %553 : vector<8x384xf32>
    %558 = arith.mulf %526, %552 : vector<8x384xf32>
    %559 = vector.extract_strided_slice %557 {offsets = [0, 0], sizes = [8, 128], strides = [1, 1]} : vector<8x384xf32> to vector<8x128xf32>
    %560 = vector.extract_strided_slice %558 {offsets = [0, 0], sizes = [8, 128], strides = [1, 1]} : vector<8x384xf32> to vector<8x128xf32>
    %561 = arith.addf %559, %560 : vector<8x128xf32>
    %562 = arith.negf %561 : vector<8x128xf32>
    %563 = math.exp %562 : vector<8x128xf32>
    %cst_167 = arith.constant 1.000000e+00 : f32
    %564 = vector.broadcast %cst_167 : f32 to vector<8x128xf32>
    %565 = arith.addf %564, %563 : vector<8x128xf32>
    %566 = arith.divf %564, %565 : vector<8x128xf32>
    %567 = vector.extract_strided_slice %557 {offsets = [0, 128], sizes = [8, 128], strides = [1, 1]} : vector<8x384xf32> to vector<8x128xf32>
    %568 = vector.extract_strided_slice %558 {offsets = [0, 128], sizes = [8, 128], strides = [1, 1]} : vector<8x384xf32> to vector<8x128xf32>
    %569 = arith.addf %567, %568 : vector<8x128xf32>
    %570 = arith.negf %569 : vector<8x128xf32>
    %571 = math.exp %570 : vector<8x128xf32>
    %cst_168 = arith.constant 1.000000e+00 : f32
    %572 = vector.broadcast %cst_168 : f32 to vector<8x128xf32>
    %573 = arith.addf %572, %571 : vector<8x128xf32>
    %574 = arith.divf %572, %573 : vector<8x128xf32>
    %575 = vector.extract_strided_slice %558 {offsets = [0, 256], sizes = [8, 128], strides = [1, 1]} : vector<8x384xf32> to vector<8x128xf32>
    %576 = arith.mulf %566, %575 : vector<8x128xf32>
    %577 = vector.extract_strided_slice %557 {offsets = [0, 256], sizes = [8, 128], strides = [1, 1]} : vector<8x384xf32> to vector<8x128xf32>
    %578 = arith.addf %576, %577 : vector<8x128xf32>
    %579 = math.tanh %578 : vector<8x128xf32>
    %cst_169 = arith.constant 1.000000e+00 : f32
    %580 = vector.broadcast %cst_169 : f32 to vector<8x128xf32>
    %581 = arith.subf %580, %574 : vector<8x128xf32>
    %582 = arith.mulf %581, %512 : vector<8x128xf32>
    %583 = arith.mulf %574, %579 : vector<8x128xf32>
    %584 = arith.addf %582, %583 : vector<8x128xf32>
    %c7_170 = arith.constant 7 : index
    %c0_171 = arith.constant 0 : index
    %c0_172 = arith.constant 0 : index
    %585 = vector.load %arg15[%c7_170, %c0_171, %c0_172] : memref<8x8x128xf32, #tpu.memory_space<vmem>>, vector<1x8x128xf32>
    %586 = vector.shape_cast %585 : vector<1x8x128xf32> to vector<8x128xf32>
    %587 = vector.shape_cast %584 : vector<8x128xf32> to vector<1x8x128xf32>
    tpu.vector_store %arg15[%c7_170, %c0_171, %c0_172], %587 {strides = array<i32>} : memref<8x8x128xf32, #tpu.memory_space<vmem>>, vector<1x8x128xf32>,
    %c7_173 = arith.constant 7 : index
    %c0_174 = arith.constant 0 : index
    %c0_175 = arith.constant 0 : index
    %588 = vector.load %arg16[%c7_173, %c0_174, %c0_175] : memref<8x8x128xf32, #tpu.memory_space<vmem>>, vector<1x8x128xf32>
    %589 = vector.shape_cast %588 : vector<1x8x128xf32> to vector<8x128xf32>
    %590 = vector.shape_cast %549 : vector<8x128xf32> to vector<1x8x128xf32>
    tpu.vector_store %arg16[%c7_173, %c0_174, %c0_175], %590 {strides = array<i32>} : memref<8x8x128xf32, #tpu.memory_space<vmem>>, vector<1x8x128xf32>,
    %c0_176 = arith.constant 0 : index
    %c0_177 = arith.constant 0 : index
    %591 = vector.load %arg17[%c0_176, %c0_177] : memref<8x128xf32, #tpu.memory_space<vmem>>, vector<8x128xf32>
    tpu.vector_store %arg17[%c0_176, %c0_177], %584 {strides = array<i32>} : memref<8x128xf32, #tpu.memory_space<vmem>>, vector<8x128xf32>,
    return
  }
  func.func @transform_0(%arg0: i32, %arg1: i32) -> (i32, i32) {
    %c0_i32 = arith.constant 0 : i32
    %c0_i32_0 = arith.constant 0 : i32
    return %arg0, %c0_i32 : i32, i32
  }
  func.func @transform_1(%arg0: i32, %arg1: i32) -> (i32, i32) {
    %c0_i32 = arith.constant 0 : i32
    %c0_i32_0 = arith.constant 0 : i32
    return %arg0, %c0_i32 : i32, i32
  }
  func.func @transform_2(%arg0: i32, %arg1: i32) -> (i32, i32, i32) {
    %c0_i32 = arith.constant 0 : i32
    %c0_i32_0 = arith.constant 0 : i32
    return %arg1, %arg0, %c0_i32 : i32, i32, i32
  }
  func.func @transform_3(%arg0: i32, %arg1: i32) -> (i32, i32) {
    %c0_i32 = arith.constant 0 : i32
    %c0_i32_0 = arith.constant 0 : i32
    return %arg0, %c0_i32 : i32, i32
  }
  func.func @transform_4(%arg0: i32, %arg1: i32) -> (i32, i32) {
    %c0_i32 = arith.constant 0 : i32
    %c0_i32_0 = arith.constant 0 : i32
    %c0_i32_1 = arith.constant 0 : i32
    return %c0_i32, %c0_i32_0 : i32, i32
  }
  func.func @transform_5(%arg0: i32, %arg1: i32) -> (i32, i32) {
    %c0_i32 = arith.constant 0 : i32
    %c0_i32_0 = arith.constant 0 : i32
    %c0_i32_1 = arith.constant 0 : i32
    return %c0_i32, %c0_i32_0 : i32, i32
  }
  func.func @transform_6(%arg0: i32, %arg1: i32) -> (i32, i32) {
    %c0_i32 = arith.constant 0 : i32
    %c0_i32_0 = arith.constant 0 : i32
    %c0_i32_1 = arith.constant 0 : i32
    return %c0_i32, %c0_i32_0 : i32, i32
  }
  func.func @transform_7(%arg0: i32, %arg1: i32) -> (i32, i32) {
    %c0_i32 = arith.constant 0 : i32
    %c0_i32_0 = arith.constant 0 : i32
    %c0_i32_1 = arith.constant 0 : i32
    return %c0_i32, %c0_i32_0 : i32, i32
  }
  func.func @transform_8(%arg0: i32, %arg1: i32) -> (i32, i32) {
    %c0_i32 = arith.constant 0 : i32
    %c0_i32_0 = arith.constant 0 : i32
    %c0_i32_1 = arith.constant 0 : i32
    return %c0_i32, %c0_i32_0 : i32, i32
  }
  func.func @transform_9(%arg0: i32, %arg1: i32) -> (i32, i32) {
    %c0_i32 = arith.constant 0 : i32
    %c0_i32_0 = arith.constant 0 : i32
    %c0_i32_1 = arith.constant 0 : i32
    return %c0_i32, %c0_i32_0 : i32, i32
  }
  func.func @transform_10(%arg0: i32, %arg1: i32) -> (i32, i32) {
    %c0_i32 = arith.constant 0 : i32
    %c0_i32_0 = arith.constant 0 : i32
    %c0_i32_1 = arith.constant 0 : i32
    return %c0_i32, %c0_i32_0 : i32, i32
  }
  func.func @transform_11(%arg0: i32, %arg1: i32) -> (i32, i32) {
    %c0_i32 = arith.constant 0 : i32
    %c0_i32_0 = arith.constant 0 : i32
    %c0_i32_1 = arith.constant 0 : i32
    return %c0_i32, %c0_i32_0 : i32, i32
  }
  func.func @transform_12(%arg0: i32, %arg1: i32) -> (i32, i32) {
    %c0_i32 = arith.constant 0 : i32
    %c0_i32_0 = arith.constant 0 : i32
    %c0_i32_1 = arith.constant 0 : i32
    return %c0_i32, %c0_i32_0 : i32, i32
  }
  func.func @transform_13(%arg0: i32, %arg1: i32) -> (i32, i32, i32) {
    %c0_i32 = arith.constant 0 : i32
    %c0_i32_0 = arith.constant 0 : i32
    return %arg1, %arg0, %c0_i32 : i32, i32, i32
  }
  func.func @transform_14(%arg0: i32, %arg1: i32) -> (i32, i32, i32) {
    %c0_i32 = arith.constant 0 : i32
    %c0_i32_0 = arith.constant 0 : i32
    return %arg1, %arg0, %c0_i32 : i32, i32, i32
  }
}

</mosaic_0001>

<bundles_post_ra>
// kernel: tpu_custom_call.1
= control target key start
LH: loop header
LB: loop body
LE: loop exit
PB: predicated region body
PF: predicated region fallthrough
CT: control target
= control target key end

     0   :  { %20 = vsyncpa [#allocation4], 0  ;;  %s15356_s0 = inlined_call_operand.vmem [shape: f32[40,128], index: 0, kind: input, shape index: {}]   ;;  %s15357_s1 = inlined_call_operand.hbm [shape: f32[40,128], index: 1, kind: input, shape index: {}]   ;;  %s15358_s2 = inlined_call_operand.hbm [shape: f32[8,8,384], index: 2, kind: input, shape index: {}]   ;;  %s15359_s3 = inlined_call_operand.vmem [shape: f32[8,128], index: 3, kind: input, shape index: {}]   ;;  %s15360_s4 = inlined_call_operand.vmem [shape: f32[8,40], index: 4, kind: input, shape index: {}]   ;;  %s15361_s5 = inlined_call_operand.vmem [shape: f32[40,8], index: 5, kind: input, shape index: {}]   ;;  %s15362_s6 = inlined_call_operand.hbm [shape: f32[128,640], index: 6, kind: input, shape index: {}]   ;;  %s15363_s7 = inlined_call_operand.hbm [shape: f32[128,128], index: 7, kind: input, shape index: {}]   ;;  %s15364_s8 = inlined_call_operand.hbm [shape: f32[128,1152], index: 8, kind: input, shape index: {}]   ;;  %s15365_s9 = inlined_call_operand.vmem [shape: f32[1,128], index: 9, kind: input, shape index: {}]   ;;  %s15366_s10 = inlined_call_operand.vmem [shape: f32[1,128], index: 10, kind: input, shape index: {}]   ;;  %s15367_s11 = inlined_call_operand.vmem [shape: f32[1,128], index: 11, kind: input, shape index: {}]   ;;  %s15368_s12 = inlined_call_operand.vmem [shape: f32[1,384], index: 12, kind: input, shape index: {}]   ;;  %s15369_s13 = inlined_call_operand.hbm [shape: f32[8,8,128], index: 13, kind: output, shape index: {0}]   ;;  %s15370_s14 = inlined_call_operand.hbm [shape: f32[8,8,128], index: 14, kind: output, shape index: {1}]  }
   0x1   :  { %21 = vsyncpa [#allocation7], 0 }
   0x2   :  { %22 = vsyncpa [#allocation10], 0 }
   0x3   :  { %23 = vsyncpa [#allocation5], 0 }
   0x4   :  { %24 = vsyncpa [#allocation14], 0  ;;  %s12736_s29 = smov [#allocation6]   ;;  %s12572_s17 = scalar_lea.hbm %s15358_s2, 3072 }
   0x5   :  { %s44_s30 = sshll.u32 %s12736_s29, 4  ;;  %p12573_p0 = scmp.ne.s32.totalorder %s15358_s2, %s12572_s17  ;;  %s45_s30 = int_to_ptr.vmem [resolvable:$true] %s44_s30 }
   0x6   :  { %p12576_p1 = scmp.lt.u32.totalorder %s12572_s17, %s15358_s2 }
   0x8   :  { %p12578_p2 = pnand %p12576_p1, %p12573_p0 }
   0xa   :  { %12581 = shalt.err (!%p12578_p2)
}
   0xb   :  { %s12582_s22 = scalar_lea.vmem %s45_s30, 3072  ;;  %p12587_p4 = scmp.lt.s32.totalorder %s45_s30, %s45_s30 }
   0xc   :  { %p12583_p3 = scmp.ne.s32.totalorder %s45_s30, %s12582_s22  ;;  %p12588_p5 = scmp.lt.s32.totalorder %s12582_s22, %s12582_s22 }
   0xe   :  { %p12589_p6 = por %p12588_p5, %p12587_p4 }
  0x10   :  { %p12590_p7 = pnand %p12589_p6, %p12583_p3 }
  0x12   :  { %12593 = shalt.err (!%p12590_p7)
}
  0x13   :  { %s12737_s23 = smov 384   ;;  %s12738_s24 = smov 24  }
  0x14   :  { %50 = dma.hbm_to_vmem [thread:$0]  %s15358_s2, 3072, %s45_s30, [#allocation7], %s12737_s23, %s12737_s23, %s12738_s24  }
  0x15   :  { %s12739_s27 = smov [#allocation9]   ;;  %s12740_s29 = smov [#allocation3]  }
  0x16   :  { %s74_s28 = sshll.u32 %s12739_s27, 4  ;;  %s32_s15 = sshll.u32 %s12740_s29, 4  ;;  %s75_s28 = int_to_ptr.vmem [resolvable:$true] %s74_s28  ;;  %s33_s15 = int_to_ptr.vmem [resolvable:$true] %s32_s15 }
  0x17   :  { %s12594_s18 = scalar_lea.hbm %s15363_s7, 2048 }
  0x18   :  { %p12595_p8 = scmp.ne.s32.totalorder %s15363_s7, %s12594_s18  ;;  %p12598_p9 = scmp.lt.u32.totalorder %s12594_s18, %s15363_s7 }
  0x1a   :  { %p12600_p10 = pnand %p12598_p9, %p12595_p8 }
  0x1c   :  { %12603 = shalt.err (!%p12600_p10)
}
  0x1d   :  { %s12604_s2 = scalar_lea.vmem %s75_s28, 2048  ;;  %p12609_p12 = scmp.lt.s32.totalorder %s75_s28, %s75_s28 }
  0x1e   :  { %p12605_p11 = scmp.ne.s32.totalorder %s75_s28, %s12604_s2  ;;  %p12610_p13 = scmp.lt.s32.totalorder %s12604_s2, %s12604_s2 }
  0x20   :  { %p12611_p0 = por %p12610_p13, %p12609_p12 }
  0x22   :  { %p12612_p1 = pnand %p12611_p0, %p12605_p11 }
  0x24   :  { %12615 = shalt.err (!%p12612_p1)
}
  0x25   :  { %s12741_s30 = smov 128   ;;  %s12742_s23 = smov 8  }
  0x26   :  { %80 = dma.hbm_to_vmem [thread:$0]  %s15363_s7, 2048, %s75_s28, [#allocation10], %s12741_s30, %s12741_s30, %s12742_s23  }
  0x27   :  { %s12616_s29 = scalar_lea.hbm %s15357_s1, 640 }
  0x28   :  { %p12617_p2 = scmp.ne.s32.totalorder %s15357_s1, %s12616_s29  ;;  %p12620_p3 = scmp.lt.u32.totalorder %s12616_s29, %s15357_s1 }
  0x2a   :  { %p12622_p4 = pnand %p12620_p3, %p12617_p2 }
  0x2c   :  { %12625 = shalt.err (!%p12622_p4)
}
  0x2d   :  { %s12626_s20 = scalar_lea.vmem %s33_s15, 640  ;;  %p12631_p6 = scmp.lt.s32.totalorder %s33_s15, %s33_s15 }
  0x2e   :  { %p12627_p5 = scmp.ne.s32.totalorder %s33_s15, %s12626_s20  ;;  %p12632_p7 = scmp.lt.s32.totalorder %s12626_s20, %s12626_s20 }
  0x30   :  { %p12633_p8 = por %p12632_p7, %p12631_p6 }
  0x32   :  { %p12634_p9 = pnand %p12633_p8, %p12627_p5 }
  0x34   :  { %12637 = shalt.err (!%p12634_p9)
}
  0x35   :  { %38 = dma.hbm_to_vmem [thread:$0]  %s15357_s1, 640, %s33_s15, [#allocation4], %s12741_s30, %s12741_s30, %s12742_s23  }
  0x36   :  { %s12743_s21 = smov [#allocation8]   ;;  %s12638_s25 = scalar_lea.hbm %s15362_s6, 10240 }
  0x37   :  { %s62_s22 = sshll.u32 %s12743_s21, 4  ;;  %p12639_p10 = scmp.ne.s32.totalorder %s15362_s6, %s12638_s25  ;;  %s63_s22 = int_to_ptr.vmem [resolvable:$true] %s62_s22 }
  0x38   :  { %p12642_p11 = scmp.lt.u32.totalorder %s12638_s25, %s15362_s6 }
  0x3a   :  { %p12644_p12 = pnand %p12642_p11, %p12639_p10 }
  0x3c   :  { %12647 = shalt.err (!%p12644_p12)
}
  0x3d   :  { %s12648_s17 = scalar_lea.vmem %s63_s22, 10240  ;;  %p12653_p0 = scmp.lt.s32.totalorder %s63_s22, %s63_s22 }
  0x3e   :  { %p12649_p13 = scmp.ne.s32.totalorder %s63_s22, %s12648_s17  ;;  %p12654_p1 = scmp.lt.s32.totalorder %s12648_s17, %s12648_s17 }
  0x40   :  { %p12655_p2 = por %p12654_p1, %p12653_p0 }
  0x42   :  { %p12656_p3 = pnand %p12655_p2, %p12649_p13 }
  0x44   :  { %12659 = shalt.err (!%p12656_p3)
}
  0x45   :  { %s12744_s1 = smov 640   ;;  %s12745_s15 = smov 40  }
  0x46   :  { %68 = dma.hbm_to_vmem [thread:$0]  %s15362_s6, 10240, %s63_s22, [#allocation7], %s12744_s1, %s12744_s1, %s12745_s15  }
  0x47   :  { %s12746_s20 = smov [#allocation11]   ;;  %s12660_s2 = scalar_lea.hbm %s15364_s8, 18432 }
  0x48   :  { %s86_s7 = sshll.u32 %s12746_s20, 4  ;;  %p12661_p4 = scmp.ne.s32.totalorder %s15364_s8, %s12660_s2  ;;  %s87_s7 = int_to_ptr.vmem [resolvable:$true] %s86_s7 }
  0x49   :  { %p12664_p5 = scmp.lt.u32.totalorder %s12660_s2, %s15364_s8 }
  0x4b   :  { %p12666_p6 = pnand %p12664_p5, %p12661_p4 }
  0x4d   :  { %12669 = shalt.err (!%p12666_p6)
}
  0x4e   :  { %s12670_s29 = scalar_lea.vmem %s87_s7, 18432  ;;  %p12675_p8 = scmp.lt.s32.totalorder %s87_s7, %s87_s7 }
  0x4f   :  { %p12671_p7 = scmp.ne.s32.totalorder %s87_s7, %s12670_s29  ;;  %p12676_p9 = scmp.lt.s32.totalorder %s12670_s29, %s12670_s29 }
  0x51   :  { %p12677_p10 = por %p12676_p9, %p12675_p8 }
  0x53   :  { %p12678_p11 = pnand %p12677_p10, %p12671_p7 }
  0x55   :  { %12681 = shalt.err (!%p12678_p11)
}
  0x56   :  { %s12747_s6 = smov 1152   ;;  %s12748_s22 = smov 72  }
  0x57   :  { %92 = dma.hbm_to_vmem [thread:$0]  %s15364_s8, 18432, %s87_s7, [#allocation10], %s12747_s6, %s12747_s6, %s12748_s22  }
  0x58   :  { %12726 = dma.done.wait [#allocation4], 640  }
  0x59   :  { %12727 = vsyncadd [#allocation4], 4294966656 }
  0x5a   :  { %12728 = dma.done.wait [#allocation7], 13312  }
  0x5b   :  { %12729 = vsyncadd [#allocation7], 4294953984 }
  0x5c   :  { %12730 = dma.done.wait [#allocation10], 20480  }
  0x5d   :  { %12731 = vsyncadd [#allocation10], 4294946816  ;;  %v15371_v0 = vmov 0.0   ;;  %v139_v1 = vld [vmem:[#allocation8 + $0x8] sm:$0xff]  ;;  %v144_v2 = vld [vmem:[#allocation8 + $0x30] sm:$0xff]  ;;  %v15373_v53 = vmov 0.0|0.0  }
  0x5e   :  { %447 = vmatprep.mubr.f32.mxu0 %v15371_v0  ;;  %518 = vmatprep.mubr.f32.mxu1 %v15371_v0  ;;  %v138_v3 = vld [vmem:[#allocation8] sm:$0xff]  ;;  %v12898_v4 = vpack.c.bf16 %v144_v2, %v139_v1  ;;  %v143_v5 = vld [vmem:[#allocation8 + $0x28] sm:$0xff]  ;;  %v149_v6 = vld [vmem:[#allocation8 + $0x58] sm:$0xff]  ;;  %vm12751_vm0 = vmmov 0   ;;  %vm621_vm1 = vcmask 64512   ;;  %vm783_vm2 = vcmask 326656  }
  0x5f   :  { %v154_v7 = vld [vmem:[#allocation8 + $0x80] sm:$0xff]  ;;  %v12900_v8 = vpack.c.bf16 %v143_v5, %v138_v3  ;;  %v148_v10 = vld [vmem:[#allocation8 + $0x50] sm:$0xff]  ;;  %v153_v11 = vld [vmem:[#allocation8 + $0x78] sm:$0xff] }
  0x60   :  { %15698 = vst [vmem:[#allocation20_spill] sm:$0xff] %v12898_v4  ;;  %v12902_v9 = vpack.c.bf16 %v154_v7, %v149_v6  ;;  %v159_v12 = vld [vmem:[#allocation8 + $0xa8] sm:$0xff]  ;;  %10010 = vmatprep.subr.bf16.mxu0 %v12898_v4  ;;  %v164_v13 = vld [vmem:[#allocation8 + $0xd0] sm:$0xff]  ;;  %v12906_v14 = vpack.c.bf16 %v153_v11, %v148_v10  ;;  %v158_v16 = vld [vmem:[#allocation8 + $0xa0] sm:$0xff] }
  0x61   :  { %15699 = vst [vmem:[#allocation21_spill] sm:$0xff] %v12900_v8  ;;  %10012 = vmatpush1.bf16.msra.mxu0 %v12900_v8  ;;  %v12909_v15 = vpack.c.bf16 %v164_v13, %v159_v12  ;;  %v163_v17 = vld [vmem:[#allocation8 + $0xc8] sm:$0xff]  ;;  %v169_v18 = vld [vmem:[#allocation8 + $0xf8] sm:$0xff]  ;;  %v174_v19 = vld [vmem:[#allocation8 + $0x120] sm:$0xff] }
  0x62   :  { %15700 = vst [vmem:[#allocation22_spill] sm:$0xff] %v12902_v9  ;;  %15701 = vst [vmem:[#allocation23_spill] sm:$0xff] %v12906_v14  ;;  %10014 = vmatprep.subr.bf16.mxu0 %v12902_v9  ;;  %v12912_v20 = vpack.c.bf16 %v163_v17, %v158_v16  ;;  %v12915_v21 = vpack.c.bf16 %v174_v19, %v169_v18  ;;  %v168_v22 = vld [vmem:[#allocation8 + $0xf0] sm:$0xff]  ;;  %v173_v23 = vld [vmem:[#allocation8 + $0x118] sm:$0xff] }
  0x63   :  { %15702 = vst [vmem:[#allocation24_spill] sm:$0xff] %v12909_v15  ;;  %v179_v24 = vld [vmem:[#allocation8 + $0x148] sm:$0xff]  ;;  %v184_v25 = vld [vmem:[#allocation8 + $0x170] sm:$0xff]  ;;  %v12918_v26 = vpack.c.bf16 %v173_v23, %v168_v22  ;;  %v178_v28 = vld [vmem:[#allocation8 + $0x140] sm:$0xff] }
  0x64   :  { %15703 = vst [vmem:[#allocation25_spill] sm:$0xff] %v12912_v20  ;;  %15704 = vst [vmem:[#allocation26_spill] sm:$0xff] %v12915_v21  ;;  %v12921_v27 = vpack.c.bf16 %v184_v25, %v179_v24  ;;  %v183_v29 = vld [vmem:[#allocation8 + $0x168] sm:$0xff]  ;;  %v189_v30 = vld [vmem:[#allocation8 + $0x198] sm:$0xff] }
  0x65   :  { %10016 = vmatpush1.bf16.msra.mxu0 %v12906_v14  ;;  %15705 = vst [vmem:[#allocation27_spill] sm:$0xff] %v12918_v26  ;;  %v194_v31 = vld [vmem:[#allocation8 + $0x1c0] sm:$0xff]  ;;  %v12924_v32 = vpack.c.bf16 %v183_v29, %v178_v28  ;;  %v188_v34 = vld [vmem:[#allocation8 + $0x190] sm:$0xff]  ;;  %v193_v35 = vld [vmem:[#allocation8 + $0x1b8] sm:$0xff] }
  0x66   :  { %10018 = vmatprep.subr.bf16.mxu0 %v12909_v15  ;;  %15706 = vst [vmem:[#allocation28_spill] sm:$0xff] %v12921_v27  ;;  %v12927_v33 = vpack.c.bf16 %v194_v31, %v189_v30  ;;  %v199_v36 = vld [vmem:[#allocation8 + $0x1e8] sm:$0xff]  ;;  %v204_v37 = vld [vmem:[#allocation8 + $0x210] sm:$0xff]  ;;  %v12930_v38 = vpack.c.bf16 %v193_v35, %v188_v34  ;;  %v198_v40 = vld [vmem:[#allocation8 + $0x1e0] sm:$0xff] }
  0x67   :  { %15707 = vst [vmem:[#allocation29_spill] sm:$0xff] %v12924_v32  ;;  %v12933_v39 = vpack.c.bf16 %v204_v37, %v199_v36  ;;  %v203_v41 = vld [vmem:[#allocation8 + $0x208] sm:$0xff]  ;;  %v209_v42 = vld [vmem:[#allocation8 + $0x238] sm:$0xff]  ;;  %v214_v43 = vld [vmem:[#allocation8 + $0x260] sm:$0xff] }
  0x68   :  { %15708 = vst [vmem:[#allocation30_spill] sm:$0xff] %v12927_v33  ;;  %15709 = vst [vmem:[#allocation31_spill] sm:$0xff] %v12930_v38  ;;  %v12936_v44 = vpack.c.bf16 %v203_v41, %v198_v40  ;;  %v12939_v45 = vpack.c.bf16 %v214_v43, %v209_v42  ;;  %v208_v46 = vld [vmem:[#allocation8 + $0x230] sm:$0xff]  ;;  %v213_v47 = vld [vmem:[#allocation8 + $0x258] sm:$0xff] }
  0x69   :  { %10020 = vmatpush1.bf16.msra.mxu0 %v12912_v20  ;;  %15710 = vst [vmem:[#allocation32_spill] sm:$0xff] %v12933_v39  ;;  %v12942_v48 = vpack.c.bf16 %v213_v47, %v208_v46  ;;  %v142_v49 = vld [vmem:[#allocation8 + $0x20] sm:$0xff]  ;;  %v147_v50 = vld [vmem:[#allocation8 + $0x48] sm:$0xff]  ;;  %v12949_v51 = vld [vmem:[%s15359_s3] sm:$0xff] }
  0x6a   :  { %10022 = vmatprep.subr.bf16.mxu0 %v12915_v21  ;;  %15711 = vst [vmem:[#allocation33_spill] sm:$0xff] %v12936_v44  ;;  %15712 = vst [vmem:[#allocation34_spill] sm:$0xff] %v12939_v45  ;;  %v12951_v52 = vpack.c.bf16 %v147_v50, %v142_v49  ;;  %v152_v54 = vld [vmem:[#allocation8 + $0x70] sm:$0xff]  ;;  %v157_v55 = vld [vmem:[#allocation8 + $0x98] sm:$0xff] }
  0x6b   :  { %15713 = vst [vmem:[#allocation35_spill] sm:$0xff] %v12942_v48  ;;  %v12956_v56 = vpack.c.bf16 %v157_v55, %v152_v54  ;;  %v162_v57 = vld [vmem:[#allocation8 + $0xc0] sm:$0xff]  ;;  %v167_v58 = vld [vmem:[#allocation8 + $0xe8] sm:$0xff]  ;;  %v172_v60 = vld [vmem:[#allocation8 + $0x110] sm:$0xff] }
  0x6c   :  { %15714 = vst [vmem:[#allocation36_spill] sm:$0xff] %v12951_v52  ;;  %v12962_v59 = vpack.c.bf16 %v167_v58, %v162_v57  ;;  %v177_v61 = vld [vmem:[#allocation8 + $0x138] sm:$0xff]  ;;  %v182_v63 = vld [vmem:[#allocation8 + $0x160] sm:$0xff]  ;;  %v187_v1 = vld [vmem:[#allocation8 + $0x188] sm:$0xff] }
  0x6d   :  { %10024 = vmatpush1.bf16.msra.mxu0 %v12918_v26  ;;  %15715 = vst [vmem:[#allocation37_spill] sm:$0xff] %v12956_v56  ;;  %v12966_v62 = vpack.c.bf16 %v177_v61, %v172_v60  ;;  %v12970_v2 = vpack.c.bf16 %v187_v1, %v182_v63  ;;  %v192_v3 = vld [vmem:[#allocation8 + $0x1b0] sm:$0xff]  ;;  %v197_v5 = vld [vmem:[#allocation8 + $0x1d8] sm:$0xff]  ;;  %v202_v7 = vld [vmem:[#allocation8 + $0x200] sm:$0xff] }
  0x6e   :  { %10026 = vmatprep.subr.bf16.mxu0 %v12921_v27  ;;  %15716 = vst [vmem:[#allocation38_spill] sm:$0xff] %v12962_v59  ;;  %v12974_v6 = vpack.c.bf16 %v197_v5, %v192_v3  ;;  %v207_v10 = vld [vmem:[#allocation8 + $0x228] sm:$0xff]  ;;  %v212_v12 = vld [vmem:[#allocation8 + $0x250] sm:$0xff]  ;;  %v217_v13 = vld [vmem:[#allocation8 + $0x278] sm:$0xff] }
  0x6f   :  { %15717 = vst [vmem:[#allocation39_spill] sm:$0xff] %v12966_v62  ;;  %15718 = vst [vmem:[#allocation40_spill] sm:$0xff] %v12970_v2  ;;  %v12978_v11 = vpack.c.bf16 %v207_v10, %v202_v7  ;;  %v12982_v16 = vpack.c.bf16 %v217_v13, %v212_v12  ;;  %v8198_v17 = vld [vmem:[%s15365_s9] ss:$0 sm:$0xff]  ;;  %v134_v24 = vld [vmem:[%s15361_s5 + $0x8] sm:$0xff] }
  0x70   :  { %15719 = vst [vmem:[#allocation41_spill] sm:$0xff] %v12974_v6  ;;  %v133_v23 = vld [vmem:[%s15361_s5] sm:$0xff]  ;;  %v135_v25 = vld [vmem:[%s15361_s5 + $0x10] sm:$0xff]  ;;  %v136_v28 = vld [vmem:[%s15361_s5 + $0x18] sm:$0xff] }
  0x71   :  { %10028 = vmatpush1.bf16.msra.mxu0 %v12924_v32  ;;  %15720 = vst [vmem:[#allocation42_spill] sm:$0xff] %v12978_v11  ;;  %15721 = vst [vmem:[#allocation43_spill] sm:$0xff] %v12982_v16  ;;  %v137_v29 = vld [vmem:[%s15361_s5 + $0x20] sm:$0xff]  ;;  %v128_v40 = vld [vmem:[#allocation3 + $0x8] sm:$0xff] }
  0x72   :  { %10030 = vmatprep.subr.bf16.mxu0 %v12927_v33  ;;  %v127_v34 = vld [vmem:[#allocation3] sm:$0xff]  ;;  %v129_v46 = vld [vmem:[#allocation3 + $0x10] sm:$0xff]  ;;  %v130_v60 = vld [vmem:[#allocation3 + $0x18] sm:$0xff] }
  0x73   :  { %v8204_v54 = vld [vmem:[%s15366_s10] ss:$0 sm:$0xff] }
  0x74   :  { %v131_v63 = vld [vmem:[#allocation3 + $0x20] sm:$0xff] }
  0x75   :  { %10032 = vmatpush1.bf16.msra.mxu0 %v12930_v38 }
  0x76   :  { %10034 = vmatprep.subr.bf16.mxu0 %v12933_v39 }
  0x79   :  { %10036 = vmatpush1.bf16.msra.mxu0 %v12936_v44 }
  0x7a   :  { %10038 = vmatprep.subr.bf16.mxu0 %v12939_v45 }
  0x7d   :  { %10040 = vmatpush1.bf16.msra.mxu0 %v12942_v48 }
  0x7e   :  { %10073 = vmatprep.subr.bf16.mxu0 %v15373_v53 }
  0x80   :  { %448 = vmatmul.mubr.f32.vlgmr.msra.gmra.mrb[0].mxu0 %v12949_v51 }
  0x81   :  { %10075 = vmatpush3.bf16.msra.mxu0 %v12951_v52  ;;  %8857 = vmatprep.mubr.msk.f32.mxu0 %vm12751_vm0, %v15371_v0 }
  0x82   :  { %10076 = vmatprep.subr.bf16.mxu0 %v15373_v53 }
  0x85   :  { %10078 = vmatpush3.bf16.msra.mxu0 %v12956_v56 }
  0x86   :  { %10079 = vmatprep.subr.bf16.mxu0 %v15373_v53 }
  0x89   :  { %10081 = vmatpush3.bf16.msra.mxu0 %v12962_v59  ;;  %v277_v59 = vld [vmem:[#allocation11 + $0x158] sm:$0xff] }
  0x8a   :  { %10082 = vmatprep.subr.bf16.mxu0 %v15373_v53 }
  0x8d   :  { %10084 = vmatpush3.bf16.msra.mxu0 %v12966_v62  ;;  %v284_v62 = vld [vmem:[#allocation11 + $0x190] sm:$0xff] }
  0x8e   :  { %10085 = vmatprep.subr.bf16.mxu0 %v15373_v53 }
  0x91   :  { %10087 = vmatpush3.bf16.msra.mxu0 %v12970_v2  ;;  %v275_v2 = vld [vmem:[#allocation11 + $0x148] sm:$0xff] }
  0x92   :  { %10088 = vmatprep.subr.bf16.mxu0 %v15373_v53 }
  0x95   :  { %10090 = vmatpush3.bf16.msra.mxu0 %v12974_v6  ;;  %v267_v6 = vld [vmem:[#allocation11 + $0x108] sm:$0xff] }
  0x96   :  { %10091 = vmatprep.subr.bf16.mxu0 %v15373_v53 }
  0x99   :  { %10093 = vmatpush3.bf16.msra.mxu0 %v12978_v11  ;;  %v258_v11 = vld [vmem:[#allocation11 + $0xc0] sm:$0xff] }
  0x9a   :  { %10094 = vmatprep.subr.bf16.mxu0 %v15373_v53 }
  0x9d   :  { %10096 = vmatpush3.bf16.msra.mxu0 %v12982_v16 }
  0x9e   :  { %8860 = vmatprep.subr.mxu0 %v15371_v0 }
  0xa0   :  { %8858 = vmatmul.mubr.f32.vlgmr.msra.gmra.mrb[2].mxu0 %v12949_v51 }
  0xa1   :  { %8862 = vmatprep.mubr.msk.f32.mxu0 %vm12751_vm0, %v15371_v0 }
 0x153   :  { %v449_v18 = vpop.f32.mrb[0].mxu0 }
 0x154   :  { %v601_v19 = vadd.f32 %v8198_v17, %v449_v18  ;;  %v12993_v22 = vpop.f32.mrb[1].mxu0 }
 0x156   :  { %8861 = vmatpush3.msra.mxu0 %v601_v19 }
 0x157   :  { %8863 = vmatmul.mubr.msk.f32.vlgmr.msra.gmra.mrb[4].mxu0 %vm621_vm1, %v133_v23  ;;  %10109 = vmatprep.subr.bf16.mxu0 %v15373_v53 }
 0x158   :  { %8865 = vmatprep.mubr.msk.f32.mxu0 %vm12751_vm0, %v15371_v0 }
 0x15b   :  { %8866 = vmatmul.mubr.msk.f32.gmra.mrb[6].mxu0 %vm621_vm1, %v134_v24 }
 0x15c   :  { %8868 = vmatprep.mubr.msk.f32.mxu0 %vm12751_vm0, %v15371_v0 }
 0x15f   :  { %8869 = vmatmul.mubr.msk.f32.gmra.mrb[8].mxu0 %vm621_vm1, %v135_v25  ;;  %v141_v25 = vld [vmem:[#allocation8 + $0x18] sm:$0xff] }
 0x160   :  { %8871 = vmatprep.mubr.msk.f32.mxu0 %vm12751_vm0, %v15371_v0 }
 0x163   :  { %8872 = vmatmul.mubr.msk.f32.gmra.mrb[10].mxu0 %vm621_vm1, %v136_v28  ;;  %v146_v28 = vld [vmem:[#allocation8 + $0x40] sm:$0xff] }
 0x164   :  { %8874 = vmatprep.mubr.msk.f32.mxu0 %vm12751_vm0, %v15371_v0 }
 0x167   :  { %8875 = vmatmul.mubr.msk.f32.gmra.mrb[12].mxu0 %vm621_vm1, %v137_v29  ;;  %v13031_v29 = vpack.c.bf16 %v146_v28, %v141_v25  ;;  %v201_v25 = vld [vmem:[#allocation8 + $0x1f8] sm:$0xff] }
 0x168   :  { %8935 = vmatprep.mubr.msk.f32.mxu0 %vm12751_vm0, %v15371_v0 }
 0x169   :  { %15722 = vst [vmem:[#allocation44_spill] sm:$0xff] %v13031_v29  ;;  %10042 = vmatprep.subr.bf16.mxu1 %v13031_v29 }
 0x173   :  { %v13026_v30 = vpop.f32.mrb[2].mxu0 }
 0x174   :  { %v8859_v31 = vpop.f32.mrb[3].mxu0 }
 0x175   :  { %v140_v31 = vld [vmem:[#allocation8 + $0x10] sm:$0xff] }
 0x22a   :  { %v703_v35 = vpop.f32.mrb[4].mxu0 }
 0x22b   :  { %v704_v36 = vadd.f32 %v703_v35, %v127_v34  ;;  %v8864_v37 = vpop.f32.mrb[5].mxu0  ;;  %v145_v34 = vld [vmem:[#allocation8 + $0x38] sm:$0xff] }
 0x22c   :  { %v13033_v35 = vpack.c.bf16 %v145_v34, %v140_v31  ;;  %v156_v37 = vld [vmem:[#allocation8 + $0x90] sm:$0xff]  ;;  %v206_v31 = vld [vmem:[#allocation8 + $0x220] sm:$0xff] }
 0x22d   :  { %12240 = vtanh.f32 %v704_v36  ;;  %v151_v36 = vld [vmem:[#allocation8 + $0x68] sm:$0xff]  ;;  %v200_v34 = vld [vmem:[#allocation8 + $0x1f0] sm:$0xff] }
 0x22e   :  { %v708_v41 = vpop.f32.mrb[6].mxu0  ;;  %15723 = vst [vmem:[#allocation45_spill] sm:$0xff] %v13033_v35  ;;  %10044 = vmatpush1.bf16.msra.mxu1 %v13033_v35 }
 0x22f   :  { %v709_v42 = vadd.f32 %v708_v41, %v128_v40  ;;  %v8867_v43 = vpop.f32.mrb[7].mxu0  ;;  %v13037_v40 = vpack.c.bf16 %v156_v37, %v151_v36  ;;  %v150_v41 = vld [vmem:[#allocation8 + $0x60] sm:$0xff]  ;;  %v205_v36 = vld [vmem:[#allocation8 + $0x218] sm:$0xff]  ;;  %v13066_v37 = vpack.c.bf16 %v206_v31, %v201_v25 }
 0x231   :  { %12242 = vtanh.f32 %v709_v42  ;;  %15724 = vst [vmem:[#allocation46_spill] sm:$0xff] %v13037_v40  ;;  %v155_v42 = vld [vmem:[#allocation8 + $0x88] sm:$0xff]  ;;  %10046 = vmatprep.subr.bf16.mxu1 %v13037_v40  ;;  %15734 = vst [vmem:[#allocation56_spill] sm:$0xff] %v13066_v37 }
 0x232   :  { %v713_v47 = vpop.f32.mrb[8].mxu0  ;;  %v13039_v43 = vpack.c.bf16 %v155_v42, %v150_v41  ;;  %v211_v41 = vld [vmem:[#allocation8 + $0x248] sm:$0xff]  ;;  %v216_v42 = vld [vmem:[#allocation8 + $0x270] sm:$0xff] }
 0x233   :  { %v714_v49 = vadd.f32 %v713_v47, %v129_v46  ;;  %v8870_v50 = vpop.f32.mrb[9].mxu0  ;;  %v161_v46 = vld [vmem:[#allocation8 + $0xb8] sm:$0xff]  ;;  %v166_v47 = vld [vmem:[#allocation8 + $0xe0] sm:$0xff] }
 0x234   :  { %15725 = vst [vmem:[#allocation47_spill] sm:$0xff] %v13039_v43  ;;  %10048 = vmatpush1.bf16.msra.mxu1 %v13039_v43  ;;  %v160_v50 = vld [vmem:[#allocation8 + $0xb0] sm:$0xff] }
 0x235   :  { %12244 = vtanh.f32 %v714_v49  ;;  %v13043_v49 = vpack.c.bf16 %v166_v47, %v161_v46  ;;  %v13069_v46 = vpack.c.bf16 %v205_v36, %v200_v34  ;;  %v13072_v47 = vpack.c.bf16 %v216_v42, %v211_v41 }
 0x236   :  { %v718_v55 = vpop.f32.mrb[10].mxu0 }
 0x237   :  { %v12241_v57 = vpop.eup %12240  ;;  %v8873_v58 = vpop.f32.mrb[11].mxu0  ;;  %v719_v5 = vadd.f32 %v718_v55, %v130_v60  ;;  %15726 = vst [vmem:[#allocation48_spill] sm:$0xff] %v13043_v49  ;;  %10050 = vmatprep.subr.bf16.mxu1 %v13043_v49  ;;  %15735 = vst [vmem:[#allocation57_spill] sm:$0xff] %v13069_v46 }
 0x238   :  { %v738_v61 = vmul.f32 %v12241_v57, %v8204_v54  ;;  %v171_v57 = vld [vmem:[#allocation8 + $0x108] sm:$0xff]  ;;  %v176_v58 = vld [vmem:[#allocation8 + $0x130] sm:$0xff]  ;;  %15736 = vst [vmem:[#allocation58_spill] sm:$0xff] %v13072_v47 }
 0x239   :  { %v13049_v60 = vpack.c.bf16 %v176_v58, %v171_v57 }
 0x23a   :  { %743 = vadd.xlane.f32.xlu0 %v738_v61  ;;  %v723_v1 = vpop.f32.mrb[12].mxu0  ;;  %v170_v61 = vld [vmem:[#allocation8 + $0x100] sm:$0xff] }
 0x23b   :  { %v12243_v3 = vpop.eup %12242  ;;  %v724_v7 = vadd.f32 %v723_v1, %v131_v63  ;;  %v8876_v10 = vpop.f32.mrb[13].mxu0  ;;  %15728 = vst [vmem:[#allocation50_spill] sm:$0xff] %v13049_v60  ;;  %v175_v63 = vld [vmem:[#allocation8 + $0x128] sm:$0xff] }
 0x23c   :  { %v739_v12 = vmul.f32 %v12243_v3, %v8204_v54  ;;  %v13051_v1 = vpack.c.bf16 %v175_v63, %v170_v61  ;;  %v181_v3 = vld [vmem:[#allocation8 + $0x158] sm:$0xff]  ;;  %v180_v10 = vld [vmem:[#allocation8 + $0x150] sm:$0xff] }
 0x23d   :  { %12246 = vtanh.f32 %v724_v7 }
 0x23e   :  { %745 = vadd.xlane.f32.xlu1 %v739_v12  ;;  %12248 = vtanh.f32 %v719_v5  ;;  %15729 = vst [vmem:[#allocation51_spill] sm:$0xff] %v13051_v1  ;;  %v186_v5 = vld [vmem:[#allocation8 + $0x180] sm:$0xff]  ;;  %v185_v12 = vld [vmem:[#allocation8 + $0x178] sm:$0xff] }
 0x23f   :  { %v12245_v13 = vpop.eup %12244  ;;  %v13055_v7 = vpack.c.bf16 %v186_v5, %v181_v3 }
 0x240   :  { %v740_v17 = vmul.f32 %v12245_v13, %v8204_v54  ;;  %v13057_v13 = vpack.c.bf16 %v185_v12, %v180_v10 }
 0x241   :  { %15730 = vst [vmem:[#allocation52_spill] sm:$0xff] %v13055_v7 }
 0x242   :  { %747 = vadd.xlane.f32.xlu1 %v740_v17  ;;  %15731 = vst [vmem:[#allocation53_spill] sm:$0xff] %v13057_v13  ;;  %v191_v17 = vld [vmem:[#allocation8 + $0x1a8] sm:$0xff] }
 0x247   :  { %v12247_v18 = vpop.eup %12246 }
 0x248   :  { %v742_v19 = vmul.f32 %v12247_v18, %v8204_v54  ;;  %v12249_v23 = vpop.eup %12248  ;;  %v196_v18 = vld [vmem:[#allocation8 + $0x1d0] sm:$0xff] }
 0x249   :  { %v741_v24 = vmul.f32 %v12249_v23, %v8204_v54  ;;  %v165_v54 = vld [vmem:[#allocation8 + $0xd8] sm:$0xff]  ;;  %v190_v23 = vld [vmem:[#allocation8 + $0x1a0] sm:$0xff] }
 0x24a   :  { %751 = vadd.xlane.f32.xlu0 %v742_v19  ;;  %v13045_v55 = vpack.c.bf16 %v165_v54, %v160_v50  ;;  %v13061_v19 = vpack.c.bf16 %v196_v18, %v191_v17  ;;  %v210_v50 = vld [vmem:[#allocation8 + $0x240] sm:$0xff]  ;;  %v215_v54 = vld [vmem:[#allocation8 + $0x268] sm:$0xff] }
 0x24b   :  { %v13075_v57 = vpack.c.bf16 %v215_v54, %v210_v50 }
 0x24c   :  { %15727 = vst [vmem:[#allocation49_spill] sm:$0xff] %v13045_v55  ;;  %10052 = vmatpush1.bf16.msra.mxu1 %v13045_v55  ;;  %15732 = vst [vmem:[#allocation54_spill] sm:$0xff] %v13061_v19 }
 0x24d   :  { %10054 = vmatprep.subr.bf16.mxu1 %v13049_v60  ;;  %15737 = vst [vmem:[#allocation59_spill] sm:$0xff] %v13075_v57 }
 0x24e   :  { %749 = vadd.xlane.f32.xlu0 %v741_v24  ;;  %v195_v24 = vld [vmem:[#allocation8 + $0x1c8] sm:$0xff] }
 0x24f   :  { %v13063_v28 = vpack.c.bf16 %v195_v24, %v190_v23 }
 0x250   :  { %10056 = vmatpush1.bf16.msra.mxu1 %v13051_v1 }
 0x251   :  { %10058 = vmatprep.subr.bf16.mxu1 %v13055_v7  ;;  %15733 = vst [vmem:[#allocation55_spill] sm:$0xff] %v13063_v28 }
 0x254   :  { %10060 = vmatpush1.bf16.msra.mxu1 %v13057_v13 }
 0x255   :  { %10062 = vmatprep.subr.bf16.mxu1 %v13061_v19 }
 0x258   :  { %10064 = vmatpush1.bf16.msra.mxu1 %v13063_v28 }
 0x259   :  { %10066 = vmatprep.subr.bf16.mxu1 %v13066_v37 }
 0x25c   :  { %10068 = vmatpush1.bf16.msra.mxu1 %v13069_v46 }
 0x25d   :  { %10070 = vmatprep.subr.bf16.mxu1 %v13072_v47 }
 0x260   :  { %10072 = vmatpush1.bf16.msra.mxu1 %v13075_v57 }
 0x261   :  { %10097 = vmatprep.subr.bf16.mxu1 %v15373_v53 }
 0x263   :  { %519 = vmatmul.mubr.f32.vlgmr.msra.gmra.mrb[0].mxu1 %v12949_v51 }
 0x264   :  { %8887 = vmatprep.mubr.msk.f32.mxu1 %vm12751_vm0, %v15371_v0 }
 0x2c7   :  { %v744_v58 = vpop.xlane.xlu0 %743 }
 0x2cb   :  { %v746_v61 = vpop.xlane.xlu1 %745 }
 0x2cf   :  { %v748_v5 = vpop.xlane.xlu1 %747 }
 0x2d7   :  { %v752_v63 = vpop.xlane.xlu0 %751 }
 0x2d8   :  { %v753_v3 = vmax.f32 %v744_v58, %v752_v63 }
 0x2da   :  { %v754_v12 = vmax.f32 %v753_v3, %v746_v61 }
 0x2db   :  { %v750_v10 = vpop.xlane.xlu0 %749 }
 0x2dc   :  { %v755_v17 = vmax.f32 %v748_v5, %v750_v10 }
 0x2de   :  { %v756_v18 = vmax.f32 %v754_v12, %v755_v17  ;;  %v122_v17 = vld [vmem:[%s15356_s0] sm:$0xff] }
 0x2e0   :  { %v757_v23 = vrot.slane %v756_v18, 4 }
 0x2e2   :  { %v758_v24 = vmax.f32 %v756_v18, %v757_v23 }
 0x2e4   :  { %v759_v25 = vrot.slane %v758_v24, 2 }
 0x2e6   :  { %v760_v31 = vmax.f32 %v758_v24, %v759_v25 }
 0x2e8   :  { %v761_v34 = vrot.slane %v760_v31, 1 }
 0x2ea   :  { %v762_v36 = vmax.f32 %v760_v31, %v761_v34  ;;  %v15738_v31 = vmov 0.0|0.0  }
 0x2ec   :  { %v766_v41 = vsub.f32 %v750_v10, %v762_v36  ;;  %v763_v51 = vsub.f32 %v744_v58, %v762_v36  ;;  %v764_v42 = vsub.f32 %v746_v61, %v762_v36  ;;  %v765_v50 = vsub.f32 %v748_v5, %v762_v36  ;;  %v123_v58 = vld [vmem:[%s15356_s0 + $0x8] sm:$0xff] }
 0x2ed   :  { %v767_v3 = vsub.f32 %v752_v63, %v762_v36 }
 0x2ee   :  { %v774_v54 = vmul.f32 1.442695, %v766_v41  ;;  %v768_v0 = vmul.f32 1.442695, %v763_v51  ;;  %v770_v53 = vmul.f32 1.442695, %v764_v42 }
 0x2ef   :  { %v772_v16 = vmul.f32 1.442695, %v765_v50  ;;  %v776_v12 = vmul.f32 1.442695, %v767_v3  ;;  %v126_v41 = vld [vmem:[%s15356_s0 + $0x20] sm:$0xff]  ;;  %v15739_v51 = vmov 0.0  }
 0x2f0   :  { %12250 = vpow2.f32 %v774_v54  ;;  %v132_v50 = vld [vmem:[%s15360_s4] sm:$0xff] }
 0x2f1   :  { %12252 = vpow2.f32 %v768_v0  ;;  %v124_v0 = vld [vmem:[%s15356_s0 + $0x10] sm:$0xff] }
 0x2f2   :  { %12254 = vpow2.f32 %v770_v53  ;;  %v125_v53 = vld [vmem:[%s15356_s0 + $0x18] sm:$0xff] }
 0x2f3   :  { %12256 = vpow2.f32 %v772_v16 }
 0x2f4   :  { %12258 = vpow2.f32 %v776_v12 }
 0x2fa   :  { %v12251_v18 = vpop.eup %12250 }
 0x2fb   :  { %v12253_v61 = vpop.eup %12252  ;;  %v781_v25 = vmul.f32 %v12251_v18, %v125_v53 }
 0x2fc   :  { %v12255_v5 = vpop.eup %12254  ;;  %v778_v10 = vmul.f32 %v12253_v61, %v122_v17 }
 0x2fd   :  { %v12257_v16 = vpop.eup %12256  ;;  %v779_v63 = vmul.f32 %v12255_v5, %v123_v58  ;;  %v10104_v54 = vpack.c.bf16 %v12255_v5, %v12253_v61  ;;  %v12752_v58 = vmov 0   ;;  %v218_v61 = vld [vmem:[#allocation9] sm:$0xff]  ;;  %v219_v5 = vld [vmem:[#allocation9 + $0x8] sm:$0xff] }
 0x2fe   :  { %v780_v24 = vmul.f32 %v12257_v16, %v124_v0  ;;  %v12259_v36 = vpop.eup %12258  ;;  %v10107_v3 = vpack.c.bf16 %v12251_v18, %v12257_v16  ;;  %12238 = vset.pattern.permute.xlu1 %v12752_v58  ;;  %12239 = vset.pattern.permute.xlu0 %v12752_v58  ;;  %v13115_v0 = vpack.c.bf16 %v219_v5, %v218_v61  ;;  %v221_v18 = vld [vmem:[#allocation9 + $0x18] sm:$0xff]  ;;  %v222_v16 = vld [vmem:[#allocation9 + $0x20] sm:$0xff]  ;;  %v231_v61 = vld [vmem:[#allocation9 + $0x68] sm:$0xff] }
 0x2ff   :  { %v10098_v23 = vpack.c.bf16 %v779_v63, %v778_v10  ;;  %v782_v42 = vmul.f32 %v12259_v36, %v126_v41  ;;  %v220_v10 = vld [vmem:[#allocation9 + $0x10] sm:$0xff]  ;;  %v223_v63 = vld [vmem:[#allocation9 + $0x28] sm:$0xff]  ;;  %v230_v58 = vld [vmem:[#allocation9 + $0x60] sm:$0xff] }
 0x300   :  { %v10101_v34 = vpack.c.bf16 %v781_v25, %v780_v24  ;;  %15740 = vst [vmem:[#allocation60_spill] sm:$0xff] %v13115_v0  ;;  %10111 = vmatpush3.bf16.msra.mxu0 %v13115_v0  ;;  %v13118_v53 = vpack.c.bf16 %v221_v18, %v220_v10  ;;  %v224_v24 = vld [vmem:[#allocation9 + $0x30] sm:$0xff]  ;;  %v225_v25 = vld [vmem:[#allocation9 + $0x38] sm:$0xff]  ;;  %v227_v41 = vld [vmem:[#allocation9 + $0x48] sm:$0xff]  ;;  %v13138_v5 = vpack.c.bf16 %v231_v61, %v230_v58 }
 0x301   :  { %10099 = vmatpush3.bf16.msra.mxu1 %v10098_v23  ;;  %10112 = vmatprep.subr.bf16.mxu0 %v15738_v31  ;;  %v13122_v23 = vpack.c.bf16 %v223_v63, %v222_v16  ;;  %v232_v10 = vld [vmem:[#allocation9 + $0x70] sm:$0xff]  ;;  %v233_v18 = vld [vmem:[#allocation9 + $0x78] sm:$0xff] }
 0x302   :  { %10100 = vmatprep.subr.bf16.mxu1 %v15738_v31  ;;  %15741 = vst [vmem:[#allocation61_spill] sm:$0xff] %v13118_v53  ;;  %15746 = vst [vmem:[#allocation66_spill] sm:$0xff] %v13138_v5  ;;  %v13142_v16 = vpack.c.bf16 %v233_v18, %v232_v10  ;;  %v237_v58 = vld [vmem:[#allocation11 + $0x18] sm:$0xff]  ;;  %v234_v10 = vld [vmem:[#allocation11] sm:$0xff] }
 0x303   :  { %15742 = vst [vmem:[#allocation62_spill] sm:$0xff] %v13122_v23  ;;  %v243_v18 = vld [vmem:[#allocation11 + $0x48] sm:$0xff] }
 0x304   :  { %10114 = vmatpush3.bf16.msra.mxu0 %v13118_v53  ;;  %15747 = vst [vmem:[#allocation67_spill] sm:$0xff] %v13142_v16 }
 0x305   :  { %10102 = vmatpush3.bf16.msra.mxu1 %v10101_v34  ;;  %10115 = vmatprep.subr.bf16.mxu0 %v15738_v31  ;;  %v13126_v34 = vpack.c.bf16 %v225_v25, %v224_v24 }
 0x306   :  { %8885 = vmatprep.subr.mxu1 %v15739_v51 }
 0x307   :  { %15743 = vst [vmem:[#allocation63_spill] sm:$0xff] %v13126_v34 }
 0x308   :  { %10117 = vmatpush3.bf16.msra.mxu0 %v13122_v23 }
 0x309   :  { %8886 = vmatpush3.msra.mxu1 %v782_v42  ;;  %10118 = vmatprep.subr.bf16.mxu0 %v15738_v31 }
 0x30a   :  { %8888 = vmatmul.mubr.msk.f32.vlgmr.msra.gmra.mrb[2].mxu1 %vm783_vm2, %v132_v50  ;;  %10103 = vmatprep.subr.bf16.mxu1 %v15738_v31 }
 0x30b   :  { %10105 = vmatpush3.bf16.msra.mxu1 %v10104_v54  ;;  %8900 = vmatprep.mubr.msk.f32.mxu1 %vm12751_vm0, %v15739_v51  ;;  %v229_v54 = vld [vmem:[#allocation9 + $0x58] sm:$0xff] }
 0x30c   :  { %10106 = vmatprep.subr.bf16.mxu1 %v15738_v31  ;;  %10120 = vmatpush3.bf16.msra.mxu0 %v13126_v34  ;;  %v280_v34 = vld [vmem:[#allocation11 + $0x170] sm:$0xff] }
 0x30d   :  { %10121 = vmatprep.subr.bf16.mxu0 %v15738_v31 }
 0x30f   :  { %10108 = vmatpush3.bf16.msra.mxu1 %v10107_v3 }
 0x310   :  { %8898 = vmatprep.subr.mxu1 %v15739_v51 }
 0x313   :  { %8899 = vmatpush3.msra.mxu1 %v12259_v36  ;;  %v226_v36 = vld [vmem:[#allocation9 + $0x40] sm:$0xff] }
 0x314   :  { %8901 = vmatmul.mubr.msk.f32.vlgmr.msra.gmra.mrb[4].mxu1 %vm783_vm2, %v132_v50  ;;  %v13130_v42 = vpack.c.bf16 %v227_v41, %v226_v36  ;;  %v228_v50 = vld [vmem:[#allocation9 + $0x50] sm:$0xff] }
 0x315   :  { %1075 = vmatprep.mubr.f32.mxu1 %v15739_v51  ;;  %v13134_v3 = vpack.c.bf16 %v229_v54, %v228_v50  ;;  %v235_v50 = vld [vmem:[#allocation11 + $0x8] sm:$0xff]  ;;  %v244_v54 = vld [vmem:[#allocation11 + $0x50] sm:$0xff] }
 0x316   :  { %15744 = vst [vmem:[#allocation64_spill] sm:$0xff] %v13130_v42  ;;  %10123 = vmatpush3.bf16.msra.mxu0 %v13130_v42  ;;  %v13148_v61 = vpack.c.bf16 %v244_v54, %v235_v50  ;;  %v13152_v42 = vpack.c.bf16 %v243_v18, %v234_v10  ;;  %v271_v54 = vld [vmem:[#allocation11 + $0x128] sm:$0xff] }
 0x317   :  { %15745 = vst [vmem:[#allocation65_spill] sm:$0xff] %v13134_v3  ;;  %10124 = vmatprep.subr.bf16.mxu0 %v15738_v31  ;;  %v279_v10 = vld [vmem:[#allocation11 + $0x168] sm:$0xff] }
 0x318   :  { %15748 = vst [vmem:[#allocation68_spill] sm:$0xff] %v13148_v61  ;;  %15750 = vst [vmem:[#allocation70_spill] sm:$0xff] %v13152_v42  ;;  %10134 = vmatprep.subr.bf16.mxu1 %v13148_v61 }
 0x319   :  { %10136 = vmatpush1.bf16.msra.mxu1 %v13152_v42 }
 0x31a   :  { %10126 = vmatpush3.bf16.msra.mxu0 %v13134_v3 }
 0x31b   :  { %10127 = vmatprep.subr.bf16.mxu0 %v15738_v31 }
 0x31e   :  { %10129 = vmatpush3.bf16.msra.mxu0 %v13138_v5  ;;  %v246_v5 = vld [vmem:[#allocation11 + $0x60] sm:$0xff] }
 0x31f   :  { %10130 = vmatprep.subr.bf16.mxu0 %v15738_v31  ;;  %v13150_v3 = vpack.c.bf16 %v246_v5, %v237_v58  ;;  %v13162_v5 = vpack.c.bf16 %v280_v34, %v271_v54  ;;  %v270_v58 = vld [vmem:[#allocation11 + $0x120] sm:$0xff]  ;;  %v307_v34 = vld [vmem:[#allocation11 + $0x248] sm:$0xff]  ;;  %v316_v54 = vld [vmem:[#allocation11 + $0x290] sm:$0xff] }
 0x320   :  { %v13165_v18 = vpack.c.bf16 %v279_v10, %v270_v58  ;;  %v306_v58 = vld [vmem:[#allocation11 + $0x240] sm:$0xff]  ;;  %v315_v10 = vld [vmem:[#allocation11 + $0x288] sm:$0xff] }
 0x321   :  { %15749 = vst [vmem:[#allocation69_spill] sm:$0xff] %v13150_v3  ;;  %15753 = vst [vmem:[#allocation73_spill] sm:$0xff] %v13162_v5 }
 0x322   :  { %10132 = vmatpush3.bf16.msra.mxu0 %v13142_v16  ;;  %v253_v16 = vld [vmem:[#allocation11 + $0x98] sm:$0xff]  ;;  %15754 = vst [vmem:[#allocation74_spill] sm:$0xff] %v13165_v18 }
 0x323   :  { %10166 = vmatprep.subr.bf16.mxu0 %v13150_v3  ;;  %v263_v3 = vld [vmem:[#allocation11 + $0xe8] sm:$0xff] }
 0x336   :  { %v13111_v12 = vpop.f32.mrb[0].mxu1 }
 0x337   :  { %v13113_v17 = vpop.f32.mrb[1].mxu1 }
 0x3dd   :  { %v13146_v63 = vpop.f32.mrb[2].mxu1 }
 0x3de   :  { %v8889_v24 = vpop.f32.mrb[3].mxu1 }
 0x3df   :  { %v262_v24 = vld [vmem:[#allocation11 + $0xe0] sm:$0xff] }
 0x3e7   :  { %v923_v25 = vpop.f32.mrb[4].mxu1 }
 0x3e8   :  { %12260 = vrcp.f32 %v923_v25  ;;  %v8902_v36 = vpop.f32.mrb[5].mxu1  ;;  %v13157_v25 = vpack.c.bf16 %v262_v24, %v253_v16  ;;  %v289_v16 = vld [vmem:[#allocation11 + $0x1b8] sm:$0xff]  ;;  %v298_v24 = vld [vmem:[#allocation11 + $0x200] sm:$0xff] }
 0x3e9   :  { %v252_v36 = vld [vmem:[#allocation11 + $0x90] sm:$0xff]  ;;  %v13168_v42 = vpack.c.bf16 %v298_v24, %v289_v16  ;;  %v325_v16 = vld [vmem:[#allocation11 + $0x2d8] sm:$0xff]  ;;  %v334_v24 = vld [vmem:[#allocation11 + $0x320] sm:$0xff] }
 0x3ea   :  { %15751 = vst [vmem:[#allocation71_spill] sm:$0xff] %v13157_v25  ;;  %10138 = vmatprep.subr.bf16.mxu1 %v13157_v25  ;;  %v13174_v25 = vpack.c.bf16 %v316_v54, %v307_v34  ;;  %v343_v34 = vld [vmem:[#allocation11 + $0x368] sm:$0xff]  ;;  %v352_v54 = vld [vmem:[#allocation11 + $0x3b0] sm:$0xff] }
 0x3eb   :  { %15755 = vst [vmem:[#allocation75_spill] sm:$0xff] %v13168_v42 }
 0x3ec   :  { %15757 = vst [vmem:[#allocation77_spill] sm:$0xff] %v13174_v25 }
 0x3f2   :  { %v12261_v41 = vpop.eup %12260 }
 0x3f3   :  { %930 = vperm.xlu1 %12238, %v12261_v41   ;;  %v261_v41 = vld [vmem:[#allocation11 + $0xd8] sm:$0xff] }
 0x3f4   :  { %v13159_v50 = vpack.c.bf16 %v261_v41, %v252_v36  ;;  %v288_v36 = vld [vmem:[#allocation11 + $0x1b0] sm:$0xff]  ;;  %v297_v41 = vld [vmem:[#allocation11 + $0x1f8] sm:$0xff] }
 0x3f5   :  { %v13171_v61 = vpack.c.bf16 %v297_v41, %v288_v36  ;;  %v324_v36 = vld [vmem:[#allocation11 + $0x2d0] sm:$0xff]  ;;  %v333_v41 = vld [vmem:[#allocation11 + $0x318] sm:$0xff] }
 0x3f6   :  { %15752 = vst [vmem:[#allocation72_spill] sm:$0xff] %v13159_v50  ;;  %10140 = vmatpush1.bf16.msra.mxu1 %v13159_v50  ;;  %v13180_v50 = vpack.c.bf16 %v334_v24, %v325_v16  ;;  %v236_v16 = vld [vmem:[#allocation11 + $0x10] sm:$0xff]  ;;  %v245_v24 = vld [vmem:[#allocation11 + $0x58] sm:$0xff] }
 0x3f7   :  { %10142 = vmatprep.subr.bf16.mxu1 %v13162_v5  ;;  %15756 = vst [vmem:[#allocation76_spill] sm:$0xff] %v13171_v61  ;;  %v13177_v5 = vpack.c.bf16 %v315_v10, %v306_v58  ;;  %v342_v58 = vld [vmem:[#allocation11 + $0x360] sm:$0xff]  ;;  %v351_v10 = vld [vmem:[#allocation11 + $0x3a8] sm:$0xff] }
 0x3f8   :  { %15759 = vst [vmem:[#allocation79_spill] sm:$0xff] %v13180_v50 }
 0x3f9   :  { %15758 = vst [vmem:[#allocation78_spill] sm:$0xff] %v13177_v5 }
 0x3fa   :  { %10144 = vmatpush1.bf16.msra.mxu1 %v13165_v18  ;;  %v13186_v18 = vpack.c.bf16 %v352_v54, %v343_v34 }
 0x3fb   :  { %10146 = vmatprep.subr.bf16.mxu1 %v13168_v42  ;;  %v13183_v42 = vpack.c.bf16 %v333_v41, %v324_v36  ;;  %v255_v36 = vld [vmem:[#allocation11 + $0xa8] sm:$0xff]  ;;  %v264_v41 = vld [vmem:[#allocation11 + $0xf0] sm:$0xff] }
 0x3fc   :  { %15761 = vst [vmem:[#allocation81_spill] sm:$0xff] %v13186_v18  ;;  %v13196_v54 = vpack.c.bf16 %v264_v41, %v255_v36 }
 0x3fd   :  { %15760 = vst [vmem:[#allocation80_spill] sm:$0xff] %v13183_v42 }
 0x3fe   :  { %10148 = vmatpush1.bf16.msra.mxu1 %v13171_v61  ;;  %15764 = vst [vmem:[#allocation84_spill] sm:$0xff] %v13196_v54  ;;  %v254_v61 = vld [vmem:[#allocation11 + $0xa0] sm:$0xff] }
 0x3ff   :  { %10150 = vmatprep.subr.bf16.mxu1 %v13174_v25  ;;  %v13189_v25 = vpack.c.bf16 %v351_v10, %v342_v58  ;;  %v282_v58 = vld [vmem:[#allocation11 + $0x180] sm:$0xff]  ;;  %v13199_v10 = vpack.c.bf16 %v263_v3, %v254_v61  ;;  %v299_v61 = vld [vmem:[#allocation11 + $0x208] sm:$0xff] }
 0x400   :  { %v290_v3 = vld [vmem:[#allocation11 + $0x1c0] sm:$0xff] }
 0x401   :  { %15762 = vst [vmem:[#allocation82_spill] sm:$0xff] %v13189_v25  ;;  %15765 = vst [vmem:[#allocation85_spill] sm:$0xff] %v13199_v10 }
 0x402   :  { %10152 = vmatpush1.bf16.msra.mxu1 %v13177_v5 }
 0x403   :  { %10154 = vmatprep.subr.bf16.mxu1 %v13180_v50  ;;  %v13193_v50 = vpack.c.bf16 %v245_v24, %v236_v16  ;;  %v272_v16 = vld [vmem:[#allocation11 + $0x130] sm:$0xff]  ;;  %v281_v24 = vld [vmem:[#allocation11 + $0x178] sm:$0xff] }
 0x404   :  { %v13206_v36 = vpack.c.bf16 %v281_v24, %v272_v16  ;;  %v327_v16 = vld [vmem:[#allocation11 + $0x2e8] sm:$0xff]  ;;  %v336_v24 = vld [vmem:[#allocation11 + $0x330] sm:$0xff] }
 0x405   :  { %15763 = vst [vmem:[#allocation83_spill] sm:$0xff] %v13193_v50 }
 0x406   :  { %10156 = vmatpush1.bf16.msra.mxu1 %v13183_v42  ;;  %v273_v42 = vld [vmem:[#allocation11 + $0x138] sm:$0xff]  ;;  %15767 = vst [vmem:[#allocation87_spill] sm:$0xff] %v13206_v36 }
 0x407   :  { %10158 = vmatprep.subr.bf16.mxu1 %v13186_v18  ;;  %v265_v18 = vld [vmem:[#allocation11 + $0xf8] sm:$0xff] }
 0x40a   :  { %10160 = vmatpush1.bf16.msra.mxu1 %v13189_v25  ;;  %v13203_v25 = vpack.c.bf16 %v282_v58, %v273_v42  ;;  %v13212_v42 = vpack.c.bf16 %v299_v61, %v290_v3  ;;  %v345_v3 = vld [vmem:[#allocation11 + $0x378] sm:$0xff]  ;;  %v354_v61 = vld [vmem:[#allocation11 + $0x3c0] sm:$0xff] }
 0x40c   :  { %15766 = vst [vmem:[#allocation86_spill] sm:$0xff] %v13203_v25  ;;  %15769 = vst [vmem:[#allocation89_spill] sm:$0xff] %v13212_v42 }
 0x472   :  { %v931_v5 = vpop.permute.xlu1 %930 }
 0x473   :  { %v933_v34 = vmul.f32 %v931_v5, %v13146_v63  ;;  %v291_v63 = vld [vmem:[#allocation11 + $0x1c8] sm:$0xff]  ;;  %v300_v5 = vld [vmem:[#allocation11 + $0x210] sm:$0xff] }
 0x474   :  { %v13209_v41 = vpack.c.bf16 %v300_v5, %v291_v63  ;;  %v13221_v5 = vpack.c.bf16 %v336_v24, %v327_v16  ;;  %v370_v16 = vld [vmem:[#allocation11 + $0x440] sm:$0xff]  ;;  %v363_v24 = vld [vmem:[#allocation11 + $0x408] sm:$0xff] }
 0x475   :  { %8936 = vmatmul.mubr.f32.vlgmr.msra.gmra.mrb[14].mxu0 %v933_v34  ;;  %v309_v34 = vld [vmem:[#allocation11 + $0x258] sm:$0xff] }
 0x476   :  { %10168 = vmatpush1.bf16.msra.mxu0 %v13193_v50  ;;  %1146 = vmatprep.mubr.f32.mxu0 %v15739_v51  ;;  %15768 = vst [vmem:[#allocation88_spill] sm:$0xff] %v13209_v41  ;;  %v318_v50 = vld [vmem:[#allocation11 + $0x2a0] sm:$0xff]  ;;  %15772 = vst [vmem:[#allocation92_spill] sm:$0xff] %v13221_v5 }
 0x477   :  { %10170 = vmatprep.subr.bf16.mxu0 %v13196_v54  ;;  %v13215_v58 = vpack.c.bf16 %v318_v50, %v309_v34  ;;  %v308_v54 = vld [vmem:[#allocation11 + $0x250] sm:$0xff]  ;;  %v13227_v34 = vpack.c.bf16 %v354_v61, %v345_v3 }
 0x479   :  { %15770 = vst [vmem:[#allocation90_spill] sm:$0xff] %v13215_v58  ;;  %15774 = vst [vmem:[#allocation94_spill] sm:$0xff] %v13227_v34 }
 0x47a   :  { %10172 = vmatpush1.bf16.msra.mxu0 %v13199_v10  ;;  %v317_v10 = vld [vmem:[#allocation11 + $0x298] sm:$0xff] }
 0x47b   :  { %10174 = vmatprep.subr.bf16.mxu0 %v13203_v25  ;;  %v13218_v63 = vpack.c.bf16 %v317_v10, %v308_v54  ;;  %v326_v25 = vld [vmem:[#allocation11 + $0x2e0] sm:$0xff]  ;;  %v361_v10 = vld [vmem:[#allocation11 + $0x3f8] sm:$0xff] }
 0x47d   :  { %15771 = vst [vmem:[#allocation91_spill] sm:$0xff] %v13218_v63 }
 0x47e   :  { %10176 = vmatpush1.bf16.msra.mxu0 %v13206_v36  ;;  %v335_v36 = vld [vmem:[#allocation11 + $0x328] sm:$0xff] }
 0x47f   :  { %10178 = vmatprep.subr.bf16.mxu0 %v13209_v41  ;;  %v13224_v50 = vpack.c.bf16 %v335_v36, %v326_v25  ;;  %v344_v41 = vld [vmem:[#allocation11 + $0x370] sm:$0xff] }
 0x480   :  { %v372_v25 = vld [vmem:[#allocation11 + $0x450] sm:$0xff] }
 0x481   :  { %15773 = vst [vmem:[#allocation93_spill] sm:$0xff] %v13224_v50  ;;  %v360_v36 = vld [vmem:[#allocation11 + $0x3f0] sm:$0xff]  ;;  %v13236_v3 = vpack.c.bf16 %v372_v25, %v363_v24  ;;  %v250_v24 = vld [vmem:[#allocation11 + $0x80] sm:$0xff]  ;;  %v247_v25 = vld [vmem:[#allocation11 + $0x68] sm:$0xff] }
 0x482   :  { %10180 = vmatpush1.bf16.msra.mxu0 %v13212_v42  ;;  %v353_v42 = vld [vmem:[#allocation11 + $0x3b8] sm:$0xff] }
 0x483   :  { %10182 = vmatprep.subr.bf16.mxu0 %v13215_v58  ;;  %v13230_v54 = vpack.c.bf16 %v353_v42, %v344_v41  ;;  %15777 = vst [vmem:[#allocation97_spill] sm:$0xff] %v13236_v3  ;;  %v362_v58 = vld [vmem:[#allocation11 + $0x400] sm:$0xff]  ;;  %v239_v42 = vld [vmem:[#allocation11 + $0x28] sm:$0xff] }
 0x485   :  { %15775 = vst [vmem:[#allocation95_spill] sm:$0xff] %v13230_v54 }
 0x486   :  { %10184 = vmatpush1.bf16.msra.mxu0 %v13218_v63  ;;  %v13234_v63 = vpack.c.bf16 %v370_v16, %v361_v10  ;;  %v248_v10 = vld [vmem:[#allocation11 + $0x70] sm:$0xff]  ;;  %v241_v16 = vld [vmem:[#allocation11 + $0x38] sm:$0xff] }
 0x487   :  { %10186 = vmatprep.subr.bf16.mxu0 %v13221_v5  ;;  %v369_v5 = vld [vmem:[#allocation11 + $0x438] sm:$0xff] }
 0x488   :  { %15776 = vst [vmem:[#allocation96_spill] sm:$0xff] %v13234_v63  ;;  %v13238_v61 = vpack.c.bf16 %v369_v5, %v360_v36  ;;  %10162 = vmatprep.subr.bf16.mxu1 %v13234_v63  ;;  %v13248_v5 = vpack.c.bf16 %v250_v24, %v241_v16  ;;  %v240_v36 = vld [vmem:[#allocation11 + $0x30] sm:$0xff] }
 0x489   :  { %v256_v63 = vld [vmem:[#allocation11 + $0xb0] sm:$0xff] }
 0x48a   :  { %10188 = vmatpush1.bf16.msra.mxu0 %v13224_v50  ;;  %15778 = vst [vmem:[#allocation98_spill] sm:$0xff] %v13238_v61  ;;  %v371_v50 = vld [vmem:[#allocation11 + $0x448] sm:$0xff]  ;;  %10164 = vmatpush1.bf16.msra.mxu1 %v13238_v61  ;;  %15781 = vst [vmem:[#allocation101_spill] sm:$0xff] %v13248_v5  ;;  %v268_v61 = vld [vmem:[#allocation11 + $0x110] sm:$0xff] }
 0x48b   :  { %10190 = vmatprep.subr.bf16.mxu0 %v13227_v34  ;;  %v13241_v41 = vpack.c.bf16 %v371_v50, %v362_v58  ;;  %v13255_v58 = vld [vmem:[%s15367_s11] ss:$0 sm:$0xff]  ;;  %v238_v50 = vld [vmem:[#allocation11 + $0x20] sm:$0xff] }
 0x48c   :  { %v257_v34 = vld [vmem:[#allocation11 + $0xb8] sm:$0xff] }
 0x48d   :  { %15779 = vst [vmem:[#allocation99_spill] sm:$0xff] %v13241_v41 }
 0x48e   :  { %10192 = vmatpush1.bf16.msra.mxu0 %v13230_v54  ;;  %v13246_v54 = vpack.c.bf16 %v248_v10, %v239_v42  ;;  %v266_v42 = vld [vmem:[#allocation11 + $0x100] sm:$0xff]  ;;  %v259_v10 = vld [vmem:[#allocation11 + $0xc8] sm:$0xff] }
 0x48f   :  { %10194 = vmatprep.subr.bf16.mxu0 %v13236_v3  ;;  %v249_v3 = vld [vmem:[#allocation11 + $0x78] sm:$0xff]  ;;  %v13265_v53 = vpack.c.bf16 %v266_v42, %v257_v34  ;;  %v13267_v0 = vpack.c.bf16 %v268_v61, %v259_v10  ;;  %v13274_v34 = vpack.c.bf16 %v265_v18, %v256_v63  ;;  %v274_v61 = vld [vmem:[#allocation11 + $0x140] sm:$0xff] }
 0x490   :  { %15780 = vst [vmem:[#allocation100_spill] sm:$0xff] %v13246_v54  ;;  %10198 = vmatprep.subr.bf16.mxu1 %v13246_v54  ;;  %v13258_v54 = vpack.c.bf16 %v247_v25, %v238_v50  ;;  %v13280_v50 = vpack.c.bf16 %v284_v62, %v275_v2  ;;  %v285_v42 = vld [vmem:[#allocation11 + $0x198] sm:$0xff]  ;;  %v294_v63 = vld [vmem:[#allocation11 + $0x1e0] sm:$0xff] }
 0x491   :  { %15784 = vst [vmem:[#allocation104_spill] sm:$0xff] %v13265_v53  ;;  %15785 = vst [vmem:[#allocation105_spill] sm:$0xff] %v13267_v0  ;;  %v293_v10 = vld [vmem:[#allocation11 + $0x1d8] sm:$0xff] }
 0x492   :  { %10196 = vmatpush1.bf16.msra.mxu0 %v13241_v41  ;;  %15782 = vst [vmem:[#allocation102_spill] sm:$0xff] %v13258_v54  ;;  %15786 = vst [vmem:[#allocation106_spill] sm:$0xff] %v13274_v34  ;;  %v301_v2 = vld [vmem:[#allocation11 + $0x218] sm:$0xff] }
 0x493   :  { %10230 = vmatprep.subr.bf16.mxu0 %v13248_v5  ;;  %v13260_v5 = vpack.c.bf16 %v249_v3, %v240_v36  ;;  %v13276_v3 = vpack.c.bf16 %v267_v6, %v258_v11  ;;  %15788 = vst [vmem:[#allocation108_spill] sm:$0xff] %v13280_v50  ;;  %v276_v36 = vld [vmem:[#allocation11 + $0x150] sm:$0xff] }
 0x494   :  { %v13290_v62 = vpack.c.bf16 %v285_v42, %v276_v36  ;;  %v310_v36 = vld [vmem:[#allocation11 + $0x260] sm:$0xff]  ;;  %v319_v42 = vld [vmem:[#allocation11 + $0x2a8] sm:$0xff] }
 0x495   :  { %15783 = vst [vmem:[#allocation103_spill] sm:$0xff] %v13260_v5  ;;  %15787 = vst [vmem:[#allocation107_spill] sm:$0xff] %v13276_v3 }
 0x496   :  { %15791 = vst [vmem:[#allocation111_spill] sm:$0xff] %v13290_v62 }
 0x548   :  { %v1000_v41 = vpop.f32.mrb[14].mxu0 }
 0x549   :  { %v1001_v16 = vadd.f32 %v1000_v41, %v12993_v22  ;;  %v8937_v24 = vpop.f32.mrb[15].mxu0  ;;  %v286_v22 = vld [vmem:[#allocation11 + $0x1a0] sm:$0xff]  ;;  %v283_v41 = vld [vmem:[#allocation11 + $0x188] sm:$0xff] }
 0x54a   :  { %v13282_v25 = vpack.c.bf16 %v286_v22, %v277_v59  ;;  %v295_v24 = vld [vmem:[#allocation11 + $0x1e8] sm:$0xff]  ;;  %v13288_v6 = vpack.c.bf16 %v283_v41, %v274_v61  ;;  %v292_v59 = vld [vmem:[#allocation11 + $0x1d0] sm:$0xff] }
 0x54b   :  { %v13263_v23 = vadd.f32 %v13255_v58, %v1001_v16  ;;  %v302_v16 = vld [vmem:[#allocation11 + $0x220] sm:$0xff]  ;;  %v303_v22 = vld [vmem:[#allocation11 + $0x228] sm:$0xff]  ;;  %v13300_v61 = vpack.c.bf16 %v301_v2, %v292_v59  ;;  %v13312_v59 = vpack.c.bf16 %v319_v42, %v310_v36 }
 0x54c   :  { %15789 = vst [vmem:[#allocation109_spill] sm:$0xff] %v13282_v25  ;;  %15790 = vst [vmem:[#allocation110_spill] sm:$0xff] %v13288_v6  ;;  %v13294_v11 = vpack.c.bf16 %v302_v16, %v293_v10  ;;  %v13302_v41 = vpack.c.bf16 %v303_v22, %v294_v63  ;;  %v312_v16 = vld [vmem:[#allocation11 + $0x270] sm:$0xff]  ;;  %v337_v22 = vld [vmem:[#allocation11 + $0x338] sm:$0xff] }
 0x54d   :  { %1399 = vst [vmem:[#allocation13] sm:$0xff] %v13263_v23  ;;  %1076 = vmatmul.mubr.f32.vlgmr.msra.gmra.mrb[6].mxu1 %v13263_v23  ;;  %1147 = vmatmul.mubr.f32.vlgmr.msra.gmra.mrb[16].mxu0 %v13263_v23  ;;  %15794 = vst [vmem:[#allocation114_spill] sm:$0xff] %v13300_v61  ;;  %v328_v63 = vld [vmem:[#allocation11 + $0x2f0] sm:$0xff] }
 0x54e   :  { %10200 = vmatpush1.bf16.msra.mxu1 %v13258_v54  ;;  %10232 = vmatpush1.bf16.msra.mxu0 %v13260_v5  ;;  %v304_v5 = vld [vmem:[#allocation11 + $0x230] sm:$0xff]  ;;  %15792 = vst [vmem:[#allocation112_spill] sm:$0xff] %v13294_v11  ;;  %15795 = vst [vmem:[#allocation115_spill] sm:$0xff] %v13302_v41  ;;  %v13324_v36 = vpack.c.bf16 %v337_v22, %v328_v63 }
 0x54f   :  { %10202 = vmatprep.subr.bf16.mxu1 %v13265_v53  ;;  %10234 = vmatprep.subr.bf16.mxu0 %v13267_v0  ;;  %v13296_v18 = vpack.c.bf16 %v304_v5, %v295_v24  ;;  %v311_v0 = vld [vmem:[#allocation11 + $0x268] sm:$0xff]  ;;  %v313_v53 = vld [vmem:[#allocation11 + $0x278] sm:$0xff]  ;;  %15798 = vst [vmem:[#allocation118_spill] sm:$0xff] %v13312_v59 }
 0x550   :  { %1217 = vmatprep.mubr.f32.mxu1 %v15739_v51  ;;  %1288 = vmatprep.mubr.f32.mxu0 %v15739_v51  ;;  %v321_v24 = vld [vmem:[#allocation11 + $0x2b8] sm:$0xff]  ;;  %15802 = vst [vmem:[#allocation122_spill] sm:$0xff] %v13324_v36 }
 0x551   :  { %15793 = vst [vmem:[#allocation113_spill] sm:$0xff] %v13296_v18  ;;  %v13314_v2 = vpack.c.bf16 %v321_v24, %v312_v16  ;;  %v346_v16 = vld [vmem:[#allocation11 + $0x380] sm:$0xff]  ;;  %v355_v24 = vld [vmem:[#allocation11 + $0x3c8] sm:$0xff] }
 0x552   :  { %10204 = vmatpush1.bf16.msra.mxu1 %v13274_v34  ;;  %10236 = vmatpush1.bf16.msra.mxu0 %v13276_v3  ;;  %v320_v34 = vld [vmem:[#allocation11 + $0x2b0] sm:$0xff]  ;;  %v322_v3 = vld [vmem:[#allocation11 + $0x2c0] sm:$0xff]  ;;  %v13336_v63 = vpack.c.bf16 %v355_v24, %v346_v16 }
 0x553   :  { %10206 = vmatprep.subr.bf16.mxu1 %v13280_v50  ;;  %10238 = vmatprep.subr.bf16.mxu0 %v13282_v25  ;;  %v13306_v5 = vpack.c.bf16 %v320_v34, %v311_v0  ;;  %v13308_v10 = vpack.c.bf16 %v322_v3, %v313_v53  ;;  %v329_v25 = vld [vmem:[#allocation11 + $0x2f8] sm:$0xff]  ;;  %v331_v50 = vld [vmem:[#allocation11 + $0x308] sm:$0xff]  ;;  %15799 = vst [vmem:[#allocation119_spill] sm:$0xff] %v13314_v2  ;;  %v330_v34 = vld [vmem:[#allocation11 + $0x300] sm:$0xff] }
 0x554   :  { %v339_v3 = vld [vmem:[#allocation11 + $0x348] sm:$0xff]  ;;  %15806 = vst [vmem:[#allocation126_spill] sm:$0xff] %v13336_v63 }
 0x555   :  { %15796 = vst [vmem:[#allocation116_spill] sm:$0xff] %v13306_v5  ;;  %15797 = vst [vmem:[#allocation117_spill] sm:$0xff] %v13308_v10  ;;  %v13326_v42 = vpack.c.bf16 %v339_v3, %v330_v34  ;;  %v364_v34 = vld [vmem:[#allocation11 + $0x410] sm:$0xff]  ;;  %v375_v3 = vld [vmem:[#allocation11 + $0x468] sm:$0xff] }
 0x556   :  { %10208 = vmatpush1.bf16.msra.mxu1 %v13288_v6  ;;  %10240 = vmatpush1.bf16.msra.mxu0 %v13290_v62  ;;  %v338_v6 = vld [vmem:[#allocation11 + $0x340] sm:$0xff]  ;;  %v340_v62 = vld [vmem:[#allocation11 + $0x350] sm:$0xff] }
 0x557   :  { %10210 = vmatprep.subr.bf16.mxu1 %v13294_v11  ;;  %10242 = vmatprep.subr.bf16.mxu0 %v13296_v18  ;;  %v13318_v0 = vpack.c.bf16 %v338_v6, %v329_v25  ;;  %v13320_v53 = vpack.c.bf16 %v340_v62, %v331_v50  ;;  %v347_v18 = vld [vmem:[#allocation11 + $0x388] sm:$0xff]  ;;  %v349_v11 = vld [vmem:[#allocation11 + $0x398] sm:$0xff]  ;;  %15803 = vst [vmem:[#allocation123_spill] sm:$0xff] %v13326_v42  ;;  %v348_v6 = vld [vmem:[#allocation11 + $0x390] sm:$0xff] }
 0x558   :  { %v357_v62 = vld [vmem:[#allocation11 + $0x3d8] sm:$0xff] }
 0x559   :  { %15800 = vst [vmem:[#allocation120_spill] sm:$0xff] %v13318_v0  ;;  %15801 = vst [vmem:[#allocation121_spill] sm:$0xff] %v13320_v53  ;;  %v13338_v22 = vpack.c.bf16 %v357_v62, %v348_v6  ;;  %v242_v6 = vld [vmem:[#allocation11 + $0x40] sm:$0xff] }
 0x55a   :  { %10212 = vmatpush1.bf16.msra.mxu1 %v13300_v61  ;;  %10244 = vmatpush1.bf16.msra.mxu0 %v13302_v41  ;;  %v356_v61 = vld [vmem:[#allocation11 + $0x3d0] sm:$0xff]  ;;  %v358_v41 = vld [vmem:[#allocation11 + $0x3e0] sm:$0xff] }
 0x55b   :  { %10214 = vmatprep.subr.bf16.mxu1 %v13306_v5  ;;  %10246 = vmatprep.subr.bf16.mxu0 %v13308_v10  ;;  %v13330_v50 = vpack.c.bf16 %v356_v61, %v347_v18  ;;  %v13332_v25 = vpack.c.bf16 %v358_v41, %v349_v11  ;;  %v365_v10 = vld [vmem:[#allocation11 + $0x418] sm:$0xff]  ;;  %v367_v5 = vld [vmem:[#allocation11 + $0x428] sm:$0xff]  ;;  %15807 = vst [vmem:[#allocation127_spill] sm:$0xff] %v13338_v22  ;;  %v366_v41 = vld [vmem:[#allocation11 + $0x420] sm:$0xff] }
 0x55c   :  { %v373_v61 = vld [vmem:[#allocation11 + $0x458] sm:$0xff]  ;;  %v13350_v24 = vpack.c.bf16 %v375_v3, %v366_v41  ;;  %v296_v3 = vld [vmem:[#allocation11 + $0x1f0] sm:$0xff] }
 0x55d   :  { %15804 = vst [vmem:[#allocation124_spill] sm:$0xff] %v13330_v50  ;;  %15805 = vst [vmem:[#allocation125_spill] sm:$0xff] %v13332_v25  ;;  %v13348_v16 = vpack.c.bf16 %v373_v61, %v364_v34  ;;  %v278_v34 = vld [vmem:[#allocation11 + $0x160] sm:$0xff]  ;;  %v287_v61 = vld [vmem:[#allocation11 + $0x1a8] sm:$0xff] }
 0x55e   :  { %10216 = vmatpush1.bf16.msra.mxu1 %v13312_v59  ;;  %10248 = vmatpush1.bf16.msra.mxu0 %v13314_v2  ;;  %v374_v59 = vld [vmem:[#allocation11 + $0x460] sm:$0xff]  ;;  %v376_v2 = vld [vmem:[#allocation11 + $0x470] sm:$0xff]  ;;  %15811 = vst [vmem:[#allocation131_spill] sm:$0xff] %v13350_v24  ;;  %v13372_v41 = vpack.c.bf16 %v287_v61, %v278_v34 }
 0x55f   :  { %10218 = vmatprep.subr.bf16.mxu1 %v13318_v0  ;;  %10250 = vmatprep.subr.bf16.mxu0 %v13320_v53  ;;  %v13342_v11 = vpack.c.bf16 %v374_v59, %v365_v10  ;;  %v13344_v18 = vpack.c.bf16 %v376_v2, %v367_v5  ;;  %15810 = vst [vmem:[#allocation130_spill] sm:$0xff] %v13348_v16  ;;  %v251_v10 = vld [vmem:[#allocation11 + $0x88] sm:$0xff]  ;;  %v260_v59 = vld [vmem:[#allocation11 + $0xd0] sm:$0xff]  ;;  %v269_v2 = vld [vmem:[#allocation11 + $0x118] sm:$0xff] }
 0x560   :  { %v13356_v5 = vpack.c.bf16 %v251_v10, %v242_v6  ;;  %v13363_v62 = vpack.c.bf16 %v269_v2, %v260_v59  ;;  %15814 = vst [vmem:[#allocation134_spill] sm:$0xff] %v13372_v41  ;;  %v305_v6 = vld [vmem:[#allocation11 + $0x238] sm:$0xff]  ;;  %v314_v59 = vld [vmem:[#allocation11 + $0x280] sm:$0xff]  ;;  %v323_v2 = vld [vmem:[#allocation11 + $0x2c8] sm:$0xff] }
 0x561   :  { %15808 = vst [vmem:[#allocation128_spill] sm:$0xff] %v13342_v11  ;;  %15809 = vst [vmem:[#allocation129_spill] sm:$0xff] %v13344_v18  ;;  %v13378_v10 = vpack.c.bf16 %v305_v6, %v296_v3  ;;  %v13384_v34 = vpack.c.bf16 %v323_v2, %v314_v59  ;;  %v332_v61 = vld [vmem:[#allocation11 + $0x310] sm:$0xff]  ;;  %v350_v6 = vld [vmem:[#allocation11 + $0x3a0] sm:$0xff] }
 0x562   :  { %10220 = vmatpush1.bf16.msra.mxu1 %v13324_v36  ;;  %10252 = vmatpush1.bf16.msra.mxu0 %v13326_v42  ;;  %15812 = vst [vmem:[#allocation132_spill] sm:$0xff] %v13356_v5  ;;  %15813 = vst [vmem:[#allocation133_spill] sm:$0xff] %v13363_v62  ;;  %v368_v2 = vld [vmem:[#allocation11 + $0x430] sm:$0xff] }
 0x563   :  { %10222 = vmatprep.subr.bf16.mxu1 %v13330_v50  ;;  %10254 = vmatprep.subr.bf16.mxu0 %v13332_v25  ;;  %15815 = vst [vmem:[#allocation135_spill] sm:$0xff] %v13378_v10  ;;  %15816 = vst [vmem:[#allocation136_spill] sm:$0xff] %v13384_v34 }
 0x566   :  { %10224 = vmatpush1.bf16.msra.mxu1 %v13336_v63  ;;  %10256 = vmatpush1.bf16.msra.mxu0 %v13338_v22 }
 0x567   :  { %10226 = vmatprep.subr.bf16.mxu1 %v13342_v11  ;;  %10258 = vmatprep.subr.bf16.mxu0 %v13344_v18 }
 0x56a   :  { %10228 = vmatpush1.bf16.msra.mxu1 %v13348_v16  ;;  %10260 = vmatpush1.bf16.msra.mxu0 %v13350_v24 }
 0x56b   :  { %10261 = vmatprep.subr.bf16.mxu1 %v15738_v31  ;;  %10286 = vmatprep.subr.bf16.mxu0 %v12898_v4 }
 0x56d   :  { %1218 = vmatmul.mubr.f32.vlgmr.msra.gmra.mrb[8].mxu1 %v13263_v23  ;;  %1289 = vmatmul.mubr.f32.vlgmr.msra.gmra.mrb[18].mxu0 %v13263_v23 }
 0x56e   :  { %10263 = vmatpush3.bf16.msra.mxu1 %v13356_v5  ;;  %8970 = vmatprep.mubr.msk.f32.mxu1 %vm12751_vm0, %v15739_v51 }
 0x56f   :  { %10264 = vmatprep.subr.bf16.mxu1 %v15738_v31  ;;  %10288 = vmatpush1.bf16.msra.mxu0 %v12900_v8 }
 0x570   :  { %10290 = vmatprep.subr.bf16.mxu0 %v12902_v9  ;;  %1464 = vmatprep.mubr.f32.mxu0 %v15739_v51 }
 0x572   :  { %10266 = vmatpush3.bf16.msra.mxu1 %v13363_v62 }
 0x573   :  { %10267 = vmatprep.subr.bf16.mxu1 %v15738_v31  ;;  %10292 = vmatpush1.bf16.msra.mxu0 %v12906_v14 }
 0x574   :  { %10294 = vmatprep.subr.bf16.mxu0 %v12909_v15  ;;  %v341_v15 = vld [vmem:[#allocation11 + $0x358] sm:$0xff] }
 0x575   :  { %v13390_v3 = vpack.c.bf16 %v341_v15, %v332_v61  ;;  %v381_v61 = vld [vmem:[%s15368_s12] sm:$0x7] }
 0x576   :  { %10269 = vmatpush3.bf16.msra.mxu1 %v13372_v41 }
 0x577   :  { %10270 = vmatprep.subr.bf16.mxu1 %v15738_v31  ;;  %10296 = vmatpush1.bf16.msra.mxu0 %v12912_v20  ;;  %15817 = vst [vmem:[#allocation137_spill] sm:$0xff] %v13390_v3 }
 0x578   :  { %10298 = vmatprep.subr.bf16.mxu0 %v12915_v21  ;;  %v359_v21 = vld [vmem:[#allocation11 + $0x3e8] sm:$0xff] }
 0x579   :  { %v13396_v59 = vpack.c.bf16 %v359_v21, %v350_v6  ;;  %v603_v21 = vlaneseq }
 0x57a   :  { %10272 = vmatpush3.bf16.msra.mxu1 %v13378_v10 }
 0x57b   :  { %10273 = vmatprep.subr.bf16.mxu1 %v15738_v31  ;;  %10300 = vmatpush1.bf16.msra.mxu0 %v12918_v26  ;;  %15818 = vst [vmem:[#allocation138_spill] sm:$0xff] %v13396_v59 }
 0x57c   :  { %10302 = vmatprep.subr.bf16.mxu0 %v12921_v27  ;;  %v377_v27 = vld [vmem:[#allocation11 + $0x478] sm:$0xff] }
 0x57d   :  { %v13402_v15 = vpack.c.bf16 %v377_v27, %v368_v2  ;;  %v604_v27 = vshrl.u32 %v603_v21, 7 }
 0x57e   :  { %10275 = vmatpush3.bf16.msra.mxu1 %v13384_v34 }
 0x57f   :  { %10276 = vmatprep.subr.bf16.mxu1 %v15738_v31  ;;  %10304 = vmatpush1.bf16.msra.mxu0 %v12924_v32  ;;  %15819 = vst [vmem:[#allocation139_spill] sm:$0xff] %v13402_v15 }
 0x580   :  { %10306 = vmatprep.subr.bf16.mxu0 %v12927_v33 }
 0x582   :  { %10278 = vmatpush3.bf16.msra.mxu1 %v13390_v3 }
 0x583   :  { %10279 = vmatprep.subr.bf16.mxu1 %v15738_v31  ;;  %10308 = vmatpush1.bf16.msra.mxu0 %v12930_v38 }
 0x584   :  { %10310 = vmatprep.subr.bf16.mxu0 %v12933_v39 }
 0x586   :  { %10281 = vmatpush3.bf16.msra.mxu1 %v13396_v59 }
 0x587   :  { %10282 = vmatprep.subr.bf16.mxu1 %v15738_v31  ;;  %10312 = vmatpush1.bf16.msra.mxu0 %v12936_v44 }
 0x588   :  { %10314 = vmatprep.subr.bf16.mxu0 %v12939_v45 }
 0x58a   :  { %10284 = vmatpush3.bf16.msra.mxu1 %v13402_v15 }
 0x58b   :  { %10318 = vmatprep.subr.bf16.mxu1 %v13031_v29  ;;  %10316 = vmatpush1.bf16.msra.mxu0 %v12942_v48 }
 0x58c   :  { %10349 = vmatprep.subr.bf16.mxu0 %v15738_v31 }
 0x58d   :  { %8971 = vmatmul.mubr.f32.vlgmr.msra.gmra.mrb[10].mxu1 %v13263_v23  ;;  %v605_v23 = vsub.s32 0, %v604_v27 }
 0x58e   :  { %10320 = vmatpush1.bf16.msra.mxu1 %v13033_v35  ;;  %1535 = vmatprep.mubr.f32.mxu1 %v15739_v51 }
 0x58f   :  { %10322 = vmatprep.subr.bf16.mxu1 %v13037_v40  ;;  %v13432_v6 = vrot.slane %v381_v61, %v605_v23 }
 0x591   :  { %15820 = vst [vmem:[#allocation140_spill] sm:$0xff] %v13432_v6  ;;  %v618_v2 = vadd.f32 %v13432_v6, %v13111_v12 }
 0x592   :  { %10324 = vmatpush1.bf16.msra.mxu1 %v13039_v43 }
 0x593   :  { %10326 = vmatprep.subr.bf16.mxu1 %v13043_v49 }
 0x596   :  { %10328 = vmatpush1.bf16.msra.mxu1 %v13045_v55 }
 0x597   :  { %10330 = vmatprep.subr.bf16.mxu1 %v13049_v60  ;;  %v1366_v60 = vld [vmem:[#allocation6 + $0x8] sm:$0xff] }
 0x59a   :  { %10332 = vmatpush1.bf16.msra.mxu1 %v13051_v1  ;;  %v1365_v1 = vld [vmem:[#allocation6] sm:$0xff] }
 0x59b   :  { %10334 = vmatprep.subr.bf16.mxu1 %v13055_v7 }
 0x59e   :  { %10336 = vmatpush1.bf16.msra.mxu1 %v13057_v13  ;;  %v613_v13 = vsub.s32 2, %v604_v27 }
 0x59f   :  { %10338 = vmatprep.subr.bf16.mxu1 %v13061_v19 }
 0x5a0   :  { %v13438_v21 = vrot.slane %v381_v61, %v613_v13 }
 0x5a2   :  { %10340 = vmatpush1.bf16.msra.mxu1 %v13063_v28  ;;  %15822 = vst [vmem:[#allocation142_spill] sm:$0xff] %v13438_v21  ;;  %v620_v12 = vadd.f32 %v13438_v21, %v13026_v30 }
 0x5a3   :  { %10342 = vmatprep.subr.bf16.mxu1 %v13066_v37 }
 0x5a6   :  { %10344 = vmatpush1.bf16.msra.mxu1 %v13069_v46 }
 0x5a7   :  { %10346 = vmatprep.subr.bf16.mxu1 %v13072_v47 }
 0x5aa   :  { %10348 = vmatpush1.bf16.msra.mxu1 %v13075_v57  ;;  %v609_v57 = vsub.s32 1, %v604_v27 }
 0x5ab   :  { %9008 = vmatprep.subr.mxu1 %v15739_v51 }
 0x5ac   :  { %v13436_v7 = vrot.slane %v381_v61, %v609_v57 }
 0x5ae   :  { %15821 = vst [vmem:[#allocation141_spill] sm:$0xff] %v13436_v7  ;;  %v619_v23 = vadd.f32 %v13436_v7, %v13113_v17 }
 0x620   :  { %v1077_v37 = vpop.f32.mrb[6].mxu1  ;;  %v1148_v46 = vpop.f32.mrb[16].mxu0 }
 0x621   :  { %v1079_v28 = vpop.f32.mrb[7].mxu1  ;;  %v1150_v47 = vpop.f32.mrb[17].mxu0  ;;  %v1368_v55 = vmul.f32 %v1365_v1, %v1077_v37 }
 0x622   :  { %v1374_v19 = vmul.f32 %v1150_v47, %v618_v2  ;;  %v1369_v6 = vmul.f32 %v1366_v60, %v1079_v28  ;;  %v1367_v60 = vld [vmem:[#allocation6 + $0x10] sm:$0xff] }
 0x623   :  { %v1370_v21 = vmul.f32 %v1367_v60, %v1148_v46  ;;  %v15824_v46 = vld [vmem:[#allocation38_spill] sm:$0xff]  ;;  %v15835_v60 = vld [vmem:[#allocation65_spill] sm:$0xff] }
 0x640   :  { %v1219_v49 = vpop.f32.mrb[8].mxu1  ;;  %v1290_v43 = vpop.f32.mrb[18].mxu0 }
 0x641   :  { %v1375_v40 = vmul.f32 %v1219_v49, %v619_v23  ;;  %v1371_v47 = vadd.f32 %v1368_v55, %v1290_v43  ;;  %v1221_v2 = vpop.f32.mrb[9].mxu1  ;;  %v1292_v27 = vpop.f32.mrb[19].mxu0 }
 0x642   :  { %v1376_v57 = vmul.f32 %v1221_v2, %v620_v12  ;;  %v1372_v35 = vadd.f32 %v1369_v6, %v1292_v27  ;;  %v15826_v2 = vld [vmem:[#allocation40_spill] sm:$0xff]  ;;  %v15827_v27 = vld [vmem:[#allocation41_spill] sm:$0xff] }
 0x643   :  { %v1377_v13 = vadd.f32 %v1374_v19, %v1371_v47 }
 0x644   :  { %v1384_v61 = vadd.f32 %v1375_v40, %v1372_v35 }
 0x645   :  { %v8208_v48 = vmul.f32 -1.442695, %v1377_v13  ;;  %v15829_v13 = vld [vmem:[#allocation43_spill] sm:$0xff] }
 0x646   :  { %v8209_v29 = vmul.f32 -1.442695, %v1384_v61  ;;  %v15830_v61 = vld [vmem:[#allocation60_spill] sm:$0xff] }
 0x647   :  { %12262 = vpow2.f32 %v8208_v48 }
 0x648   :  { %12264 = vpow2.f32 %v8209_v29  ;;  %v12496_v29 = vld [vmem:[%s15359_s3] sm:$0xff] }
 0x651   :  { %v12263_v17 = vpop.eup %12262 }
 0x652   :  { %v1381_v1 = vadd.f32 1.0, %v12263_v17  ;;  %v12265_v37 = vpop.eup %12264  ;;  %v15831_v17 = vld [vmem:[#allocation61_spill] sm:$0xff] }
 0x653   :  { %v1388_v30 = vadd.f32 1.0, %v12265_v37  ;;  %v15833_v37 = vld [vmem:[#allocation63_spill] sm:$0xff] }
 0x654   :  { %12266 = vrcp.f32 %v1381_v1  ;;  %v15832_v1 = vld [vmem:[#allocation62_spill] sm:$0xff] }
 0x655   :  { %12268 = vrcp.f32 %v1388_v30  ;;  %v15834_v30 = vld [vmem:[#allocation64_spill] sm:$0xff] }
 0x65e   :  { %v12267_v28 = vpop.eup %12266 }
 0x65f   :  { %v1391_v49 = vmul.f32 %v12267_v28, %v1376_v57  ;;  %v12269_v35 = vpop.eup %12268  ;;  %v15828_v57 = vld [vmem:[#allocation42_spill] sm:$0xff] }
 0x660   :  { %v1361_v43 = vpop.f32.mrb[10].mxu1  ;;  %v1394_v40 = vsub.f32 1.0, %v12269_v35  ;;  %v15836_v28 = vld [vmem:[#allocation66_spill] sm:$0xff] }
 0x661   :  { %v1373_v55 = vadd.f32 %v1370_v21, %v1361_v43  ;;  %v8972_v23 = vpop.f32.mrb[11].mxu1  ;;  %v15825_v21 = vld [vmem:[#allocation39_spill] sm:$0xff]  ;;  %v15838_v43 = vld [vmem:[#allocation69_spill] sm:$0xff] }
 0x662   :  { %v1395_v19 = vmul.f32 %v12496_v29, %v1394_v40  ;;  %v13506_v29 = vld [vmem:[%s15361_s5] sm:$0xff] }
 0x663   :  { %v1392_v6 = vadd.f32 %v1391_v49, %v1373_v55  ;;  %v15837_v49 = vld [vmem:[#allocation67_spill] sm:$0xff]  ;;  %15840 = vst [vmem:[#allocation145_spill] sm:$0xff] %v13506_v29 }
 0x665   :  { %12270 = vtanh.f32 %v1392_v6  ;;  %v13496_v6 = vld [vmem:[%s15365_s9] ss:$0 sm:$0xff] }
 0x666   :  { %15839 = vst [vmem:[#allocation144_spill] sm:$0xff] %v13496_v6 }
 0x66f   :  { %v12271_v48 = vpop.eup %12270 }
 0x670   :  { %v1396_v12 = vmul.f32 %v12271_v48, %v12269_v35 }
 0x672   :  { %v13447_v47 = vadd.f32 %v1396_v12, %v1395_v19  ;;  %v13516_v19 = vld [vmem:[%s15361_s5 + $0x8] sm:$0xff]  ;;  %v13525_v12 = vld [vmem:[%s15361_s5 + $0x10] sm:$0xff] }
 0x673   :  { %15841 = vst [vmem:[#allocation146_spill] sm:$0xff] %v13516_v19  ;;  %15842 = vst [vmem:[#allocation147_spill] sm:$0xff] %v13525_v12 }
 0x674   :  { %15823 = vst [vmem:[#allocation143_spill] sm:$0xff] %v13447_v47  ;;  %1465 = vmatmul.mubr.f32.vlgmr.msra.gmra.mrb[20].mxu0 %v13447_v47  ;;  %1398 = vst [vmem:[#allocation12] sm:$0xff] %v13447_v47  ;;  %1536 = vmatmul.mubr.f32.vlgmr.msra.gmra.mrb[12].mxu1 %v13447_v47 }
 0x675   :  { %10351 = vmatpush3.bf16.msra.mxu0 %v12951_v52  ;;  %9005 = vmatprep.mubr.msk.f32.mxu0 %vm12751_vm0, %v15739_v51 }
 0x676   :  { %10352 = vmatprep.subr.bf16.mxu0 %v15738_v31  ;;  %9010 = vmatprep.mubr.msk.f32.mxu1 %vm12751_vm0, %v15739_v51 }
 0x679   :  { %10354 = vmatpush3.bf16.msra.mxu0 %v12956_v56 }
 0x67a   :  { %10355 = vmatprep.subr.bf16.mxu0 %v15738_v31 }
 0x67d   :  { %10357 = vmatpush3.bf16.msra.mxu0 %v15824_v46 }
 0x67e   :  { %10358 = vmatprep.subr.bf16.mxu0 %v15738_v31 }
 0x681   :  { %10360 = vmatpush3.bf16.msra.mxu0 %v15825_v21 }
 0x682   :  { %10361 = vmatprep.subr.bf16.mxu0 %v15738_v31 }
 0x685   :  { %10363 = vmatpush3.bf16.msra.mxu0 %v15826_v2 }
 0x686   :  { %10364 = vmatprep.subr.bf16.mxu0 %v15738_v31 }
 0x689   :  { %10366 = vmatpush3.bf16.msra.mxu0 %v15827_v27 }
 0x68a   :  { %10367 = vmatprep.subr.bf16.mxu0 %v15738_v31 }
 0x68d   :  { %10369 = vmatpush3.bf16.msra.mxu0 %v15828_v57 }
 0x68e   :  { %10370 = vmatprep.subr.bf16.mxu0 %v15738_v31 }
 0x691   :  { %10372 = vmatpush3.bf16.msra.mxu0 %v15829_v13 }
 0x692   :  { %10385 = vmatprep.subr.bf16.mxu0 %v15738_v31 }
 0x694   :  { %9006 = vmatmul.mubr.f32.vlgmr.msra.gmra.mrb[22].mxu0 %v13447_v47 }
 0x695   :  { %10387 = vmatpush3.bf16.msra.mxu0 %v15830_v61  ;;  %9083 = vmatprep.mubr.msk.f32.mxu0 %vm12751_vm0, %v15739_v51  ;;  %v13557_v61 = vld [vmem:[#allocation3 + $0x18] sm:$0xff] }
 0x696   :  { %10388 = vmatprep.subr.bf16.mxu0 %v15738_v31  ;;  %15847 = vst [vmem:[#allocation152_spill] sm:$0xff] %v13557_v61 }
 0x699   :  { %10390 = vmatpush3.bf16.msra.mxu0 %v15831_v17 }
 0x69a   :  { %10391 = vmatprep.subr.bf16.mxu0 %v15738_v31 }
 0x69d   :  { %10393 = vmatpush3.bf16.msra.mxu0 %v15832_v1 }
 0x69e   :  { %10394 = vmatprep.subr.bf16.mxu0 %v15738_v31 }
 0x6a1   :  { %10396 = vmatpush3.bf16.msra.mxu0 %v15833_v37 }
 0x6a2   :  { %10397 = vmatprep.subr.bf16.mxu0 %v15738_v31 }
 0x6a5   :  { %10399 = vmatpush3.bf16.msra.mxu0 %v15834_v30 }
 0x6a6   :  { %10400 = vmatprep.subr.bf16.mxu0 %v15738_v31 }
 0x6a9   :  { %10402 = vmatpush3.bf16.msra.mxu0 %v15835_v60 }
 0x6aa   :  { %10403 = vmatprep.subr.bf16.mxu0 %v15738_v31 }
 0x6ad   :  { %10405 = vmatpush3.bf16.msra.mxu0 %v15836_v28  ;;  %v13554_v28 = vld [vmem:[#allocation3 + $0x8] sm:$0xff] }
 0x6ae   :  { %10406 = vmatprep.subr.bf16.mxu0 %v15738_v31  ;;  %15846 = vst [vmem:[#allocation151_spill] sm:$0xff] %v13554_v28 }
 0x6b1   :  { %10408 = vmatpush3.bf16.msra.mxu0 %v15837_v49 }
 0x6b2   :  { %10442 = vmatprep.subr.bf16.mxu0 %v15838_v43 }
 0x747   :  { %v1466_v55 = vpop.f32.mrb[20].mxu0  ;;  %v13491_v23 = vpop.f32.mrb[12].mxu1 }
 0x748   :  { %v1612_v35 = vadd.f32 %v13496_v6, %v1466_v55  ;;  %v13499_v40 = vpop.f32.mrb[21].mxu0  ;;  %v13501_v48 = vpop.f32.mrb[13].mxu1  ;;  %v13534_v55 = vld [vmem:[%s15361_s5 + $0x18] sm:$0xff]  ;;  %v13551_v6 = vld [vmem:[#allocation3] sm:$0xff] }
 0x749   :  { %15843 = vst [vmem:[#allocation148_spill] sm:$0xff] %v13534_v55  ;;  %15845 = vst [vmem:[#allocation150_spill] sm:$0xff] %v13551_v6 }
 0x74a   :  { %9009 = vmatpush3.msra.mxu1 %v1612_v35  ;;  %v13543_v35 = vld [vmem:[%s15361_s5 + $0x20] sm:$0xff] }
 0x74b   :  { %9011 = vmatmul.mubr.msk.f32.vlgmr.msra.gmra.mrb[14].mxu1 %vm621_vm1, %v13506_v29  ;;  %10373 = vmatprep.subr.bf16.mxu1 %v15738_v31  ;;  %15844 = vst [vmem:[#allocation149_spill] sm:$0xff] %v13543_v35 }
 0x74c   :  { %9013 = vmatprep.mubr.msk.f32.mxu1 %vm12751_vm0, %v15739_v51 }
 0x74f   :  { %9014 = vmatmul.mubr.msk.f32.gmra.mrb[16].mxu1 %vm621_vm1, %v13516_v19 }
 0x750   :  { %9016 = vmatprep.mubr.msk.f32.mxu1 %vm12751_vm0, %v15739_v51 }
 0x753   :  { %9017 = vmatmul.mubr.msk.f32.gmra.mrb[18].mxu1 %vm621_vm1, %v13525_v12 }
 0x754   :  { %9019 = vmatprep.mubr.msk.f32.mxu1 %vm12751_vm0, %v15739_v51 }
 0x757   :  { %9020 = vmatmul.mubr.msk.f32.gmra.mrb[20].mxu1 %vm621_vm1, %v13534_v55 }
 0x758   :  { %9022 = vmatprep.mubr.msk.f32.mxu1 %vm12751_vm0, %v15739_v51 }
 0x75b   :  { %9023 = vmatmul.mubr.msk.f32.gmra.mrb[22].mxu1 %vm621_vm1, %v13543_v35 }
 0x75c   :  { %9035 = vmatprep.mubr.msk.f32.mxu1 %vm12751_vm0, %v15739_v51 }
 0x767   :  { %v13549_v12 = vpop.f32.mrb[22].mxu0 }
 0x768   :  { %v9007_v19 = vpop.f32.mrb[23].mxu0 }
 0x81e   :  { %v1682_v29 = vpop.f32.mrb[14].mxu1 }
 0x81f   :  { %v1683_v55 = vadd.f32 %v13551_v6, %v1682_v29  ;;  %v9012_v43 = vpop.f32.mrb[15].mxu1 }
 0x820   :  { %v13563_v43 = vld [vmem:[%s15366_s10] ss:$0 sm:$0xff] }
 0x821   :  { %12272 = vtanh.f32 %v1683_v55  ;;  %15848 = vst [vmem:[#allocation153_spill] sm:$0xff] %v13563_v43  ;;  %v13569_v55 = vld [vmem:[#allocation3 + $0x20] sm:$0xff] }
 0x822   :  { %v1687_v49 = vpop.f32.mrb[16].mxu1  ;;  %15850 = vst [vmem:[#allocation155_spill] sm:$0xff] %v13569_v55 }
 0x823   :  { %v1688_v60 = vadd.f32 %v13554_v28, %v1687_v49  ;;  %v9015_v30 = vpop.f32.mrb[17].mxu1  ;;  %v13566_v49 = vld [vmem:[#allocation3 + $0x10] sm:$0xff] }
 0x824   :  { %15849 = vst [vmem:[#allocation154_spill] sm:$0xff] %v13566_v49 }
 0x825   :  { %12274 = vtanh.f32 %v1688_v60 }
 0x826   :  { %v1692_v35 = vpop.f32.mrb[18].mxu1 }
 0x827   :  { %v9018_v37 = vpop.f32.mrb[19].mxu1 }
 0x828   :  { %v1693_v37 = vadd.f32 %v13566_v49, %v1692_v35 }
 0x82a   :  { %v1697_v1 = vpop.f32.mrb[20].mxu1 }
 0x82b   :  { %v12273_v17 = vpop.eup %12272  ;;  %v1698_v19 = vadd.f32 %v13557_v61, %v1697_v1  ;;  %v9021_v13 = vpop.f32.mrb[21].mxu1 }
 0x82c   :  { %v1711_v29 = vmul.f32 %v13563_v43, %v12273_v17 }
 0x82d   :  { %12276 = vtanh.f32 %v1698_v19 }
 0x82e   :  { %1716 = vadd.xlane.f32.xlu0 %v1711_v29  ;;  %v1702_v30 = vpop.f32.mrb[22].mxu1 }
 0x82f   :  { %v12275_v60 = vpop.eup %12274  ;;  %v1703_v1 = vadd.f32 %v13569_v55, %v1702_v30  ;;  %v9024_v13 = vpop.f32.mrb[23].mxu1 }
 0x830   :  { %v1712_v61 = vmul.f32 %v13563_v43, %v12275_v60 }
 0x831   :  { %12278 = vtanh.f32 %v1703_v1 }
 0x832   :  { %1718 = vadd.xlane.f32.xlu0 %v1712_v61  ;;  %12280 = vtanh.f32 %v1693_v37 }
 0x837   :  { %v12277_v28 = vpop.eup %12276 }
 0x838   :  { %v1714_v17 = vmul.f32 %v13563_v43, %v12277_v28 }
 0x83a   :  { %1722 = vadd.xlane.f32.xlu1 %v1714_v17 }
 0x83b   :  { %v12279_v19 = vpop.eup %12278 }
 0x83c   :  { %v1715_v29 = vmul.f32 %v13563_v43, %v12279_v19  ;;  %v12281_v6 = vpop.eup %12280 }
 0x83d   :  { %v1713_v35 = vmul.f32 %v13563_v43, %v12281_v6 }
 0x83e   :  { %1724 = vadd.xlane.f32.xlu0 %v1715_v29 }
 0x842   :  { %1720 = vadd.xlane.f32.xlu0 %v1713_v35 }
 0x8bb   :  { %v1717_v49 = vpop.xlane.xlu0 %1716 }
 0x8bf   :  { %v1719_v30 = vpop.xlane.xlu0 %1718 }
 0x8c7   :  { %v1723_v60 = vpop.xlane.xlu1 %1722 }
 0x8cb   :  { %v1725_v13 = vpop.xlane.xlu0 %1724 }
 0x8cc   :  { %v1726_v55 = vmax.f32 %v1717_v49, %v1725_v13 }
 0x8ce   :  { %v1727_v61 = vmax.f32 %v1726_v55, %v1719_v30 }
 0x8cf   :  { %v1721_v1 = vpop.xlane.xlu0 %1720 }
 0x8d0   :  { %v1728_v37 = vmax.f32 %v1721_v1, %v1723_v60 }
 0x8d2   :  { %v1729_v57 = vmax.f32 %v1727_v61, %v1728_v37 }
 0x8d4   :  { %v1730_v27 = vrot.slane %v1729_v57, 4 }
 0x8d6   :  { %v1731_v28 = vmax.f32 %v1729_v57, %v1730_v27 }
 0x8d8   :  { %v1732_v17 = vrot.slane %v1731_v28, 2 }
 0x8da   :  { %v1733_v2 = vmax.f32 %v1731_v28, %v1732_v17  ;;  %v13605_v28 = vld [vmem:[%s15356_s0 + $0x20] sm:$0xff] }
 0x8dc   :  { %v1734_v21 = vrot.slane %v1733_v2, 1 }
 0x8de   :  { %v1735_v19 = vmax.f32 %v1733_v2, %v1734_v21  ;;  %v13579_v21 = vld [vmem:[%s15356_s0] sm:$0xff] }
 0x8e0   :  { %v1738_v46 = vsub.f32 %v1721_v1, %v1735_v19  ;;  %v1736_v29 = vsub.f32 %v1717_v49, %v1735_v19  ;;  %v1737_v56 = vsub.f32 %v1719_v30, %v1735_v19  ;;  %v1739_v6 = vsub.f32 %v1723_v60, %v1735_v19  ;;  %v13597_v30 = vld [vmem:[%s15356_s0 + $0x18] sm:$0xff] }
 0x8e1   :  { %v1740_v55 = vsub.f32 %v1725_v13, %v1735_v19 }
 0x8e2   :  { %v1745_v35 = vmul.f32 1.442695, %v1738_v46  ;;  %v1741_v43 = vmul.f32 1.442695, %v1736_v29  ;;  %v1743_v52 = vmul.f32 1.442695, %v1737_v56 }
 0x8e3   :  { %v1747_v47 = vmul.f32 1.442695, %v1739_v6  ;;  %v1749_v61 = vmul.f32 1.442695, %v1740_v55  ;;  %v13585_v56 = vld [vmem:[%s15356_s0 + $0x8] sm:$0xff]  ;;  %v13611_v29 = vld [vmem:[%s15360_s4] sm:$0xff] }
 0x8e4   :  { %12282 = vpow2.f32 %v1745_v35  ;;  %v15851_v35 = vld [vmem:[#allocation68_spill] sm:$0xff]  ;;  %v15852_v55 = vld [vmem:[#allocation70_spill] sm:$0xff] }
 0x8e5   :  { %12284 = vpow2.f32 %v1741_v43  ;;  %v13591_v43 = vld [vmem:[%s15356_s0 + $0x10] sm:$0xff] }
 0x8e6   :  { %12286 = vpow2.f32 %v1743_v52 }
 0x8e7   :  { %12288 = vpow2.f32 %v1747_v47 }
 0x8e8   :  { %12290 = vpow2.f32 %v1749_v61  ;;  %v15853_v61 = vld [vmem:[#allocation71_spill] sm:$0xff] }
 0x8ee   :  { %v12283_v37 = vpop.eup %12282 }
 0x8ef   :  { %v12285_v27 = vpop.eup %12284  ;;  %v1753_v49 = vmul.f32 %v13591_v43, %v12283_v37 }
 0x8f0   :  { %v12287_v57 = vpop.eup %12286  ;;  %v1751_v46 = vmul.f32 %v13579_v21, %v12285_v27 }
 0x8f1   :  { %v12289_v2 = vpop.eup %12288  ;;  %v1752_v52 = vmul.f32 %v13585_v56, %v12287_v57  ;;  %v10380_v19 = vpack.c.bf16 %v12287_v57, %v12285_v27  ;;  %v15854_v27 = vld [vmem:[#allocation72_spill] sm:$0xff]  ;;  %v15855_v57 = vld [vmem:[#allocation73_spill] sm:$0xff] }
 0x8f2   :  { %v1754_v13 = vmul.f32 %v13597_v30, %v12289_v2  ;;  %v12291_v1 = vpop.eup %12290  ;;  %v10383_v6 = vpack.c.bf16 %v12289_v2, %v12283_v37  ;;  %v15856_v37 = vld [vmem:[#allocation74_spill] sm:$0xff]  ;;  %v15858_v2 = vld [vmem:[#allocation76_spill] sm:$0xff] }
 0x8f3   :  { %v10374_v47 = vpack.c.bf16 %v1752_v52, %v1751_v46  ;;  %v1755_v17 = vmul.f32 %v13605_v28, %v12291_v1  ;;  %v15857_v46 = vld [vmem:[#allocation75_spill] sm:$0xff]  ;;  %v15859_v52 = vld [vmem:[#allocation77_spill] sm:$0xff] }
 0x8f4   :  { %v10377_v60 = vpack.c.bf16 %v1754_v13, %v1753_v49  ;;  %v15861_v49 = vld [vmem:[#allocation79_spill] sm:$0xff]  ;;  %v15862_v13 = vld [vmem:[#allocation80_spill] sm:$0xff] }
 0x8f5   :  { %10375 = vmatpush3.bf16.msra.mxu1 %v10374_v47  ;;  %v15860_v47 = vld [vmem:[#allocation78_spill] sm:$0xff] }
 0x8f6   :  { %10376 = vmatprep.subr.bf16.mxu1 %v15738_v31 }
 0x8f9   :  { %10378 = vmatpush3.bf16.msra.mxu1 %v10377_v60  ;;  %v15863_v60 = vld [vmem:[#allocation81_spill] sm:$0xff] }
 0x8fa   :  { %9033 = vmatprep.subr.mxu1 %v15739_v51 }
 0x8fd   :  { %9034 = vmatpush3.msra.mxu1 %v1755_v17  ;;  %v15865_v17 = vld [vmem:[#allocation96_spill] sm:$0xff] }
 0x8fe   :  { %9036 = vmatmul.mubr.msk.f32.vlgmr.msra.gmra.mrb[24].mxu1 %vm783_vm2, %v13611_v29  ;;  %10379 = vmatprep.subr.bf16.mxu1 %v15738_v31 }
 0x8ff   :  { %10381 = vmatpush3.bf16.msra.mxu1 %v10380_v19  ;;  %9048 = vmatprep.mubr.msk.f32.mxu1 %vm12751_vm0, %v15739_v51  ;;  %v15866_v19 = vld [vmem:[#allocation98_spill] sm:$0xff] }
 0x900   :  { %10382 = vmatprep.subr.bf16.mxu1 %v15738_v31 }
 0x903   :  { %10384 = vmatpush3.bf16.msra.mxu1 %v10383_v6  ;;  %v15867_v6 = vld [vmem:[#allocation100_spill] sm:$0xff] }
 0x904   :  { %9046 = vmatprep.subr.mxu1 %v15739_v51 }
 0x907   :  { %9047 = vmatpush3.msra.mxu1 %v12291_v1  ;;  %v15864_v1 = vld [vmem:[#allocation82_spill] sm:$0xff] }
 0x908   :  { %9049 = vmatmul.mubr.msk.f32.vlgmr.msra.gmra.mrb[26].mxu1 %vm783_vm2, %v13611_v29  ;;  %10410 = vmatprep.subr.bf16.mxu1 %v15851_v35 }
 0x909   :  { %10412 = vmatpush1.bf16.msra.mxu1 %v15852_v55  ;;  %2038 = vmatprep.mubr.f32.mxu1 %v15739_v51 }
 0x90a   :  { %10414 = vmatprep.subr.bf16.mxu1 %v15853_v61 }
 0x90d   :  { %10416 = vmatpush1.bf16.msra.mxu1 %v15854_v27 }
 0x90e   :  { %10418 = vmatprep.subr.bf16.mxu1 %v15855_v57 }
 0x911   :  { %10420 = vmatpush1.bf16.msra.mxu1 %v15856_v37 }
 0x912   :  { %10422 = vmatprep.subr.bf16.mxu1 %v15857_v46 }
 0x915   :  { %10424 = vmatpush1.bf16.msra.mxu1 %v15858_v2 }
 0x916   :  { %10426 = vmatprep.subr.bf16.mxu1 %v15859_v52 }
 0x919   :  { %10428 = vmatpush1.bf16.msra.mxu1 %v15860_v47 }
 0x91a   :  { %10430 = vmatprep.subr.bf16.mxu1 %v15861_v49 }
 0x91d   :  { %10432 = vmatpush1.bf16.msra.mxu1 %v15862_v13  ;;  %v15868_v13 = vld [vmem:[#allocation83_spill] sm:$0xff] }
 0x91e   :  { %10434 = vmatprep.subr.bf16.mxu1 %v15863_v60 }
 0x921   :  { %10436 = vmatpush1.bf16.msra.mxu1 %v15864_v1  ;;  %v15869_v1 = vld [vmem:[#allocation84_spill] sm:$0xff] }
 0x922   :  { %10438 = vmatprep.subr.bf16.mxu1 %v15865_v17  ;;  %v15870_v17 = vld [vmem:[#allocation85_spill] sm:$0xff] }
 0x925   :  { %10440 = vmatpush1.bf16.msra.mxu1 %v15866_v19  ;;  %v15871_v19 = vld [vmem:[#allocation86_spill] sm:$0xff] }
 0x926   :  { %10474 = vmatprep.subr.bf16.mxu1 %v15867_v6  ;;  %v15872_v6 = vld [vmem:[#allocation87_spill] sm:$0xff] }
 0x9d1   :  { %v1822_v46 = vpop.f32.mrb[24].mxu1 }
 0x9d2   :  { %v9037_v2 = vpop.f32.mrb[25].mxu1 }
 0x9d3   :  { %v15873_v2 = vld [vmem:[#allocation88_spill] sm:$0xff] }
 0x9db   :  { %v1892_v37 = vpop.f32.mrb[26].mxu1 }
 0x9dc   :  { %12292 = vrcp.f32 %v1892_v37  ;;  %v9050_v52 = vpop.f32.mrb[27].mxu1  ;;  %v15874_v37 = vld [vmem:[#allocation89_spill] sm:$0xff] }
 0x9dd   :  { %v15875_v52 = vld [vmem:[#allocation90_spill] sm:$0xff] }
 0x9e6   :  { %v12293_v47 = vpop.eup %12292 }
 0x9e7   :  { %1899 = vperm.xlu0 %12239, %v12293_v47   ;;  %v15878_v47 = vld [vmem:[#allocation93_spill] sm:$0xff] }
 0xa66   :  { %v1900_v49 = vpop.permute.xlu0 %1899 }
 0xa67   :  { %v1902_v57 = vmul.f32 %v1900_v49, %v1822_v46  ;;  %v15876_v46 = vld [vmem:[#allocation91_spill] sm:$0xff]  ;;  %v15879_v49 = vld [vmem:[#allocation94_spill] sm:$0xff] }
 0xa69   :  { %9084 = vmatmul.mubr.f32.vlgmr.msra.gmra.mrb[24].mxu0 %v1902_v57  ;;  %v15877_v57 = vld [vmem:[#allocation92_spill] sm:$0xff] }
 0xa6a   :  { %10444 = vmatpush1.bf16.msra.mxu0 %v15868_v13  ;;  %2109 = vmatprep.mubr.f32.mxu0 %v15739_v51 }
 0xa6b   :  { %10446 = vmatprep.subr.bf16.mxu0 %v15869_v1  ;;  %v15880_v1 = vld [vmem:[#allocation95_spill] sm:$0xff] }
 0xa6e   :  { %10448 = vmatpush1.bf16.msra.mxu0 %v15870_v17  ;;  %v15881_v17 = vld [vmem:[#allocation97_spill] sm:$0xff] }
 0xa6f   :  { %10450 = vmatprep.subr.bf16.mxu0 %v15871_v19  ;;  %v15882_v19 = vld [vmem:[#allocation99_spill] sm:$0xff] }
 0xa72   :  { %10452 = vmatpush1.bf16.msra.mxu0 %v15872_v6  ;;  %v15883_v6 = vld [vmem:[#allocation101_spill] sm:$0xff] }
 0xa73   :  { %10454 = vmatprep.subr.bf16.mxu0 %v15873_v2 }
 0xa76   :  { %10456 = vmatpush1.bf16.msra.mxu0 %v15874_v37 }
 0xa77   :  { %10458 = vmatprep.subr.bf16.mxu0 %v15875_v52 }
 0xa7a   :  { %10460 = vmatpush1.bf16.msra.mxu0 %v15876_v46 }
 0xa7b   :  { %10462 = vmatprep.subr.bf16.mxu0 %v15877_v57 }
 0xa7e   :  { %10464 = vmatpush1.bf16.msra.mxu0 %v15878_v47 }
 0xa7f   :  { %10466 = vmatprep.subr.bf16.mxu0 %v15879_v49  ;;  %v15897_v49 = vld [vmem:[#allocation116_spill] sm:$0xff] }
 0xa82   :  { %10468 = vmatpush1.bf16.msra.mxu0 %v15880_v1  ;;  %v15896_v1 = vld [vmem:[#allocation115_spill] sm:$0xff] }
 0xa83   :  { %10470 = vmatprep.subr.bf16.mxu0 %v15881_v17  ;;  %v15884_v17 = vld [vmem:[#allocation103_spill] sm:$0xff] }
 0xa86   :  { %10472 = vmatpush1.bf16.msra.mxu0 %v15882_v19  ;;  %v15885_v19 = vld [vmem:[#allocation104_spill] sm:$0xff] }
 0xa87   :  { %10506 = vmatprep.subr.bf16.mxu0 %v15883_v6  ;;  %v15886_v6 = vld [vmem:[#allocation105_spill] sm:$0xff] }
 0xb3c   :  { %v1969_v2 = vpop.f32.mrb[24].mxu0 }
 0xb3d   :  { %v1970_v37 = vadd.f32 %v1969_v2, %v13499_v40  ;;  %v9085_v52 = vpop.f32.mrb[25].mxu0  ;;  %v15888_v40 = vld [vmem:[#allocation107_spill] sm:$0xff]  ;;  %v15889_v2 = vld [vmem:[#allocation108_spill] sm:$0xff] }
 0xb3e   :  { %v15891_v52 = vld [vmem:[#allocation110_spill] sm:$0xff] }
 0xb3f   :  { %v13659_v46 = vadd.f32 %v13255_v58, %v1970_v37  ;;  %v15887_v58 = vld [vmem:[#allocation106_spill] sm:$0xff]  ;;  %v15890_v37 = vld [vmem:[#allocation109_spill] sm:$0xff] }
 0xb41   :  { %2365 = vst [vmem:[#allocation13 + $0x8] sm:$0xff] %v13659_v46  ;;  %2039 = vmatmul.mubr.f32.vlgmr.msra.gmra.mrb[28].mxu1 %v13659_v46  ;;  %2110 = vmatmul.mubr.f32.vlgmr.msra.gmra.mrb[26].mxu0 %v13659_v46 }
 0xb42   :  { %10476 = vmatpush1.bf16.msra.mxu1 %v13258_v54  ;;  %10508 = vmatpush1.bf16.msra.mxu0 %v15884_v17  ;;  %v15892_v54 = vld [vmem:[#allocation111_spill] sm:$0xff]  ;;  %v15893_v17 = vld [vmem:[#allocation112_spill] sm:$0xff] }
 0xb43   :  { %10478 = vmatprep.subr.bf16.mxu1 %v15885_v19  ;;  %10510 = vmatprep.subr.bf16.mxu0 %v15886_v6  ;;  %v15894_v19 = vld [vmem:[#allocation113_spill] sm:$0xff]  ;;  %v15895_v6 = vld [vmem:[#allocation114_spill] sm:$0xff] }
 0xb44   :  { %2180 = vmatprep.mubr.f32.mxu1 %v15739_v51  ;;  %2251 = vmatprep.mubr.f32.mxu0 %v15739_v51 }
 0xb46   :  { %10480 = vmatpush1.bf16.msra.mxu1 %v15887_v58  ;;  %10512 = vmatpush1.bf16.msra.mxu0 %v15888_v40  ;;  %v15898_v58 = vld [vmem:[#allocation117_spill] sm:$0xff]  ;;  %v15899_v40 = vld [vmem:[#allocation118_spill] sm:$0xff] }
 0xb47   :  { %10482 = vmatprep.subr.bf16.mxu1 %v15889_v2  ;;  %10514 = vmatprep.subr.bf16.mxu0 %v15890_v37  ;;  %v15900_v2 = vld [vmem:[#allocation119_spill] sm:$0xff] }
 0xb4a   :  { %10484 = vmatpush1.bf16.msra.mxu1 %v15891_v52  ;;  %10516 = vmatpush1.bf16.msra.mxu0 %v15892_v54 }
 0xb4b   :  { %10486 = vmatprep.subr.bf16.mxu1 %v15893_v17  ;;  %10518 = vmatprep.subr.bf16.mxu0 %v15894_v19 }
 0xb4e   :  { %10488 = vmatpush1.bf16.msra.mxu1 %v15895_v6  ;;  %10520 = vmatpush1.bf16.msra.mxu0 %v15896_v1 }
 0xb4f   :  { %10490 = vmatprep.subr.bf16.mxu1 %v15897_v49  ;;  %10522 = vmatprep.subr.bf16.mxu0 %v15898_v58 }
 0xb52   :  { %10492 = vmatpush1.bf16.msra.mxu1 %v15899_v40  ;;  %10524 = vmatpush1.bf16.msra.mxu0 %v15900_v2 }
 0xb53   :  { %10494 = vmatprep.subr.bf16.mxu1 %v13318_v0  ;;  %10526 = vmatprep.subr.bf16.mxu0 %v13320_v53 }
 0xb56   :  { %10496 = vmatpush1.bf16.msra.mxu1 %v13324_v36  ;;  %10528 = vmatpush1.bf16.msra.mxu0 %v13326_v42 }
 0xb57   :  { %10498 = vmatprep.subr.bf16.mxu1 %v13330_v50  ;;  %10530 = vmatprep.subr.bf16.mxu0 %v13332_v25 }
 0xb5a   :  { %10500 = vmatpush1.bf16.msra.mxu1 %v13336_v63  ;;  %10532 = vmatpush1.bf16.msra.mxu0 %v13338_v22 }
 0xb5b   :  { %10502 = vmatprep.subr.bf16.mxu1 %v13342_v11  ;;  %10534 = vmatprep.subr.bf16.mxu0 %v13344_v18 }
 0xb5e   :  { %10504 = vmatpush1.bf16.msra.mxu1 %v13348_v16  ;;  %10536 = vmatpush1.bf16.msra.mxu0 %v13350_v24 }
 0xb5f   :  { %10537 = vmatprep.subr.bf16.mxu1 %v15738_v31  ;;  %10562 = vmatprep.subr.bf16.mxu0 %v12898_v4  ;;  %v15901_v4 = vld [vmem:[#allocation24_spill] sm:$0xff] }
 0xb61   :  { %2181 = vmatmul.mubr.f32.vlgmr.msra.gmra.mrb[30].mxu1 %v13659_v46  ;;  %2252 = vmatmul.mubr.f32.vlgmr.msra.gmra.mrb[28].mxu0 %v13659_v46 }
 0xb62   :  { %10539 = vmatpush3.bf16.msra.mxu1 %v13356_v5  ;;  %9118 = vmatprep.mubr.msk.f32.mxu1 %vm12751_vm0, %v15739_v51  ;;  %v15902_v5 = vld [vmem:[#allocation26_spill] sm:$0xff] }
 0xb63   :  { %10540 = vmatprep.subr.bf16.mxu1 %v15738_v31  ;;  %10564 = vmatpush1.bf16.msra.mxu0 %v12900_v8 }
 0xb64   :  { %10566 = vmatprep.subr.bf16.mxu0 %v12902_v9  ;;  %2430 = vmatprep.mubr.f32.mxu0 %v15739_v51 }
 0xb66   :  { %10542 = vmatpush3.bf16.msra.mxu1 %v13363_v62  ;;  %v15903_v62 = vld [vmem:[#allocation28_spill] sm:$0xff] }
 0xb67   :  { %10543 = vmatprep.subr.bf16.mxu1 %v15738_v31  ;;  %10568 = vmatpush1.bf16.msra.mxu0 %v12906_v14 }
 0xb68   :  { %10570 = vmatprep.subr.bf16.mxu0 %v15901_v4 }
 0xb6a   :  { %10545 = vmatpush3.bf16.msra.mxu1 %v13372_v41 }
 0xb6b   :  { %10546 = vmatprep.subr.bf16.mxu1 %v15738_v31  ;;  %10572 = vmatpush1.bf16.msra.mxu0 %v12912_v20 }
 0xb6c   :  { %10574 = vmatprep.subr.bf16.mxu0 %v15902_v5 }
 0xb6e   :  { %10548 = vmatpush3.bf16.msra.mxu1 %v13378_v10  ;;  %v15922_v10 = vld [vmem:[#allocation142_spill] sm:$0xff] }
 0xb6f   :  { %10549 = vmatprep.subr.bf16.mxu1 %v15738_v31  ;;  %10576 = vmatpush1.bf16.msra.mxu0 %v12918_v26  ;;  %v2329_v26 = vld [vmem:[#allocation6 + $0x18] sm:$0xff] }
 0xb70   :  { %10578 = vmatprep.subr.bf16.mxu0 %v15903_v62 }
 0xb72   :  { %10551 = vmatpush3.bf16.msra.mxu1 %v13384_v34  ;;  %v15917_v34 = vld [vmem:[#allocation56_spill] sm:$0xff] }
 0xb73   :  { %10552 = vmatprep.subr.bf16.mxu1 %v15738_v31  ;;  %10580 = vmatpush1.bf16.msra.mxu0 %v12924_v32  ;;  %v15904_v32 = vld [vmem:[#allocation44_spill] sm:$0xff] }
 0xb74   :  { %10582 = vmatprep.subr.bf16.mxu0 %v12927_v33  ;;  %v15905_v33 = vld [vmem:[#allocation35_spill] sm:$0xff] }
 0xb76   :  { %10554 = vmatpush3.bf16.msra.mxu1 %v13390_v3  ;;  %v15914_v3 = vld [vmem:[#allocation53_spill] sm:$0xff] }
 0xb77   :  { %10555 = vmatprep.subr.bf16.mxu1 %v15738_v31  ;;  %10584 = vmatpush1.bf16.msra.mxu0 %v12930_v38  ;;  %v15906_v38 = vld [vmem:[#allocation45_spill] sm:$0xff] }
 0xb78   :  { %10586 = vmatprep.subr.bf16.mxu0 %v12933_v39  ;;  %v15908_v39 = vld [vmem:[#allocation47_spill] sm:$0xff] }
 0xb7a   :  { %10557 = vmatpush3.bf16.msra.mxu1 %v13396_v59  ;;  %v15907_v59 = vld [vmem:[#allocation46_spill] sm:$0xff] }
 0xb7b   :  { %10558 = vmatprep.subr.bf16.mxu1 %v15738_v31  ;;  %10588 = vmatpush1.bf16.msra.mxu0 %v12936_v44  ;;  %v15909_v44 = vld [vmem:[#allocation48_spill] sm:$0xff] }
 0xb7c   :  { %10590 = vmatprep.subr.bf16.mxu0 %v12939_v45  ;;  %v15910_v45 = vld [vmem:[#allocation49_spill] sm:$0xff] }
 0xb7e   :  { %10560 = vmatpush3.bf16.msra.mxu1 %v13402_v15  ;;  %v15911_v15 = vld [vmem:[#allocation50_spill] sm:$0xff] }
 0xb7f   :  { %10594 = vmatprep.subr.bf16.mxu1 %v15904_v32  ;;  %10592 = vmatpush1.bf16.msra.mxu0 %v15905_v33  ;;  %v15912_v32 = vld [vmem:[#allocation51_spill] sm:$0xff]  ;;  %v15913_v33 = vld [vmem:[#allocation52_spill] sm:$0xff] }
 0xb80   :  { %10625 = vmatprep.subr.bf16.mxu0 %v15738_v31 }
 0xb81   :  { %9119 = vmatmul.mubr.f32.vlgmr.msra.gmra.mrb[32].mxu1 %v13659_v46  ;;  %v15915_v46 = vld [vmem:[#allocation54_spill] sm:$0xff] }
 0xb82   :  { %10596 = vmatpush1.bf16.msra.mxu1 %v15906_v38  ;;  %2501 = vmatprep.mubr.f32.mxu1 %v15739_v51  ;;  %v15916_v38 = vld [vmem:[#allocation55_spill] sm:$0xff] }
 0xb83   :  { %10598 = vmatprep.subr.bf16.mxu1 %v15907_v59  ;;  %v15918_v59 = vld [vmem:[#allocation57_spill] sm:$0xff] }
 0xb86   :  { %10600 = vmatpush1.bf16.msra.mxu1 %v15908_v39  ;;  %v15919_v39 = vld [vmem:[#allocation58_spill] sm:$0xff] }
 0xb87   :  { %10602 = vmatprep.subr.bf16.mxu1 %v15909_v44  ;;  %v15920_v44 = vld [vmem:[#allocation59_spill] sm:$0xff] }
 0xb8a   :  { %10604 = vmatpush1.bf16.msra.mxu1 %v15910_v45 }
 0xb8b   :  { %10606 = vmatprep.subr.bf16.mxu1 %v15911_v15  ;;  %v15921_v15 = vld [vmem:[#allocation140_spill] sm:$0xff] }
 0xb8e   :  { %10608 = vmatpush1.bf16.msra.mxu1 %v15912_v32  ;;  %v1613_v32 = vadd.f32 %v13491_v23, %v15921_v15 }
 0xb8f   :  { %10610 = vmatprep.subr.bf16.mxu1 %v15913_v33 }
 0xb92   :  { %10612 = vmatpush1.bf16.msra.mxu1 %v15914_v3 }
 0xb93   :  { %10614 = vmatprep.subr.bf16.mxu1 %v15915_v46 }
 0xb96   :  { %10616 = vmatpush1.bf16.msra.mxu1 %v15916_v38  ;;  %v2330_v38 = vld [vmem:[#allocation6 + $0x20] sm:$0xff] }
 0xb97   :  { %10618 = vmatprep.subr.bf16.mxu1 %v15917_v34  ;;  %v1614_v34 = vadd.f32 %v13501_v48, %v13436_v7 }
 0xb9a   :  { %10620 = vmatpush1.bf16.msra.mxu1 %v15918_v59 }
 0xb9b   :  { %10622 = vmatprep.subr.bf16.mxu1 %v15919_v39  ;;  %v1615_v39 = vadd.f32 %v13549_v12, %v15922_v10 }
 0xb9e   :  { %10624 = vmatpush1.bf16.msra.mxu1 %v15920_v44 }
 0xb9f   :  { %9156 = vmatprep.subr.mxu1 %v15739_v51 }
 0xc14   :  { %v2040_v33 = vpop.f32.mrb[28].mxu1  ;;  %v2111_v45 = vpop.f32.mrb[26].mxu0 }
 0xc15   :  { %v2042_v3 = vpop.f32.mrb[29].mxu1  ;;  %v2113_v62 = vpop.f32.mrb[27].mxu0  ;;  %v2332_v59 = vmul.f32 %v2329_v26, %v2040_v33 }
 0xc16   :  { %v2338_v46 = vmul.f32 %v2113_v62, %v1613_v32  ;;  %v2333_v44 = vmul.f32 %v2330_v38, %v2042_v3  ;;  %v2331_v38 = vld [vmem:[#allocation6 + $0x28] sm:$0xff] }
 0xc17   :  { %v2334_v10 = vmul.f32 %v2331_v38, %v2111_v45  ;;  %v15926_v45 = vld [vmem:[#allocation37_spill] sm:$0xff]  ;;  %v15936_v38 = vld [vmem:[#allocation63_spill] sm:$0xff] }
 0xc34   :  { %v2182_v5 = vpop.f32.mrb[30].mxu1  ;;  %v2253_v20 = vpop.f32.mrb[28].mxu0 }
 0xc35   :  { %v2339_v41 = vmul.f32 %v2182_v5, %v1614_v34  ;;  %v2335_v4 = vadd.f32 %v2332_v59, %v2253_v20  ;;  %v2184_v23 = vpop.f32.mrb[31].mxu1  ;;  %v2255_v15 = vpop.f32.mrb[29].mxu0 }
 0xc36   :  { %v2340_v14 = vmul.f32 %v2184_v23, %v1615_v39  ;;  %v2336_v9 = vadd.f32 %v2333_v44, %v2255_v15  ;;  %v15929_v23 = vld [vmem:[#allocation40_spill] sm:$0xff] }
 0xc37   :  { %v2341_v8 = vadd.f32 %v2338_v46, %v2335_v4  ;;  %v15928_v46 = vld [vmem:[#allocation39_spill] sm:$0xff] }
 0xc38   :  { %v2348_v32 = vadd.f32 %v2339_v41, %v2336_v9  ;;  %v15923_v41 = vld [vmem:[#allocation143_spill] sm:$0xff] }
 0xc39   :  { %v8217_v62 = vmul.f32 -1.442695, %v2341_v8 }
 0xc3a   :  { %v8218_v24 = vmul.f32 -1.442695, %v2348_v32  ;;  %v15930_v32 = vld [vmem:[#allocation41_spill] sm:$0xff] }
 0xc3b   :  { %12294 = vpow2.f32 %v8217_v62  ;;  %v15931_v62 = vld [vmem:[#allocation42_spill] sm:$0xff] }
 0xc3c   :  { %12296 = vpow2.f32 %v8218_v24 }
 0xc45   :  { %v12295_v48 = vpop.eup %12294 }
 0xc46   :  { %v2345_v26 = vadd.f32 1.0, %v12295_v48  ;;  %v12297_v33 = vpop.eup %12296  ;;  %v15932_v48 = vld [vmem:[#allocation43_spill] sm:$0xff] }
 0xc47   :  { %v2352_v12 = vadd.f32 1.0, %v12297_v33  ;;  %v15934_v33 = vld [vmem:[#allocation61_spill] sm:$0xff] }
 0xc48   :  { %12298 = vrcp.f32 %v2345_v26  ;;  %v15933_v26 = vld [vmem:[#allocation60_spill] sm:$0xff] }
 0xc49   :  { %12300 = vrcp.f32 %v2352_v12  ;;  %v15935_v12 = vld [vmem:[#allocation62_spill] sm:$0xff] }
 0xc52   :  { %v12299_v3 = vpop.eup %12298 }
 0xc53   :  { %v2355_v5 = vmul.f32 %v12299_v3, %v2340_v14  ;;  %v12301_v4 = vpop.eup %12300  ;;  %v15925_v14 = vld [vmem:[#allocation36_spill] sm:$0xff] }
 0xc54   :  { %v2324_v20 = vpop.f32.mrb[32].mxu1  ;;  %v2358_v8 = vsub.f32 1.0, %v12301_v4  ;;  %v15937_v3 = vld [vmem:[#allocation64_spill] sm:$0xff] }
 0xc55   :  { %v2337_v34 = vadd.f32 %v2334_v10, %v2324_v20  ;;  %v9120_v39 = vpop.f32.mrb[33].mxu1  ;;  %v15927_v10 = vld [vmem:[#allocation38_spill] sm:$0xff] }
 0xc56   :  { %v2359_v24 = vmul.f32 %v2358_v8, %v15923_v41  ;;  %v15939_v20 = vld [vmem:[#allocation66_spill] sm:$0xff]  ;;  %v15941_v39 = vld [vmem:[#allocation69_spill] sm:$0xff]  ;;  %v15942_v8 = vld [vmem:[#allocation144_spill] sm:$0xff] }
 0xc57   :  { %v2356_v44 = vadd.f32 %v2355_v5, %v2337_v34  ;;  %v15938_v5 = vld [vmem:[#allocation65_spill] sm:$0xff]  ;;  %v15940_v34 = vld [vmem:[#allocation67_spill] sm:$0xff] }
 0xc59   :  { %12302 = vtanh.f32 %v2356_v44 }
 0xc63   :  { %v12303_v9 = vpop.eup %12302 }
 0xc64   :  { %v2360_v59 = vmul.f32 %v12303_v9, %v12301_v4 }
 0xc66   :  { %v13760_v15 = vadd.f32 %v2360_v59, %v2359_v24  ;;  %v15944_v59 = vld [vmem:[#allocation145_spill] sm:$0xff] }
 0xc68   :  { %15924 = vst [vmem:[#allocation68_spill] sm:$0xff] %v13760_v15  ;;  %2431 = vmatmul.mubr.f32.vlgmr.msra.gmra.mrb[30].mxu0 %v13760_v15  ;;  %2363 = vst [vmem:[#allocation12 + $0x8] sm:$0xff] %v13760_v15  ;;  %2502 = vmatmul.mubr.f32.vlgmr.msra.gmra.mrb[34].mxu1 %v13760_v15 }
 0xc69   :  { %10627 = vmatpush3.bf16.msra.mxu0 %v15925_v14  ;;  %9153 = vmatprep.mubr.msk.f32.mxu0 %vm12751_vm0, %v15739_v51 }
 0xc6a   :  { %10628 = vmatprep.subr.bf16.mxu0 %v15738_v31  ;;  %9158 = vmatprep.mubr.msk.f32.mxu1 %vm12751_vm0, %v15739_v51 }
 0xc6d   :  { %10630 = vmatpush3.bf16.msra.mxu0 %v15926_v45 }
 0xc6e   :  { %10631 = vmatprep.subr.bf16.mxu0 %v15738_v31 }
 0xc71   :  { %10633 = vmatpush3.bf16.msra.mxu0 %v15927_v10 }
 0xc72   :  { %10634 = vmatprep.subr.bf16.mxu0 %v15738_v31 }
 0xc75   :  { %10636 = vmatpush3.bf16.msra.mxu0 %v15928_v46  ;;  %v15953_v46 = vld [vmem:[#allocation153_spill] sm:$0xff] }
 0xc76   :  { %10637 = vmatprep.subr.bf16.mxu0 %v15738_v31 }
 0xc79   :  { %10639 = vmatpush3.bf16.msra.mxu0 %v15929_v23 }
 0xc7a   :  { %10640 = vmatprep.subr.bf16.mxu0 %v15738_v31 }
 0xc7d   :  { %10642 = vmatpush3.bf16.msra.mxu0 %v15930_v32 }
 0xc7e   :  { %10643 = vmatprep.subr.bf16.mxu0 %v15738_v31 }
 0xc81   :  { %10645 = vmatpush3.bf16.msra.mxu0 %v15931_v62 }
 0xc82   :  { %10646 = vmatprep.subr.bf16.mxu0 %v15738_v31 }
 0xc85   :  { %10648 = vmatpush3.bf16.msra.mxu0 %v15932_v48 }
 0xc86   :  { %10661 = vmatprep.subr.bf16.mxu0 %v15738_v31 }
 0xc88   :  { %9154 = vmatmul.mubr.f32.vlgmr.msra.gmra.mrb[32].mxu0 %v13760_v15 }
 0xc89   :  { %10663 = vmatpush3.bf16.msra.mxu0 %v15933_v26  ;;  %9231 = vmatprep.mubr.msk.f32.mxu0 %vm12751_vm0, %v15739_v51  ;;  %v15952_v26 = vld [vmem:[#allocation154_spill] sm:$0xff] }
 0xc8a   :  { %10664 = vmatprep.subr.bf16.mxu0 %v15738_v31 }
 0xc8d   :  { %10666 = vmatpush3.bf16.msra.mxu0 %v15934_v33 }
 0xc8e   :  { %10667 = vmatprep.subr.bf16.mxu0 %v15738_v31 }
 0xc91   :  { %10669 = vmatpush3.bf16.msra.mxu0 %v15935_v12 }
 0xc92   :  { %10670 = vmatprep.subr.bf16.mxu0 %v15738_v31 }
 0xc95   :  { %10672 = vmatpush3.bf16.msra.mxu0 %v15936_v38  ;;  %v15951_v38 = vld [vmem:[#allocation151_spill] sm:$0xff] }
 0xc96   :  { %10673 = vmatprep.subr.bf16.mxu0 %v15738_v31 }
 0xc99   :  { %10675 = vmatpush3.bf16.msra.mxu0 %v15937_v3 }
 0xc9a   :  { %10676 = vmatprep.subr.bf16.mxu0 %v15738_v31 }
 0xc9d   :  { %10678 = vmatpush3.bf16.msra.mxu0 %v15938_v5 }
 0xc9e   :  { %10679 = vmatprep.subr.bf16.mxu0 %v15738_v31 }
 0xca1   :  { %10681 = vmatpush3.bf16.msra.mxu0 %v15939_v20 }
 0xca2   :  { %10682 = vmatprep.subr.bf16.mxu0 %v15738_v31 }
 0xca5   :  { %10684 = vmatpush3.bf16.msra.mxu0 %v15940_v34  ;;  %v15945_v34 = vld [vmem:[#allocation146_spill] sm:$0xff] }
 0xca6   :  { %10718 = vmatprep.subr.bf16.mxu0 %v15941_v39 }
 0xd3b   :  { %v2432_v44 = vpop.f32.mrb[30].mxu0  ;;  %v13804_v4 = vpop.f32.mrb[34].mxu1 }
 0xd3c   :  { %v2578_v9 = vadd.f32 %v15942_v8, %v2432_v44  ;;  %v13807_v41 = vpop.f32.mrb[31].mxu0  ;;  %v13809_v24 = vpop.f32.mrb[35].mxu1  ;;  %v15946_v44 = vld [vmem:[#allocation147_spill] sm:$0xff]  ;;  %v15947_v8 = vld [vmem:[#allocation148_spill] sm:$0xff] }
 0xd3d   :  { %15943 = vst [vmem:[#allocation70_spill] sm:$0xff] %v13809_v24 }
 0xd3e   :  { %9157 = vmatpush3.msra.mxu1 %v2578_v9  ;;  %v15948_v9 = vld [vmem:[#allocation149_spill] sm:$0xff] }
 0xd3f   :  { %9159 = vmatmul.mubr.msk.f32.vlgmr.msra.gmra.mrb[36].mxu1 %vm621_vm1, %v15944_v59  ;;  %10649 = vmatprep.subr.bf16.mxu1 %v15738_v31 }
 0xd40   :  { %9161 = vmatprep.mubr.msk.f32.mxu1 %vm12751_vm0, %v15739_v51 }
 0xd43   :  { %9162 = vmatmul.mubr.msk.f32.gmra.mrb[38].mxu1 %vm621_vm1, %v15945_v34 }
 0xd44   :  { %9164 = vmatprep.mubr.msk.f32.mxu1 %vm12751_vm0, %v15739_v51 }
 0xd47   :  { %9165 = vmatmul.mubr.msk.f32.gmra.mrb[40].mxu1 %vm621_vm1, %v15946_v44  ;;  %v15950_v44 = vld [vmem:[#allocation150_spill] sm:$0xff] }
 0xd48   :  { %9167 = vmatprep.mubr.msk.f32.mxu1 %vm12751_vm0, %v15739_v51 }
 0xd4b   :  { %9168 = vmatmul.mubr.msk.f32.gmra.mrb[42].mxu1 %vm621_vm1, %v15947_v8 }
 0xd4c   :  { %9170 = vmatprep.mubr.msk.f32.mxu1 %vm12751_vm0, %v15739_v51 }
 0xd4f   :  { %9171 = vmatmul.mubr.msk.f32.gmra.mrb[44].mxu1 %vm621_vm1, %v15948_v9 }
 0xd50   :  { %9183 = vmatprep.mubr.msk.f32.mxu1 %vm12751_vm0, %v15739_v51 }
 0xd5b   :  { %v13832_v34 = vpop.f32.mrb[32].mxu0 }
 0xd5c   :  { %15949 = vst [vmem:[#allocation71_spill] sm:$0xff] %v13832_v34  ;;  %v9155_v59 = vpop.f32.mrb[33].mxu0 }
 0xe12   :  { %v2648_v39 = vpop.f32.mrb[36].mxu1 }
 0xe13   :  { %v2649_v20 = vadd.f32 %v15950_v44, %v2648_v39  ;;  %v9160_v5 = vpop.f32.mrb[37].mxu1  ;;  %v15955_v44 = vld [vmem:[#allocation155_spill] sm:$0xff] }
 0xe14   :  { %v15954_v5 = vld [vmem:[#allocation152_spill] sm:$0xff] }
 0xe15   :  { %12304 = vtanh.f32 %v2649_v20 }
 0xe16   :  { %v2653_v3 = vpop.f32.mrb[38].mxu1 }
 0xe17   :  { %v2654_v8 = vadd.f32 %v15951_v38, %v2653_v3  ;;  %v9163_v12 = vpop.f32.mrb[39].mxu1 }
 0xe19   :  { %12306 = vtanh.f32 %v2654_v8 }
 0xe1a   :  { %v2658_v33 = vpop.f32.mrb[40].mxu1 }
 0xe1b   :  { %v2659_v48 = vadd.f32 %v15952_v26, %v2658_v33  ;;  %v9166_v9 = vpop.f32.mrb[41].mxu1 }
 0xe1d   :  { %12308 = vtanh.f32 %v2659_v48 }
 0xe1e   :  { %v2663_v62 = vpop.f32.mrb[42].mxu1 }
 0xe1f   :  { %v12305_v32 = vpop.eup %12304  ;;  %v9169_v23 = vpop.f32.mrb[43].mxu1  ;;  %v2664_v20 = vadd.f32 %v15954_v5, %v2663_v62 }
 0xe20   :  { %v2677_v59 = vmul.f32 %v15953_v46, %v12305_v32 }
 0xe22   :  { %2682 = vadd.xlane.f32.xlu1 %v2677_v59  ;;  %v2668_v10 = vpop.f32.mrb[44].mxu1 }
 0xe23   :  { %v12307_v39 = vpop.eup %12306  ;;  %v2669_v45 = vadd.f32 %v15955_v44, %v2668_v10  ;;  %v9172_v38 = vpop.f32.mrb[45].mxu1 }
 0xe24   :  { %v2678_v12 = vmul.f32 %v15953_v46, %v12307_v39 }
 0xe25   :  { %12310 = vtanh.f32 %v2669_v45 }
 0xe26   :  { %2684 = vadd.xlane.f32.xlu1 %v2678_v12  ;;  %12312 = vtanh.f32 %v2664_v20 }
 0xe27   :  { %v12309_v26 = vpop.eup %12308 }
 0xe28   :  { %v2679_v48 = vmul.f32 %v15953_v46, %v12309_v26 }
 0xe2a   :  { %2686 = vadd.xlane.f32.xlu0 %v2679_v48 }
 0xe2f   :  { %v12311_v23 = vpop.eup %12310 }
 0xe30   :  { %v2681_v32 = vmul.f32 %v15953_v46, %v12311_v23  ;;  %v12313_v33 = vpop.eup %12312 }
 0xe31   :  { %v2680_v3 = vmul.f32 %v15953_v46, %v12313_v33 }
 0xe32   :  { %2690 = vadd.xlane.f32.xlu1 %v2681_v32 }
 0xe36   :  { %2688 = vadd.xlane.f32.xlu1 %v2680_v3 }
 0xeaf   :  { %v2683_v62 = vpop.xlane.xlu1 %2682 }
 0xeb3   :  { %v2685_v10 = vpop.xlane.xlu1 %2684 }
 0xeb7   :  { %v2687_v59 = vpop.xlane.xlu0 %2686 }
 0xebf   :  { %v2691_v8 = vpop.xlane.xlu1 %2690 }
 0xec0   :  { %v2692_v9 = vmax.f32 %v2683_v62, %v2691_v8 }
 0xec2   :  { %v2693_v39 = vmax.f32 %v2692_v9, %v2685_v10 }
 0xec3   :  { %v2689_v45 = vpop.xlane.xlu1 %2688 }
 0xec4   :  { %v2694_v5 = vmax.f32 %v2687_v59, %v2689_v45 }
 0xec6   :  { %v2695_v20 = vmax.f32 %v2693_v39, %v2694_v5 }
 0xec8   :  { %v2696_v44 = vrot.slane %v2695_v20, 4 }
 0xeca   :  { %v2697_v38 = vmax.f32 %v2695_v20, %v2696_v44 }
 0xecc   :  { %v2698_v12 = vrot.slane %v2697_v38, 2 }
 0xece   :  { %v2699_v26 = vmax.f32 %v2697_v38, %v2698_v12  ;;  %v15960_v12 = vld [vmem:[#allocation77_spill] sm:$0xff] }
 0xed0   :  { %v2700_v48 = vrot.slane %v2699_v26, 1 }
 0xed2   :  { %v2701_v23 = vmax.f32 %v2699_v26, %v2700_v48  ;;  %v15962_v26 = vld [vmem:[#allocation79_spill] sm:$0xff]  ;;  %v15963_v48 = vld [vmem:[#allocation80_spill] sm:$0xff] }
 0xed4   :  { %v2705_v14 = vsub.f32 %v2689_v45, %v2701_v23  ;;  %v2702_v32 = vsub.f32 %v2683_v62, %v2701_v23  ;;  %v2703_v15 = vsub.f32 %v2685_v10, %v2701_v23  ;;  %v2704_v46 = vsub.f32 %v2687_v59, %v2701_v23  ;;  %v15959_v59 = vld [vmem:[#allocation76_spill] sm:$0xff] }
 0xed5   :  { %v2706_v9 = vsub.f32 %v2691_v8, %v2701_v23  ;;  %v15964_v23 = vld [vmem:[#allocation82_spill] sm:$0xff] }
 0xed6   :  { %v2713_v33 = vmul.f32 1.442695, %v2705_v14  ;;  %v2707_v3 = vmul.f32 1.442695, %v2702_v32  ;;  %v2709_v34 = vmul.f32 1.442695, %v2703_v15 }
 0xed7   :  { %v2711_v24 = vmul.f32 1.442695, %v2704_v46  ;;  %v2715_v39 = vmul.f32 1.442695, %v2706_v9  ;;  %v15965_v32 = vld [vmem:[#allocation96_spill] sm:$0xff]  ;;  %v15966_v46 = vld [vmem:[#allocation98_spill] sm:$0xff] }
 0xed8   :  { %12314 = vpow2.f32 %v2713_v33  ;;  %v15967_v33 = vld [vmem:[#allocation100_spill] sm:$0xff] }
 0xed9   :  { %12316 = vpow2.f32 %v2707_v3 }
 0xeda   :  { %12318 = vpow2.f32 %v2709_v34 }
 0xedb   :  { %12320 = vpow2.f32 %v2711_v24 }
 0xedc   :  { %12322 = vpow2.f32 %v2715_v39 }
 0xee2   :  { %v12315_v5 = vpop.eup %12314 }
 0xee3   :  { %v12317_v20 = vpop.eup %12316  ;;  %v2720_v15 = vmul.f32 %v13597_v30, %v12315_v5  ;;  %v15957_v30 = vld [vmem:[#allocation74_spill] sm:$0xff] }
 0xee4   :  { %v12319_v44 = vpop.eup %12318  ;;  %v2717_v38 = vmul.f32 %v13579_v21, %v12317_v20 }
 0xee5   :  { %v12321_v45 = vpop.eup %12320  ;;  %v2718_v62 = vmul.f32 %v13585_v56, %v12319_v44  ;;  %v10656_v21 = vpack.c.bf16 %v12319_v44, %v12317_v20 }
 0xee6   :  { %v2719_v14 = vmul.f32 %v13591_v43, %v12321_v45  ;;  %v12323_v24 = vpop.eup %12322  ;;  %v10659_v56 = vpack.c.bf16 %v12315_v5, %v12321_v45  ;;  %v15956_v43 = vld [vmem:[#allocation73_spill] sm:$0xff]  ;;  %v15968_v45 = vld [vmem:[#allocation84_spill] sm:$0xff] }
 0xee7   :  { %v10650_v10 = vpack.c.bf16 %v2718_v62, %v2717_v38  ;;  %v2721_v8 = vmul.f32 %v13605_v28, %v12323_v24  ;;  %v15958_v28 = vld [vmem:[#allocation75_spill] sm:$0xff]  ;;  %v15969_v62 = vld [vmem:[#allocation85_spill] sm:$0xff] }
 0xee8   :  { %v10653_v34 = vpack.c.bf16 %v2720_v15, %v2719_v14  ;;  %v15971_v14 = vld [vmem:[#allocation87_spill] sm:$0xff]  ;;  %v15972_v15 = vld [vmem:[#allocation88_spill] sm:$0xff] }
 0xee9   :  { %10651 = vmatpush3.bf16.msra.mxu1 %v10650_v10  ;;  %v15970_v10 = vld [vmem:[#allocation86_spill] sm:$0xff] }
 0xeea   :  { %10652 = vmatprep.subr.bf16.mxu1 %v15738_v31 }
 0xeed   :  { %10654 = vmatpush3.bf16.msra.mxu1 %v10653_v34  ;;  %v15973_v34 = vld [vmem:[#allocation89_spill] sm:$0xff] }
 0xeee   :  { %9181 = vmatprep.subr.mxu1 %v15739_v51 }
 0xef1   :  { %9182 = vmatpush3.msra.mxu1 %v2721_v8  ;;  %v15975_v8 = vld [vmem:[#allocation91_spill] sm:$0xff] }
 0xef2   :  { %9184 = vmatmul.mubr.msk.f32.vlgmr.msra.gmra.mrb[46].mxu1 %vm783_vm2, %v13611_v29  ;;  %10655 = vmatprep.subr.bf16.mxu1 %v15738_v31 }
 0xef3   :  { %10657 = vmatpush3.bf16.msra.mxu1 %v10656_v21  ;;  %9196 = vmatprep.mubr.msk.f32.mxu1 %vm12751_vm0, %v15739_v51  ;;  %v15976_v21 = vld [vmem:[#allocation94_spill] sm:$0xff] }
 0xef4   :  { %10658 = vmatprep.subr.bf16.mxu1 %v15738_v31 }
 0xef7   :  { %10660 = vmatpush3.bf16.msra.mxu1 %v10659_v56  ;;  %v15977_v56 = vld [vmem:[#allocation95_spill] sm:$0xff] }
 0xef8   :  { %9194 = vmatprep.subr.mxu1 %v15739_v51 }
 0xefb   :  { %9195 = vmatpush3.msra.mxu1 %v12323_v24  ;;  %v15974_v24 = vld [vmem:[#allocation90_spill] sm:$0xff] }
 0xefc   :  { %9197 = vmatmul.mubr.msk.f32.vlgmr.msra.gmra.mrb[48].mxu1 %vm783_vm2, %v13611_v29  ;;  %10686 = vmatprep.subr.bf16.mxu1 %v15851_v35  ;;  %v15961_v29 = vld [vmem:[#allocation78_spill] sm:$0xff] }
 0xefd   :  { %10688 = vmatpush1.bf16.msra.mxu1 %v15852_v55  ;;  %3004 = vmatprep.mubr.f32.mxu1 %v15739_v51 }
 0xefe   :  { %10690 = vmatprep.subr.bf16.mxu1 %v15853_v61 }
 0xf01   :  { %10692 = vmatpush1.bf16.msra.mxu1 %v15854_v27 }
 0xf02   :  { %10694 = vmatprep.subr.bf16.mxu1 %v15956_v43 }
 0xf05   :  { %10696 = vmatpush1.bf16.msra.mxu1 %v15957_v30 }
 0xf06   :  { %10698 = vmatprep.subr.bf16.mxu1 %v15958_v28 }
 0xf09   :  { %10700 = vmatpush1.bf16.msra.mxu1 %v15959_v59 }
 0xf0a   :  { %10702 = vmatprep.subr.bf16.mxu1 %v15960_v12 }
 0xf0d   :  { %10704 = vmatpush1.bf16.msra.mxu1 %v15961_v29 }
 0xf0e   :  { %10706 = vmatprep.subr.bf16.mxu1 %v15962_v26 }
 0xf11   :  { %10708 = vmatpush1.bf16.msra.mxu1 %v15963_v48 }
 0xf12   :  { %10710 = vmatprep.subr.bf16.mxu1 %v15863_v60 }
 0xf15   :  { %10712 = vmatpush1.bf16.msra.mxu1 %v15964_v23 }
 0xf16   :  { %10714 = vmatprep.subr.bf16.mxu1 %v15965_v32 }
 0xf19   :  { %10716 = vmatpush1.bf16.msra.mxu1 %v15966_v46 }
 0xf1a   :  { %10750 = vmatprep.subr.bf16.mxu1 %v15967_v33 }
 0xfc5   :  { %v2788_v3 = vpop.f32.mrb[46].mxu1 }
 0xfc6   :  { %v9185_v9 = vpop.f32.mrb[47].mxu1 }
 0xfc7   :  { %v15979_v9 = vld [vmem:[#allocation99_spill] sm:$0xff] }
 0xfcf   :  { %v2858_v39 = vpop.f32.mrb[48].mxu1 }
 0xfd0   :  { %12324 = vrcp.f32 %v2858_v39  ;;  %v9198_v5 = vpop.f32.mrb[49].mxu1  ;;  %v15980_v39 = vld [vmem:[#allocation101_spill] sm:$0xff] }
 0xfda   :  { %v12325_v20 = vpop.eup %12324 }
 0xfdb   :  { %2865 = vperm.xlu1 %12238, %v12325_v20  }
0x105a   :  { %v2866_v44 = vpop.permute.xlu1 %2865 }
0x105b   :  { %v2868_v38 = vmul.f32 %v2866_v44, %v2788_v3  ;;  %v15978_v3 = vld [vmem:[#allocation97_spill] sm:$0xff] }
0x105d   :  { %9232 = vmatmul.mubr.f32.vlgmr.msra.gmra.mrb[34].mxu0 %v2868_v38  ;;  %v13899_v38 = vld [vmem:[%s15367_s11] ss:$0 sm:$0xff] }
0x105e   :  { %10720 = vmatpush1.bf16.msra.mxu0 %v15868_v13  ;;  %3075 = vmatprep.mubr.f32.mxu0 %v15739_v51  ;;  %15981 = vst [vmem:[#allocation72_spill] sm:$0xff] %v13899_v38 }
0x105f   :  { %10722 = vmatprep.subr.bf16.mxu0 %v15968_v45 }
0x1062   :  { %10724 = vmatpush1.bf16.msra.mxu0 %v15969_v62 }
0x1063   :  { %10726 = vmatprep.subr.bf16.mxu0 %v15970_v10 }
0x1066   :  { %10728 = vmatpush1.bf16.msra.mxu0 %v15971_v14 }
0x1067   :  { %10730 = vmatprep.subr.bf16.mxu0 %v15972_v15 }
0x106a   :  { %10732 = vmatpush1.bf16.msra.mxu0 %v15973_v34 }
0x106b   :  { %10734 = vmatprep.subr.bf16.mxu0 %v15974_v24 }
0x106e   :  { %10736 = vmatpush1.bf16.msra.mxu0 %v15975_v8 }
0x106f   :  { %10738 = vmatprep.subr.bf16.mxu0 %v15877_v57 }
0x1072   :  { %10740 = vmatpush1.bf16.msra.mxu0 %v15878_v47 }
0x1073   :  { %10742 = vmatprep.subr.bf16.mxu0 %v15976_v21 }
0x1076   :  { %10744 = vmatpush1.bf16.msra.mxu0 %v15977_v56 }
0x1077   :  { %10746 = vmatprep.subr.bf16.mxu0 %v15978_v3 }
0x107a   :  { %10748 = vmatpush1.bf16.msra.mxu0 %v15979_v9  ;;  %v15982_v9 = vld [vmem:[#allocation102_spill] sm:$0xff] }
0x107b   :  { %10782 = vmatprep.subr.bf16.mxu0 %v15980_v39  ;;  %v15983_v39 = vld [vmem:[#allocation103_spill] sm:$0xff] }
0x1130   :  { %v2935_v5 = vpop.f32.mrb[34].mxu0 }
0x1131   :  { %v2936_v20 = vadd.f32 %v2935_v5, %v13807_v41  ;;  %v9233_v44 = vpop.f32.mrb[35].mxu0  ;;  %v15984_v41 = vld [vmem:[#allocation104_spill] sm:$0xff]  ;;  %v15985_v5 = vld [vmem:[#allocation105_spill] sm:$0xff] }
0x1132   :  { %v15987_v44 = vld [vmem:[#allocation107_spill] sm:$0xff] }
0x1133   :  { %v13902_v47 = vadd.f32 %v13899_v38, %v2936_v20  ;;  %v15986_v20 = vld [vmem:[#allocation106_spill] sm:$0xff]  ;;  %v15988_v38 = vld [vmem:[#allocation108_spill] sm:$0xff] }
0x1135   :  { %3331 = vst [vmem:[#allocation13 + $0x10] sm:$0xff] %v13902_v47  ;;  %3005 = vmatmul.mubr.f32.vlgmr.msra.gmra.mrb[50].mxu1 %v13902_v47  ;;  %3076 = vmatmul.mubr.f32.vlgmr.msra.gmra.mrb[36].mxu0 %v13902_v47 }
0x1136   :  { %10752 = vmatpush1.bf16.msra.mxu1 %v15982_v9  ;;  %10784 = vmatpush1.bf16.msra.mxu0 %v15983_v39 }
0x1137   :  { %10754 = vmatprep.subr.bf16.mxu1 %v15984_v41  ;;  %10786 = vmatprep.subr.bf16.mxu0 %v15985_v5 }
0x1138   :  { %3146 = vmatprep.mubr.f32.mxu1 %v15739_v51  ;;  %3217 = vmatprep.mubr.f32.mxu0 %v15739_v51 }
0x113a   :  { %10756 = vmatpush1.bf16.msra.mxu1 %v15986_v20  ;;  %10788 = vmatpush1.bf16.msra.mxu0 %v15987_v44 }
0x113b   :  { %10758 = vmatprep.subr.bf16.mxu1 %v15988_v38  ;;  %10790 = vmatprep.subr.bf16.mxu0 %v15890_v37 }
0x113e   :  { %10760 = vmatpush1.bf16.msra.mxu1 %v15891_v52  ;;  %10792 = vmatpush1.bf16.msra.mxu0 %v15892_v54 }
0x113f   :  { %10762 = vmatprep.subr.bf16.mxu1 %v15893_v17  ;;  %10794 = vmatprep.subr.bf16.mxu0 %v15894_v19 }
0x1142   :  { %10764 = vmatpush1.bf16.msra.mxu1 %v15895_v6  ;;  %10796 = vmatpush1.bf16.msra.mxu0 %v15896_v1 }
0x1143   :  { %10766 = vmatprep.subr.bf16.mxu1 %v15897_v49  ;;  %10798 = vmatprep.subr.bf16.mxu0 %v15898_v58  ;;  %v16032_v58 = vld [vmem:[#allocation142_spill] sm:$0xff] }
0x1146   :  { %10768 = vmatpush1.bf16.msra.mxu1 %v15899_v40  ;;  %10800 = vmatpush1.bf16.msra.mxu0 %v15900_v2  ;;  %v3295_v2 = vld [vmem:[#allocation6 + $0x30] sm:$0xff] }
0x1147   :  { %10770 = vmatprep.subr.bf16.mxu1 %v13318_v0  ;;  %10802 = vmatprep.subr.bf16.mxu0 %v13320_v53  ;;  %v15989_v0 = vld [vmem:[#allocation131_spill] sm:$0xff] }
0x114a   :  { %10772 = vmatpush1.bf16.msra.mxu1 %v13324_v36  ;;  %10804 = vmatpush1.bf16.msra.mxu0 %v13326_v42  ;;  %v15990_v36 = vld [vmem:[#allocation20_spill] sm:$0xff] }
0x114b   :  { %10774 = vmatprep.subr.bf16.mxu1 %v13330_v50  ;;  %10806 = vmatprep.subr.bf16.mxu0 %v13332_v25  ;;  %v15991_v25 = vld [vmem:[#allocation132_spill] sm:$0xff] }
0x114c   :  { %v16003_v50 = vld [vmem:[#allocation136_spill] sm:$0xff] }
0x114d   :  { %v16026_v42 = vld [vmem:[#allocation56_spill] sm:$0xff] }
0x114e   :  { %10776 = vmatpush1.bf16.msra.mxu1 %v13336_v63  ;;  %10808 = vmatpush1.bf16.msra.mxu0 %v13338_v22  ;;  %v15998_v22 = vld [vmem:[#allocation25_spill] sm:$0xff]  ;;  %v15999_v63 = vld [vmem:[#allocation26_spill] sm:$0xff] }
0x114f   :  { %10778 = vmatprep.subr.bf16.mxu1 %v13342_v11  ;;  %10810 = vmatprep.subr.bf16.mxu0 %v13344_v18  ;;  %v15992_v18 = vld [vmem:[#allocation21_spill] sm:$0xff]  ;;  %v15996_v11 = vld [vmem:[#allocation24_spill] sm:$0xff] }
0x1152   :  { %10780 = vmatpush1.bf16.msra.mxu1 %v13348_v16  ;;  %10812 = vmatpush1.bf16.msra.mxu0 %v15989_v0  ;;  %v15993_v16 = vld [vmem:[#allocation22_spill] sm:$0xff]  ;;  %v15994_v0 = vld [vmem:[#allocation133_spill] sm:$0xff] }
0x1153   :  { %10813 = vmatprep.subr.bf16.mxu1 %v15738_v31  ;;  %10838 = vmatprep.subr.bf16.mxu0 %v15990_v36  ;;  %v15995_v36 = vld [vmem:[#allocation23_spill] sm:$0xff] }
0x1155   :  { %3147 = vmatmul.mubr.f32.vlgmr.msra.gmra.mrb[52].mxu1 %v13902_v47  ;;  %3218 = vmatmul.mubr.f32.vlgmr.msra.gmra.mrb[38].mxu0 %v13902_v47 }
0x1156   :  { %10815 = vmatpush3.bf16.msra.mxu1 %v15991_v25  ;;  %9266 = vmatprep.mubr.msk.f32.mxu1 %vm12751_vm0, %v15739_v51  ;;  %v15997_v25 = vld [vmem:[#allocation134_spill] sm:$0xff] }
0x1157   :  { %10816 = vmatprep.subr.bf16.mxu1 %v15738_v31  ;;  %10840 = vmatpush1.bf16.msra.mxu0 %v15992_v18  ;;  %v16000_v18 = vld [vmem:[#allocation135_spill] sm:$0xff] }
0x1158   :  { %10842 = vmatprep.subr.bf16.mxu0 %v15993_v16  ;;  %3396 = vmatprep.mubr.f32.mxu0 %v15739_v51  ;;  %v16001_v16 = vld [vmem:[#allocation27_spill] sm:$0xff] }
0x115a   :  { %10818 = vmatpush3.bf16.msra.mxu1 %v15994_v0  ;;  %v16002_v0 = vld [vmem:[#allocation28_spill] sm:$0xff] }
0x115b   :  { %10819 = vmatprep.subr.bf16.mxu1 %v15738_v31  ;;  %10844 = vmatpush1.bf16.msra.mxu0 %v15995_v36  ;;  %v16006_v36 = vld [vmem:[#allocation137_spill] sm:$0xff] }
0x115c   :  { %10846 = vmatprep.subr.bf16.mxu0 %v15996_v11  ;;  %v16004_v11 = vld [vmem:[#allocation29_spill] sm:$0xff] }
0x115e   :  { %10821 = vmatpush3.bf16.msra.mxu1 %v15997_v25  ;;  %v16005_v25 = vld [vmem:[#allocation30_spill] sm:$0xff] }
0x115f   :  { %10822 = vmatprep.subr.bf16.mxu1 %v15738_v31  ;;  %10848 = vmatpush1.bf16.msra.mxu0 %v15998_v22  ;;  %v16009_v22 = vld [vmem:[#allocation138_spill] sm:$0xff] }
0x1160   :  { %10850 = vmatprep.subr.bf16.mxu0 %v15999_v63  ;;  %v16007_v63 = vld [vmem:[#allocation31_spill] sm:$0xff] }
0x1162   :  { %10824 = vmatpush3.bf16.msra.mxu1 %v16000_v18  ;;  %v16008_v18 = vld [vmem:[#allocation32_spill] sm:$0xff] }
0x1163   :  { %10825 = vmatprep.subr.bf16.mxu1 %v15738_v31  ;;  %10852 = vmatpush1.bf16.msra.mxu0 %v16001_v16  ;;  %v16012_v16 = vld [vmem:[#allocation139_spill] sm:$0xff] }
0x1164   :  { %10854 = vmatprep.subr.bf16.mxu0 %v16002_v0  ;;  %v16010_v0 = vld [vmem:[#allocation33_spill] sm:$0xff] }
0x1166   :  { %10827 = vmatpush3.bf16.msra.mxu1 %v16003_v50  ;;  %v16011_v50 = vld [vmem:[#allocation34_spill] sm:$0xff] }
0x1167   :  { %10828 = vmatprep.subr.bf16.mxu1 %v15738_v31  ;;  %10856 = vmatpush1.bf16.msra.mxu0 %v16004_v11  ;;  %v16013_v11 = vld [vmem:[#allocation44_spill] sm:$0xff] }
0x1168   :  { %10858 = vmatprep.subr.bf16.mxu0 %v16005_v25  ;;  %v16014_v25 = vld [vmem:[#allocation35_spill] sm:$0xff] }
0x116a   :  { %10830 = vmatpush3.bf16.msra.mxu1 %v16006_v36  ;;  %v16023_v36 = vld [vmem:[#allocation53_spill] sm:$0xff] }
0x116b   :  { %10831 = vmatprep.subr.bf16.mxu1 %v15738_v31  ;;  %10860 = vmatpush1.bf16.msra.mxu0 %v16007_v63  ;;  %v16015_v63 = vld [vmem:[#allocation45_spill] sm:$0xff] }
0x116c   :  { %10862 = vmatprep.subr.bf16.mxu0 %v16008_v18  ;;  %v16017_v18 = vld [vmem:[#allocation47_spill] sm:$0xff] }
0x116e   :  { %10833 = vmatpush3.bf16.msra.mxu1 %v16009_v22  ;;  %v16016_v22 = vld [vmem:[#allocation46_spill] sm:$0xff] }
0x116f   :  { %10834 = vmatprep.subr.bf16.mxu1 %v15738_v31  ;;  %10864 = vmatpush1.bf16.msra.mxu0 %v16010_v0  ;;  %v16018_v0 = vld [vmem:[#allocation48_spill] sm:$0xff] }
0x1170   :  { %10866 = vmatprep.subr.bf16.mxu0 %v16011_v50  ;;  %v16019_v50 = vld [vmem:[#allocation49_spill] sm:$0xff] }
0x1172   :  { %10836 = vmatpush3.bf16.msra.mxu1 %v16012_v16  ;;  %v16020_v16 = vld [vmem:[#allocation50_spill] sm:$0xff] }
0x1173   :  { %10870 = vmatprep.subr.bf16.mxu1 %v16013_v11  ;;  %10868 = vmatpush1.bf16.msra.mxu0 %v16014_v25  ;;  %v16021_v11 = vld [vmem:[#allocation51_spill] sm:$0xff]  ;;  %v16022_v25 = vld [vmem:[#allocation52_spill] sm:$0xff] }
0x1174   :  { %10901 = vmatprep.subr.bf16.mxu0 %v15738_v31 }
0x1175   :  { %9267 = vmatmul.mubr.f32.vlgmr.msra.gmra.mrb[54].mxu1 %v13902_v47  ;;  %v16024_v47 = vld [vmem:[#allocation54_spill] sm:$0xff] }
0x1176   :  { %10872 = vmatpush1.bf16.msra.mxu1 %v16015_v63  ;;  %3467 = vmatprep.mubr.f32.mxu1 %v15739_v51  ;;  %v16025_v63 = vld [vmem:[#allocation55_spill] sm:$0xff] }
0x1177   :  { %10874 = vmatprep.subr.bf16.mxu1 %v16016_v22  ;;  %v16027_v22 = vld [vmem:[#allocation57_spill] sm:$0xff] }
0x117a   :  { %10876 = vmatpush1.bf16.msra.mxu1 %v16017_v18  ;;  %v16028_v18 = vld [vmem:[#allocation58_spill] sm:$0xff] }
0x117b   :  { %10878 = vmatprep.subr.bf16.mxu1 %v16018_v0  ;;  %v16029_v0 = vld [vmem:[#allocation59_spill] sm:$0xff] }
0x117e   :  { %10880 = vmatpush1.bf16.msra.mxu1 %v16019_v50 }
0x117f   :  { %10882 = vmatprep.subr.bf16.mxu1 %v16020_v16  ;;  %v16030_v16 = vld [vmem:[#allocation140_spill] sm:$0xff] }
0x1182   :  { %10884 = vmatpush1.bf16.msra.mxu1 %v16021_v11  ;;  %v2579_v11 = vadd.f32 %v13804_v4, %v16030_v16 }
0x1183   :  { %10886 = vmatprep.subr.bf16.mxu1 %v16022_v25 }
0x1186   :  { %10888 = vmatpush1.bf16.msra.mxu1 %v16023_v36 }
0x1187   :  { %10890 = vmatprep.subr.bf16.mxu1 %v16024_v47 }
0x118a   :  { %10892 = vmatpush1.bf16.msra.mxu1 %v16025_v63  ;;  %v3296_v63 = vld [vmem:[#allocation6 + $0x38] sm:$0xff] }
0x118b   :  { %10894 = vmatprep.subr.bf16.mxu1 %v16026_v42  ;;  %v16031_v42 = vld [vmem:[#allocation70_spill] sm:$0xff] }
0x118c   :  { %v2580_v40 = vadd.f32 %v16031_v42, %v13436_v7 }
0x118e   :  { %10896 = vmatpush1.bf16.msra.mxu1 %v16027_v22 }
0x118f   :  { %10898 = vmatprep.subr.bf16.mxu1 %v16028_v18  ;;  %v16033_v18 = vld [vmem:[#allocation71_spill] sm:$0xff] }
0x1190   :  { %v2581_v49 = vadd.f32 %v16033_v18, %v16032_v58 }
0x1192   :  { %10900 = vmatpush1.bf16.msra.mxu1 %v16029_v0 }
0x1193   :  { %9304 = vmatprep.subr.mxu1 %v15739_v51 }
0x1208   :  { %v3006_v25 = vpop.f32.mrb[50].mxu1  ;;  %v3077_v50 = vpop.f32.mrb[36].mxu0 }
0x1209   :  { %v3008_v36 = vpop.f32.mrb[51].mxu1  ;;  %v3079_v53 = vpop.f32.mrb[37].mxu0  ;;  %v3298_v22 = vmul.f32 %v3295_v2, %v3006_v25 }
0x120a   :  { %v3304_v47 = vmul.f32 %v3079_v53, %v2579_v11  ;;  %v3299_v0 = vmul.f32 %v3296_v63, %v3008_v36  ;;  %v3297_v36 = vld [vmem:[#allocation6 + $0x40] sm:$0xff] }
0x120b   :  { %v3300_v58 = vmul.f32 %v3297_v36, %v3077_v50  ;;  %v16037_v50 = vld [vmem:[#allocation37_spill] sm:$0xff]  ;;  %v16047_v36 = vld [vmem:[#allocation63_spill] sm:$0xff] }
0x1228   :  { %v3148_v1 = vpop.f32.mrb[52].mxu1  ;;  %v3219_v6 = vpop.f32.mrb[38].mxu0 }
0x1229   :  { %v3305_v19 = vmul.f32 %v3148_v1, %v2580_v40  ;;  %v3301_v17 = vadd.f32 %v3298_v22, %v3219_v6  ;;  %v3150_v4 = vpop.f32.mrb[53].mxu1  ;;  %v3221_v16 = vpop.f32.mrb[39].mxu0  ;;  %v16034_v40 = vld [vmem:[#allocation68_spill] sm:$0xff] }
0x122a   :  { %v3306_v54 = vmul.f32 %v3150_v4, %v2581_v49  ;;  %v3302_v52 = vadd.f32 %v3299_v0, %v3221_v16  ;;  %v16040_v4 = vld [vmem:[#allocation40_spill] sm:$0xff] }
0x122b   :  { %v3307_v37 = vadd.f32 %v3304_v47, %v3301_v17  ;;  %v16039_v47 = vld [vmem:[#allocation39_spill] sm:$0xff] }
0x122c   :  { %v3314_v53 = vadd.f32 %v3305_v19, %v3302_v52 }
0x122d   :  { %v8226_v11 = vmul.f32 -1.442695, %v3307_v37 }
0x122e   :  { %v8227_v38 = vmul.f32 -1.442695, %v3314_v53  ;;  %v16041_v53 = vld [vmem:[#allocation41_spill] sm:$0xff] }
0x122f   :  { %12326 = vpow2.f32 %v8226_v11  ;;  %v16042_v11 = vld [vmem:[#allocation42_spill] sm:$0xff] }
0x1230   :  { %12328 = vpow2.f32 %v8227_v38 }
0x1239   :  { %v12327_v42 = vpop.eup %12326 }
0x123a   :  { %v3311_v25 = vadd.f32 1.0, %v12327_v42  ;;  %v12329_v2 = vpop.eup %12328  ;;  %v16043_v42 = vld [vmem:[#allocation43_spill] sm:$0xff] }
0x123b   :  { %v3318_v18 = vadd.f32 1.0, %v12329_v2  ;;  %v16045_v2 = vld [vmem:[#allocation61_spill] sm:$0xff] }
0x123c   :  { %12330 = vrcp.f32 %v3311_v25  ;;  %v16044_v25 = vld [vmem:[#allocation60_spill] sm:$0xff] }
0x123d   :  { %12332 = vrcp.f32 %v3318_v18  ;;  %v16046_v18 = vld [vmem:[#allocation62_spill] sm:$0xff] }
0x1246   :  { %v12331_v63 = vpop.eup %12330 }
0x1247   :  { %v3321_v1 = vmul.f32 %v12331_v63, %v3306_v54  ;;  %v12333_v16 = vpop.eup %12332  ;;  %v16036_v54 = vld [vmem:[#allocation36_spill] sm:$0xff] }
0x1248   :  { %v3290_v22 = vpop.f32.mrb[54].mxu1  ;;  %v3324_v17 = vsub.f32 1.0, %v12333_v16  ;;  %v16048_v63 = vld [vmem:[#allocation64_spill] sm:$0xff] }
0x1249   :  { %v3303_v6 = vadd.f32 %v3300_v58, %v3290_v22  ;;  %v9268_v49 = vpop.f32.mrb[55].mxu1  ;;  %v16038_v58 = vld [vmem:[#allocation38_spill] sm:$0xff] }
0x124a   :  { %v3325_v37 = vmul.f32 %v3324_v17, %v16034_v40  ;;  %v16050_v22 = vld [vmem:[#allocation66_spill] sm:$0xff]  ;;  %v16052_v49 = vld [vmem:[#allocation69_spill] sm:$0xff]  ;;  %v14052_v17 = vld [vmem:[%s15365_s9] ss:$0 sm:$0xff] }
0x124b   :  { %v3322_v0 = vadd.f32 %v3321_v1, %v3303_v6  ;;  %v16049_v1 = vld [vmem:[#allocation65_spill] sm:$0xff]  ;;  %v16051_v6 = vld [vmem:[#allocation67_spill] sm:$0xff]  ;;  %16053 = vst [vmem:[#allocation83_spill] sm:$0xff] %v14052_v17 }
0x124d   :  { %12334 = vtanh.f32 %v3322_v0 }
0x1257   :  { %v12335_v19 = vpop.eup %12334 }
0x1258   :  { %v3326_v52 = vmul.f32 %v12335_v19, %v12333_v16 }
0x125a   :  { %v14003_v38 = vadd.f32 %v3326_v52, %v3325_v37  ;;  %v14062_v52 = vld [vmem:[%s15361_s5] sm:$0xff] }
0x125b   :  { %16055 = vst [vmem:[#allocation144_spill] sm:$0xff] %v14062_v52 }
0x125c   :  { %16035 = vst [vmem:[#allocation81_spill] sm:$0xff] %v14003_v38  ;;  %3397 = vmatmul.mubr.f32.vlgmr.msra.gmra.mrb[40].mxu0 %v14003_v38  ;;  %3329 = vst [vmem:[#allocation12 + $0x10] sm:$0xff] %v14003_v38  ;;  %3468 = vmatmul.mubr.f32.vlgmr.msra.gmra.mrb[56].mxu1 %v14003_v38 }
0x125d   :  { %10903 = vmatpush3.bf16.msra.mxu0 %v16036_v54  ;;  %9301 = vmatprep.mubr.msk.f32.mxu0 %vm12751_vm0, %v15739_v51 }
0x125e   :  { %10904 = vmatprep.subr.bf16.mxu0 %v15738_v31  ;;  %9306 = vmatprep.mubr.msk.f32.mxu1 %vm12751_vm0, %v15739_v51 }
0x1261   :  { %10906 = vmatpush3.bf16.msra.mxu0 %v16037_v50 }
0x1262   :  { %10907 = vmatprep.subr.bf16.mxu0 %v15738_v31 }
0x1265   :  { %10909 = vmatpush3.bf16.msra.mxu0 %v16038_v58 }
0x1266   :  { %10910 = vmatprep.subr.bf16.mxu0 %v15738_v31 }
0x1269   :  { %10912 = vmatpush3.bf16.msra.mxu0 %v16039_v47 }
0x126a   :  { %10913 = vmatprep.subr.bf16.mxu0 %v15738_v31 }
0x126d   :  { %10915 = vmatpush3.bf16.msra.mxu0 %v16040_v4 }
0x126e   :  { %10916 = vmatprep.subr.bf16.mxu0 %v15738_v31 }
0x1271   :  { %10918 = vmatpush3.bf16.msra.mxu0 %v16041_v53 }
0x1272   :  { %10919 = vmatprep.subr.bf16.mxu0 %v15738_v31 }
0x1275   :  { %10921 = vmatpush3.bf16.msra.mxu0 %v16042_v11 }
0x1276   :  { %10922 = vmatprep.subr.bf16.mxu0 %v15738_v31 }
0x1279   :  { %10924 = vmatpush3.bf16.msra.mxu0 %v16043_v42 }
0x127a   :  { %10937 = vmatprep.subr.bf16.mxu0 %v15738_v31 }
0x127c   :  { %9302 = vmatmul.mubr.f32.vlgmr.msra.gmra.mrb[42].mxu0 %v14003_v38 }
0x127d   :  { %10939 = vmatpush3.bf16.msra.mxu0 %v16044_v25  ;;  %9379 = vmatprep.mubr.msk.f32.mxu0 %vm12751_vm0, %v15739_v51 }
0x127e   :  { %10940 = vmatprep.subr.bf16.mxu0 %v15738_v31 }
0x1281   :  { %10942 = vmatpush3.bf16.msra.mxu0 %v16045_v2 }
0x1282   :  { %10943 = vmatprep.subr.bf16.mxu0 %v15738_v31 }
0x1285   :  { %10945 = vmatpush3.bf16.msra.mxu0 %v16046_v18 }
0x1286   :  { %10946 = vmatprep.subr.bf16.mxu0 %v15738_v31 }
0x1289   :  { %10948 = vmatpush3.bf16.msra.mxu0 %v16047_v36  ;;  %v14107_v36 = vld [vmem:[#allocation3] sm:$0xff] }
0x128a   :  { %10949 = vmatprep.subr.bf16.mxu0 %v15738_v31  ;;  %16061 = vst [vmem:[#allocation150_spill] sm:$0xff] %v14107_v36 }
0x128d   :  { %10951 = vmatpush3.bf16.msra.mxu0 %v16048_v63 }
0x128e   :  { %10952 = vmatprep.subr.bf16.mxu0 %v15738_v31 }
0x1291   :  { %10954 = vmatpush3.bf16.msra.mxu0 %v16049_v1 }
0x1292   :  { %10955 = vmatprep.subr.bf16.mxu0 %v15738_v31 }
0x1295   :  { %10957 = vmatpush3.bf16.msra.mxu0 %v16050_v22 }
0x1296   :  { %10958 = vmatprep.subr.bf16.mxu0 %v15738_v31 }
0x1299   :  { %10960 = vmatpush3.bf16.msra.mxu0 %v16051_v6  ;;  %v14099_v6 = vld [vmem:[%s15361_s5 + $0x20] sm:$0xff] }
0x129a   :  { %10994 = vmatprep.subr.bf16.mxu0 %v16052_v49  ;;  %v14090_v49 = vld [vmem:[%s15361_s5 + $0x18] sm:$0xff]  ;;  %16059 = vst [vmem:[#allocation148_spill] sm:$0xff] %v14099_v6 }
0x129b   :  { %16058 = vst [vmem:[#allocation147_spill] sm:$0xff] %v14090_v49 }
0x132f   :  { %v3398_v0 = vpop.f32.mrb[40].mxu0  ;;  %v14047_v16 = vpop.f32.mrb[56].mxu1 }
0x1330   :  { %v3544_v19 = vadd.f32 %v14052_v17, %v3398_v0  ;;  %v14055_v40 = vpop.f32.mrb[41].mxu0  ;;  %v14057_v37 = vpop.f32.mrb[57].mxu1  ;;  %v14072_v0 = vld [vmem:[%s15361_s5 + $0x8] sm:$0xff] }
0x1331   :  { %16054 = vst [vmem:[#allocation143_spill] sm:$0xff] %v14057_v37  ;;  %16056 = vst [vmem:[#allocation145_spill] sm:$0xff] %v14072_v0 }
0x1332   :  { %9305 = vmatpush3.msra.mxu1 %v3544_v19  ;;  %v14081_v19 = vld [vmem:[%s15361_s5 + $0x10] sm:$0xff] }
0x1333   :  { %9307 = vmatmul.mubr.msk.f32.vlgmr.msra.gmra.mrb[58].mxu1 %vm621_vm1, %v14062_v52  ;;  %10925 = vmatprep.subr.bf16.mxu1 %v15738_v31  ;;  %16057 = vst [vmem:[#allocation146_spill] sm:$0xff] %v14081_v19  ;;  %v14113_v52 = vld [vmem:[#allocation3 + $0x10] sm:$0xff] }
0x1334   :  { %9309 = vmatprep.mubr.msk.f32.mxu1 %vm12751_vm0, %v15739_v51  ;;  %16063 = vst [vmem:[#allocation154_spill] sm:$0xff] %v14113_v52 }
0x1337   :  { %9310 = vmatmul.mubr.msk.f32.gmra.mrb[60].mxu1 %vm621_vm1, %v14072_v0 }
0x1338   :  { %9312 = vmatprep.mubr.msk.f32.mxu1 %vm12751_vm0, %v15739_v51 }
0x133b   :  { %9313 = vmatmul.mubr.msk.f32.gmra.mrb[62].mxu1 %vm621_vm1, %v14081_v19 }
0x133c   :  { %9315 = vmatprep.mubr.msk.f32.mxu1 %vm12751_vm0, %v15739_v51 }
0x133f   :  { %9316 = vmatmul.mubr.msk.f32.gmra.mrb[64].mxu1 %vm621_vm1, %v14090_v49  ;;  %v14110_v49 = vld [vmem:[#allocation3 + $0x8] sm:$0xff] }
0x1340   :  { %9318 = vmatprep.mubr.msk.f32.mxu1 %vm12751_vm0, %v15739_v51  ;;  %16062 = vst [vmem:[#allocation151_spill] sm:$0xff] %v14110_v49 }
0x1343   :  { %9319 = vmatmul.mubr.msk.f32.gmra.mrb[66].mxu1 %vm621_vm1, %v14099_v6 }
0x1344   :  { %9331 = vmatprep.mubr.msk.f32.mxu1 %vm12751_vm0, %v15739_v51 }
0x134f   :  { %v14105_v22 = vpop.f32.mrb[42].mxu0 }
0x1350   :  { %16060 = vst [vmem:[#allocation149_spill] sm:$0xff] %v14105_v22  ;;  %v9303_v1 = vpop.f32.mrb[43].mxu0 }
0x1406   :  { %v3614_v63 = vpop.f32.mrb[58].mxu1 }
0x1407   :  { %v3615_v18 = vadd.f32 %v14107_v36, %v3614_v63  ;;  %v9308_v2 = vpop.f32.mrb[59].mxu1 }
0x1408   :  { %v14119_v2 = vld [vmem:[%s15366_s10] ss:$0 sm:$0xff] }
0x1409   :  { %12336 = vtanh.f32 %v3615_v18  ;;  %16064 = vst [vmem:[#allocation153_spill] sm:$0xff] %v14119_v2 }
0x140a   :  { %v3619_v25 = vpop.f32.mrb[60].mxu1 }
0x140b   :  { %v3620_v19 = vadd.f32 %v14110_v49, %v3619_v25  ;;  %v9311_v0 = vpop.f32.mrb[61].mxu1 }
0x140c   :  { %v14122_v0 = vld [vmem:[#allocation3 + $0x18] sm:$0xff] }
0x140d   :  { %12338 = vtanh.f32 %v3620_v19  ;;  %16065 = vst [vmem:[#allocation152_spill] sm:$0xff] %v14122_v0 }
0x140e   :  { %v3624_v6 = vpop.f32.mrb[62].mxu1 }
0x140f   :  { %v3625_v17 = vadd.f32 %v14113_v52, %v3624_v6  ;;  %v9314_v1 = vpop.f32.mrb[63].mxu1  ;;  %v14125_v6 = vld [vmem:[#allocation3 + $0x20] sm:$0xff] }
0x1410   :  { %16066 = vst [vmem:[#allocation155_spill] sm:$0xff] %v14125_v6 }
0x1411   :  { %12340 = vtanh.f32 %v3625_v17 }
0x1412   :  { %v3629_v42 = vpop.f32.mrb[64].mxu1 }
0x1413   :  { %v12337_v11 = vpop.eup %12336  ;;  %v9317_v53 = vpop.f32.mrb[65].mxu1  ;;  %v3630_v19 = vadd.f32 %v14122_v0, %v3629_v42 }
0x1414   :  { %v3643_v18 = vmul.f32 %v14119_v2, %v12337_v11 }
0x1416   :  { %3648 = vadd.xlane.f32.xlu1 %v3643_v18  ;;  %v3634_v25 = vpop.f32.mrb[66].mxu1 }
0x1417   :  { %v12339_v63 = vpop.eup %12338  ;;  %v3635_v17 = vadd.f32 %v14125_v6, %v3634_v25  ;;  %v9320_v1 = vpop.f32.mrb[67].mxu1 }
0x1418   :  { %v3644_v53 = vmul.f32 %v14119_v2, %v12339_v63 }
0x1419   :  { %12342 = vtanh.f32 %v3635_v17 }
0x141a   :  { %3650 = vadd.xlane.f32.xlu0 %v3644_v53  ;;  %12344 = vtanh.f32 %v3630_v19 }
0x141b   :  { %v12341_v52 = vpop.eup %12340 }
0x141c   :  { %v3645_v11 = vmul.f32 %v14119_v2, %v12341_v52 }
0x141e   :  { %3652 = vadd.xlane.f32.xlu0 %v3645_v11 }
0x1423   :  { %v12343_v18 = vpop.eup %12342 }
0x1424   :  { %v3647_v49 = vmul.f32 %v14119_v2, %v12343_v18  ;;  %v12345_v36 = vpop.eup %12344 }
0x1425   :  { %v3646_v42 = vmul.f32 %v14119_v2, %v12345_v36 }
0x1426   :  { %3656 = vadd.xlane.f32.xlu0 %v3647_v49 }
0x142a   :  { %3654 = vadd.xlane.f32.xlu0 %v3646_v42 }
0x14a3   :  { %v3649_v1 = vpop.xlane.xlu1 %3648 }
0x14a7   :  { %v3651_v0 = vpop.xlane.xlu0 %3650 }
0x14ab   :  { %v3653_v25 = vpop.xlane.xlu0 %3652 }
0x14b3   :  { %v3657_v6 = vpop.xlane.xlu0 %3656 }
0x14b4   :  { %v3658_v63 = vmax.f32 %v3649_v1, %v3657_v6 }
0x14b6   :  { %v3659_v53 = vmax.f32 %v3658_v63, %v3651_v0 }
0x14b7   :  { %v3655_v17 = vpop.xlane.xlu0 %3654 }
0x14b8   :  { %v3660_v4 = vmax.f32 %v3653_v25, %v3655_v17 }
0x14ba   :  { %v3661_v19 = vmax.f32 %v3659_v53, %v3660_v4 }
0x14bc   :  { %v3662_v47 = vrot.slane %v3661_v19, 4 }
0x14be   :  { %v3663_v52 = vmax.f32 %v3661_v19, %v3662_v47 }
0x14c0   :  { %v3664_v11 = vrot.slane %v3663_v52, 2 }
0x14c2   :  { %v3665_v58 = vmax.f32 %v3663_v52, %v3664_v11  ;;  %v14161_v52 = vld [vmem:[%s15356_s0 + $0x20] sm:$0xff] }
0x14c4   :  { %v3666_v50 = vrot.slane %v3665_v58, 1 }
0x14c6   :  { %v3667_v18 = vmax.f32 %v3665_v58, %v3666_v50  ;;  %v14135_v50 = vld [vmem:[%s15356_s0] sm:$0xff] }
0x14c8   :  { %v3671_v54 = vsub.f32 %v3655_v17, %v3667_v18  ;;  %v3668_v49 = vsub.f32 %v3649_v1, %v3667_v18  ;;  %v3669_v38 = vsub.f32 %v3651_v0, %v3667_v18  ;;  %v3670_v36 = vsub.f32 %v3653_v25, %v3667_v18 }
0x14c9   :  { %v3672_v63 = vsub.f32 %v3657_v6, %v3667_v18  ;;  %v14153_v6 = vld [vmem:[%s15356_s0 + $0x18] sm:$0xff] }
0x14ca   :  { %v3679_v42 = vmul.f32 1.442695, %v3671_v54  ;;  %v3673_v2 = vmul.f32 1.442695, %v3668_v49  ;;  %v3675_v22 = vmul.f32 1.442695, %v3669_v38 }
0x14cb   :  { %v3677_v37 = vmul.f32 1.442695, %v3670_v36  ;;  %v3681_v4 = vmul.f32 1.442695, %v3672_v63  ;;  %v14141_v38 = vld [vmem:[%s15356_s0 + $0x8] sm:$0xff]  ;;  %v14168_v49 = vld [vmem:[%s15360_s4] sm:$0xff] }
0x14cc   :  { %12346 = vpow2.f32 %v3679_v42 }
0x14cd   :  { %12348 = vpow2.f32 %v3673_v2  ;;  %v14147_v2 = vld [vmem:[%s15356_s0 + $0x10] sm:$0xff] }
0x14ce   :  { %12350 = vpow2.f32 %v3675_v22 }
0x14cf   :  { %12352 = vpow2.f32 %v3677_v37 }
0x14d0   :  { %12354 = vpow2.f32 %v3681_v4 }
0x14d6   :  { %v12347_v53 = vpop.eup %12346 }
0x14d7   :  { %v12349_v47 = vpop.eup %12348  ;;  %v3686_v25 = vmul.f32 %v14153_v6, %v12347_v53 }
0x14d8   :  { %v12351_v19 = vpop.eup %12350  ;;  %v3683_v54 = vmul.f32 %v14135_v50, %v12349_v47 }
0x14d9   :  { %v12353_v58 = vpop.eup %12352  ;;  %v3684_v22 = vmul.f32 %v14141_v38, %v12351_v19  ;;  %v10932_v18 = vpack.c.bf16 %v12351_v19, %v12349_v47 }
0x14da   :  { %v3685_v0 = vmul.f32 %v14147_v2, %v12353_v58  ;;  %v12355_v17 = vpop.eup %12354  ;;  %v10935_v36 = vpack.c.bf16 %v12347_v53, %v12353_v58  ;;  %v16067_v58 = vld [vmem:[#allocation93_spill] sm:$0xff] }
0x14db   :  { %v10926_v37 = vpack.c.bf16 %v3684_v22, %v3683_v54  ;;  %v3687_v11 = vmul.f32 %v14161_v52, %v12355_v17  ;;  %v16068_v22 = vld [vmem:[#allocation99_spill] sm:$0xff] }
0x14dc   :  { %v10929_v1 = vpack.c.bf16 %v3686_v25, %v3685_v0 }
0x14dd   :  { %10927 = vmatpush3.bf16.msra.mxu1 %v10926_v37  ;;  %v16069_v37 = vld [vmem:[#allocation101_spill] sm:$0xff] }
0x14de   :  { %10928 = vmatprep.subr.bf16.mxu1 %v15738_v31 }
0x14e1   :  { %10930 = vmatpush3.bf16.msra.mxu1 %v10929_v1 }
0x14e2   :  { %9329 = vmatprep.subr.mxu1 %v15739_v51 }
0x14e5   :  { %9330 = vmatpush3.msra.mxu1 %v3687_v11 }
0x14e6   :  { %10931 = vmatprep.subr.bf16.mxu1 %v15738_v31  ;;  %9332 = vmatmul.mubr.msk.f32.vlgmr.msra.gmra.mrb[68].mxu1 %vm783_vm2, %v14168_v49 }
0x14e7   :  { %10933 = vmatpush3.bf16.msra.mxu1 %v10932_v18  ;;  %9344 = vmatprep.mubr.msk.f32.mxu1 %vm12751_vm0, %v15739_v51  ;;  %v16072_v18 = vld [vmem:[#allocation109_spill] sm:$0xff] }
0x14e8   :  { %10934 = vmatprep.subr.bf16.mxu1 %v15738_v31 }
0x14eb   :  { %10936 = vmatpush3.bf16.msra.mxu1 %v10935_v36  ;;  %v16073_v36 = vld [vmem:[#allocation110_spill] sm:$0xff] }
0x14ec   :  { %9342 = vmatprep.subr.mxu1 %v15739_v51 }
0x14ef   :  { %9343 = vmatpush3.msra.mxu1 %v12355_v17  ;;  %v16070_v17 = vld [vmem:[#allocation72_spill] sm:$0xff] }
0x14f0   :  { %9345 = vmatmul.mubr.msk.f32.vlgmr.msra.gmra.mrb[70].mxu1 %vm783_vm2, %v14168_v49  ;;  %10962 = vmatprep.subr.bf16.mxu1 %v15851_v35 }
0x14f1   :  { %10964 = vmatpush1.bf16.msra.mxu1 %v15852_v55  ;;  %3970 = vmatprep.mubr.f32.mxu1 %v15739_v51 }
0x14f2   :  { %10966 = vmatprep.subr.bf16.mxu1 %v15853_v61 }
0x14f5   :  { %10968 = vmatpush1.bf16.msra.mxu1 %v15854_v27 }
0x14f6   :  { %10970 = vmatprep.subr.bf16.mxu1 %v15956_v43 }
0x14f9   :  { %10972 = vmatpush1.bf16.msra.mxu1 %v15957_v30 }
0x14fa   :  { %10974 = vmatprep.subr.bf16.mxu1 %v15958_v28 }
0x14fd   :  { %10976 = vmatpush1.bf16.msra.mxu1 %v15959_v59 }
0x14fe   :  { %10978 = vmatprep.subr.bf16.mxu1 %v15960_v12 }
0x1501   :  { %10980 = vmatpush1.bf16.msra.mxu1 %v15961_v29 }
0x1502   :  { %10982 = vmatprep.subr.bf16.mxu1 %v15962_v26 }
0x1505   :  { %10984 = vmatpush1.bf16.msra.mxu1 %v15963_v48 }
0x1506   :  { %10986 = vmatprep.subr.bf16.mxu1 %v15863_v60 }
0x1509   :  { %10988 = vmatpush1.bf16.msra.mxu1 %v15964_v23 }
0x150a   :  { %10990 = vmatprep.subr.bf16.mxu1 %v15965_v32 }
0x150d   :  { %10992 = vmatpush1.bf16.msra.mxu1 %v15966_v46 }
0x150e   :  { %11026 = vmatprep.subr.bf16.mxu1 %v15967_v33 }
0x15b9   :  { %v3754_v42 = vpop.f32.mrb[68].mxu1 }
0x15ba   :  { %v9333_v63 = vpop.f32.mrb[69].mxu1 }
0x15bb   :  { %v16075_v63 = vld [vmem:[#allocation112_spill] sm:$0xff] }
0x15c3   :  { %v3824_v4 = vpop.f32.mrb[70].mxu1 }
0x15c4   :  { %12356 = vrcp.f32 %v3824_v4  ;;  %v9346_v53 = vpop.f32.mrb[71].mxu1  ;;  %v16076_v4 = vld [vmem:[#allocation113_spill] sm:$0xff] }
0x15c5   :  { %v16077_v53 = vld [vmem:[#allocation114_spill] sm:$0xff] }
0x15ce   :  { %v12357_v47 = vpop.eup %12356 }
0x15cf   :  { %3831 = vperm.xlu0 %12239, %v12357_v47   ;;  %v16078_v47 = vld [vmem:[#allocation115_spill] sm:$0xff] }
0x164e   :  { %v3832_v19 = vpop.permute.xlu0 %3831 }
0x164f   :  { %v3834_v54 = vmul.f32 %v3832_v19, %v3754_v42  ;;  %v16074_v42 = vld [vmem:[#allocation111_spill] sm:$0xff]  ;;  %v16079_v19 = vld [vmem:[#allocation116_spill] sm:$0xff] }
0x1651   :  { %9380 = vmatmul.mubr.f32.vlgmr.msra.gmra.mrb[44].mxu0 %v3834_v54  ;;  %v16080_v54 = vld [vmem:[#allocation117_spill] sm:$0xff] }
0x1652   :  { %10996 = vmatpush1.bf16.msra.mxu0 %v15868_v13  ;;  %4041 = vmatprep.mubr.f32.mxu0 %v15739_v51 }
0x1653   :  { %10998 = vmatprep.subr.bf16.mxu0 %v15968_v45 }
0x1656   :  { %11000 = vmatpush1.bf16.msra.mxu0 %v15969_v62 }
0x1657   :  { %11002 = vmatprep.subr.bf16.mxu0 %v15970_v10 }
0x165a   :  { %11004 = vmatpush1.bf16.msra.mxu0 %v15971_v14 }
0x165b   :  { %11006 = vmatprep.subr.bf16.mxu0 %v15972_v15 }
0x165e   :  { %11008 = vmatpush1.bf16.msra.mxu0 %v15973_v34 }
0x165f   :  { %11010 = vmatprep.subr.bf16.mxu0 %v15974_v24 }
0x1662   :  { %11012 = vmatpush1.bf16.msra.mxu0 %v15975_v8 }
0x1663   :  { %11014 = vmatprep.subr.bf16.mxu0 %v15877_v57 }
0x1666   :  { %11016 = vmatpush1.bf16.msra.mxu0 %v16067_v58 }
0x1667   :  { %11018 = vmatprep.subr.bf16.mxu0 %v15976_v21 }
0x166a   :  { %11020 = vmatpush1.bf16.msra.mxu0 %v15977_v56 }
0x166b   :  { %11022 = vmatprep.subr.bf16.mxu0 %v15978_v3 }
0x166e   :  { %11024 = vmatpush1.bf16.msra.mxu0 %v16068_v22 }
0x166f   :  { %11058 = vmatprep.subr.bf16.mxu0 %v16069_v37 }
0x1724   :  { %v3901_v0 = vpop.f32.mrb[44].mxu0 }
0x1725   :  { %v3902_v25 = vadd.f32 %v3901_v0, %v14055_v40  ;;  %v9381_v1 = vpop.f32.mrb[45].mxu0  ;;  %v16071_v40 = vld [vmem:[#allocation108_spill] sm:$0xff]  ;;  %v16081_v0 = vld [vmem:[#allocation118_spill] sm:$0xff] }
0x1726   :  { %v16083_v1 = vld [vmem:[#allocation120_spill] sm:$0xff] }
0x1727   :  { %v14215_v11 = vadd.f32 %v16070_v17, %v3902_v25  ;;  %v16082_v25 = vld [vmem:[#allocation119_spill] sm:$0xff]  ;;  %v16084_v17 = vld [vmem:[#allocation121_spill] sm:$0xff] }
0x1729   :  { %4297 = vst [vmem:[#allocation13 + $0x18] sm:$0xff] %v14215_v11  ;;  %3971 = vmatmul.mubr.f32.vlgmr.msra.gmra.mrb[72].mxu1 %v14215_v11  ;;  %4042 = vmatmul.mubr.f32.vlgmr.msra.gmra.mrb[46].mxu0 %v14215_v11 }
0x172a   :  { %11028 = vmatpush1.bf16.msra.mxu1 %v15982_v9  ;;  %11060 = vmatpush1.bf16.msra.mxu0 %v15983_v39 }
0x172b   :  { %11030 = vmatprep.subr.bf16.mxu1 %v15984_v41  ;;  %11062 = vmatprep.subr.bf16.mxu0 %v15985_v5 }
0x172c   :  { %4112 = vmatprep.mubr.f32.mxu1 %v15739_v51  ;;  %4183 = vmatprep.mubr.f32.mxu0 %v15739_v51 }
0x172e   :  { %11032 = vmatpush1.bf16.msra.mxu1 %v15986_v20  ;;  %11064 = vmatpush1.bf16.msra.mxu0 %v15987_v44 }
0x172f   :  { %11034 = vmatprep.subr.bf16.mxu1 %v16071_v40  ;;  %11066 = vmatprep.subr.bf16.mxu0 %v16072_v18  ;;  %v16137_v40 = vld [vmem:[#allocation142_spill] sm:$0xff] }
0x1732   :  { %11036 = vmatpush1.bf16.msra.mxu1 %v16073_v36  ;;  %11068 = vmatpush1.bf16.msra.mxu0 %v16074_v42  ;;  %v16085_v42 = vld [vmem:[#allocation122_spill] sm:$0xff]  ;;  %v4261_v36 = vld [vmem:[#allocation6 + $0x48] sm:$0xff] }
0x1733   :  { %11038 = vmatprep.subr.bf16.mxu1 %v16075_v63  ;;  %11070 = vmatprep.subr.bf16.mxu0 %v16076_v4  ;;  %v16086_v63 = vld [vmem:[#allocation123_spill] sm:$0xff]  ;;  %v16087_v4 = vld [vmem:[#allocation124_spill] sm:$0xff] }
0x1736   :  { %11040 = vmatpush1.bf16.msra.mxu1 %v16077_v53  ;;  %11072 = vmatpush1.bf16.msra.mxu0 %v16078_v47  ;;  %v16088_v53 = vld [vmem:[#allocation125_spill] sm:$0xff]  ;;  %v16089_v47 = vld [vmem:[#allocation126_spill] sm:$0xff] }
0x1737   :  { %11042 = vmatprep.subr.bf16.mxu1 %v16079_v19  ;;  %11074 = vmatprep.subr.bf16.mxu0 %v16080_v54  ;;  %v16090_v19 = vld [vmem:[#allocation127_spill] sm:$0xff]  ;;  %v16091_v54 = vld [vmem:[#allocation128_spill] sm:$0xff] }
0x173a   :  { %11044 = vmatpush1.bf16.msra.mxu1 %v16081_v0  ;;  %11076 = vmatpush1.bf16.msra.mxu0 %v16082_v25  ;;  %v16092_v0 = vld [vmem:[#allocation129_spill] sm:$0xff]  ;;  %v16093_v25 = vld [vmem:[#allocation130_spill] sm:$0xff] }
0x173b   :  { %11046 = vmatprep.subr.bf16.mxu1 %v16083_v1  ;;  %11078 = vmatprep.subr.bf16.mxu0 %v16084_v17  ;;  %v16094_v1 = vld [vmem:[#allocation131_spill] sm:$0xff] }
0x173e   :  { %11048 = vmatpush1.bf16.msra.mxu1 %v16085_v42  ;;  %11080 = vmatpush1.bf16.msra.mxu0 %v16086_v63  ;;  %v16095_v42 = vld [vmem:[#allocation20_spill] sm:$0xff] }
0x173f   :  { %11050 = vmatprep.subr.bf16.mxu1 %v16087_v4  ;;  %11082 = vmatprep.subr.bf16.mxu0 %v16088_v53  ;;  %v16096_v53 = vld [vmem:[#allocation132_spill] sm:$0xff] }
0x1740   :  { %v16108_v4 = vld [vmem:[#allocation136_spill] sm:$0xff] }
0x1741   :  { %v16131_v63 = vld [vmem:[#allocation56_spill] sm:$0xff] }
0x1742   :  { %11052 = vmatpush1.bf16.msra.mxu1 %v16089_v47  ;;  %11084 = vmatpush1.bf16.msra.mxu0 %v16090_v19  ;;  %v16103_v19 = vld [vmem:[#allocation25_spill] sm:$0xff]  ;;  %v16104_v47 = vld [vmem:[#allocation26_spill] sm:$0xff] }
0x1743   :  { %11054 = vmatprep.subr.bf16.mxu1 %v16091_v54  ;;  %11086 = vmatprep.subr.bf16.mxu0 %v16092_v0  ;;  %v16097_v0 = vld [vmem:[#allocation21_spill] sm:$0xff]  ;;  %v16101_v54 = vld [vmem:[#allocation24_spill] sm:$0xff] }
0x1746   :  { %11056 = vmatpush1.bf16.msra.mxu1 %v16093_v25  ;;  %11088 = vmatpush1.bf16.msra.mxu0 %v16094_v1  ;;  %v16098_v25 = vld [vmem:[#allocation22_spill] sm:$0xff]  ;;  %v16099_v1 = vld [vmem:[#allocation133_spill] sm:$0xff] }
0x1747   :  { %11089 = vmatprep.subr.bf16.mxu1 %v15738_v31  ;;  %11114 = vmatprep.subr.bf16.mxu0 %v16095_v42  ;;  %v16100_v42 = vld [vmem:[#allocation23_spill] sm:$0xff] }
0x1749   :  { %4113 = vmatmul.mubr.f32.vlgmr.msra.gmra.mrb[74].mxu1 %v14215_v11  ;;  %4184 = vmatmul.mubr.f32.vlgmr.msra.gmra.mrb[48].mxu0 %v14215_v11 }
0x174a   :  { %11091 = vmatpush3.bf16.msra.mxu1 %v16096_v53  ;;  %9414 = vmatprep.mubr.msk.f32.mxu1 %vm12751_vm0, %v15739_v51  ;;  %v16102_v53 = vld [vmem:[#allocation134_spill] sm:$0xff] }
0x174b   :  { %11092 = vmatprep.subr.bf16.mxu1 %v15738_v31  ;;  %11116 = vmatpush1.bf16.msra.mxu0 %v16097_v0  ;;  %v16105_v0 = vld [vmem:[#allocation135_spill] sm:$0xff] }
0x174c   :  { %11118 = vmatprep.subr.bf16.mxu0 %v16098_v25  ;;  %4362 = vmatprep.mubr.f32.mxu0 %v15739_v51  ;;  %v16106_v25 = vld [vmem:[#allocation27_spill] sm:$0xff] }
0x174e   :  { %11094 = vmatpush3.bf16.msra.mxu1 %v16099_v1  ;;  %v16107_v1 = vld [vmem:[#allocation28_spill] sm:$0xff] }
0x174f   :  { %11095 = vmatprep.subr.bf16.mxu1 %v15738_v31  ;;  %11120 = vmatpush1.bf16.msra.mxu0 %v16100_v42  ;;  %v16111_v42 = vld [vmem:[#allocation137_spill] sm:$0xff] }
0x1750   :  { %11122 = vmatprep.subr.bf16.mxu0 %v16101_v54  ;;  %v16109_v54 = vld [vmem:[#allocation29_spill] sm:$0xff] }
0x1752   :  { %11097 = vmatpush3.bf16.msra.mxu1 %v16102_v53  ;;  %v16110_v53 = vld [vmem:[#allocation30_spill] sm:$0xff] }
0x1753   :  { %11098 = vmatprep.subr.bf16.mxu1 %v15738_v31  ;;  %11124 = vmatpush1.bf16.msra.mxu0 %v16103_v19  ;;  %v16114_v19 = vld [vmem:[#allocation138_spill] sm:$0xff] }
0x1754   :  { %11126 = vmatprep.subr.bf16.mxu0 %v16104_v47  ;;  %v16112_v47 = vld [vmem:[#allocation31_spill] sm:$0xff] }
0x1756   :  { %11100 = vmatpush3.bf16.msra.mxu1 %v16105_v0  ;;  %v16113_v0 = vld [vmem:[#allocation32_spill] sm:$0xff] }
0x1757   :  { %11101 = vmatprep.subr.bf16.mxu1 %v15738_v31  ;;  %11128 = vmatpush1.bf16.msra.mxu0 %v16106_v25  ;;  %v16117_v25 = vld [vmem:[#allocation139_spill] sm:$0xff] }
0x1758   :  { %11130 = vmatprep.subr.bf16.mxu0 %v16107_v1  ;;  %v16115_v1 = vld [vmem:[#allocation33_spill] sm:$0xff] }
0x175a   :  { %11103 = vmatpush3.bf16.msra.mxu1 %v16108_v4  ;;  %v16116_v4 = vld [vmem:[#allocation34_spill] sm:$0xff] }
0x175b   :  { %11104 = vmatprep.subr.bf16.mxu1 %v15738_v31  ;;  %11132 = vmatpush1.bf16.msra.mxu0 %v16109_v54  ;;  %v16118_v54 = vld [vmem:[#allocation44_spill] sm:$0xff] }
0x175c   :  { %11134 = vmatprep.subr.bf16.mxu0 %v16110_v53  ;;  %v16119_v53 = vld [vmem:[#allocation35_spill] sm:$0xff] }
0x175e   :  { %11106 = vmatpush3.bf16.msra.mxu1 %v16111_v42  ;;  %v16128_v42 = vld [vmem:[#allocation53_spill] sm:$0xff] }
0x175f   :  { %11107 = vmatprep.subr.bf16.mxu1 %v15738_v31  ;;  %11136 = vmatpush1.bf16.msra.mxu0 %v16112_v47  ;;  %v16120_v47 = vld [vmem:[#allocation45_spill] sm:$0xff] }
0x1760   :  { %11138 = vmatprep.subr.bf16.mxu0 %v16113_v0  ;;  %v16122_v0 = vld [vmem:[#allocation47_spill] sm:$0xff] }
0x1762   :  { %11109 = vmatpush3.bf16.msra.mxu1 %v16114_v19  ;;  %v16121_v19 = vld [vmem:[#allocation46_spill] sm:$0xff] }
0x1763   :  { %11110 = vmatprep.subr.bf16.mxu1 %v15738_v31  ;;  %11140 = vmatpush1.bf16.msra.mxu0 %v16115_v1  ;;  %v16123_v1 = vld [vmem:[#allocation48_spill] sm:$0xff] }
0x1764   :  { %11142 = vmatprep.subr.bf16.mxu0 %v16116_v4  ;;  %v16124_v4 = vld [vmem:[#allocation49_spill] sm:$0xff] }
0x1766   :  { %11112 = vmatpush3.bf16.msra.mxu1 %v16117_v25  ;;  %v16125_v25 = vld [vmem:[#allocation50_spill] sm:$0xff] }
0x1767   :  { %11146 = vmatprep.subr.bf16.mxu1 %v16118_v54  ;;  %11144 = vmatpush1.bf16.msra.mxu0 %v16119_v53  ;;  %v16126_v54 = vld [vmem:[#allocation51_spill] sm:$0xff]  ;;  %v16127_v53 = vld [vmem:[#allocation52_spill] sm:$0xff] }
0x1768   :  { %11177 = vmatprep.subr.bf16.mxu0 %v15738_v31 }
0x1769   :  { %9415 = vmatmul.mubr.f32.vlgmr.msra.gmra.mrb[76].mxu1 %v14215_v11  ;;  %v16129_v11 = vld [vmem:[#allocation54_spill] sm:$0xff] }
0x176a   :  { %11148 = vmatpush1.bf16.msra.mxu1 %v16120_v47  ;;  %4433 = vmatprep.mubr.f32.mxu1 %v15739_v51  ;;  %v16130_v47 = vld [vmem:[#allocation55_spill] sm:$0xff] }
0x176b   :  { %11150 = vmatprep.subr.bf16.mxu1 %v16121_v19  ;;  %v16132_v19 = vld [vmem:[#allocation57_spill] sm:$0xff] }
0x176e   :  { %11152 = vmatpush1.bf16.msra.mxu1 %v16122_v0  ;;  %v16133_v0 = vld [vmem:[#allocation58_spill] sm:$0xff] }
0x176f   :  { %11154 = vmatprep.subr.bf16.mxu1 %v16123_v1  ;;  %v16134_v1 = vld [vmem:[#allocation59_spill] sm:$0xff] }
0x1772   :  { %11156 = vmatpush1.bf16.msra.mxu1 %v16124_v4 }
0x1773   :  { %11158 = vmatprep.subr.bf16.mxu1 %v16125_v25  ;;  %v16135_v25 = vld [vmem:[#allocation140_spill] sm:$0xff] }
0x1776   :  { %11160 = vmatpush1.bf16.msra.mxu1 %v16126_v54  ;;  %v3545_v54 = vadd.f32 %v14047_v16, %v16135_v25 }
0x1777   :  { %11162 = vmatprep.subr.bf16.mxu1 %v16127_v53 }
0x177a   :  { %11164 = vmatpush1.bf16.msra.mxu1 %v16128_v42 }
0x177b   :  { %11166 = vmatprep.subr.bf16.mxu1 %v16129_v11 }
0x177e   :  { %11168 = vmatpush1.bf16.msra.mxu1 %v16130_v47  ;;  %v4262_v47 = vld [vmem:[#allocation6 + $0x50] sm:$0xff] }
0x177f   :  { %11170 = vmatprep.subr.bf16.mxu1 %v16131_v63  ;;  %v16136_v63 = vld [vmem:[#allocation143_spill] sm:$0xff] }
0x1780   :  { %v3546_v18 = vadd.f32 %v16136_v63, %v13436_v7 }
0x1782   :  { %11172 = vmatpush1.bf16.msra.mxu1 %v16132_v19 }
0x1783   :  { %11174 = vmatprep.subr.bf16.mxu1 %v16133_v0  ;;  %v16138_v0 = vld [vmem:[#allocation149_spill] sm:$0xff] }
0x1784   :  { %v3547_v44 = vadd.f32 %v16138_v0, %v16137_v40 }
0x1786   :  { %11176 = vmatpush1.bf16.msra.mxu1 %v16134_v1 }
0x1787   :  { %9452 = vmatprep.subr.mxu1 %v15739_v51 }
0x17fc   :  { %v3972_v53 = vpop.f32.mrb[72].mxu1  ;;  %v4043_v4 = vpop.f32.mrb[46].mxu0 }
0x17fd   :  { %v3974_v42 = vpop.f32.mrb[73].mxu1  ;;  %v4045_v17 = vpop.f32.mrb[47].mxu0  ;;  %v4264_v19 = vmul.f32 %v4261_v36, %v3972_v53 }
0x17fe   :  { %v4270_v11 = vmul.f32 %v4045_v17, %v3545_v54  ;;  %v4265_v1 = vmul.f32 %v4262_v47, %v3974_v42  ;;  %v4263_v42 = vld [vmem:[#allocation6 + $0x58] sm:$0xff] }
0x17ff   :  { %v4266_v40 = vmul.f32 %v4263_v42, %v4043_v4  ;;  %v16143_v4 = vld [vmem:[#allocation38_spill] sm:$0xff] }
0x181c   :  { %v4114_v20 = vpop.f32.mrb[74].mxu1  ;;  %v4185_v5 = vpop.f32.mrb[48].mxu0 }
0x181d   :  { %v4271_v41 = vmul.f32 %v4114_v20, %v3546_v18  ;;  %v4267_v39 = vadd.f32 %v4264_v19, %v4185_v5  ;;  %v4116_v16 = vpop.f32.mrb[75].mxu1  ;;  %v4187_v25 = vpop.f32.mrb[49].mxu0 }
0x181e   :  { %v4272_v9 = vmul.f32 %v4116_v16, %v3547_v44  ;;  %v4268_v37 = vadd.f32 %v4265_v1, %v4187_v25  ;;  %v16145_v16 = vld [vmem:[#allocation40_spill] sm:$0xff] }
0x181f   :  { %v4273_v22 = vadd.f32 %v4270_v11, %v4267_v39  ;;  %v16144_v11 = vld [vmem:[#allocation39_spill] sm:$0xff] }
0x1820   :  { %v4280_v54 = vadd.f32 %v4271_v41, %v4268_v37  ;;  %v16139_v37 = vld [vmem:[#allocation81_spill] sm:$0xff] }
0x1821   :  { %v8235_v17 = vmul.f32 -1.442695, %v4273_v22 }
0x1822   :  { %v8236_v3 = vmul.f32 -1.442695, %v4280_v54  ;;  %v16146_v54 = vld [vmem:[#allocation41_spill] sm:$0xff] }
0x1823   :  { %12358 = vpow2.f32 %v8235_v17  ;;  %v16147_v17 = vld [vmem:[#allocation42_spill] sm:$0xff] }
0x1824   :  { %12360 = vpow2.f32 %v8236_v3 }
0x182d   :  { %v12359_v63 = vpop.eup %12358 }
0x182e   :  { %v4277_v36 = vadd.f32 1.0, %v12359_v63  ;;  %v12361_v53 = vpop.eup %12360  ;;  %v16148_v63 = vld [vmem:[#allocation43_spill] sm:$0xff] }
0x182f   :  { %v4284_v0 = vadd.f32 1.0, %v12361_v53 }
0x1830   :  { %12362 = vrcp.f32 %v4277_v36 }
0x1831   :  { %12364 = vrcp.f32 %v4284_v0  ;;  %v16149_v0 = vld [vmem:[#allocation83_spill] sm:$0xff] }
0x183a   :  { %v12363_v47 = vpop.eup %12362 }
0x183b   :  { %v4287_v20 = vmul.f32 %v12363_v47, %v4272_v9  ;;  %v12365_v39 = vpop.eup %12364  ;;  %v16141_v9 = vld [vmem:[#allocation36_spill] sm:$0xff] }
0x183c   :  { %v4256_v5 = vpop.f32.mrb[76].mxu1  ;;  %v4290_v41 = vsub.f32 1.0, %v12365_v39 }
0x183d   :  { %v4269_v18 = vadd.f32 %v4266_v40, %v4256_v5  ;;  %v9416_v44 = vpop.f32.mrb[77].mxu1  ;;  %v16142_v40 = vld [vmem:[#allocation37_spill] sm:$0xff]  ;;  %v16151_v5 = vld [vmem:[#allocation144_spill] sm:$0xff] }
0x183e   :  { %v4291_v3 = vmul.f32 %v4290_v41, %v16139_v37  ;;  %v16153_v44 = vld [vmem:[#allocation146_spill] sm:$0xff] }
0x183f   :  { %v4288_v19 = vadd.f32 %v4287_v20, %v4269_v18  ;;  %v16152_v18 = vld [vmem:[#allocation145_spill] sm:$0xff] }
0x1841   :  { %12366 = vtanh.f32 %v4288_v19  ;;  %v16154_v19 = vld [vmem:[#allocation147_spill] sm:$0xff] }
0x184b   :  { %v12367_v22 = vpop.eup %12366 }
0x184c   :  { %v4292_v25 = vmul.f32 %v12367_v22, %v12365_v39  ;;  %v16155_v39 = vld [vmem:[#allocation148_spill] sm:$0xff] }
0x184e   :  { %v14316_v1 = vadd.f32 %v4292_v25, %v4291_v3  ;;  %v16157_v3 = vld [vmem:[#allocation150_spill] sm:$0xff] }
0x1850   :  { %16140 = vst [vmem:[#allocation73_spill] sm:$0xff] %v14316_v1  ;;  %4363 = vmatmul.mubr.f32.vlgmr.msra.gmra.mrb[50].mxu0 %v14316_v1  ;;  %4295 = vst [vmem:[#allocation12 + $0x18] sm:$0xff] %v14316_v1  ;;  %4434 = vmatmul.mubr.f32.vlgmr.msra.gmra.mrb[78].mxu1 %v14316_v1 }
0x1851   :  { %11179 = vmatpush3.bf16.msra.mxu0 %v16141_v9  ;;  %9449 = vmatprep.mubr.msk.f32.mxu0 %vm12751_vm0, %v15739_v51 }
0x1852   :  { %11180 = vmatprep.subr.bf16.mxu0 %v15738_v31  ;;  %9454 = vmatprep.mubr.msk.f32.mxu1 %vm12751_vm0, %v15739_v51 }
0x1855   :  { %11182 = vmatpush3.bf16.msra.mxu0 %v16142_v40 }
0x1856   :  { %11183 = vmatprep.subr.bf16.mxu0 %v15738_v31 }
0x1859   :  { %11185 = vmatpush3.bf16.msra.mxu0 %v16143_v4 }
0x185a   :  { %11186 = vmatprep.subr.bf16.mxu0 %v15738_v31 }
0x185d   :  { %11188 = vmatpush3.bf16.msra.mxu0 %v16144_v11  ;;  %v16160_v11 = vld [vmem:[#allocation153_spill] sm:$0xff] }
0x185e   :  { %11189 = vmatprep.subr.bf16.mxu0 %v15738_v31 }
0x1861   :  { %11191 = vmatpush3.bf16.msra.mxu0 %v16145_v16 }
0x1862   :  { %11192 = vmatprep.subr.bf16.mxu0 %v15738_v31 }
0x1865   :  { %11194 = vmatpush3.bf16.msra.mxu0 %v16146_v54 }
0x1866   :  { %11195 = vmatprep.subr.bf16.mxu0 %v15738_v31 }
0x1869   :  { %11197 = vmatpush3.bf16.msra.mxu0 %v16147_v17 }
0x186a   :  { %11198 = vmatprep.subr.bf16.mxu0 %v15738_v31 }
0x186d   :  { %11200 = vmatpush3.bf16.msra.mxu0 %v16148_v63 }
0x186e   :  { %11207 = vmatprep.subr.bf16.mxu0 %v15738_v31 }
0x1870   :  { %9450 = vmatmul.mubr.f32.vlgmr.msra.gmra.mrb[52].mxu0 %v14316_v1 }
0x1871   :  { %9492 = vmatprep.mubr.msk.f32.mxu0 %vm12751_vm0, %v15739_v51 }
0x1923   :  { %v4364_v36 = vpop.f32.mrb[50].mxu0  ;;  %v14344_v53 = vpop.f32.mrb[78].mxu1 }
0x1924   :  { %v4510_v42 = vadd.f32 %v16149_v0, %v4364_v36  ;;  %v14347_v47 = vpop.f32.mrb[51].mxu0  ;;  %v14349_v20 = vpop.f32.mrb[79].mxu1 }
0x1925   :  { %16150 = vst [vmem:[#allocation74_spill] sm:$0xff] %v14349_v20 }
0x1926   :  { %9453 = vmatpush3.msra.mxu1 %v4510_v42  ;;  %v16158_v42 = vld [vmem:[#allocation151_spill] sm:$0xff] }
0x1927   :  { %9455 = vmatmul.mubr.msk.f32.vlgmr.msra.gmra.mrb[80].mxu1 %vm621_vm1, %v16151_v5  ;;  %11201 = vmatprep.subr.bf16.mxu1 %v15738_v31 }
0x1928   :  { %9457 = vmatprep.mubr.msk.f32.mxu1 %vm12751_vm0, %v15739_v51 }
0x192b   :  { %9458 = vmatmul.mubr.msk.f32.gmra.mrb[82].mxu1 %vm621_vm1, %v16152_v18 }
0x192c   :  { %9460 = vmatprep.mubr.msk.f32.mxu1 %vm12751_vm0, %v15739_v51 }
0x192f   :  { %9461 = vmatmul.mubr.msk.f32.gmra.mrb[84].mxu1 %vm621_vm1, %v16153_v44 }
0x1930   :  { %9463 = vmatprep.mubr.msk.f32.mxu1 %vm12751_vm0, %v15739_v51 }
0x1933   :  { %9464 = vmatmul.mubr.msk.f32.gmra.mrb[86].mxu1 %vm621_vm1, %v16154_v19  ;;  %v16159_v19 = vld [vmem:[#allocation154_spill] sm:$0xff] }
0x1934   :  { %9466 = vmatprep.mubr.msk.f32.mxu1 %vm12751_vm0, %v15739_v51 }
0x1937   :  { %9467 = vmatmul.mubr.msk.f32.gmra.mrb[88].mxu1 %vm621_vm1, %v16155_v39 }
0x1938   :  { %9479 = vmatprep.mubr.msk.f32.mxu1 %vm12751_vm0, %v15739_v51 }
0x1943   :  { %v14372_v41 = vpop.f32.mrb[52].mxu0 }
0x1944   :  { %16156 = vst [vmem:[#allocation75_spill] sm:$0xff] %v14372_v41  ;;  %v9451_v22 = vpop.f32.mrb[53].mxu0 }
0x19fa   :  { %v4580_v37 = vpop.f32.mrb[80].mxu1 }
0x19fb   :  { %v4581_v25 = vadd.f32 %v16157_v3, %v4580_v37  ;;  %v9456_v36 = vpop.f32.mrb[81].mxu1  ;;  %v16161_v3 = vld [vmem:[#allocation152_spill] sm:$0xff] }
0x19fc   :  { %v16162_v36 = vld [vmem:[#allocation155_spill] sm:$0xff] }
0x19fd   :  { %12368 = vtanh.f32 %v4581_v25 }
0x19fe   :  { %v4585_v0 = vpop.f32.mrb[82].mxu1 }
0x19ff   :  { %v4586_v5 = vadd.f32 %v16158_v42, %v4585_v0  ;;  %v9459_v18 = vpop.f32.mrb[83].mxu1 }
0x1a01   :  { %12370 = vtanh.f32 %v4586_v5 }
0x1a02   :  { %v4590_v44 = vpop.f32.mrb[84].mxu1 }
0x1a03   :  { %v4591_v63 = vadd.f32 %v16159_v19, %v4590_v44  ;;  %v9462_v39 = vpop.f32.mrb[85].mxu1 }
0x1a05   :  { %12372 = vtanh.f32 %v4591_v63 }
0x1a06   :  { %v4595_v17 = vpop.f32.mrb[86].mxu1 }
0x1a07   :  { %v12369_v54 = vpop.eup %12368  ;;  %v9465_v16 = vpop.f32.mrb[87].mxu1  ;;  %v4596_v25 = vadd.f32 %v16161_v3, %v4595_v17 }
0x1a08   :  { %v4609_v22 = vmul.f32 %v16160_v11, %v12369_v54 }
0x1a0a   :  { %v4600_v4 = vpop.f32.mrb[88].mxu1  ;;  %4614 = vadd.xlane.f32.xlu1 %v4609_v22 }
0x1a0b   :  { %v12371_v37 = vpop.eup %12370  ;;  %v4601_v40 = vadd.f32 %v16162_v36, %v4600_v4  ;;  %v9468_v0 = vpop.f32.mrb[89].mxu1 }
0x1a0c   :  { %v4610_v42 = vmul.f32 %v16160_v11, %v12371_v37 }
0x1a0d   :  { %12374 = vtanh.f32 %v4601_v40 }
0x1a0e   :  { %4616 = vadd.xlane.f32.xlu1 %v4610_v42  ;;  %12376 = vtanh.f32 %v4596_v25 }
0x1a0f   :  { %v12373_v5 = vpop.eup %12372 }
0x1a10   :  { %v4611_v63 = vmul.f32 %v16160_v11, %v12373_v5 }
0x1a12   :  { %4618 = vadd.xlane.f32.xlu0 %v4611_v63 }
0x1a17   :  { %v12375_v16 = vpop.eup %12374 }
0x1a18   :  { %v4613_v54 = vmul.f32 %v16160_v11, %v12375_v16  ;;  %v12377_v18 = vpop.eup %12376 }
0x1a19   :  { %v4612_v44 = vmul.f32 %v16160_v11, %v12377_v18 }
0x1a1a   :  { %4622 = vadd.xlane.f32.xlu1 %v4613_v54 }
0x1a1e   :  { %4620 = vadd.xlane.f32.xlu1 %v4612_v44 }
0x1a97   :  { %v4615_v17 = vpop.xlane.xlu1 %4614 }
0x1a9b   :  { %v4617_v4 = vpop.xlane.xlu1 %4616 }
0x1a9f   :  { %v4619_v22 = vpop.xlane.xlu0 %4618 }
0x1aa7   :  { %v4623_v19 = vpop.xlane.xlu1 %4622 }
0x1aa8   :  { %v4624_v39 = vmax.f32 %v4615_v17, %v4623_v19 }
0x1aaa   :  { %v4625_v37 = vmax.f32 %v4624_v39, %v4617_v4 }
0x1aab   :  { %v4621_v40 = vpop.xlane.xlu1 %4620 }
0x1aac   :  { %v4626_v3 = vmax.f32 %v4619_v22, %v4621_v40 }
0x1aae   :  { %v4627_v25 = vmax.f32 %v4625_v37, %v4626_v3 }
0x1ab0   :  { %v4628_v36 = vrot.slane %v4627_v25, 4 }
0x1ab2   :  { %v4629_v0 = vmax.f32 %v4627_v25, %v4628_v36 }
0x1ab4   :  { %v4630_v42 = vrot.slane %v4629_v0, 2 }
0x1ab6   :  { %v4631_v5 = vmax.f32 %v4629_v0, %v4630_v42  ;;  %v16169_v0 = vld [vmem:[#allocation66_spill] sm:$0xff]  ;;  %v16170_v42 = vld [vmem:[#allocation67_spill] sm:$0xff] }
0x1ab8   :  { %v4632_v63 = vrot.slane %v4631_v5, 1 }
0x1aba   :  { %v4633_v16 = vmax.f32 %v4631_v5, %v4632_v63  ;;  %v16171_v5 = vld [vmem:[#allocation69_spill] sm:$0xff] }
0x1abc   :  { %v4637_v9 = vsub.f32 %v4621_v40, %v4633_v16  ;;  %v4634_v54 = vsub.f32 %v4615_v17, %v4633_v16  ;;  %v4635_v1 = vsub.f32 %v4617_v4, %v4633_v16  ;;  %v4636_v11 = vsub.f32 %v4619_v22, %v4633_v16 }
0x1abd   :  { %v4638_v7 = vsub.f32 %v4623_v19, %v4633_v16  ;;  %v16168_v19 = vld [vmem:[#allocation65_spill] sm:$0xff] }
0x1abe   :  { %v4645_v18 = vmul.f32 1.442695, %v4637_v9  ;;  %v4639_v44 = vmul.f32 1.442695, %v4634_v54  ;;  %v4641_v41 = vmul.f32 1.442695, %v4635_v1 }
0x1abf   :  { %v4643_v20 = vmul.f32 1.442695, %v4636_v11  ;;  %v4647_v39 = vmul.f32 1.442695, %v4638_v7 }
0x1ac0   :  { %12378 = vpow2.f32 %v4645_v18 }
0x1ac1   :  { %12380 = vpow2.f32 %v4639_v44 }
0x1ac2   :  { %12382 = vpow2.f32 %v4641_v41 }
0x1ac3   :  { %12384 = vpow2.f32 %v4643_v20 }
0x1ac4   :  { %12386 = vpow2.f32 %v4647_v39 }
0x1aca   :  { %v12379_v37 = vpop.eup %12378 }
0x1acb   :  { %v12381_v3 = vpop.eup %12380  ;;  %v4652_v22 = vmul.f32 %v14153_v6, %v12379_v37  ;;  %v16165_v6 = vld [vmem:[#allocation62_spill] sm:$0xff] }
0x1acc   :  { %v12383_v25 = vpop.eup %12382  ;;  %v4649_v36 = vmul.f32 %v14135_v50, %v12381_v3 }
0x1acd   :  { %v12385_v40 = vpop.eup %12384  ;;  %v11208_v17 = vpack.c.bf16 %v12383_v25, %v12381_v3  ;;  %v4650_v4 = vmul.f32 %v14141_v38, %v12383_v25  ;;  %v16163_v38 = vld [vmem:[#allocation60_spill] sm:$0xff]  ;;  %v16173_v3 = vld [vmem:[#allocation99_spill] sm:$0xff]  ;;  %v16174_v25 = vld [vmem:[#allocation101_spill] sm:$0xff] }
0x1ace   :  { %v4651_v1 = vmul.f32 %v14147_v2, %v12385_v40  ;;  %v11211_v7 = vpack.c.bf16 %v12379_v37, %v12385_v40  ;;  %v12387_v41 = vpop.eup %12386  ;;  %v16164_v2 = vld [vmem:[#allocation61_spill] sm:$0xff] }
0x1acf   :  { %11209 = vmatpush3.bf16.msra.mxu0 %v11208_v17  ;;  %v11202_v9 = vpack.c.bf16 %v4650_v4, %v4649_v36  ;;  %v4653_v50 = vmul.f32 %v14161_v52, %v12387_v41  ;;  %v16166_v52 = vld [vmem:[#allocation63_spill] sm:$0xff]  ;;  %v16172_v37 = vld [vmem:[#allocation97_spill] sm:$0xff] }
0x1ad0   :  { %11210 = vmatprep.subr.bf16.mxu0 %v15738_v31  ;;  %v11205_v20 = vpack.c.bf16 %v4652_v22, %v4651_v1  ;;  %v14455_v4 = vld [vmem:[%s15367_s11] ss:$0 sm:$0xff]  ;;  %v16176_v1 = vld [vmem:[#allocation102_spill] sm:$0xff] }
0x1ad1   :  { %11203 = vmatpush3.bf16.msra.mxu1 %v11202_v9  ;;  %16175 = vst [vmem:[#allocation76_spill] sm:$0xff] %v14455_v4  ;;  %v16177_v22 = vld [vmem:[#allocation103_spill] sm:$0xff] }
0x1ad2   :  { %11204 = vmatprep.subr.bf16.mxu1 %v15738_v31 }
0x1ad3   :  { %11212 = vmatpush3.bf16.msra.mxu0 %v11211_v7  ;;  %v16179_v7 = vld [vmem:[#allocation105_spill] sm:$0xff] }
0x1ad4   :  { %9490 = vmatprep.subr.mxu0 %v15739_v51 }
0x1ad5   :  { %11206 = vmatpush3.bf16.msra.mxu1 %v11205_v20  ;;  %v16180_v20 = vld [vmem:[#allocation106_spill] sm:$0xff] }
0x1ad6   :  { %9477 = vmatprep.subr.mxu1 %v15739_v51 }
0x1ad7   :  { %9491 = vmatpush3.msra.mxu0 %v12387_v41  ;;  %v16181_v41 = vld [vmem:[#allocation107_spill] sm:$0xff] }
0x1ad8   :  { %9493 = vmatmul.mubr.msk.f32.vlgmr.msra.gmra.mrb[54].mxu0 %vm783_vm2, %v14168_v49  ;;  %11238 = vmatprep.subr.bf16.mxu0 %v15851_v35 }
0x1ad9   :  { %9478 = vmatpush3.msra.mxu1 %v4653_v50  ;;  %11240 = vmatpush1.bf16.msra.mxu0 %v15852_v55  ;;  %v16182_v50 = vld [vmem:[#allocation108_spill] sm:$0xff] }
0x1ada   :  { %9480 = vmatmul.mubr.msk.f32.vlgmr.msra.gmra.mrb[90].mxu1 %vm783_vm2, %v14168_v49  ;;  %11213 = vmatprep.subr.bf16.mxu1 %v15738_v31  ;;  %v16167_v49 = vld [vmem:[#allocation64_spill] sm:$0xff] }
0x1adb   :  { %11215 = vmatpush3.bf16.msra.mxu1 %v16163_v38  ;;  %9527 = vmatprep.mubr.msk.f32.mxu1 %vm12751_vm0, %v15739_v51 }
0x1adc   :  { %11216 = vmatprep.subr.bf16.mxu1 %v15738_v31  ;;  %11242 = vmatprep.subr.bf16.mxu0 %v15853_v61 }
0x1add   :  { %11244 = vmatpush1.bf16.msra.mxu0 %v15854_v27  ;;  %4936 = vmatprep.mubr.f32.mxu0 %v15739_v51 }
0x1ade   :  { %11246 = vmatprep.subr.bf16.mxu0 %v15956_v43 }
0x1adf   :  { %11218 = vmatpush3.bf16.msra.mxu1 %v16164_v2 }
0x1ae0   :  { %11219 = vmatprep.subr.bf16.mxu1 %v15738_v31 }
0x1ae1   :  { %11248 = vmatpush1.bf16.msra.mxu0 %v15957_v30 }
0x1ae2   :  { %11250 = vmatprep.subr.bf16.mxu0 %v15958_v28 }
0x1ae3   :  { %11221 = vmatpush3.bf16.msra.mxu1 %v16165_v6 }
0x1ae4   :  { %11222 = vmatprep.subr.bf16.mxu1 %v15738_v31 }
0x1ae5   :  { %11252 = vmatpush1.bf16.msra.mxu0 %v15959_v59 }
0x1ae6   :  { %11254 = vmatprep.subr.bf16.mxu0 %v15960_v12 }
0x1ae7   :  { %11224 = vmatpush3.bf16.msra.mxu1 %v16166_v52 }
0x1ae8   :  { %11225 = vmatprep.subr.bf16.mxu1 %v15738_v31 }
0x1ae9   :  { %11256 = vmatpush1.bf16.msra.mxu0 %v15961_v29 }
0x1aea   :  { %11258 = vmatprep.subr.bf16.mxu0 %v15962_v26 }
0x1aeb   :  { %11227 = vmatpush3.bf16.msra.mxu1 %v16167_v49 }
0x1aec   :  { %11228 = vmatprep.subr.bf16.mxu1 %v15738_v31 }
0x1aed   :  { %11260 = vmatpush1.bf16.msra.mxu0 %v15963_v48 }
0x1aee   :  { %11262 = vmatprep.subr.bf16.mxu0 %v15863_v60 }
0x1aef   :  { %11230 = vmatpush3.bf16.msra.mxu1 %v16168_v19 }
0x1af0   :  { %11231 = vmatprep.subr.bf16.mxu1 %v15738_v31 }
0x1af1   :  { %11264 = vmatpush1.bf16.msra.mxu0 %v15964_v23 }
0x1af2   :  { %11266 = vmatprep.subr.bf16.mxu0 %v15965_v32 }
0x1af3   :  { %11233 = vmatpush3.bf16.msra.mxu1 %v16169_v0 }
0x1af4   :  { %11234 = vmatprep.subr.bf16.mxu1 %v15738_v31 }
0x1af5   :  { %11268 = vmatpush1.bf16.msra.mxu0 %v15966_v46 }
0x1af6   :  { %11302 = vmatprep.subr.bf16.mxu0 %v15967_v33 }
0x1af7   :  { %11236 = vmatpush3.bf16.msra.mxu1 %v16170_v42 }
0x1af8   :  { %11270 = vmatprep.subr.bf16.mxu1 %v16171_v5 }
0x1bab   :  { %v4790_v63 = vpop.f32.mrb[54].mxu0 }
0x1bac   :  { %12388 = vrcp.f32 %v4790_v63  ;;  %v9494_v16 = vpop.f32.mrb[55].mxu0  ;;  %v16183_v63 = vld [vmem:[#allocation109_spill] sm:$0xff] }
0x1bad   :  { %v4720_v54 = vpop.f32.mrb[90].mxu1  ;;  %v16184_v16 = vld [vmem:[#allocation110_spill] sm:$0xff] }
0x1bae   :  { %v9481_v11 = vpop.f32.mrb[91].mxu1 }
0x1baf   :  { %v16186_v11 = vld [vmem:[#allocation112_spill] sm:$0xff] }
0x1bb6   :  { %v12389_v18 = vpop.eup %12388 }
0x1bb7   :  { %4797 = vperm.xlu1 %12238, %v12389_v18   ;;  %v16187_v18 = vld [vmem:[#allocation113_spill] sm:$0xff] }
0x1c36   :  { %v4798_v44 = vpop.permute.xlu1 %4797 }
0x1c37   :  { %v4800_v39 = vmul.f32 %v4798_v44, %v4720_v54  ;;  %v16185_v54 = vld [vmem:[#allocation111_spill] sm:$0xff]  ;;  %v16188_v44 = vld [vmem:[#allocation114_spill] sm:$0xff] }
0x1c39   :  { %9528 = vmatmul.mubr.f32.vlgmr.msra.gmra.mrb[92].mxu1 %v4800_v39  ;;  %v16189_v39 = vld [vmem:[#allocation115_spill] sm:$0xff] }
0x1c3a   :  { %11272 = vmatpush1.bf16.msra.mxu1 %v15868_v13  ;;  %5007 = vmatprep.mubr.f32.mxu1 %v15739_v51 }
0x1c3b   :  { %11274 = vmatprep.subr.bf16.mxu1 %v15968_v45 }
0x1c3e   :  { %11276 = vmatpush1.bf16.msra.mxu1 %v15969_v62 }
0x1c3f   :  { %11278 = vmatprep.subr.bf16.mxu1 %v15970_v10 }
0x1c42   :  { %11280 = vmatpush1.bf16.msra.mxu1 %v15971_v14 }
0x1c43   :  { %11282 = vmatprep.subr.bf16.mxu1 %v15972_v15 }
0x1c46   :  { %11284 = vmatpush1.bf16.msra.mxu1 %v15973_v34 }
0x1c47   :  { %11286 = vmatprep.subr.bf16.mxu1 %v15974_v24 }
0x1c4a   :  { %11288 = vmatpush1.bf16.msra.mxu1 %v15975_v8 }
0x1c4b   :  { %11290 = vmatprep.subr.bf16.mxu1 %v15877_v57 }
0x1c4e   :  { %11292 = vmatpush1.bf16.msra.mxu1 %v16067_v58 }
0x1c4f   :  { %11294 = vmatprep.subr.bf16.mxu1 %v15976_v21 }
0x1c52   :  { %11296 = vmatpush1.bf16.msra.mxu1 %v15977_v56 }
0x1c53   :  { %11298 = vmatprep.subr.bf16.mxu1 %v16172_v37 }
0x1c56   :  { %11300 = vmatpush1.bf16.msra.mxu1 %v16173_v3 }
0x1c57   :  { %11334 = vmatprep.subr.bf16.mxu1 %v16174_v25 }
0x1d0c   :  { %v4867_v36 = vpop.f32.mrb[92].mxu1 }
0x1d0d   :  { %v4868_v40 = vadd.f32 %v4867_v36, %v14347_v47  ;;  %v9529_v17 = vpop.f32.mrb[93].mxu1  ;;  %v16178_v47 = vld [vmem:[#allocation104_spill] sm:$0xff] }
0x1d0e   :  { %v16190_v36 = vld [vmem:[#allocation116_spill] sm:$0xff]  ;;  %v16192_v17 = vld [vmem:[#allocation118_spill] sm:$0xff] }
0x1d0f   :  { %v14458_v9 = vadd.f32 %v14455_v4, %v4868_v40  ;;  %v16191_v40 = vld [vmem:[#allocation117_spill] sm:$0xff] }
0x1d11   :  { %5263 = vst [vmem:[#allocation13 + $0x20] sm:$0xff] %v14458_v9  ;;  %4937 = vmatmul.mubr.f32.vlgmr.msra.gmra.mrb[56].mxu0 %v14458_v9  ;;  %5008 = vmatmul.mubr.f32.vlgmr.msra.gmra.mrb[94].mxu1 %v14458_v9 }
0x1d12   :  { %11304 = vmatpush1.bf16.msra.mxu0 %v16176_v1  ;;  %11336 = vmatpush1.bf16.msra.mxu1 %v16177_v22 }
0x1d13   :  { %11306 = vmatprep.subr.bf16.mxu0 %v16178_v47  ;;  %11338 = vmatprep.subr.bf16.mxu1 %v16179_v7  ;;  %v16249_v47 = vld [vmem:[#allocation142_spill] sm:$0xff] }
0x1d14   :  { %5078 = vmatprep.mubr.f32.mxu0 %v15739_v51  ;;  %5149 = vmatprep.mubr.f32.mxu1 %v15739_v51 }
0x1d16   :  { %11308 = vmatpush1.bf16.msra.mxu0 %v16180_v20  ;;  %11340 = vmatpush1.bf16.msra.mxu1 %v16181_v41  ;;  %v5227_v41 = vld [vmem:[#allocation6 + $0x60] sm:$0xff]  ;;  %v16247_v20 = vld [vmem:[#allocation141_spill] sm:$0xff] }
0x1d17   :  { %11310 = vmatprep.subr.bf16.mxu0 %v16182_v50  ;;  %11342 = vmatprep.subr.bf16.mxu1 %v16183_v63  ;;  %v16193_v50 = vld [vmem:[#allocation119_spill] sm:$0xff]  ;;  %v16194_v63 = vld [vmem:[#allocation120_spill] sm:$0xff] }
0x1d1a   :  { %11312 = vmatpush1.bf16.msra.mxu0 %v16184_v16  ;;  %11344 = vmatpush1.bf16.msra.mxu1 %v16185_v54  ;;  %v16195_v16 = vld [vmem:[#allocation121_spill] sm:$0xff]  ;;  %v16196_v54 = vld [vmem:[#allocation122_spill] sm:$0xff] }
0x1d1b   :  { %11314 = vmatprep.subr.bf16.mxu0 %v16186_v11  ;;  %11346 = vmatprep.subr.bf16.mxu1 %v16187_v18  ;;  %v16197_v11 = vld [vmem:[#allocation123_spill] sm:$0xff]  ;;  %v16198_v18 = vld [vmem:[#allocation124_spill] sm:$0xff] }
0x1d1e   :  { %11316 = vmatpush1.bf16.msra.mxu0 %v16188_v44  ;;  %11348 = vmatpush1.bf16.msra.mxu1 %v16189_v39  ;;  %v16199_v44 = vld [vmem:[#allocation125_spill] sm:$0xff]  ;;  %v16200_v39 = vld [vmem:[#allocation126_spill] sm:$0xff] }
0x1d1f   :  { %11318 = vmatprep.subr.bf16.mxu0 %v16190_v36  ;;  %11350 = vmatprep.subr.bf16.mxu1 %v16191_v40  ;;  %v16201_v36 = vld [vmem:[#allocation127_spill] sm:$0xff]  ;;  %v16202_v40 = vld [vmem:[#allocation128_spill] sm:$0xff] }
0x1d22   :  { %11320 = vmatpush1.bf16.msra.mxu0 %v16192_v17  ;;  %11352 = vmatpush1.bf16.msra.mxu1 %v16193_v50  ;;  %v16203_v17 = vld [vmem:[#allocation129_spill] sm:$0xff]  ;;  %v16204_v50 = vld [vmem:[#allocation130_spill] sm:$0xff] }
0x1d23   :  { %11322 = vmatprep.subr.bf16.mxu0 %v16194_v63  ;;  %11354 = vmatprep.subr.bf16.mxu1 %v16195_v16  ;;  %v16205_v63 = vld [vmem:[#allocation131_spill] sm:$0xff] }
0x1d26   :  { %11324 = vmatpush1.bf16.msra.mxu0 %v16196_v54  ;;  %11356 = vmatpush1.bf16.msra.mxu1 %v16197_v11  ;;  %v16206_v54 = vld [vmem:[#allocation20_spill] sm:$0xff] }
0x1d27   :  { %11326 = vmatprep.subr.bf16.mxu0 %v16198_v18  ;;  %11358 = vmatprep.subr.bf16.mxu1 %v16199_v44  ;;  %v16207_v44 = vld [vmem:[#allocation132_spill] sm:$0xff] }
0x1d28   :  { %v16219_v18 = vld [vmem:[#allocation136_spill] sm:$0xff] }
0x1d29   :  { %v16242_v11 = vld [vmem:[#allocation56_spill] sm:$0xff] }
0x1d2a   :  { %11328 = vmatpush1.bf16.msra.mxu0 %v16200_v39  ;;  %11360 = vmatpush1.bf16.msra.mxu1 %v16201_v36  ;;  %v16214_v36 = vld [vmem:[#allocation25_spill] sm:$0xff]  ;;  %v16215_v39 = vld [vmem:[#allocation26_spill] sm:$0xff] }
0x1d2b   :  { %11330 = vmatprep.subr.bf16.mxu0 %v16202_v40  ;;  %11362 = vmatprep.subr.bf16.mxu1 %v16203_v17  ;;  %v16208_v17 = vld [vmem:[#allocation21_spill] sm:$0xff]  ;;  %v16212_v40 = vld [vmem:[#allocation24_spill] sm:$0xff] }
0x1d2e   :  { %11332 = vmatpush1.bf16.msra.mxu0 %v16204_v50  ;;  %11364 = vmatpush1.bf16.msra.mxu1 %v16205_v63  ;;  %v16209_v50 = vld [vmem:[#allocation22_spill] sm:$0xff]  ;;  %v16210_v63 = vld [vmem:[#allocation133_spill] sm:$0xff] }
0x1d2f   :  { %11365 = vmatprep.subr.bf16.mxu0 %v15738_v31  ;;  %11390 = vmatprep.subr.bf16.mxu1 %v16206_v54  ;;  %v16211_v54 = vld [vmem:[#allocation23_spill] sm:$0xff] }
0x1d31   :  { %5079 = vmatmul.mubr.f32.vlgmr.msra.gmra.mrb[58].mxu0 %v14458_v9  ;;  %5150 = vmatmul.mubr.f32.vlgmr.msra.gmra.mrb[96].mxu1 %v14458_v9 }
0x1d32   :  { %11367 = vmatpush3.bf16.msra.mxu0 %v16207_v44  ;;  %9562 = vmatprep.mubr.msk.f32.mxu0 %vm12751_vm0, %v15739_v51  ;;  %v16213_v44 = vld [vmem:[#allocation134_spill] sm:$0xff] }
0x1d33   :  { %11368 = vmatprep.subr.bf16.mxu0 %v15738_v31  ;;  %11392 = vmatpush1.bf16.msra.mxu1 %v16208_v17  ;;  %v16216_v17 = vld [vmem:[#allocation135_spill] sm:$0xff] }
0x1d34   :  { %11394 = vmatprep.subr.bf16.mxu1 %v16209_v50  ;;  %5328 = vmatprep.mubr.f32.mxu1 %v15739_v51  ;;  %v16217_v50 = vld [vmem:[#allocation27_spill] sm:$0xff] }
0x1d36   :  { %11370 = vmatpush3.bf16.msra.mxu0 %v16210_v63  ;;  %v16218_v63 = vld [vmem:[#allocation28_spill] sm:$0xff] }
0x1d37   :  { %11371 = vmatprep.subr.bf16.mxu0 %v15738_v31  ;;  %11396 = vmatpush1.bf16.msra.mxu1 %v16211_v54  ;;  %v16222_v54 = vld [vmem:[#allocation137_spill] sm:$0xff] }
0x1d38   :  { %11398 = vmatprep.subr.bf16.mxu1 %v16212_v40  ;;  %v16220_v40 = vld [vmem:[#allocation29_spill] sm:$0xff] }
0x1d3a   :  { %11373 = vmatpush3.bf16.msra.mxu0 %v16213_v44  ;;  %v16221_v44 = vld [vmem:[#allocation30_spill] sm:$0xff] }
0x1d3b   :  { %11374 = vmatprep.subr.bf16.mxu0 %v15738_v31  ;;  %11400 = vmatpush1.bf16.msra.mxu1 %v16214_v36  ;;  %v16225_v36 = vld [vmem:[#allocation138_spill] sm:$0xff] }
0x1d3c   :  { %11402 = vmatprep.subr.bf16.mxu1 %v16215_v39  ;;  %v16223_v39 = vld [vmem:[#allocation31_spill] sm:$0xff] }
0x1d3e   :  { %11376 = vmatpush3.bf16.msra.mxu0 %v16216_v17  ;;  %v16224_v17 = vld [vmem:[#allocation32_spill] sm:$0xff] }
0x1d3f   :  { %11377 = vmatprep.subr.bf16.mxu0 %v15738_v31  ;;  %11404 = vmatpush1.bf16.msra.mxu1 %v16217_v50  ;;  %v16228_v50 = vld [vmem:[#allocation139_spill] sm:$0xff] }
0x1d40   :  { %11406 = vmatprep.subr.bf16.mxu1 %v16218_v63  ;;  %v16226_v63 = vld [vmem:[#allocation33_spill] sm:$0xff] }
0x1d42   :  { %11379 = vmatpush3.bf16.msra.mxu0 %v16219_v18  ;;  %v16227_v18 = vld [vmem:[#allocation34_spill] sm:$0xff] }
0x1d43   :  { %11380 = vmatprep.subr.bf16.mxu0 %v15738_v31  ;;  %11408 = vmatpush1.bf16.msra.mxu1 %v16220_v40  ;;  %v16229_v40 = vld [vmem:[#allocation44_spill] sm:$0xff] }
0x1d44   :  { %11410 = vmatprep.subr.bf16.mxu1 %v16221_v44  ;;  %v16230_v44 = vld [vmem:[#allocation35_spill] sm:$0xff] }
0x1d46   :  { %11382 = vmatpush3.bf16.msra.mxu0 %v16222_v54  ;;  %v16239_v54 = vld [vmem:[#allocation53_spill] sm:$0xff] }
0x1d47   :  { %11383 = vmatprep.subr.bf16.mxu0 %v15738_v31  ;;  %11412 = vmatpush1.bf16.msra.mxu1 %v16223_v39  ;;  %v16231_v39 = vld [vmem:[#allocation45_spill] sm:$0xff] }
0x1d48   :  { %11414 = vmatprep.subr.bf16.mxu1 %v16224_v17  ;;  %v16233_v17 = vld [vmem:[#allocation47_spill] sm:$0xff] }
0x1d4a   :  { %11385 = vmatpush3.bf16.msra.mxu0 %v16225_v36  ;;  %v16232_v36 = vld [vmem:[#allocation46_spill] sm:$0xff] }
0x1d4b   :  { %11386 = vmatprep.subr.bf16.mxu0 %v15738_v31  ;;  %11416 = vmatpush1.bf16.msra.mxu1 %v16226_v63  ;;  %v16234_v63 = vld [vmem:[#allocation48_spill] sm:$0xff] }
0x1d4c   :  { %11418 = vmatprep.subr.bf16.mxu1 %v16227_v18  ;;  %v16235_v18 = vld [vmem:[#allocation49_spill] sm:$0xff] }
0x1d4e   :  { %11388 = vmatpush3.bf16.msra.mxu0 %v16228_v50  ;;  %v16236_v50 = vld [vmem:[#allocation50_spill] sm:$0xff] }
0x1d4f   :  { %11422 = vmatprep.subr.bf16.mxu0 %v16229_v40  ;;  %11420 = vmatpush1.bf16.msra.mxu1 %v16230_v44  ;;  %v16237_v40 = vld [vmem:[#allocation51_spill] sm:$0xff]  ;;  %v16238_v44 = vld [vmem:[#allocation52_spill] sm:$0xff] }
0x1d50   :  { %11453 = vmatprep.subr.bf16.mxu1 %v15738_v31 }
0x1d51   :  { %9563 = vmatmul.mubr.f32.vlgmr.msra.gmra.mrb[60].mxu0 %v14458_v9  ;;  %v16240_v9 = vld [vmem:[#allocation54_spill] sm:$0xff] }
0x1d52   :  { %11424 = vmatpush1.bf16.msra.mxu0 %v16231_v39  ;;  %5399 = vmatprep.mubr.f32.mxu0 %v15739_v51  ;;  %v16241_v39 = vld [vmem:[#allocation55_spill] sm:$0xff] }
0x1d53   :  { %11426 = vmatprep.subr.bf16.mxu0 %v16232_v36  ;;  %v16243_v36 = vld [vmem:[#allocation57_spill] sm:$0xff] }
0x1d56   :  { %11428 = vmatpush1.bf16.msra.mxu0 %v16233_v17  ;;  %v16244_v17 = vld [vmem:[#allocation58_spill] sm:$0xff] }
0x1d57   :  { %11430 = vmatprep.subr.bf16.mxu0 %v16234_v63  ;;  %v16245_v63 = vld [vmem:[#allocation59_spill] sm:$0xff] }
0x1d5a   :  { %11432 = vmatpush1.bf16.msra.mxu0 %v16235_v18 }
0x1d5b   :  { %11434 = vmatprep.subr.bf16.mxu0 %v16236_v50  ;;  %v16246_v50 = vld [vmem:[#allocation140_spill] sm:$0xff] }
0x1d5e   :  { %11436 = vmatpush1.bf16.msra.mxu0 %v16237_v40  ;;  %v4511_v40 = vadd.f32 %v14344_v53, %v16246_v50 }
0x1d5f   :  { %11438 = vmatprep.subr.bf16.mxu0 %v16238_v44 }
0x1d62   :  { %11440 = vmatpush1.bf16.msra.mxu0 %v16239_v54 }
0x1d63   :  { %11442 = vmatprep.subr.bf16.mxu0 %v16240_v9 }
0x1d66   :  { %11444 = vmatpush1.bf16.msra.mxu0 %v16241_v39  ;;  %v5228_v39 = vld [vmem:[#allocation6 + $0x68] sm:$0xff] }
0x1d67   :  { %11446 = vmatprep.subr.bf16.mxu0 %v16242_v11  ;;  %v16248_v11 = vld [vmem:[#allocation74_spill] sm:$0xff] }
0x1d68   :  { %v4512_v7 = vadd.f32 %v16248_v11, %v16247_v20 }
0x1d6a   :  { %11448 = vmatpush1.bf16.msra.mxu0 %v16243_v36 }
0x1d6b   :  { %11450 = vmatprep.subr.bf16.mxu0 %v16244_v17  ;;  %v16250_v17 = vld [vmem:[#allocation75_spill] sm:$0xff] }
0x1d6c   :  { %v4513_v22 = vadd.f32 %v16250_v17, %v16249_v47 }
0x1d6e   :  { %11452 = vmatpush1.bf16.msra.mxu0 %v16245_v63 }
0x1d6f   :  { %9600 = vmatprep.subr.mxu0 %v15739_v51 }
0x1de4   :  { %v4938_v44 = vpop.f32.mrb[56].mxu0  ;;  %v5009_v18 = vpop.f32.mrb[94].mxu1 }
0x1de5   :  { %v4940_v54 = vpop.f32.mrb[57].mxu0  ;;  %v5011_v16 = vpop.f32.mrb[95].mxu1  ;;  %v5230_v36 = vmul.f32 %v5227_v41, %v4938_v44 }
0x1de6   :  { %v5236_v9 = vmul.f32 %v5011_v16, %v4511_v40  ;;  %v5231_v63 = vmul.f32 %v5228_v39, %v4940_v54  ;;  %v5229_v54 = vld [vmem:[#allocation6 + $0x70] sm:$0xff] }
0x1de7   :  { %v5232_v47 = vmul.f32 %v5229_v54, %v5009_v18  ;;  %v16255_v18 = vld [vmem:[#allocation38_spill] sm:$0xff] }
0x1e04   :  { %v5080_v1 = vpop.f32.mrb[58].mxu0  ;;  %v5151_v4 = vpop.f32.mrb[96].mxu1 }
0x1e05   :  { %v5237_v25 = vmul.f32 %v5080_v1, %v4512_v7  ;;  %v5233_v3 = vadd.f32 %v5230_v36, %v5151_v4  ;;  %v5082_v53 = vpop.f32.mrb[59].mxu0  ;;  %v5153_v50 = vpop.f32.mrb[97].mxu1 }
0x1e06   :  { %v5238_v37 = vmul.f32 %v5082_v53, %v4513_v22  ;;  %v5234_v56 = vadd.f32 %v5231_v63, %v5153_v50  ;;  %v16257_v53 = vld [vmem:[#allocation40_spill] sm:$0xff] }
0x1e07   :  { %v5239_v21 = vadd.f32 %v5236_v9, %v5233_v3  ;;  %v16256_v9 = vld [vmem:[#allocation39_spill] sm:$0xff] }
0x1e08   :  { %v5246_v16 = vadd.f32 %v5237_v25, %v5234_v56  ;;  %v16251_v25 = vld [vmem:[#allocation73_spill] sm:$0xff] }
0x1e09   :  { %v8244_v40 = vmul.f32 -1.442695, %v5239_v21 }
0x1e0a   :  { %v8245_v58 = vmul.f32 -1.442695, %v5246_v16  ;;  %v16258_v16 = vld [vmem:[#allocation41_spill] sm:$0xff] }
0x1e0b   :  { %12390 = vpow2.f32 %v8244_v40  ;;  %v16259_v40 = vld [vmem:[#allocation42_spill] sm:$0xff] }
0x1e0c   :  { %12392 = vpow2.f32 %v8245_v58 }
0x1e15   :  { %v12391_v11 = vpop.eup %12390 }
0x1e16   :  { %v5243_v41 = vadd.f32 1.0, %v12391_v11  ;;  %v12393_v44 = vpop.eup %12392  ;;  %v16260_v11 = vld [vmem:[#allocation43_spill] sm:$0xff] }
0x1e17   :  { %v5250_v17 = vadd.f32 1.0, %v12393_v44 }
0x1e18   :  { %12394 = vrcp.f32 %v5243_v41 }
0x1e19   :  { %12396 = vrcp.f32 %v5250_v17  ;;  %v14592_v17 = vld [vmem:[%s15365_s9] ss:$0 sm:$0xff] }
0x1e1a   :  { %16261 = vst [vmem:[#allocation78_spill] sm:$0xff] %v14592_v17 }
0x1e22   :  { %v12395_v39 = vpop.eup %12394 }
0x1e23   :  { %v5253_v1 = vmul.f32 %v12395_v39, %v5238_v37  ;;  %v12397_v56 = vpop.eup %12396  ;;  %v16253_v37 = vld [vmem:[#allocation36_spill] sm:$0xff] }
0x1e24   :  { %v5222_v4 = vpop.f32.mrb[60].mxu0  ;;  %v5256_v21 = vsub.f32 1.0, %v12397_v56 }
0x1e25   :  { %v5235_v7 = vadd.f32 %v5232_v47, %v5222_v4  ;;  %v9564_v22 = vpop.f32.mrb[61].mxu0  ;;  %v16254_v47 = vld [vmem:[#allocation37_spill] sm:$0xff]  ;;  %v14602_v4 = vld [vmem:[%s15361_s5 + $0x18] sm:$0xff] }
0x1e26   :  { %v5257_v58 = vmul.f32 %v5256_v21, %v16251_v25  ;;  %16263 = vst [vmem:[#allocation80_spill] sm:$0xff] %v14602_v4  ;;  %v14622_v22 = vld [vmem:[%s15361_s5 + $0x20] sm:$0xff] }
0x1e27   :  { %v5254_v50 = vadd.f32 %v5253_v1, %v5235_v7  ;;  %v14609_v7 = vld [vmem:[%s15361_s5] sm:$0xff]  ;;  %16265 = vst [vmem:[#allocation96_spill] sm:$0xff] %v14622_v22 }
0x1e28   :  { %16264 = vst [vmem:[#allocation82_spill] sm:$0xff] %v14609_v7 }
0x1e29   :  { %12398 = vtanh.f32 %v5254_v50  ;;  %v14629_v50 = vld [vmem:[%s15361_s5 + $0x8] sm:$0xff] }
0x1e2a   :  { %16266 = vst [vmem:[#allocation98_spill] sm:$0xff] %v14629_v50 }
0x1e33   :  { %v12399_v3 = vpop.eup %12398 }
0x1e34   :  { %v5258_v63 = vmul.f32 %v12399_v3, %v12397_v56  ;;  %v14640_v56 = vld [vmem:[%s15361_s5 + $0x10] sm:$0xff] }
0x1e35   :  { %16267 = vst [vmem:[#allocation100_spill] sm:$0xff] %v14640_v56 }
0x1e36   :  { %v14559_v36 = vadd.f32 %v5258_v63, %v5257_v58 }
0x1e38   :  { %16252 = vst [vmem:[#allocation77_spill] sm:$0xff] %v14559_v36  ;;  %5329 = vmatmul.mubr.f32.vlgmr.msra.gmra.mrb[98].mxu1 %v14559_v36  ;;  %5261 = vst [vmem:[#allocation12 + $0x20] sm:$0xff] %v14559_v36  ;;  %5400 = vmatmul.mubr.f32.vlgmr.msra.gmra.mrb[62].mxu0 %v14559_v36 }
0x1e39   :  { %11455 = vmatpush3.bf16.msra.mxu1 %v16253_v37  ;;  %9597 = vmatprep.mubr.msk.f32.mxu1 %vm12751_vm0, %v15739_v51 }
0x1e3a   :  { %11456 = vmatprep.subr.bf16.mxu1 %v15738_v31  ;;  %9602 = vmatprep.mubr.msk.f32.mxu0 %vm12751_vm0, %v15739_v51 }
0x1e3d   :  { %11458 = vmatpush3.bf16.msra.mxu1 %v16254_v47 }
0x1e3e   :  { %11459 = vmatprep.subr.bf16.mxu1 %v15738_v31 }
0x1e41   :  { %11461 = vmatpush3.bf16.msra.mxu1 %v16255_v18 }
0x1e42   :  { %11462 = vmatprep.subr.bf16.mxu1 %v15738_v31 }
0x1e45   :  { %11464 = vmatpush3.bf16.msra.mxu1 %v16256_v9 }
0x1e46   :  { %11465 = vmatprep.subr.bf16.mxu1 %v15738_v31 }
0x1e49   :  { %11467 = vmatpush3.bf16.msra.mxu1 %v16257_v53 }
0x1e4a   :  { %11468 = vmatprep.subr.bf16.mxu1 %v15738_v31 }
0x1e4d   :  { %11470 = vmatpush3.bf16.msra.mxu1 %v16258_v16  ;;  %v14657_v16 = vld [vmem:[#allocation3 + $0x10] sm:$0xff] }
0x1e4e   :  { %11471 = vmatprep.subr.bf16.mxu1 %v15738_v31  ;;  %16272 = vst [vmem:[#allocation71_spill] sm:$0xff] %v14657_v16 }
0x1e51   :  { %11473 = vmatpush3.bf16.msra.mxu1 %v16259_v40 }
0x1e52   :  { %11474 = vmatprep.subr.bf16.mxu1 %v15738_v31 }
0x1e55   :  { %11476 = vmatpush3.bf16.msra.mxu1 %v16260_v11 }
0x1e56   :  { %12217 = vmatprep.subr.mxu1 %v15739_v51 }
0x1e58   :  { %9598 = vmatmul.mubr.f32.vlgmr.msra.gmra.mrb[100].mxu1 %v14559_v36 }
0x1e59   :  { %9611 = vmatprep.mubr.msk.f32.mxu1 %vm12751_vm0, %v15739_v51 }
0x1f0b   :  { %v5330_v41 = vpop.f32.mrb[98].mxu1  ;;  %v14587_v44 = vpop.f32.mrb[62].mxu0 }
0x1f0c   :  { %v5476_v54 = vadd.f32 %v14592_v17, %v5330_v41  ;;  %v14595_v39 = vpop.f32.mrb[99].mxu1  ;;  %v14597_v1 = vpop.f32.mrb[63].mxu0  ;;  %v14648_v41 = vld [vmem:[#allocation3] sm:$0xff]  ;;  %v14654_v17 = vld [vmem:[#allocation3 + $0x8] sm:$0xff] }
0x1f0d   :  { %16262 = vst [vmem:[#allocation79_spill] sm:$0xff] %v14597_v1  ;;  %16269 = vst [vmem:[#allocation85_spill] sm:$0xff] %v14648_v41 }
0x1f0e   :  { %9601 = vmatpush3.msra.mxu0 %v5476_v54  ;;  %12218 = vmatpush3.msra.mxu1 %v5476_v54  ;;  %16271 = vst [vmem:[#allocation70_spill] sm:$0xff] %v14654_v17 }
0x1f0f   :  { %9612 = vmatmul.mubr.msk.f32.vlgmr.msra.gmra.mrb[102].mxu1 %vm621_vm1, %v14602_v4  ;;  %9603 = vmatmul.mubr.msk.f32.vlgmr.msra.gmra.mrb[64].mxu0 %vm621_vm1, %v14609_v7  ;;  %v14651_v7 = vld [vmem:[#allocation3 + $0x20] sm:$0xff] }
0x1f10   :  { %9614 = vmatprep.mubr.msk.f32.mxu1 %vm12751_vm0, %v15739_v51  ;;  %9605 = vmatprep.mubr.msk.f32.mxu0 %vm12751_vm0, %v15739_v51  ;;  %16270 = vst [vmem:[#allocation86_spill] sm:$0xff] %v14651_v7 }
0x1f11   :  { %11483 = vmatprep.subr.bf16.mxu1 %v15738_v31  ;;  %11477 = vmatprep.subr.bf16.mxu0 %v15738_v31 }
0x1f13   :  { %9615 = vmatmul.mubr.msk.f32.gmra.mrb[104].mxu1 %vm621_vm1, %v14622_v22  ;;  %9606 = vmatmul.mubr.msk.f32.gmra.mrb[66].mxu0 %vm621_vm1, %v14629_v50 }
0x1f14   :  { %9608 = vmatprep.mubr.msk.f32.mxu0 %vm12751_vm0, %v15739_v51  ;;  %9640 = vmatprep.mubr.msk.f32.mxu1 %vm12751_vm0, %v15739_v51 }
0x1f17   :  { %9609 = vmatmul.mubr.msk.f32.gmra.mrb[68].mxu0 %vm621_vm1, %v14640_v56 }
0x1f18   :  { %9627 = vmatprep.mubr.msk.f32.mxu0 %vm12751_vm0, %v15739_v51 }
0x1f2b   :  { %v14646_v21 = vpop.f32.mrb[100].mxu1 }
0x1f2c   :  { %16268 = vst [vmem:[#allocation84_spill] sm:$0xff] %v14646_v21  ;;  %v9599_v3 = vpop.f32.mrb[101].mxu1 }
0x1fe2   :  { %v5561_v25 = vpop.f32.mrb[102].mxu1  ;;  %v5546_v58 = vpop.f32.mrb[64].mxu0 }
0x1fe3   :  { %v9613_v63 = vpop.f32.mrb[103].mxu1  ;;  %v5547_v54 = vadd.f32 %v14648_v41, %v5546_v58  ;;  %v9604_v22 = vpop.f32.mrb[65].mxu0 }
0x1fe5   :  { %12400 = vtanh.f32 %v5547_v54  ;;  %v14660_v54 = vld [vmem:[#allocation3 + $0x18] sm:$0xff] }
0x1fe6   :  { %v5566_v4 = vpop.f32.mrb[104].mxu1  ;;  %v5551_v50 = vpop.f32.mrb[66].mxu0  ;;  %16273 = vst [vmem:[#allocation68_spill] sm:$0xff] %v14660_v54  ;;  %v5562_v41 = vadd.f32 %v14660_v54, %v5561_v25 }
0x1fe7   :  { %v5567_v56 = vadd.f32 %v14651_v7, %v5566_v4  ;;  %v5552_v11 = vadd.f32 %v14654_v17, %v5551_v50  ;;  %v9607_v3 = vpop.f32.mrb[67].mxu0  ;;  %v9616_v40 = vpop.f32.mrb[105].mxu1  ;;  %v14666_v50 = vld [vmem:[%s15366_s10] ss:$0 sm:$0xff] }
0x1fe8   :  { %16274 = vst [vmem:[#allocation72_spill] sm:$0xff] %v14666_v50 }
0x1fe9   :  { %12402 = vtanh.f32 %v5567_v56 }
0x1fea   :  { %12404 = vtanh.f32 %v5552_v11  ;;  %v5556_v63 = vpop.f32.mrb[68].mxu0 }
0x1feb   :  { %v5557_v22 = vadd.f32 %v14657_v16, %v5556_v63  ;;  %v9610_v58 = vpop.f32.mrb[69].mxu0 }
0x1fed   :  { %12406 = vtanh.f32 %v5557_v22 }
0x1fee   :  { %12408 = vtanh.f32 %v5562_v41 }
0x1fef   :  { %v12401_v4 = vpop.eup %12400 }
0x1ff0   :  { %v5575_v40 = vmul.f32 %v14666_v50, %v12401_v4 }
0x1ff2   :  { %5580 = vadd.xlane.f32.xlu1 %v5575_v40 }
0x1ff3   :  { %v12403_v11 = vpop.eup %12402 }
0x1ff4   :  { %v12405_v56 = vpop.eup %12404  ;;  %v5579_v3 = vmul.f32 %v14666_v50, %v12403_v11 }
0x1ff5   :  { %v5576_v63 = vmul.f32 %v14666_v50, %v12405_v56 }
0x1ff6   :  { %5588 = vadd.xlane.f32.xlu0 %v5579_v3 }
0x1ff7   :  { %v12407_v22 = vpop.eup %12406 }
0x1ff8   :  { %v5577_v25 = vmul.f32 %v14666_v50, %v12407_v22  ;;  %v12409_v58 = vpop.eup %12408 }
0x1ff9   :  { %v5578_v7 = vmul.f32 %v14666_v50, %v12409_v58 }
0x1ffa   :  { %5582 = vadd.xlane.f32.xlu0 %v5576_v63 }
0x1ffe   :  { %5584 = vadd.xlane.f32.xlu0 %v5577_v25 }
0x2002   :  { %5586 = vadd.xlane.f32.xlu0 %v5578_v7 }
0x207f   :  { %v5581_v16 = vpop.xlane.xlu1 %5580 }
0x2083   :  { %v5589_v54 = vpop.xlane.xlu0 %5588 }
0x2084   :  { %v5590_v40 = vmax.f32 %v5581_v16, %v5589_v54 }
0x2087   :  { %v5583_v4 = vpop.xlane.xlu0 %5582 }
0x2088   :  { %v5591_v53 = vmax.f32 %v5590_v40, %v5583_v4 }
0x208b   :  { %v5585_v41 = vpop.xlane.xlu0 %5584 }
0x208f   :  { %v5587_v17 = vpop.xlane.xlu0 %5586 }
0x2090   :  { %v5592_v11 = vmax.f32 %v5585_v41, %v5587_v17 }
0x2092   :  { %v5593_v3 = vmax.f32 %v5591_v53, %v5592_v11 }
0x2094   :  { %v5594_v9 = vrot.slane %v5593_v3, 4 }
0x2096   :  { %v5595_v56 = vmax.f32 %v5593_v3, %v5594_v9 }
0x2098   :  { %v5596_v18 = vrot.slane %v5595_v56, 2 }
0x209a   :  { %v5597_v63 = vmax.f32 %v5595_v56, %v5596_v18  ;;  %v14704_v56 = vld [vmem:[%s15356_s0 + $0x20] sm:$0xff] }
0x209c   :  { %v5598_v47 = vrot.slane %v5597_v63, 1 }
0x209e   :  { %v5599_v22 = vmax.f32 %v5597_v63, %v5598_v47  ;;  %v14676_v47 = vld [vmem:[%s15356_s0] sm:$0xff] }
0x20a0   :  { %v5603_v37 = vsub.f32 %v5587_v17, %v5599_v22  ;;  %v5600_v25 = vsub.f32 %v5581_v16, %v5599_v22  ;;  %v5601_v36 = vsub.f32 %v5583_v4, %v5599_v22  ;;  %v5602_v58 = vsub.f32 %v5585_v41, %v5599_v22  ;;  %v14682_v17 = vld [vmem:[%s15356_s0 + $0x8] sm:$0xff] }
0x20a1   :  { %v5604_v20 = vsub.f32 %v5589_v54, %v5599_v22  ;;  %v14710_v22 = vld [vmem:[%s15360_s4] sm:$0xff] }
0x20a2   :  { %v5611_v7 = vmul.f32 1.442695, %v5603_v37  ;;  %v5605_v50 = vmul.f32 1.442695, %v5600_v25  ;;  %v5607_v21 = vmul.f32 1.442695, %v5601_v36 }
0x20a3   :  { %v5609_v1 = vmul.f32 1.442695, %v5602_v58  ;;  %v5613_v53 = vmul.f32 1.442695, %v5604_v20 }
0x20a4   :  { %12410 = vpow2.f32 %v5611_v7 }
0x20a5   :  { %12412 = vpow2.f32 %v5605_v50  ;;  %v14694_v50 = vld [vmem:[%s15356_s0 + $0x18] sm:$0xff] }
0x20a6   :  { %12414 = vpow2.f32 %v5607_v21  ;;  %v14688_v21 = vld [vmem:[%s15356_s0 + $0x10] sm:$0xff] }
0x20a7   :  { %12416 = vpow2.f32 %v5609_v1 }
0x20a8   :  { %12418 = vpow2.f32 %v5613_v53 }
0x20ae   :  { %v12411_v40 = vpop.eup %12410 }
0x20af   :  { %v12413_v9 = vpop.eup %12412  ;;  %v5618_v4 = vmul.f32 %v14694_v50, %v12411_v40 }
0x20b0   :  { %v12415_v18 = vpop.eup %12414  ;;  %v5615_v37 = vmul.f32 %v14676_v47, %v12413_v9 }
0x20b1   :  { %v12417_v16 = vpop.eup %12416  ;;  %v11484_v36 = vpack.c.bf16 %v12415_v18, %v12413_v9  ;;  %v5616_v20 = vmul.f32 %v14682_v17, %v12415_v18 }
0x20b2   :  { %v5617_v54 = vmul.f32 %v14688_v21, %v12417_v16  ;;  %v11487_v41 = vpack.c.bf16 %v12411_v40, %v12417_v16  ;;  %v12419_v3 = vpop.eup %12418  ;;  %v16276_v16 = vld [vmem:[#allocation94_spill] sm:$0xff] }
0x20b3   :  { %11485 = vmatpush3.bf16.msra.mxu1 %v11484_v36  ;;  %v11478_v1 = vpack.c.bf16 %v5616_v20, %v5615_v37  ;;  %v5619_v63 = vmul.f32 %v14704_v56, %v12419_v3  ;;  %v16275_v37 = vld [vmem:[#allocation93_spill] sm:$0xff]  ;;  %v16277_v36 = vld [vmem:[#allocation95_spill] sm:$0xff] }
0x20b4   :  { %11486 = vmatprep.subr.bf16.mxu1 %v15738_v31  ;;  %v11481_v11 = vpack.c.bf16 %v5618_v4, %v5617_v54  ;;  %v16278_v20 = vld [vmem:[#allocation97_spill] sm:$0xff] }
0x20b5   :  { %11479 = vmatpush3.bf16.msra.mxu0 %v11478_v1  ;;  %v16279_v1 = vld [vmem:[#allocation99_spill] sm:$0xff]  ;;  %v16280_v54 = vld [vmem:[#allocation101_spill] sm:$0xff] }
0x20b6   :  { %11480 = vmatprep.subr.bf16.mxu0 %v15738_v31 }
0x20b7   :  { %11488 = vmatpush3.bf16.msra.mxu1 %v11487_v41 }
0x20b8   :  { %9638 = vmatprep.subr.mxu1 %v15739_v51 }
0x20b9   :  { %11482 = vmatpush3.bf16.msra.mxu0 %v11481_v11 }
0x20ba   :  { %9625 = vmatprep.subr.mxu0 %v15739_v51 }
0x20bb   :  { %9639 = vmatpush3.msra.mxu1 %v12419_v3  ;;  %v16281_v3 = vld [vmem:[#allocation76_spill] sm:$0xff] }
0x20bc   :  { %9641 = vmatmul.mubr.msk.f32.vlgmr.msra.gmra.mrb[106].mxu1 %vm783_vm2, %v14710_v22  ;;  %11514 = vmatprep.subr.bf16.mxu1 %v15851_v35 }
0x20bd   :  { %9626 = vmatpush3.msra.mxu0 %v5619_v63  ;;  %11516 = vmatpush1.bf16.msra.mxu1 %v15852_v55 }
0x20be   :  { %9628 = vmatmul.mubr.msk.f32.vlgmr.msra.gmra.mrb[70].mxu0 %vm783_vm2, %v14710_v22  ;;  %11489 = vmatprep.subr.bf16.mxu0 %v15738_v31 }
0x20bf   :  { %11491 = vmatpush3.bf16.msra.mxu0 %v16163_v38  ;;  %9675 = vmatprep.mubr.msk.f32.mxu0 %vm12751_vm0, %v15739_v51 }
0x20c0   :  { %11492 = vmatprep.subr.bf16.mxu0 %v15738_v31  ;;  %11518 = vmatprep.subr.bf16.mxu1 %v15853_v61 }
0x20c1   :  { %11520 = vmatpush1.bf16.msra.mxu1 %v15854_v27  ;;  %5902 = vmatprep.mubr.f32.mxu1 %v15739_v51 }
0x20c2   :  { %11522 = vmatprep.subr.bf16.mxu1 %v15956_v43 }
0x20c3   :  { %11494 = vmatpush3.bf16.msra.mxu0 %v16164_v2 }
0x20c4   :  { %11495 = vmatprep.subr.bf16.mxu0 %v15738_v31 }
0x20c5   :  { %11524 = vmatpush1.bf16.msra.mxu1 %v15957_v30 }
0x20c6   :  { %11526 = vmatprep.subr.bf16.mxu1 %v15958_v28 }
0x20c7   :  { %11497 = vmatpush3.bf16.msra.mxu0 %v16165_v6 }
0x20c8   :  { %11498 = vmatprep.subr.bf16.mxu0 %v15738_v31 }
0x20c9   :  { %11528 = vmatpush1.bf16.msra.mxu1 %v15959_v59 }
0x20ca   :  { %11530 = vmatprep.subr.bf16.mxu1 %v15960_v12 }
0x20cb   :  { %11500 = vmatpush3.bf16.msra.mxu0 %v16166_v52 }
0x20cc   :  { %11501 = vmatprep.subr.bf16.mxu0 %v15738_v31 }
0x20cd   :  { %11532 = vmatpush1.bf16.msra.mxu1 %v15961_v29 }
0x20ce   :  { %11534 = vmatprep.subr.bf16.mxu1 %v15962_v26 }
0x20cf   :  { %11503 = vmatpush3.bf16.msra.mxu0 %v16167_v49 }
0x20d0   :  { %11504 = vmatprep.subr.bf16.mxu0 %v15738_v31 }
0x20d1   :  { %11536 = vmatpush1.bf16.msra.mxu1 %v15963_v48 }
0x20d2   :  { %11538 = vmatprep.subr.bf16.mxu1 %v15863_v60 }
0x20d3   :  { %11506 = vmatpush3.bf16.msra.mxu0 %v16168_v19 }
0x20d4   :  { %11507 = vmatprep.subr.bf16.mxu0 %v15738_v31 }
0x20d5   :  { %11540 = vmatpush1.bf16.msra.mxu1 %v15964_v23 }
0x20d6   :  { %11542 = vmatprep.subr.bf16.mxu1 %v15965_v32 }
0x20d7   :  { %11509 = vmatpush3.bf16.msra.mxu0 %v16169_v0 }
0x20d8   :  { %11510 = vmatprep.subr.bf16.mxu0 %v15738_v31 }
0x20d9   :  { %11544 = vmatpush1.bf16.msra.mxu1 %v15966_v46 }
0x20da   :  { %11578 = vmatprep.subr.bf16.mxu1 %v15967_v33 }
0x20db   :  { %11512 = vmatpush3.bf16.msra.mxu0 %v16170_v42 }
0x20dc   :  { %11546 = vmatprep.subr.bf16.mxu0 %v16171_v5 }
0x218f   :  { %v5756_v25 = vpop.f32.mrb[106].mxu1 }
0x2190   :  { %12420 = vrcp.f32 %v5756_v25  ;;  %v9642_v58 = vpop.f32.mrb[107].mxu1  ;;  %v16282_v25 = vld [vmem:[#allocation102_spill] sm:$0xff] }
0x2191   :  { %v5686_v53 = vpop.f32.mrb[70].mxu0  ;;  %v16283_v58 = vld [vmem:[#allocation103_spill] sm:$0xff] }
0x2192   :  { %v9629_v40 = vpop.f32.mrb[71].mxu0 }
0x2193   :  { %v16287_v40 = vld [vmem:[#allocation107_spill] sm:$0xff] }
0x219a   :  { %v12421_v7 = vpop.eup %12420 }
0x219b   :  { %5763 = vperm.xlu0 %12239, %v12421_v7   ;;  %v16284_v7 = vld [vmem:[#allocation104_spill] sm:$0xff] }
0x221a   :  { %v5764_v9 = vpop.permute.xlu0 %5763 }
0x221b   :  { %v5766_v18 = vmul.f32 %v5764_v9, %v5686_v53  ;;  %v16285_v53 = vld [vmem:[#allocation105_spill] sm:$0xff]  ;;  %v16288_v9 = vld [vmem:[#allocation108_spill] sm:$0xff] }
0x221d   :  { %9676 = vmatmul.mubr.f32.vlgmr.msra.gmra.mrb[72].mxu0 %v5766_v18  ;;  %v16289_v18 = vld [vmem:[#allocation109_spill] sm:$0xff] }
0x221e   :  { %11548 = vmatpush1.bf16.msra.mxu0 %v15868_v13  ;;  %5973 = vmatprep.mubr.f32.mxu0 %v15739_v51 }
0x221f   :  { %11550 = vmatprep.subr.bf16.mxu0 %v15968_v45 }
0x2222   :  { %11552 = vmatpush1.bf16.msra.mxu0 %v15969_v62 }
0x2223   :  { %11554 = vmatprep.subr.bf16.mxu0 %v15970_v10 }
0x2226   :  { %11556 = vmatpush1.bf16.msra.mxu0 %v15971_v14 }
0x2227   :  { %11558 = vmatprep.subr.bf16.mxu0 %v15972_v15 }
0x222a   :  { %11560 = vmatpush1.bf16.msra.mxu0 %v15973_v34 }
0x222b   :  { %11562 = vmatprep.subr.bf16.mxu0 %v15974_v24 }
0x222e   :  { %11564 = vmatpush1.bf16.msra.mxu0 %v15975_v8 }
0x222f   :  { %11566 = vmatprep.subr.bf16.mxu0 %v15877_v57 }
0x2232   :  { %11568 = vmatpush1.bf16.msra.mxu0 %v16275_v37 }
0x2233   :  { %11570 = vmatprep.subr.bf16.mxu0 %v16276_v16 }
0x2236   :  { %11572 = vmatpush1.bf16.msra.mxu0 %v16277_v36 }
0x2237   :  { %11574 = vmatprep.subr.bf16.mxu0 %v16278_v20  ;;  %v16355_v20 = vld [vmem:[#allocation142_spill] sm:$0xff] }
0x223a   :  { %11576 = vmatpush1.bf16.msra.mxu0 %v16279_v1 }
0x223b   :  { %11610 = vmatprep.subr.bf16.mxu0 %v16280_v54  ;;  %v16353_v54 = vld [vmem:[#allocation141_spill] sm:$0xff] }
0x22f0   :  { %v5833_v4 = vpop.f32.mrb[72].mxu0 }
0x22f1   :  { %v5834_v41 = vadd.f32 %v5833_v4, %v14595_v39  ;;  %v9677_v11 = vpop.f32.mrb[73].mxu0  ;;  %v16286_v39 = vld [vmem:[#allocation106_spill] sm:$0xff] }
0x22f2   :  { %v16290_v4 = vld [vmem:[#allocation110_spill] sm:$0xff]  ;;  %v16292_v11 = vld [vmem:[#allocation112_spill] sm:$0xff] }
0x22f3   :  { %v14772_v63 = vadd.f32 %v16281_v3, %v5834_v41  ;;  %v16291_v41 = vld [vmem:[#allocation111_spill] sm:$0xff]  ;;  %v16293_v3 = vld [vmem:[#allocation113_spill] sm:$0xff] }
0x22f5   :  { %6229 = vst [vmem:[#allocation13 + $0x28] sm:$0xff] %v14772_v63  ;;  %5903 = vmatmul.mubr.f32.vlgmr.msra.gmra.mrb[108].mxu1 %v14772_v63  ;;  %5974 = vmatmul.mubr.f32.vlgmr.msra.gmra.mrb[74].mxu0 %v14772_v63 }
0x22f6   :  { %11580 = vmatpush1.bf16.msra.mxu1 %v16282_v25  ;;  %11612 = vmatpush1.bf16.msra.mxu0 %v16283_v58  ;;  %v16296_v58 = vld [vmem:[#allocation116_spill] sm:$0xff]  ;;  %v6193_v25 = vld [vmem:[#allocation6 + $0x78] sm:$0xff] }
0x22f7   :  { %11582 = vmatprep.subr.bf16.mxu1 %v16284_v7  ;;  %11614 = vmatprep.subr.bf16.mxu0 %v16285_v53  ;;  %v16294_v53 = vld [vmem:[#allocation114_spill] sm:$0xff]  ;;  %v16295_v7 = vld [vmem:[#allocation115_spill] sm:$0xff] }
0x22f8   :  { %6044 = vmatprep.mubr.f32.mxu1 %v15739_v51  ;;  %6115 = vmatprep.mubr.f32.mxu0 %v15739_v51 }
0x22fa   :  { %11584 = vmatpush1.bf16.msra.mxu1 %v16286_v39  ;;  %11616 = vmatpush1.bf16.msra.mxu0 %v16287_v40  ;;  %v16297_v39 = vld [vmem:[#allocation117_spill] sm:$0xff]  ;;  %v16298_v40 = vld [vmem:[#allocation118_spill] sm:$0xff] }
0x22fb   :  { %11586 = vmatprep.subr.bf16.mxu1 %v16288_v9  ;;  %11618 = vmatprep.subr.bf16.mxu0 %v16289_v18  ;;  %v16299_v9 = vld [vmem:[#allocation119_spill] sm:$0xff]  ;;  %v16300_v18 = vld [vmem:[#allocation120_spill] sm:$0xff] }
0x22fe   :  { %11588 = vmatpush1.bf16.msra.mxu1 %v16290_v4  ;;  %11620 = vmatpush1.bf16.msra.mxu0 %v16291_v41  ;;  %v16301_v4 = vld [vmem:[#allocation121_spill] sm:$0xff]  ;;  %v16302_v41 = vld [vmem:[#allocation122_spill] sm:$0xff] }
0x22ff   :  { %11590 = vmatprep.subr.bf16.mxu1 %v16292_v11  ;;  %11622 = vmatprep.subr.bf16.mxu0 %v16293_v3  ;;  %v16303_v11 = vld [vmem:[#allocation123_spill] sm:$0xff]  ;;  %v16304_v3 = vld [vmem:[#allocation124_spill] sm:$0xff] }
0x2302   :  { %11592 = vmatpush1.bf16.msra.mxu1 %v16294_v53  ;;  %11624 = vmatpush1.bf16.msra.mxu0 %v16295_v7  ;;  %v16305_v53 = vld [vmem:[#allocation125_spill] sm:$0xff]  ;;  %v16306_v7 = vld [vmem:[#allocation126_spill] sm:$0xff] }
0x2303   :  { %11594 = vmatprep.subr.bf16.mxu1 %v16296_v58  ;;  %11626 = vmatprep.subr.bf16.mxu0 %v16297_v39  ;;  %v16307_v58 = vld [vmem:[#allocation127_spill] sm:$0xff]  ;;  %v16308_v39 = vld [vmem:[#allocation128_spill] sm:$0xff] }
0x2306   :  { %11596 = vmatpush1.bf16.msra.mxu1 %v16298_v40  ;;  %11628 = vmatpush1.bf16.msra.mxu0 %v16299_v9  ;;  %v16309_v40 = vld [vmem:[#allocation129_spill] sm:$0xff]  ;;  %v16310_v9 = vld [vmem:[#allocation130_spill] sm:$0xff] }
0x2307   :  { %11598 = vmatprep.subr.bf16.mxu1 %v16300_v18  ;;  %11630 = vmatprep.subr.bf16.mxu0 %v16301_v4  ;;  %v16311_v18 = vld [vmem:[#allocation131_spill] sm:$0xff] }
0x230a   :  { %11600 = vmatpush1.bf16.msra.mxu1 %v16302_v41  ;;  %11632 = vmatpush1.bf16.msra.mxu0 %v16303_v11  ;;  %v16312_v41 = vld [vmem:[#allocation20_spill] sm:$0xff] }
0x230b   :  { %11602 = vmatprep.subr.bf16.mxu1 %v16304_v3  ;;  %11634 = vmatprep.subr.bf16.mxu0 %v16305_v53  ;;  %v16313_v53 = vld [vmem:[#allocation132_spill] sm:$0xff] }
0x230c   :  { %v16325_v3 = vld [vmem:[#allocation136_spill] sm:$0xff] }
0x230d   :  { %v16348_v11 = vld [vmem:[#allocation56_spill] sm:$0xff] }
0x230e   :  { %11604 = vmatpush1.bf16.msra.mxu1 %v16306_v7  ;;  %11636 = vmatpush1.bf16.msra.mxu0 %v16307_v58  ;;  %v16320_v58 = vld [vmem:[#allocation25_spill] sm:$0xff]  ;;  %v16321_v7 = vld [vmem:[#allocation26_spill] sm:$0xff] }
0x230f   :  { %11606 = vmatprep.subr.bf16.mxu1 %v16308_v39  ;;  %11638 = vmatprep.subr.bf16.mxu0 %v16309_v40  ;;  %v16314_v40 = vld [vmem:[#allocation21_spill] sm:$0xff]  ;;  %v16318_v39 = vld [vmem:[#allocation24_spill] sm:$0xff] }
0x2312   :  { %11608 = vmatpush1.bf16.msra.mxu1 %v16310_v9  ;;  %11640 = vmatpush1.bf16.msra.mxu0 %v16311_v18  ;;  %v16315_v9 = vld [vmem:[#allocation22_spill] sm:$0xff]  ;;  %v16316_v18 = vld [vmem:[#allocation133_spill] sm:$0xff] }
0x2313   :  { %11641 = vmatprep.subr.bf16.mxu1 %v15738_v31  ;;  %11666 = vmatprep.subr.bf16.mxu0 %v16312_v41  ;;  %v16317_v41 = vld [vmem:[#allocation23_spill] sm:$0xff] }
0x2315   :  { %6045 = vmatmul.mubr.f32.vlgmr.msra.gmra.mrb[110].mxu1 %v14772_v63  ;;  %6116 = vmatmul.mubr.f32.vlgmr.msra.gmra.mrb[76].mxu0 %v14772_v63 }
0x2316   :  { %11643 = vmatpush3.bf16.msra.mxu1 %v16313_v53  ;;  %9710 = vmatprep.mubr.msk.f32.mxu1 %vm12751_vm0, %v15739_v51  ;;  %v16319_v53 = vld [vmem:[#allocation134_spill] sm:$0xff] }
0x2317   :  { %11644 = vmatprep.subr.bf16.mxu1 %v15738_v31  ;;  %11668 = vmatpush1.bf16.msra.mxu0 %v16314_v40  ;;  %v16322_v40 = vld [vmem:[#allocation135_spill] sm:$0xff] }
0x2318   :  { %11670 = vmatprep.subr.bf16.mxu0 %v16315_v9  ;;  %6294 = vmatprep.mubr.f32.mxu0 %v15739_v51  ;;  %v16323_v9 = vld [vmem:[#allocation27_spill] sm:$0xff] }
0x231a   :  { %11646 = vmatpush3.bf16.msra.mxu1 %v16316_v18  ;;  %v16324_v18 = vld [vmem:[#allocation28_spill] sm:$0xff] }
0x231b   :  { %11647 = vmatprep.subr.bf16.mxu1 %v15738_v31  ;;  %11672 = vmatpush1.bf16.msra.mxu0 %v16317_v41  ;;  %v16328_v41 = vld [vmem:[#allocation137_spill] sm:$0xff] }
0x231c   :  { %11674 = vmatprep.subr.bf16.mxu0 %v16318_v39  ;;  %v16326_v39 = vld [vmem:[#allocation29_spill] sm:$0xff] }
0x231e   :  { %11649 = vmatpush3.bf16.msra.mxu1 %v16319_v53  ;;  %v16327_v53 = vld [vmem:[#allocation30_spill] sm:$0xff] }
0x231f   :  { %11650 = vmatprep.subr.bf16.mxu1 %v15738_v31  ;;  %11676 = vmatpush1.bf16.msra.mxu0 %v16320_v58  ;;  %v16331_v58 = vld [vmem:[#allocation138_spill] sm:$0xff] }
0x2320   :  { %11678 = vmatprep.subr.bf16.mxu0 %v16321_v7  ;;  %v16329_v7 = vld [vmem:[#allocation31_spill] sm:$0xff] }
0x2322   :  { %11652 = vmatpush3.bf16.msra.mxu1 %v16322_v40  ;;  %v16330_v40 = vld [vmem:[#allocation32_spill] sm:$0xff] }
0x2323   :  { %11653 = vmatprep.subr.bf16.mxu1 %v15738_v31  ;;  %11680 = vmatpush1.bf16.msra.mxu0 %v16323_v9  ;;  %v16334_v9 = vld [vmem:[#allocation139_spill] sm:$0xff] }
0x2324   :  { %11682 = vmatprep.subr.bf16.mxu0 %v16324_v18  ;;  %v16332_v18 = vld [vmem:[#allocation33_spill] sm:$0xff] }
0x2326   :  { %11655 = vmatpush3.bf16.msra.mxu1 %v16325_v3  ;;  %v16333_v3 = vld [vmem:[#allocation34_spill] sm:$0xff] }
0x2327   :  { %11656 = vmatprep.subr.bf16.mxu1 %v15738_v31  ;;  %11684 = vmatpush1.bf16.msra.mxu0 %v16326_v39  ;;  %v16335_v39 = vld [vmem:[#allocation44_spill] sm:$0xff] }
0x2328   :  { %11686 = vmatprep.subr.bf16.mxu0 %v16327_v53  ;;  %v16336_v53 = vld [vmem:[#allocation35_spill] sm:$0xff] }
0x232a   :  { %11658 = vmatpush3.bf16.msra.mxu1 %v16328_v41  ;;  %v16345_v41 = vld [vmem:[#allocation53_spill] sm:$0xff] }
0x232b   :  { %11659 = vmatprep.subr.bf16.mxu1 %v15738_v31  ;;  %11688 = vmatpush1.bf16.msra.mxu0 %v16329_v7  ;;  %v16337_v7 = vld [vmem:[#allocation45_spill] sm:$0xff] }
0x232c   :  { %11690 = vmatprep.subr.bf16.mxu0 %v16330_v40  ;;  %v16339_v40 = vld [vmem:[#allocation47_spill] sm:$0xff] }
0x232e   :  { %11661 = vmatpush3.bf16.msra.mxu1 %v16331_v58  ;;  %v16338_v58 = vld [vmem:[#allocation46_spill] sm:$0xff] }
0x232f   :  { %11662 = vmatprep.subr.bf16.mxu1 %v15738_v31  ;;  %11692 = vmatpush1.bf16.msra.mxu0 %v16332_v18  ;;  %v16340_v18 = vld [vmem:[#allocation48_spill] sm:$0xff] }
0x2330   :  { %11694 = vmatprep.subr.bf16.mxu0 %v16333_v3  ;;  %v16341_v3 = vld [vmem:[#allocation49_spill] sm:$0xff] }
0x2332   :  { %11664 = vmatpush3.bf16.msra.mxu1 %v16334_v9  ;;  %v16342_v9 = vld [vmem:[#allocation50_spill] sm:$0xff] }
0x2333   :  { %11698 = vmatprep.subr.bf16.mxu1 %v16335_v39  ;;  %11696 = vmatpush1.bf16.msra.mxu0 %v16336_v53  ;;  %v16343_v39 = vld [vmem:[#allocation51_spill] sm:$0xff]  ;;  %v16344_v53 = vld [vmem:[#allocation52_spill] sm:$0xff] }
0x2334   :  { %11729 = vmatprep.subr.bf16.mxu0 %v15738_v31 }
0x2335   :  { %9711 = vmatmul.mubr.f32.vlgmr.msra.gmra.mrb[112].mxu1 %v14772_v63  ;;  %v16346_v63 = vld [vmem:[#allocation54_spill] sm:$0xff] }
0x2336   :  { %11700 = vmatpush1.bf16.msra.mxu1 %v16337_v7  ;;  %6365 = vmatprep.mubr.f32.mxu1 %v15739_v51  ;;  %v16347_v7 = vld [vmem:[#allocation55_spill] sm:$0xff] }
0x2337   :  { %11702 = vmatprep.subr.bf16.mxu1 %v16338_v58  ;;  %v16349_v58 = vld [vmem:[#allocation57_spill] sm:$0xff] }
0x233a   :  { %11704 = vmatpush1.bf16.msra.mxu1 %v16339_v40  ;;  %v16350_v40 = vld [vmem:[#allocation58_spill] sm:$0xff] }
0x233b   :  { %11706 = vmatprep.subr.bf16.mxu1 %v16340_v18  ;;  %v16351_v18 = vld [vmem:[#allocation59_spill] sm:$0xff] }
0x233e   :  { %11708 = vmatpush1.bf16.msra.mxu1 %v16341_v3 }
0x233f   :  { %11710 = vmatprep.subr.bf16.mxu1 %v16342_v9  ;;  %v16352_v9 = vld [vmem:[#allocation140_spill] sm:$0xff] }
0x2342   :  { %11712 = vmatpush1.bf16.msra.mxu1 %v16343_v39  ;;  %v5477_v39 = vadd.f32 %v14587_v44, %v16352_v9 }
0x2343   :  { %11714 = vmatprep.subr.bf16.mxu1 %v16344_v53 }
0x2346   :  { %11716 = vmatpush1.bf16.msra.mxu1 %v16345_v41 }
0x2347   :  { %11718 = vmatprep.subr.bf16.mxu1 %v16346_v63 }
0x234a   :  { %11720 = vmatpush1.bf16.msra.mxu1 %v16347_v7  ;;  %v6194_v7 = vld [vmem:[#allocation6 + $0x80] sm:$0xff] }
0x234b   :  { %11722 = vmatprep.subr.bf16.mxu1 %v16348_v11  ;;  %v16354_v11 = vld [vmem:[#allocation79_spill] sm:$0xff] }
0x234c   :  { %v5478_v1 = vadd.f32 %v16354_v11, %v16353_v54 }
0x234e   :  { %11724 = vmatpush1.bf16.msra.mxu1 %v16349_v58 }
0x234f   :  { %11726 = vmatprep.subr.bf16.mxu1 %v16350_v40  ;;  %v16356_v40 = vld [vmem:[#allocation84_spill] sm:$0xff] }
0x2350   :  { %v5479_v36 = vadd.f32 %v16356_v40, %v16355_v20 }
0x2352   :  { %11728 = vmatpush1.bf16.msra.mxu1 %v16351_v18 }
0x2353   :  { %9748 = vmatprep.subr.mxu1 %v15739_v51 }
0x23c8   :  { %v5904_v53 = vpop.f32.mrb[108].mxu1  ;;  %v5975_v3 = vpop.f32.mrb[74].mxu0 }
0x23c9   :  { %v5906_v41 = vpop.f32.mrb[109].mxu1  ;;  %v5977_v4 = vpop.f32.mrb[75].mxu0  ;;  %v6196_v58 = vmul.f32 %v6193_v25, %v5904_v53 }
0x23ca   :  { %v6202_v63 = vmul.f32 %v5977_v4, %v5477_v39  ;;  %v6197_v18 = vmul.f32 %v6194_v7, %v5906_v41  ;;  %v6195_v7 = vld [vmem:[#allocation6 + $0x88] sm:$0xff] }
0x23cb   :  { %v6198_v20 = vmul.f32 %v6195_v7, %v5975_v3  ;;  %v16361_v3 = vld [vmem:[#allocation38_spill] sm:$0xff] }
0x23e8   :  { %v6046_v16 = vpop.f32.mrb[110].mxu1  ;;  %v6117_v37 = vpop.f32.mrb[76].mxu0 }
0x23e9   :  { %v6203_v57 = vmul.f32 %v6046_v16, %v5478_v1  ;;  %v6199_v8 = vadd.f32 %v6196_v58, %v6117_v37  ;;  %v6048_v44 = vpop.f32.mrb[111].mxu1  ;;  %v6119_v9 = vpop.f32.mrb[77].mxu0 }
0x23ea   :  { %v6204_v24 = vmul.f32 %v6048_v44, %v5479_v36  ;;  %v6200_v34 = vadd.f32 %v6197_v18, %v6119_v9  ;;  %v16363_v44 = vld [vmem:[#allocation40_spill] sm:$0xff] }
0x23eb   :  { %v6205_v15 = vadd.f32 %v6202_v63, %v6199_v8  ;;  %v16357_v8 = vld [vmem:[#allocation77_spill] sm:$0xff]  ;;  %v16362_v63 = vld [vmem:[#allocation39_spill] sm:$0xff] }
0x23ec   :  { %v6212_v39 = vadd.f32 %v6203_v57, %v6200_v34 }
0x23ed   :  { %v8253_v4 = vmul.f32 -1.442695, %v6205_v15 }
0x23ee   :  { %v8254_v14 = vmul.f32 -1.442695, %v6212_v39  ;;  %v16364_v39 = vld [vmem:[#allocation41_spill] sm:$0xff] }
0x23ef   :  { %12422 = vpow2.f32 %v8253_v4  ;;  %v16365_v4 = vld [vmem:[#allocation42_spill] sm:$0xff] }
0x23f0   :  { %12424 = vpow2.f32 %v8254_v14 }
0x23f9   :  { %v12423_v11 = vpop.eup %12422 }
0x23fa   :  { %v6209_v25 = vadd.f32 1.0, %v12423_v11  ;;  %v12425_v53 = vpop.eup %12424  ;;  %v16366_v11 = vld [vmem:[#allocation43_spill] sm:$0xff] }
0x23fb   :  { %v6216_v40 = vadd.f32 1.0, %v12425_v53 }
0x23fc   :  { %12426 = vrcp.f32 %v6209_v25 }
0x23fd   :  { %12428 = vrcp.f32 %v6216_v40  ;;  %v16367_v40 = vld [vmem:[#allocation78_spill] sm:$0xff] }
0x2406   :  { %v12427_v41 = vpop.eup %12426 }
0x2407   :  { %v6219_v16 = vmul.f32 %v12427_v41, %v6204_v24  ;;  %v12429_v57 = vpop.eup %12428  ;;  %v16359_v24 = vld [vmem:[#allocation36_spill] sm:$0xff] }
0x2408   :  { %v6188_v37 = vpop.f32.mrb[112].mxu1  ;;  %v6222_v15 = vsub.f32 1.0, %v12429_v57 }
0x2409   :  { %v6201_v1 = vadd.f32 %v6198_v20, %v6188_v37  ;;  %v9712_v36 = vpop.f32.mrb[113].mxu1  ;;  %v16360_v20 = vld [vmem:[#allocation37_spill] sm:$0xff]  ;;  %v16369_v37 = vld [vmem:[#allocation82_spill] sm:$0xff] }
0x240a   :  { %v6223_v14 = vmul.f32 %v6222_v15, %v16357_v8  ;;  %v16371_v36 = vld [vmem:[#allocation100_spill] sm:$0xff] }
0x240b   :  { %v6220_v58 = vadd.f32 %v6219_v16, %v6201_v1  ;;  %v16370_v1 = vld [vmem:[#allocation98_spill] sm:$0xff] }
0x240d   :  { %12430 = vtanh.f32 %v6220_v58  ;;  %v16372_v58 = vld [vmem:[#allocation80_spill] sm:$0xff] }
0x2417   :  { %v12431_v34 = vpop.eup %12430 }
0x2418   :  { %v6224_v9 = vmul.f32 %v12431_v34, %v12429_v57  ;;  %v16373_v57 = vld [vmem:[#allocation96_spill] sm:$0xff] }
0x241a   :  { %v14873_v18 = vadd.f32 %v6224_v9, %v6223_v14  ;;  %v16375_v14 = vld [vmem:[#allocation85_spill] sm:$0xff] }
0x241c   :  { %16358 = vst [vmem:[#allocation143_spill] sm:$0xff] %v14873_v18  ;;  %6295 = vmatmul.mubr.f32.vlgmr.msra.gmra.mrb[78].mxu0 %v14873_v18  ;;  %6227 = vst [vmem:[#allocation12 + $0x28] sm:$0xff] %v14873_v18  ;;  %6366 = vmatmul.mubr.f32.vlgmr.msra.gmra.mrb[114].mxu1 %v14873_v18 }
0x241d   :  { %11731 = vmatpush3.bf16.msra.mxu0 %v16359_v24  ;;  %9745 = vmatprep.mubr.msk.f32.mxu0 %vm12751_vm0, %v15739_v51 }
0x241e   :  { %11732 = vmatprep.subr.bf16.mxu0 %v15738_v31  ;;  %9750 = vmatprep.mubr.msk.f32.mxu1 %vm12751_vm0, %v15739_v51 }
0x2421   :  { %11734 = vmatpush3.bf16.msra.mxu0 %v16360_v20 }
0x2422   :  { %11735 = vmatprep.subr.bf16.mxu0 %v15738_v31 }
0x2425   :  { %11737 = vmatpush3.bf16.msra.mxu0 %v16361_v3 }
0x2426   :  { %11738 = vmatprep.subr.bf16.mxu0 %v15738_v31 }
0x2429   :  { %11740 = vmatpush3.bf16.msra.mxu0 %v16362_v63  ;;  %v16378_v63 = vld [vmem:[#allocation72_spill] sm:$0xff] }
0x242a   :  { %11741 = vmatprep.subr.bf16.mxu0 %v15738_v31 }
0x242d   :  { %11743 = vmatpush3.bf16.msra.mxu0 %v16363_v44 }
0x242e   :  { %11744 = vmatprep.subr.bf16.mxu0 %v15738_v31 }
0x2431   :  { %11746 = vmatpush3.bf16.msra.mxu0 %v16364_v39 }
0x2432   :  { %11747 = vmatprep.subr.bf16.mxu0 %v15738_v31 }
0x2435   :  { %11749 = vmatpush3.bf16.msra.mxu0 %v16365_v4 }
0x2436   :  { %11750 = vmatprep.subr.bf16.mxu0 %v15738_v31 }
0x2439   :  { %11752 = vmatpush3.bf16.msra.mxu0 %v16366_v11 }
0x243a   :  { %11759 = vmatprep.subr.bf16.mxu0 %v15738_v31 }
0x243c   :  { %9746 = vmatmul.mubr.f32.vlgmr.msra.gmra.mrb[80].mxu0 %v14873_v18 }
0x243d   :  { %9788 = vmatprep.mubr.msk.f32.mxu0 %vm12751_vm0, %v15739_v51 }
0x24ef   :  { %v6296_v25 = vpop.f32.mrb[78].mxu0  ;;  %v14901_v53 = vpop.f32.mrb[114].mxu1 }
0x24f0   :  { %v6442_v7 = vadd.f32 %v16367_v40, %v6296_v25  ;;  %v14904_v41 = vpop.f32.mrb[79].mxu0  ;;  %v14906_v16 = vpop.f32.mrb[115].mxu1 }
0x24f1   :  { %16368 = vst [vmem:[#allocation149_spill] sm:$0xff] %v14906_v16 }
0x24f2   :  { %9749 = vmatpush3.msra.mxu1 %v6442_v7  ;;  %v16376_v7 = vld [vmem:[#allocation70_spill] sm:$0xff] }
0x24f3   :  { %9751 = vmatmul.mubr.msk.f32.vlgmr.msra.gmra.mrb[116].mxu1 %vm621_vm1, %v16369_v37  ;;  %11753 = vmatprep.subr.bf16.mxu1 %v15738_v31 }
0x24f4   :  { %9753 = vmatprep.mubr.msk.f32.mxu1 %vm12751_vm0, %v15739_v51 }
0x24f7   :  { %9754 = vmatmul.mubr.msk.f32.gmra.mrb[118].mxu1 %vm621_vm1, %v16370_v1 }
0x24f8   :  { %9756 = vmatprep.mubr.msk.f32.mxu1 %vm12751_vm0, %v15739_v51 }
0x24fb   :  { %9757 = vmatmul.mubr.msk.f32.gmra.mrb[120].mxu1 %vm621_vm1, %v16371_v36 }
0x24fc   :  { %9759 = vmatprep.mubr.msk.f32.mxu1 %vm12751_vm0, %v15739_v51 }
0x24ff   :  { %9760 = vmatmul.mubr.msk.f32.gmra.mrb[122].mxu1 %vm621_vm1, %v16372_v58  ;;  %v16377_v58 = vld [vmem:[#allocation71_spill] sm:$0xff] }
0x2500   :  { %9762 = vmatprep.mubr.msk.f32.mxu1 %vm12751_vm0, %v15739_v51 }
0x2503   :  { %9763 = vmatmul.mubr.msk.f32.gmra.mrb[124].mxu1 %vm621_vm1, %v16373_v57 }
0x2504   :  { %9775 = vmatprep.mubr.msk.f32.mxu1 %vm12751_vm0, %v15739_v51 }
0x250f   :  { %v14929_v15 = vpop.f32.mrb[80].mxu0 }
0x2510   :  { %16374 = vst [vmem:[#allocation81_spill] sm:$0xff] %v14929_v15  ;;  %v9747_v34 = vpop.f32.mrb[81].mxu0 }
0x25c6   :  { %v6512_v8 = vpop.f32.mrb[116].mxu1 }
0x25c7   :  { %v6513_v9 = vadd.f32 %v16375_v14, %v6512_v8  ;;  %v9752_v25 = vpop.f32.mrb[117].mxu1  ;;  %v16379_v14 = vld [vmem:[#allocation68_spill] sm:$0xff] }
0x25c8   :  { %v16380_v25 = vld [vmem:[#allocation86_spill] sm:$0xff] }
0x25c9   :  { %12432 = vtanh.f32 %v6513_v9 }
0x25ca   :  { %v6517_v40 = vpop.f32.mrb[118].mxu1 }
0x25cb   :  { %v6518_v37 = vadd.f32 %v16376_v7, %v6517_v40  ;;  %v9755_v1 = vpop.f32.mrb[119].mxu1 }
0x25cd   :  { %12434 = vtanh.f32 %v6518_v37 }
0x25ce   :  { %v6522_v36 = vpop.f32.mrb[120].mxu1 }
0x25cf   :  { %v6523_v11 = vadd.f32 %v16377_v58, %v6522_v36  ;;  %v9758_v57 = vpop.f32.mrb[121].mxu1 }
0x25d1   :  { %12436 = vtanh.f32 %v6523_v11 }
0x25d2   :  { %v6527_v4 = vpop.f32.mrb[122].mxu1 }
0x25d3   :  { %v12433_v39 = vpop.eup %12432  ;;  %v9761_v44 = vpop.f32.mrb[123].mxu1  ;;  %v6528_v9 = vadd.f32 %v16379_v14, %v6527_v4 }
0x25d4   :  { %v6541_v34 = vmul.f32 %v16378_v63, %v12433_v39 }
0x25d6   :  { %v6532_v3 = vpop.f32.mrb[124].mxu1  ;;  %6546 = vadd.xlane.f32.xlu1 %v6541_v34 }
0x25d7   :  { %v12435_v8 = vpop.eup %12434  ;;  %v6533_v20 = vadd.f32 %v16380_v25, %v6532_v3  ;;  %v9764_v40 = vpop.f32.mrb[125].mxu1 }
0x25d8   :  { %v6542_v7 = vmul.f32 %v16378_v63, %v12435_v8 }
0x25d9   :  { %12438 = vtanh.f32 %v6533_v20 }
0x25da   :  { %6548 = vadd.xlane.f32.xlu1 %v6542_v7  ;;  %12440 = vtanh.f32 %v6528_v9 }
0x25db   :  { %v12437_v37 = vpop.eup %12436 }
0x25dc   :  { %v6543_v11 = vmul.f32 %v16378_v63, %v12437_v37 }
0x25de   :  { %6550 = vadd.xlane.f32.xlu0 %v6543_v11 }
0x25e3   :  { %v12439_v44 = vpop.eup %12438 }
0x25e4   :  { %v6545_v39 = vmul.f32 %v16378_v63, %v12439_v44  ;;  %v12441_v1 = vpop.eup %12440 }
0x25e5   :  { %v6544_v36 = vmul.f32 %v16378_v63, %v12441_v1 }
0x25e6   :  { %6554 = vadd.xlane.f32.xlu1 %v6545_v39 }
0x25ea   :  { %6552 = vadd.xlane.f32.xlu1 %v6544_v36 }
0x2663   :  { %v6547_v4 = vpop.xlane.xlu1 %6546 }
0x2667   :  { %v6549_v3 = vpop.xlane.xlu1 %6548 }
0x266b   :  { %v6551_v34 = vpop.xlane.xlu0 %6550 }
0x2673   :  { %v6555_v58 = vpop.xlane.xlu1 %6554 }
0x2674   :  { %v6556_v57 = vmax.f32 %v6547_v4, %v6555_v58 }
0x2676   :  { %v6557_v8 = vmax.f32 %v6556_v57, %v6549_v3 }
0x2677   :  { %v6553_v20 = vpop.xlane.xlu1 %6552 }
0x2678   :  { %v6558_v14 = vmax.f32 %v6551_v34, %v6553_v20 }
0x267a   :  { %v6559_v9 = vmax.f32 %v6557_v8, %v6558_v14 }
0x267c   :  { %v6560_v25 = vrot.slane %v6559_v9, 4 }
0x267e   :  { %v6561_v40 = vmax.f32 %v6559_v9, %v6560_v25 }
0x2680   :  { %v6562_v7 = vrot.slane %v6561_v40, 2 }
0x2682   :  { %v6563_v37 = vmax.f32 %v6561_v40, %v6562_v7  ;;  %v16381_v7 = vld [vmem:[#allocation87_spill] sm:$0xff] }
0x2684   :  { %v6564_v11 = vrot.slane %v6563_v37, 1 }
0x2686   :  { %v6565_v44 = vmax.f32 %v6563_v37, %v6564_v11  ;;  %v16382_v37 = vld [vmem:[#allocation88_spill] sm:$0xff]  ;;  %v16383_v11 = vld [vmem:[#allocation89_spill] sm:$0xff] }
0x2688   :  { %v6569_v24 = vsub.f32 %v6553_v20, %v6565_v44  ;;  %v6566_v39 = vsub.f32 %v6547_v4, %v6565_v44  ;;  %v6567_v18 = vsub.f32 %v6549_v3, %v6565_v44  ;;  %v6568_v63 = vsub.f32 %v6551_v34, %v6565_v44 }
0x2689   :  { %v6570_v54 = vsub.f32 %v6555_v58, %v6565_v44  ;;  %v16384_v44 = vld [vmem:[#allocation90_spill] sm:$0xff] }
0x268a   :  { %v6577_v1 = vmul.f32 1.442695, %v6569_v24  ;;  %v6571_v36 = vmul.f32 1.442695, %v6566_v39  ;;  %v6573_v15 = vmul.f32 1.442695, %v6567_v18 }
0x268b   :  { %v6575_v16 = vmul.f32 1.442695, %v6568_v63  ;;  %v6579_v57 = vmul.f32 1.442695, %v6570_v54  ;;  %v16385_v39 = vld [vmem:[#allocation91_spill] sm:$0xff]  ;;  %v16386_v63 = vld [vmem:[#allocation92_spill] sm:$0xff] }
0x268c   :  { %12442 = vpow2.f32 %v6577_v1  ;;  %v16387_v1 = vld [vmem:[#allocation93_spill] sm:$0xff] }
0x268d   :  { %12444 = vpow2.f32 %v6571_v36  ;;  %v16388_v36 = vld [vmem:[#allocation94_spill] sm:$0xff] }
0x268e   :  { %12446 = vpow2.f32 %v6573_v15 }
0x268f   :  { %12448 = vpow2.f32 %v6575_v16 }
0x2690   :  { %12450 = vpow2.f32 %v6579_v57  ;;  %v16389_v57 = vld [vmem:[#allocation95_spill] sm:$0xff] }
0x2696   :  { %v12443_v8 = vpop.eup %12442 }
0x2697   :  { %v12445_v14 = vpop.eup %12444  ;;  %v6584_v34 = vmul.f32 %v14694_v50, %v12443_v8 }
0x2698   :  { %v12447_v9 = vpop.eup %12446  ;;  %v6581_v25 = vmul.f32 %v14676_v47, %v12445_v14 }
0x2699   :  { %v12449_v20 = vpop.eup %12448  ;;  %v11760_v4 = vpack.c.bf16 %v12447_v9, %v12445_v14  ;;  %v6582_v3 = vmul.f32 %v14682_v17, %v12447_v9  ;;  %v16391_v14 = vld [vmem:[#allocation99_spill] sm:$0xff]  ;;  %v16392_v9 = vld [vmem:[#allocation101_spill] sm:$0xff] }
0x269a   :  { %v6583_v18 = vmul.f32 %v14688_v21, %v12449_v20  ;;  %v11763_v54 = vpack.c.bf16 %v12443_v8, %v12449_v20  ;;  %v12451_v15 = vpop.eup %12450  ;;  %v16390_v8 = vld [vmem:[#allocation97_spill] sm:$0xff] }
0x269b   :  { %11761 = vmatpush3.bf16.msra.mxu0 %v11760_v4  ;;  %v11754_v24 = vpack.c.bf16 %v6582_v3, %v6581_v25  ;;  %v6585_v47 = vmul.f32 %v14704_v56, %v12451_v15  ;;  %v15012_v3 = vld [vmem:[%s15367_s11] ss:$0 sm:$0xff] }
0x269c   :  { %11762 = vmatprep.subr.bf16.mxu0 %v15738_v31  ;;  %v11757_v16 = vpack.c.bf16 %v6584_v34, %v6583_v18  ;;  %16393 = vst [vmem:[#allocation83_spill] sm:$0xff] %v15012_v3  ;;  %v16394_v18 = vld [vmem:[#allocation102_spill] sm:$0xff]  ;;  %v16395_v34 = vld [vmem:[#allocation103_spill] sm:$0xff] }
0x269d   :  { %11755 = vmatpush3.bf16.msra.mxu1 %v11754_v24 }
0x269e   :  { %11756 = vmatprep.subr.bf16.mxu1 %v15738_v31 }
0x269f   :  { %11764 = vmatpush3.bf16.msra.mxu0 %v11763_v54  ;;  %v16397_v54 = vld [vmem:[#allocation105_spill] sm:$0xff] }
0x26a0   :  { %9786 = vmatprep.subr.mxu0 %v15739_v51 }
0x26a1   :  { %11758 = vmatpush3.bf16.msra.mxu1 %v11757_v16  ;;  %v16398_v16 = vld [vmem:[#allocation106_spill] sm:$0xff] }
0x26a2   :  { %9773 = vmatprep.subr.mxu1 %v15739_v51 }
0x26a3   :  { %9787 = vmatpush3.msra.mxu0 %v12451_v15  ;;  %v16399_v15 = vld [vmem:[#allocation107_spill] sm:$0xff] }
0x26a4   :  { %9789 = vmatmul.mubr.msk.f32.vlgmr.msra.gmra.mrb[82].mxu0 %vm783_vm2, %v14710_v22  ;;  %11790 = vmatprep.subr.bf16.mxu0 %v15851_v35 }
0x26a5   :  { %9774 = vmatpush3.msra.mxu1 %v6585_v47  ;;  %11792 = vmatpush1.bf16.msra.mxu0 %v15852_v55  ;;  %v16400_v47 = vld [vmem:[#allocation108_spill] sm:$0xff] }
0x26a6   :  { %9776 = vmatmul.mubr.msk.f32.vlgmr.msra.gmra.mrb[126].mxu1 %vm783_vm2, %v14710_v22  ;;  %11765 = vmatprep.subr.bf16.mxu1 %v15738_v31 }
0x26a7   :  { %11767 = vmatpush3.bf16.msra.mxu1 %v16163_v38  ;;  %9823 = vmatprep.mubr.msk.f32.mxu1 %vm12751_vm0, %v15739_v51 }
0x26a8   :  { %11768 = vmatprep.subr.bf16.mxu1 %v15738_v31  ;;  %11794 = vmatprep.subr.bf16.mxu0 %v15853_v61 }
0x26a9   :  { %11796 = vmatpush1.bf16.msra.mxu0 %v15854_v27  ;;  %6868 = vmatprep.mubr.f32.mxu0 %v15739_v51 }
0x26aa   :  { %11798 = vmatprep.subr.bf16.mxu0 %v15956_v43 }
0x26ab   :  { %11770 = vmatpush3.bf16.msra.mxu1 %v16164_v2 }
0x26ac   :  { %11771 = vmatprep.subr.bf16.mxu1 %v15738_v31 }
0x26ad   :  { %11800 = vmatpush1.bf16.msra.mxu0 %v15957_v30 }
0x26ae   :  { %11802 = vmatprep.subr.bf16.mxu0 %v15958_v28 }
0x26af   :  { %11773 = vmatpush3.bf16.msra.mxu1 %v16165_v6 }
0x26b0   :  { %11774 = vmatprep.subr.bf16.mxu1 %v15738_v31 }
0x26b1   :  { %11804 = vmatpush1.bf16.msra.mxu0 %v15959_v59 }
0x26b2   :  { %11806 = vmatprep.subr.bf16.mxu0 %v15960_v12 }
0x26b3   :  { %11776 = vmatpush3.bf16.msra.mxu1 %v16166_v52 }
0x26b4   :  { %11777 = vmatprep.subr.bf16.mxu1 %v15738_v31 }
0x26b5   :  { %11808 = vmatpush1.bf16.msra.mxu0 %v15961_v29 }
0x26b6   :  { %11810 = vmatprep.subr.bf16.mxu0 %v15962_v26 }
0x26b7   :  { %11779 = vmatpush3.bf16.msra.mxu1 %v16167_v49 }
0x26b8   :  { %11780 = vmatprep.subr.bf16.mxu1 %v15738_v31 }
0x26b9   :  { %11812 = vmatpush1.bf16.msra.mxu0 %v15963_v48 }
0x26ba   :  { %11814 = vmatprep.subr.bf16.mxu0 %v15863_v60 }
0x26bb   :  { %11782 = vmatpush3.bf16.msra.mxu1 %v16168_v19 }
0x26bc   :  { %11783 = vmatprep.subr.bf16.mxu1 %v15738_v31 }
0x26bd   :  { %11816 = vmatpush1.bf16.msra.mxu0 %v15964_v23 }
0x26be   :  { %11818 = vmatprep.subr.bf16.mxu0 %v15965_v32 }
0x26bf   :  { %11785 = vmatpush3.bf16.msra.mxu1 %v16169_v0 }
0x26c0   :  { %11786 = vmatprep.subr.bf16.mxu1 %v15738_v31 }
0x26c1   :  { %11820 = vmatpush1.bf16.msra.mxu0 %v15966_v46 }
0x26c2   :  { %11854 = vmatprep.subr.bf16.mxu0 %v15967_v33 }
0x26c3   :  { %11788 = vmatpush3.bf16.msra.mxu1 %v16170_v42 }
0x26c4   :  { %11822 = vmatprep.subr.bf16.mxu1 %v16171_v5 }
0x2777   :  { %v6722_v17 = vpop.f32.mrb[82].mxu0 }
0x2778   :  { %12452 = vrcp.f32 %v6722_v17  ;;  %v9790_v21 = vpop.f32.mrb[83].mxu0  ;;  %v16401_v17 = vld [vmem:[#allocation109_spill] sm:$0xff] }
0x2779   :  { %v6652_v50 = vpop.f32.mrb[126].mxu1  ;;  %v16402_v21 = vld [vmem:[#allocation110_spill] sm:$0xff] }
0x277a   :  { %v9777_v56 = vpop.f32.mrb[127].mxu1 }
0x277b   :  { %v16404_v56 = vld [vmem:[#allocation112_spill] sm:$0xff] }
0x2782   :  { %v12453_v22 = vpop.eup %12452 }
0x2783   :  { %6729 = vperm.xlu1 %12238, %v12453_v22   ;;  %v16405_v22 = vld [vmem:[#allocation113_spill] sm:$0xff] }
0x2802   :  { %v6730_v58 = vpop.permute.xlu1 %6729 }
0x2803   :  { %v6732_v40 = vmul.f32 %v6730_v58, %v6652_v50  ;;  %v16403_v50 = vld [vmem:[#allocation111_spill] sm:$0xff]  ;;  %v16406_v58 = vld [vmem:[#allocation114_spill] sm:$0xff] }
0x2805   :  { %9824 = vmatmul.mubr.f32.vlgmr.msra.gmra.mrb[128].mxu1 %v6732_v40  ;;  %v16407_v40 = vld [vmem:[#allocation115_spill] sm:$0xff] }
0x2806   :  { %11824 = vmatpush1.bf16.msra.mxu1 %v15868_v13  ;;  %6939 = vmatprep.mubr.f32.mxu1 %v15739_v51 }
0x2807   :  { %11826 = vmatprep.subr.bf16.mxu1 %v15968_v45 }
0x280a   :  { %11828 = vmatpush1.bf16.msra.mxu1 %v15969_v62 }
0x280b   :  { %11830 = vmatprep.subr.bf16.mxu1 %v15970_v10 }
0x280e   :  { %11832 = vmatpush1.bf16.msra.mxu1 %v16381_v7 }
0x280f   :  { %11834 = vmatprep.subr.bf16.mxu1 %v16382_v37 }
0x2812   :  { %11836 = vmatpush1.bf16.msra.mxu1 %v16383_v11 }
0x2813   :  { %11838 = vmatprep.subr.bf16.mxu1 %v16384_v44 }
0x2816   :  { %11840 = vmatpush1.bf16.msra.mxu1 %v16385_v39 }
0x2817   :  { %11842 = vmatprep.subr.bf16.mxu1 %v16386_v63 }
0x281a   :  { %11844 = vmatpush1.bf16.msra.mxu1 %v16387_v1 }
0x281b   :  { %11846 = vmatprep.subr.bf16.mxu1 %v16388_v36 }
0x281e   :  { %11848 = vmatpush1.bf16.msra.mxu1 %v16389_v57 }
0x281f   :  { %11850 = vmatprep.subr.bf16.mxu1 %v16390_v8 }
0x2822   :  { %11852 = vmatpush1.bf16.msra.mxu1 %v16391_v14 }
0x2823   :  { %11886 = vmatprep.subr.bf16.mxu1 %v16392_v9 }
0x28d8   :  { %v6799_v25 = vpop.f32.mrb[128].mxu1 }
0x28d9   :  { %v6800_v20 = vadd.f32 %v6799_v25, %v14904_v41  ;;  %v9825_v4 = vpop.f32.mrb[129].mxu1  ;;  %v16396_v41 = vld [vmem:[#allocation104_spill] sm:$0xff] }
0x28da   :  { %v16408_v25 = vld [vmem:[#allocation116_spill] sm:$0xff]  ;;  %v16410_v4 = vld [vmem:[#allocation118_spill] sm:$0xff] }
0x28db   :  { %v15015_v24 = vadd.f32 %v15012_v3, %v6800_v20  ;;  %v16409_v20 = vld [vmem:[#allocation117_spill] sm:$0xff] }
0x28dd   :  { %7195 = vst [vmem:[#allocation13 + $0x30] sm:$0xff] %v15015_v24  ;;  %6869 = vmatmul.mubr.f32.vlgmr.msra.gmra.mrb[84].mxu0 %v15015_v24  ;;  %6940 = vmatmul.mubr.f32.vlgmr.msra.gmra.mrb[130].mxu1 %v15015_v24 }
0x28de   :  { %11856 = vmatpush1.bf16.msra.mxu0 %v16394_v18  ;;  %11888 = vmatpush1.bf16.msra.mxu1 %v16395_v34 }
0x28df   :  { %11858 = vmatprep.subr.bf16.mxu0 %v16396_v41  ;;  %11890 = vmatprep.subr.bf16.mxu1 %v16397_v54  ;;  %v16467_v41 = vld [vmem:[#allocation142_spill] sm:$0xff] }
0x28e0   :  { %7010 = vmatprep.mubr.f32.mxu0 %v15739_v51  ;;  %7081 = vmatprep.mubr.f32.mxu1 %v15739_v51 }
0x28e2   :  { %11860 = vmatpush1.bf16.msra.mxu0 %v16398_v16  ;;  %11892 = vmatpush1.bf16.msra.mxu1 %v16399_v15  ;;  %v7159_v15 = vld [vmem:[#allocation6 + $0x90] sm:$0xff]  ;;  %v16465_v16 = vld [vmem:[#allocation141_spill] sm:$0xff] }
0x28e3   :  { %11862 = vmatprep.subr.bf16.mxu0 %v16400_v47  ;;  %11894 = vmatprep.subr.bf16.mxu1 %v16401_v17  ;;  %v16411_v47 = vld [vmem:[#allocation119_spill] sm:$0xff]  ;;  %v16412_v17 = vld [vmem:[#allocation120_spill] sm:$0xff] }
0x28e6   :  { %11864 = vmatpush1.bf16.msra.mxu0 %v16402_v21  ;;  %11896 = vmatpush1.bf16.msra.mxu1 %v16403_v50  ;;  %v16413_v21 = vld [vmem:[#allocation121_spill] sm:$0xff]  ;;  %v16414_v50 = vld [vmem:[#allocation122_spill] sm:$0xff] }
0x28e7   :  { %11866 = vmatprep.subr.bf16.mxu0 %v16404_v56  ;;  %11898 = vmatprep.subr.bf16.mxu1 %v16405_v22  ;;  %v16415_v56 = vld [vmem:[#allocation123_spill] sm:$0xff]  ;;  %v16416_v22 = vld [vmem:[#allocation124_spill] sm:$0xff] }
0x28ea   :  { %11868 = vmatpush1.bf16.msra.mxu0 %v16406_v58  ;;  %11900 = vmatpush1.bf16.msra.mxu1 %v16407_v40  ;;  %v16417_v58 = vld [vmem:[#allocation125_spill] sm:$0xff]  ;;  %v16418_v40 = vld [vmem:[#allocation126_spill] sm:$0xff] }
0x28eb   :  { %11870 = vmatprep.subr.bf16.mxu0 %v16408_v25  ;;  %11902 = vmatprep.subr.bf16.mxu1 %v16409_v20  ;;  %v16419_v25 = vld [vmem:[#allocation127_spill] sm:$0xff]  ;;  %v16420_v20 = vld [vmem:[#allocation128_spill] sm:$0xff] }
0x28ee   :  { %11872 = vmatpush1.bf16.msra.mxu0 %v16410_v4  ;;  %11904 = vmatpush1.bf16.msra.mxu1 %v16411_v47  ;;  %v16421_v4 = vld [vmem:[#allocation129_spill] sm:$0xff]  ;;  %v16422_v47 = vld [vmem:[#allocation130_spill] sm:$0xff] }
0x28ef   :  { %11874 = vmatprep.subr.bf16.mxu0 %v16412_v17  ;;  %11906 = vmatprep.subr.bf16.mxu1 %v16413_v21  ;;  %v16423_v17 = vld [vmem:[#allocation131_spill] sm:$0xff] }
0x28f2   :  { %11876 = vmatpush1.bf16.msra.mxu0 %v16414_v50  ;;  %11908 = vmatpush1.bf16.msra.mxu1 %v16415_v56  ;;  %v16424_v50 = vld [vmem:[#allocation20_spill] sm:$0xff] }
0x28f3   :  { %11878 = vmatprep.subr.bf16.mxu0 %v16416_v22  ;;  %11910 = vmatprep.subr.bf16.mxu1 %v16417_v58  ;;  %v16425_v58 = vld [vmem:[#allocation132_spill] sm:$0xff] }
0x28f4   :  { %v16437_v22 = vld [vmem:[#allocation136_spill] sm:$0xff] }
0x28f5   :  { %v16460_v56 = vld [vmem:[#allocation56_spill] sm:$0xff] }
0x28f6   :  { %11880 = vmatpush1.bf16.msra.mxu0 %v16418_v40  ;;  %11912 = vmatpush1.bf16.msra.mxu1 %v16419_v25  ;;  %v16432_v25 = vld [vmem:[#allocation25_spill] sm:$0xff]  ;;  %v16433_v40 = vld [vmem:[#allocation26_spill] sm:$0xff] }
0x28f7   :  { %11882 = vmatprep.subr.bf16.mxu0 %v16420_v20  ;;  %11914 = vmatprep.subr.bf16.mxu1 %v16421_v4  ;;  %v16426_v4 = vld [vmem:[#allocation21_spill] sm:$0xff]  ;;  %v16430_v20 = vld [vmem:[#allocation24_spill] sm:$0xff] }
0x28fa   :  { %11884 = vmatpush1.bf16.msra.mxu0 %v16422_v47  ;;  %11916 = vmatpush1.bf16.msra.mxu1 %v16423_v17  ;;  %v16427_v47 = vld [vmem:[#allocation22_spill] sm:$0xff]  ;;  %v16428_v17 = vld [vmem:[#allocation133_spill] sm:$0xff] }
0x28fb   :  { %11917 = vmatprep.subr.bf16.mxu0 %v15738_v31  ;;  %11942 = vmatprep.subr.bf16.mxu1 %v16424_v50  ;;  %v16429_v50 = vld [vmem:[#allocation23_spill] sm:$0xff] }
0x28fd   :  { %7011 = vmatmul.mubr.f32.vlgmr.msra.gmra.mrb[86].mxu0 %v15015_v24  ;;  %7082 = vmatmul.mubr.f32.vlgmr.msra.gmra.mrb[132].mxu1 %v15015_v24 }
0x28fe   :  { %11919 = vmatpush3.bf16.msra.mxu0 %v16425_v58  ;;  %9858 = vmatprep.mubr.msk.f32.mxu0 %vm12751_vm0, %v15739_v51  ;;  %v16431_v58 = vld [vmem:[#allocation134_spill] sm:$0xff] }
0x28ff   :  { %11920 = vmatprep.subr.bf16.mxu0 %v15738_v31  ;;  %11944 = vmatpush1.bf16.msra.mxu1 %v16426_v4  ;;  %v16434_v4 = vld [vmem:[#allocation135_spill] sm:$0xff] }
0x2900   :  { %11946 = vmatprep.subr.bf16.mxu1 %v16427_v47  ;;  %7260 = vmatprep.mubr.f32.mxu1 %v15739_v51  ;;  %v16435_v47 = vld [vmem:[#allocation27_spill] sm:$0xff] }
0x2902   :  { %11922 = vmatpush3.bf16.msra.mxu0 %v16428_v17  ;;  %v16436_v17 = vld [vmem:[#allocation28_spill] sm:$0xff] }
0x2903   :  { %11923 = vmatprep.subr.bf16.mxu0 %v15738_v31  ;;  %11948 = vmatpush1.bf16.msra.mxu1 %v16429_v50  ;;  %v16439_v50 = vld [vmem:[#allocation30_spill] sm:$0xff] }
0x2904   :  { %11950 = vmatprep.subr.bf16.mxu1 %v16430_v20  ;;  %v16438_v20 = vld [vmem:[#allocation29_spill] sm:$0xff] }
0x2906   :  { %11925 = vmatpush3.bf16.msra.mxu0 %v16431_v58  ;;  %v16440_v58 = vld [vmem:[#allocation137_spill] sm:$0xff] }
0x2907   :  { %11926 = vmatprep.subr.bf16.mxu0 %v15738_v31  ;;  %11952 = vmatpush1.bf16.msra.mxu1 %v16432_v25  ;;  %v16442_v25 = vld [vmem:[#allocation32_spill] sm:$0xff] }
0x2908   :  { %11954 = vmatprep.subr.bf16.mxu1 %v16433_v40  ;;  %v16441_v40 = vld [vmem:[#allocation31_spill] sm:$0xff] }
0x290a   :  { %11928 = vmatpush3.bf16.msra.mxu0 %v16434_v4  ;;  %v16443_v4 = vld [vmem:[#allocation138_spill] sm:$0xff] }
0x290b   :  { %11929 = vmatprep.subr.bf16.mxu0 %v15738_v31  ;;  %11956 = vmatpush1.bf16.msra.mxu1 %v16435_v47  ;;  %v16445_v47 = vld [vmem:[#allocation34_spill] sm:$0xff] }
0x290c   :  { %11958 = vmatprep.subr.bf16.mxu1 %v16436_v17  ;;  %v16444_v17 = vld [vmem:[#allocation33_spill] sm:$0xff] }
0x290e   :  { %11931 = vmatpush3.bf16.msra.mxu0 %v16437_v22  ;;  %v16446_v22 = vld [vmem:[#allocation139_spill] sm:$0xff] }
0x290f   :  { %11932 = vmatprep.subr.bf16.mxu0 %v15738_v31  ;;  %11960 = vmatpush1.bf16.msra.mxu1 %v16438_v20  ;;  %v16447_v20 = vld [vmem:[#allocation44_spill] sm:$0xff] }
0x2910   :  { %11962 = vmatprep.subr.bf16.mxu1 %v16439_v50  ;;  %v16448_v50 = vld [vmem:[#allocation35_spill] sm:$0xff] }
0x2912   :  { %11934 = vmatpush3.bf16.msra.mxu0 %v16440_v58  ;;  %v16457_v58 = vld [vmem:[#allocation53_spill] sm:$0xff] }
0x2913   :  { %11935 = vmatprep.subr.bf16.mxu0 %v15738_v31  ;;  %11964 = vmatpush1.bf16.msra.mxu1 %v16441_v40  ;;  %v16449_v40 = vld [vmem:[#allocation45_spill] sm:$0xff] }
0x2914   :  { %11966 = vmatprep.subr.bf16.mxu1 %v16442_v25  ;;  %v16450_v25 = vld [vmem:[#allocation46_spill] sm:$0xff] }
0x2916   :  { %11937 = vmatpush3.bf16.msra.mxu0 %v16443_v4  ;;  %v16451_v4 = vld [vmem:[#allocation47_spill] sm:$0xff] }
0x2917   :  { %11938 = vmatprep.subr.bf16.mxu0 %v15738_v31  ;;  %11968 = vmatpush1.bf16.msra.mxu1 %v16444_v17  ;;  %v16452_v17 = vld [vmem:[#allocation48_spill] sm:$0xff] }
0x2918   :  { %11970 = vmatprep.subr.bf16.mxu1 %v16445_v47  ;;  %v16453_v47 = vld [vmem:[#allocation49_spill] sm:$0xff] }
0x291a   :  { %11940 = vmatpush3.bf16.msra.mxu0 %v16446_v22  ;;  %v16454_v22 = vld [vmem:[#allocation50_spill] sm:$0xff] }
0x291b   :  { %11974 = vmatprep.subr.bf16.mxu0 %v16447_v20  ;;  %11972 = vmatpush1.bf16.msra.mxu1 %v16448_v50  ;;  %v16455_v20 = vld [vmem:[#allocation51_spill] sm:$0xff]  ;;  %v16456_v50 = vld [vmem:[#allocation52_spill] sm:$0xff] }
0x291c   :  { %12005 = vmatprep.subr.bf16.mxu1 %v15738_v31 }
0x291d   :  { %9859 = vmatmul.mubr.f32.vlgmr.msra.gmra.mrb[88].mxu0 %v15015_v24  ;;  %v16458_v24 = vld [vmem:[#allocation54_spill] sm:$0xff] }
0x291e   :  { %11976 = vmatpush1.bf16.msra.mxu0 %v16449_v40  ;;  %7331 = vmatprep.mubr.f32.mxu0 %v15739_v51  ;;  %v16459_v40 = vld [vmem:[#allocation55_spill] sm:$0xff] }
0x291f   :  { %11978 = vmatprep.subr.bf16.mxu0 %v16450_v25  ;;  %v16461_v25 = vld [vmem:[#allocation57_spill] sm:$0xff] }
0x2922   :  { %11980 = vmatpush1.bf16.msra.mxu0 %v16451_v4  ;;  %v16462_v4 = vld [vmem:[#allocation58_spill] sm:$0xff] }
0x2923   :  { %11982 = vmatprep.subr.bf16.mxu0 %v16452_v17  ;;  %v16463_v17 = vld [vmem:[#allocation59_spill] sm:$0xff] }
0x2926   :  { %11984 = vmatpush1.bf16.msra.mxu0 %v16453_v47 }
0x2927   :  { %11986 = vmatprep.subr.bf16.mxu0 %v16454_v22  ;;  %v16464_v22 = vld [vmem:[#allocation140_spill] sm:$0xff] }
0x2928   :  { %v6443_v47 = vadd.f32 %v14901_v53, %v16464_v22 }
0x292a   :  { %11988 = vmatpush1.bf16.msra.mxu0 %v16455_v20 }
0x292b   :  { %11990 = vmatprep.subr.bf16.mxu0 %v16456_v50 }
0x292e   :  { %11992 = vmatpush1.bf16.msra.mxu0 %v16457_v58 }
0x292f   :  { %11994 = vmatprep.subr.bf16.mxu0 %v16458_v24 }
0x2932   :  { %11996 = vmatpush1.bf16.msra.mxu0 %v16459_v40  ;;  %v7160_v40 = vld [vmem:[#allocation6 + $0x98] sm:$0xff] }
0x2933   :  { %11998 = vmatprep.subr.bf16.mxu0 %v16460_v56  ;;  %v16466_v56 = vld [vmem:[#allocation149_spill] sm:$0xff] }
0x2934   :  { %v6444_v54 = vadd.f32 %v16466_v56, %v16465_v16 }
0x2936   :  { %12000 = vmatpush1.bf16.msra.mxu0 %v16461_v25 }
0x2937   :  { %12002 = vmatprep.subr.bf16.mxu0 %v16462_v4  ;;  %v16468_v4 = vld [vmem:[#allocation81_spill] sm:$0xff] }
0x2938   :  { %v6445_v34 = vadd.f32 %v16468_v4, %v16467_v41 }
0x293a   :  { %12004 = vmatpush1.bf16.msra.mxu0 %v16463_v17 }
0x293b   :  { %9896 = vmatprep.subr.mxu0 %v15739_v51 }
0x29b0   :  { %v6870_v20 = vpop.f32.mrb[84].mxu0  ;;  %v6941_v50 = vpop.f32.mrb[130].mxu1 }
0x29b1   :  { %v6872_v58 = vpop.f32.mrb[85].mxu0  ;;  %v6943_v21 = vpop.f32.mrb[131].mxu1  ;;  %v7162_v25 = vmul.f32 %v7159_v15, %v6870_v20 }
0x29b2   :  { %v7168_v24 = vmul.f32 %v6943_v21, %v6443_v47  ;;  %v7163_v17 = vmul.f32 %v7160_v40, %v6872_v58  ;;  %v7161_v58 = vld [vmem:[#allocation6 + $0xa0] sm:$0xff] }
0x29b3   :  { %v7164_v41 = vmul.f32 %v7161_v58, %v6941_v50  ;;  %v16473_v50 = vld [vmem:[#allocation38_spill] sm:$0xff] }
0x29d0   :  { %v7012_v18 = vpop.f32.mrb[86].mxu0  ;;  %v7083_v3 = vpop.f32.mrb[132].mxu1 }
0x29d1   :  { %v7169_v9 = vmul.f32 %v7012_v18, %v6444_v54  ;;  %v7165_v14 = vadd.f32 %v7162_v25, %v7083_v3  ;;  %v7014_v53 = vpop.f32.mrb[87].mxu0  ;;  %v7085_v22 = vpop.f32.mrb[133].mxu1 }
0x29d2   :  { %v7170_v8 = vmul.f32 %v7014_v53, %v6445_v34  ;;  %v7166_v57 = vadd.f32 %v7163_v17, %v7085_v22  ;;  %v16474_v17 = vld [vmem:[#allocation39_spill] sm:$0xff]  ;;  %v16475_v53 = vld [vmem:[#allocation40_spill] sm:$0xff] }
0x29d3   :  { %v7171_v36 = vadd.f32 %v7168_v24, %v7165_v14 }
0x29d4   :  { %v7178_v21 = vadd.f32 %v7169_v9, %v7166_v57  ;;  %v16469_v9 = vld [vmem:[#allocation143_spill] sm:$0xff] }
0x29d5   :  { %v8262_v47 = vmul.f32 -1.442695, %v7171_v36 }
0x29d6   :  { %v8263_v1 = vmul.f32 -1.442695, %v7178_v21  ;;  %v16476_v21 = vld [vmem:[#allocation41_spill] sm:$0xff] }
0x29d7   :  { %12454 = vpow2.f32 %v8262_v47  ;;  %v16477_v47 = vld [vmem:[#allocation42_spill] sm:$0xff] }
0x29d8   :  { %12456 = vpow2.f32 %v8263_v1 }
0x29e1   :  { %v12455_v56 = vpop.eup %12454 }
0x29e2   :  { %v7175_v15 = vadd.f32 1.0, %v12455_v56  ;;  %v12457_v20 = vpop.eup %12456  ;;  %v16478_v56 = vld [vmem:[#allocation43_spill] sm:$0xff] }
0x29e3   :  { %v7182_v4 = vadd.f32 1.0, %v12457_v20 }
0x29e4   :  { %12458 = vrcp.f32 %v7175_v15 }
0x29e5   :  { %12460 = vrcp.f32 %v7182_v4  ;;  %v12554_v4 = vld [vmem:[%s15365_s9] ss:$0 sm:$0xff] }
0x29ee   :  { %v12459_v40 = vpop.eup %12458 }
0x29ef   :  { %v7185_v18 = vmul.f32 %v12459_v40, %v7170_v8  ;;  %v12461_v57 = vpop.eup %12460  ;;  %v16471_v8 = vld [vmem:[#allocation36_spill] sm:$0xff] }
0x29f0   :  { %v7154_v3 = vpop.f32.mrb[88].mxu0  ;;  %v7188_v36 = vsub.f32 1.0, %v12461_v57 }
0x29f1   :  { %v7167_v54 = vadd.f32 %v7164_v41, %v7154_v3  ;;  %v9860_v34 = vpop.f32.mrb[89].mxu0  ;;  %v16472_v41 = vld [vmem:[#allocation37_spill] sm:$0xff]  ;;  %v12555_v3 = vld [vmem:[%s15361_s5] sm:$0xff] }
0x29f2   :  { %v7189_v1 = vmul.f32 %v7188_v36, %v16469_v9  ;;  %v12557_v34 = vld [vmem:[%s15361_s5 + $0x10] sm:$0xff] }
0x29f3   :  { %v7186_v22 = vadd.f32 %v7185_v18, %v7167_v54  ;;  %v12556_v54 = vld [vmem:[%s15361_s5 + $0x8] sm:$0xff] }
0x29f5   :  { %12462 = vtanh.f32 %v7186_v22  ;;  %v12558_v22 = vld [vmem:[%s15361_s5 + $0x18] sm:$0xff] }
0x29ff   :  { %v12463_v14 = vpop.eup %12462 }
0x2a00   :  { %v7190_v24 = vmul.f32 %v12463_v14, %v12461_v57  ;;  %v12559_v57 = vld [vmem:[%s15361_s5 + $0x20] sm:$0xff] }
0x2a02   :  { %v15116_v25 = vadd.f32 %v7190_v24, %v7189_v1  ;;  %v12560_v1 = vld [vmem:[#allocation3] sm:$0xff] }
0x2a04   :  { %16470 = vst [vmem:[#allocation144_spill] sm:$0xff] %v15116_v25  ;;  %7261 = vmatmul.mubr.f32.vlgmr.msra.gmra.mrb[134].mxu1 %v15116_v25  ;;  %7193 = vst [vmem:[#allocation12 + $0x30] sm:$0xff] %v15116_v25  ;;  %7332 = vmatmul.mubr.f32.vlgmr.msra.gmra.mrb[90].mxu0 %v15116_v25 }
0x2a05   :  { %12007 = vmatpush3.bf16.msra.mxu1 %v16471_v8  ;;  %9893 = vmatprep.mubr.msk.f32.mxu1 %vm12751_vm0, %v15739_v51 }
0x2a06   :  { %12008 = vmatprep.subr.bf16.mxu1 %v15738_v31  ;;  %9898 = vmatprep.mubr.msk.f32.mxu0 %vm12751_vm0, %v15739_v51 }
0x2a09   :  { %12010 = vmatpush3.bf16.msra.mxu1 %v16472_v41 }
0x2a0a   :  { %12011 = vmatprep.subr.bf16.mxu1 %v15738_v31 }
0x2a0d   :  { %12013 = vmatpush3.bf16.msra.mxu1 %v16473_v50  ;;  %v12561_v50 = vld [vmem:[#allocation3 + $0x8] sm:$0xff] }
0x2a0e   :  { %12014 = vmatprep.subr.bf16.mxu1 %v15738_v31 }
0x2a11   :  { %12016 = vmatpush3.bf16.msra.mxu1 %v16474_v17 }
0x2a12   :  { %12017 = vmatprep.subr.bf16.mxu1 %v15738_v31 }
0x2a15   :  { %12019 = vmatpush3.bf16.msra.mxu1 %v16475_v53 }
0x2a16   :  { %12020 = vmatprep.subr.bf16.mxu1 %v15738_v31 }
0x2a19   :  { %12022 = vmatpush3.bf16.msra.mxu1 %v16476_v21 }
0x2a1a   :  { %12023 = vmatprep.subr.bf16.mxu1 %v15738_v31 }
0x2a1d   :  { %12025 = vmatpush3.bf16.msra.mxu1 %v16477_v47  ;;  %v12562_v47 = vld [vmem:[#allocation3 + $0x10] sm:$0xff] }
0x2a1e   :  { %12026 = vmatprep.subr.bf16.mxu1 %v15738_v31 }
0x2a21   :  { %12028 = vmatpush3.bf16.msra.mxu1 %v16478_v56 }
0x2a22   :  { %12035 = vmatprep.subr.bf16.mxu1 %v15738_v31 }
0x2a24   :  { %9894 = vmatmul.mubr.f32.vlgmr.msra.gmra.mrb[136].mxu1 %v15116_v25 }
0x2a25   :  { %9936 = vmatprep.mubr.msk.f32.mxu1 %vm12751_vm0, %v15739_v51 }
0x2ad7   :  { %v7262_v15 = vpop.f32.mrb[134].mxu1  ;;  %v15144_v20 = vpop.f32.mrb[90].mxu0 }
0x2ad8   :  { %v7408_v58 = vadd.f32 %v12554_v4, %v7262_v15  ;;  %v15149_v40 = vpop.f32.mrb[135].mxu1  ;;  %v15151_v18 = vpop.f32.mrb[91].mxu0 }
0x2ad9   :  { %16479 = vst [vmem:[#allocation145_spill] sm:$0xff] %v15151_v18 }
0x2ada   :  { %9897 = vmatpush3.msra.mxu0 %v7408_v58 }
0x2adb   :  { %9899 = vmatmul.mubr.msk.f32.vlgmr.msra.gmra.mrb[92].mxu0 %vm621_vm1, %v12555_v3  ;;  %12029 = vmatprep.subr.bf16.mxu0 %v15738_v31 }
0x2adc   :  { %9901 = vmatprep.mubr.msk.f32.mxu0 %vm12751_vm0, %v15739_v51 }
0x2adf   :  { %9902 = vmatmul.mubr.msk.f32.gmra.mrb[94].mxu0 %vm621_vm1, %v12556_v54  ;;  %v12563_v54 = vld [vmem:[%s15366_s10] ss:$0 sm:$0xff] }
0x2ae0   :  { %9904 = vmatprep.mubr.msk.f32.mxu0 %vm12751_vm0, %v15739_v51 }
0x2ae3   :  { %9905 = vmatmul.mubr.msk.f32.gmra.mrb[96].mxu0 %vm621_vm1, %v12557_v34 }
0x2ae4   :  { %9907 = vmatprep.mubr.msk.f32.mxu0 %vm12751_vm0, %v15739_v51 }
0x2ae7   :  { %9908 = vmatmul.mubr.msk.f32.gmra.mrb[98].mxu0 %vm621_vm1, %v12558_v22 }
0x2ae8   :  { %9910 = vmatprep.mubr.msk.f32.mxu0 %vm12751_vm0, %v15739_v51 }
0x2aeb   :  { %9911 = vmatmul.mubr.msk.f32.gmra.mrb[100].mxu0 %vm621_vm1, %v12559_v57 }
0x2aec   :  { %9923 = vmatprep.mubr.msk.f32.mxu0 %vm12751_vm0, %v15739_v51 }
0x2af7   :  { %v15184_v36 = vpop.f32.mrb[136].mxu1 }
0x2af8   :  { %16480 = vst [vmem:[#allocation146_spill] sm:$0xff] %v15184_v36  ;;  %v9895_v14 = vpop.f32.mrb[137].mxu1 }
0x2af9   :  { %v12564_v14 = vld [vmem:[#allocation3 + $0x18] sm:$0xff] }
0x2bae   :  { %v7478_v9 = vpop.f32.mrb[92].mxu0 }
0x2baf   :  { %v7479_v24 = vadd.f32 %v12560_v1, %v7478_v9  ;;  %v9900_v8 = vpop.f32.mrb[93].mxu0  ;;  %v12565_v1 = vld [vmem:[#allocation3 + $0x20] sm:$0xff] }
0x2bb1   :  { %12464 = vtanh.f32 %v7479_v24 }
0x2bb2   :  { %v7483_v41 = vpop.f32.mrb[94].mxu0 }
0x2bb3   :  { %v7484_v17 = vadd.f32 %v12561_v50, %v7483_v41  ;;  %v9903_v53 = vpop.f32.mrb[95].mxu0 }
0x2bb5   :  { %12466 = vtanh.f32 %v7484_v17 }
0x2bb6   :  { %v7488_v21 = vpop.f32.mrb[96].mxu0 }
0x2bb7   :  { %v7489_v56 = vadd.f32 %v12562_v47, %v7488_v21  ;;  %v9906_v15 = vpop.f32.mrb[97].mxu0 }
0x2bb9   :  { %12468 = vtanh.f32 %v7489_v56 }
0x2bba   :  { %v7493_v4 = vpop.f32.mrb[98].mxu0 }
0x2bbb   :  { %v12465_v58 = vpop.eup %12464  ;;  %v9909_v3 = vpop.f32.mrb[99].mxu0  ;;  %v7494_v9 = vadd.f32 %v12564_v14, %v7493_v4 }
0x2bbc   :  { %v7507_v34 = vmul.f32 %v12563_v54, %v12465_v58 }
0x2bbe   :  { %v7498_v22 = vpop.f32.mrb[100].mxu0  ;;  %7512 = vadd.xlane.f32.xlu1 %v7507_v34 }
0x2bbf   :  { %v12467_v57 = vpop.eup %12466  ;;  %v7499_v24 = vadd.f32 %v12565_v1, %v7498_v22  ;;  %v9912_v8 = vpop.f32.mrb[101].mxu0 }
0x2bc0   :  { %v7508_v41 = vmul.f32 %v12563_v54, %v12467_v57 }
0x2bc1   :  { %12470 = vtanh.f32 %v7499_v24 }
0x2bc2   :  { %7514 = vadd.xlane.f32.xlu0 %v7508_v41  ;;  %12472 = vtanh.f32 %v7494_v9 }
0x2bc3   :  { %v12469_v50 = vpop.eup %12468 }
0x2bc4   :  { %v7509_v17 = vmul.f32 %v12563_v54, %v12469_v50 }
0x2bc6   :  { %7516 = vadd.xlane.f32.xlu0 %v7509_v17 }
0x2bcb   :  { %v12471_v53 = vpop.eup %12470 }
0x2bcc   :  { %v7511_v21 = vmul.f32 %v12563_v54, %v12471_v53  ;;  %v12473_v47 = vpop.eup %12472 }
0x2bcd   :  { %v7510_v56 = vmul.f32 %v12563_v54, %v12473_v47 }
0x2bce   :  { %7520 = vadd.xlane.f32.xlu0 %v7511_v21 }
0x2bd2   :  { %7518 = vadd.xlane.f32.xlu0 %v7510_v56 }
0x2c4b   :  { %v7513_v3 = vpop.xlane.xlu1 %7512 }
0x2c4f   :  { %v7515_v15 = vpop.xlane.xlu0 %7514 }
0x2c53   :  { %v7517_v58 = vpop.xlane.xlu0 %7516 }
0x2c5b   :  { %v7521_v4 = vpop.xlane.xlu0 %7520 }
0x2c5c   :  { %v7522_v34 = vmax.f32 %v7513_v3, %v7521_v4 }
0x2c5e   :  { %v7523_v14 = vmax.f32 %v7522_v34, %v7515_v15 }
0x2c5f   :  { %v7519_v22 = vpop.xlane.xlu0 %7518 }
0x2c60   :  { %v7524_v57 = vmax.f32 %v7517_v58, %v7519_v22 }
0x2c62   :  { %v7525_v1 = vmax.f32 %v7523_v14, %v7524_v57 }
0x2c64   :  { %v7526_v24 = vrot.slane %v7525_v1, 4 }
0x2c66   :  { %v7527_v8 = vmax.f32 %v7525_v1, %v7526_v24 }
0x2c68   :  { %v7528_v9 = vrot.slane %v7527_v8, 2 }
0x2c6a   :  { %v7529_v41 = vmax.f32 %v7527_v8, %v7528_v9 }
0x2c6c   :  { %v7530_v50 = vrot.slane %v7529_v41, 1 }
0x2c6e   :  { %v7531_v17 = vmax.f32 %v7529_v41, %v7530_v50 }
0x2c70   :  { %v7535_v53 = vsub.f32 %v7519_v22, %v7531_v17  ;;  %v7532_v25 = vsub.f32 %v7513_v3, %v7531_v17  ;;  %v7533_v21 = vsub.f32 %v7515_v15, %v7531_v17  ;;  %v7534_v54 = vsub.f32 %v7517_v58, %v7531_v17  ;;  %v12566_v3 = vld [vmem:[%s15356_s0] sm:$0xff] }
0x2c71   :  { %v7536_v16 = vsub.f32 %v7521_v4, %v7531_v17  ;;  %v12569_v4 = vld [vmem:[%s15356_s0 + $0x18] sm:$0xff]  ;;  %v12570_v17 = vld [vmem:[%s15356_s0 + $0x20] sm:$0xff] }
0x2c72   :  { %v7543_v47 = vmul.f32 1.442695, %v7535_v53  ;;  %v7537_v56 = vmul.f32 1.442695, %v7532_v25  ;;  %v7539_v36 = vmul.f32 1.442695, %v7533_v21 }
0x2c73   :  { %v7541_v18 = vmul.f32 1.442695, %v7534_v54  ;;  %v7545_v34 = vmul.f32 1.442695, %v7536_v16  ;;  %v12567_v25 = vld [vmem:[%s15356_s0 + $0x8] sm:$0xff]  ;;  %v12568_v16 = vld [vmem:[%s15356_s0 + $0x10] sm:$0xff] }
0x2c74   :  { %12474 = vpow2.f32 %v7543_v47  ;;  %v12571_v21 = vld [vmem:[%s15360_s4] sm:$0xff]  ;;  %v16507_v54 = vld [vmem:[#allocation121_spill] sm:$0xff]  ;;  %v16508_v47 = vld [vmem:[#allocation122_spill] sm:$0xff]  ;;  %s12753_s0 = smov [#allocation13]  }
0x2c75   :  { %12476 = vpow2.f32 %v7537_v56  ;;  %v16509_v56 = vld [vmem:[#allocation123_spill] sm:$0xff]  ;;  %s8180_s4 = sshll.u32 %s12753_s0, 4  ;;  %s8181_s4 = int_to_ptr.vmem [resolvable:$true] %s8180_s4 }
0x2c76   :  { %12478 = vpow2.f32 %v7539_v36  ;;  %s12682_s3 = scalar_lea.vmem %s8181_s4, 1024  ;;  %p12687_p13 = scmp.lt.s32.totalorder %s8181_s4, %s8181_s4 }
0x2c77   :  { %12480 = vpow2.f32 %v7541_v18  ;;  %p12683_p12 = scmp.ne.s32.totalorder %s8181_s4, %s12682_s3  ;;  %p12688_p0 = scmp.lt.s32.totalorder %s12682_s3, %s12682_s3 }
0x2c78   :  { %12482 = vpow2.f32 %v7545_v34  ;;  %v16510_v34 = vld [vmem:[#allocation124_spill] sm:$0xff] }
0x2c79   :  { %p12689_p1 = por %p12688_p0, %p12687_p13 }
0x2c7b   :  { %p12690_p2 = pnand %p12689_p1, %p12683_p12 }
0x2c7e   :  { %v12475_v14 = vpop.eup %12474 }
0x2c7f   :  { %v12477_v57 = vpop.eup %12476  ;;  %v7550_v8 = vmul.f32 %v12569_v4, %v12475_v14  ;;  %v16523_v4 = vld [vmem:[#allocation137_spill] sm:$0xff] }
0x2c80   :  { %v12479_v1 = vpop.eup %12478  ;;  %v7547_v15 = vmul.f32 %v12566_v3, %v12477_v57  ;;  %v16514_v3 = vld [vmem:[#allocation128_spill] sm:$0xff] }
0x2c81   :  { %v12481_v58 = vpop.eup %12480  ;;  %v12036_v22 = vpack.c.bf16 %v12479_v1, %v12477_v57  ;;  %v7548_v24 = vmul.f32 %v12567_v25, %v12479_v1  ;;  %v16512_v57 = vld [vmem:[#allocation126_spill] sm:$0xff]  ;;  %v16513_v1 = vld [vmem:[#allocation127_spill] sm:$0xff]  ;;  %v16518_v25 = vld [vmem:[#allocation132_spill] sm:$0xff] }
0x2c82   :  { %v7549_v18 = vmul.f32 %v12568_v16, %v12481_v58  ;;  %v12039_v9 = vpack.c.bf16 %v12475_v14, %v12481_v58  ;;  %v12483_v50 = vpop.eup %12482  ;;  %v16511_v14 = vld [vmem:[#allocation125_spill] sm:$0xff]  ;;  %v16516_v58 = vld [vmem:[#allocation130_spill] sm:$0xff]  ;;  %v16521_v16 = vld [vmem:[#allocation135_spill] sm:$0xff] }
0x2c83   :  { %12037 = vmatpush3.bf16.msra.mxu1 %v12036_v22  ;;  %v12030_v36 = vpack.c.bf16 %v7548_v24, %v7547_v15  ;;  %v7551_v53 = vmul.f32 %v12570_v17, %v12483_v50  ;;  %v16515_v15 = vld [vmem:[#allocation129_spill] sm:$0xff]  ;;  %v16517_v22 = vld [vmem:[#allocation131_spill] sm:$0xff] }
0x2c84   :  { %12038 = vmatprep.subr.bf16.mxu1 %v15738_v31  ;;  %v12033_v41 = vpack.c.bf16 %v7550_v8, %v7549_v18  ;;  %v16519_v24 = vld [vmem:[#allocation133_spill] sm:$0xff]  ;;  %v16522_v18 = vld [vmem:[#allocation136_spill] sm:$0xff]  ;;  %v16525_v8 = vld [vmem:[#allocation139_spill] sm:$0xff] }
0x2c85   :  { %12031 = vmatpush3.bf16.msra.mxu0 %v12030_v36  ;;  %v16520_v36 = vld [vmem:[#allocation134_spill] sm:$0xff] }
0x2c86   :  { %12032 = vmatprep.subr.bf16.mxu0 %v15738_v31 }
0x2c87   :  { %12040 = vmatpush3.bf16.msra.mxu1 %v12039_v9 }
0x2c88   :  { %9934 = vmatprep.subr.mxu1 %v15739_v51 }
0x2c89   :  { %12034 = vmatpush3.bf16.msra.mxu0 %v12033_v41 }
0x2c8a   :  { %9921 = vmatprep.subr.mxu0 %v15739_v51 }
0x2c8b   :  { %9935 = vmatpush3.msra.mxu1 %v12483_v50 }
0x2c8c   :  { %9937 = vmatmul.mubr.msk.f32.vlgmr.msra.gmra.mrb[138].mxu1 %vm783_vm2, %v12571_v21  ;;  %12066 = vmatprep.subr.bf16.mxu1 %v15851_v35 }
0x2c8d   :  { %9922 = vmatpush3.msra.mxu0 %v7551_v53  ;;  %12068 = vmatpush1.bf16.msra.mxu1 %v15852_v55 }
0x2c8e   :  { %9924 = vmatmul.mubr.msk.f32.vlgmr.msra.gmra.mrb[102].mxu0 %vm783_vm2, %v12571_v21  ;;  %12041 = vmatprep.subr.bf16.mxu0 %v15738_v31 }
0x2c8f   :  { %12043 = vmatpush3.bf16.msra.mxu0 %v16163_v38  ;;  %9971 = vmatprep.mubr.msk.f32.mxu0 %vm12751_vm0, %v15739_v51  ;;  %v16491_v38 = vld [vmem:[#allocation105_spill] sm:$0xff] }
0x2c90   :  { %12044 = vmatprep.subr.bf16.mxu0 %v15738_v31  ;;  %12070 = vmatprep.subr.bf16.mxu1 %v15853_v61 }
0x2c91   :  { %12072 = vmatpush1.bf16.msra.mxu1 %v15854_v27  ;;  %7834 = vmatprep.mubr.f32.mxu1 %v15739_v51 }
0x2c92   :  { %12074 = vmatprep.subr.bf16.mxu1 %v15956_v43 }
0x2c93   :  { %12046 = vmatpush3.bf16.msra.mxu0 %v16164_v2  ;;  %v16492_v2 = vld [vmem:[#allocation106_spill] sm:$0xff] }
0x2c94   :  { %12047 = vmatprep.subr.bf16.mxu0 %v15738_v31 }
0x2c95   :  { %12076 = vmatpush1.bf16.msra.mxu1 %v15957_v30 }
0x2c96   :  { %12078 = vmatprep.subr.bf16.mxu1 %v15958_v28  ;;  %v16482_v28 = vld [vmem:[#allocation94_spill] sm:$0xff] }
0x2c97   :  { %12049 = vmatpush3.bf16.msra.mxu0 %v16165_v6  ;;  %v16493_v6 = vld [vmem:[#allocation107_spill] sm:$0xff] }
0x2c98   :  { %12050 = vmatprep.subr.bf16.mxu0 %v15738_v31 }
0x2c99   :  { %12080 = vmatpush1.bf16.msra.mxu1 %v15959_v59  ;;  %v16483_v59 = vld [vmem:[#allocation95_spill] sm:$0xff] }
0x2c9a   :  { %12082 = vmatprep.subr.bf16.mxu1 %v15960_v12  ;;  %v16484_v12 = vld [vmem:[#allocation97_spill] sm:$0xff] }
0x2c9b   :  { %12052 = vmatpush3.bf16.msra.mxu0 %v16166_v52  ;;  %v16494_v52 = vld [vmem:[#allocation108_spill] sm:$0xff] }
0x2c9c   :  { %12053 = vmatprep.subr.bf16.mxu0 %v15738_v31 }
0x2c9d   :  { %12084 = vmatpush1.bf16.msra.mxu1 %v15961_v29  ;;  %v16485_v29 = vld [vmem:[#allocation99_spill] sm:$0xff] }
0x2c9e   :  { %12086 = vmatprep.subr.bf16.mxu1 %v15962_v26  ;;  %v16486_v26 = vld [vmem:[#allocation101_spill] sm:$0xff] }
0x2c9f   :  { %12055 = vmatpush3.bf16.msra.mxu0 %v16167_v49  ;;  %v16495_v49 = vld [vmem:[#allocation109_spill] sm:$0xff] }
0x2ca0   :  { %12056 = vmatprep.subr.bf16.mxu0 %v15738_v31 }
0x2ca1   :  { %12088 = vmatpush1.bf16.msra.mxu1 %v15963_v48 }
0x2ca2   :  { %12090 = vmatprep.subr.bf16.mxu1 %v15863_v60 }
0x2ca3   :  { %12058 = vmatpush3.bf16.msra.mxu0 %v16168_v19  ;;  %v16496_v19 = vld [vmem:[#allocation110_spill] sm:$0xff] }
0x2ca4   :  { %12059 = vmatprep.subr.bf16.mxu0 %v15738_v31 }
0x2ca5   :  { %12092 = vmatpush1.bf16.msra.mxu1 %v15964_v23 }
0x2ca6   :  { %12094 = vmatprep.subr.bf16.mxu1 %v15965_v32 }
0x2ca7   :  { %12061 = vmatpush3.bf16.msra.mxu0 %v16169_v0  ;;  %v16497_v0 = vld [vmem:[#allocation111_spill] sm:$0xff] }
0x2ca8   :  { %12062 = vmatprep.subr.bf16.mxu0 %v15738_v31 }
0x2ca9   :  { %12096 = vmatpush1.bf16.msra.mxu1 %v15966_v46  ;;  %v16487_v46 = vld [vmem:[#allocation83_spill] sm:$0xff] }
0x2caa   :  { %12130 = vmatprep.subr.bf16.mxu1 %v15967_v33 }
0x2cab   :  { %12064 = vmatpush3.bf16.msra.mxu0 %v16170_v42  ;;  %v16498_v42 = vld [vmem:[#allocation112_spill] sm:$0xff] }
0x2cac   :  { %12098 = vmatprep.subr.bf16.mxu0 %v16171_v5  ;;  %v16499_v5 = vld [vmem:[#allocation113_spill] sm:$0xff] }
0x2d5f   :  { %v7688_v35 = vpop.f32.mrb[138].mxu1 }
0x2d60   :  { %12484 = vrcp.f32 %v7688_v35  ;;  %v9938_v55 = vpop.f32.mrb[139].mxu1 }
0x2d61   :  { %v7618_v27 = vpop.f32.mrb[102].mxu0 }
0x2d62   :  { %v9925_v60 = vpop.f32.mrb[103].mxu0 }
0x2d6a   :  { %v12485_v61 = vpop.eup %12484 }
0x2d6b   :  { %7695 = vperm.xlu0 %12239, %v12485_v61  }
0x2dea   :  { %v7696_v43 = vpop.permute.xlu0 %7695 }
0x2deb   :  { %v7698_v30 = vmul.f32 %v7696_v43, %v7618_v27 }
0x2ded   :  { %9972 = vmatmul.mubr.f32.vlgmr.msra.gmra.mrb[104].mxu0 %v7698_v30 }
0x2dee   :  { %12100 = vmatpush1.bf16.msra.mxu0 %v15868_v13  ;;  %7905 = vmatprep.mubr.f32.mxu0 %v15739_v51  ;;  %v16481_v13 = vld [vmem:[#allocation93_spill] sm:$0xff] }
0x2def   :  { %12102 = vmatprep.subr.bf16.mxu0 %v15968_v45  ;;  %v16488_v45 = vld [vmem:[#allocation102_spill] sm:$0xff] }
0x2df2   :  { %12104 = vmatpush1.bf16.msra.mxu0 %v15969_v62  ;;  %v16489_v62 = vld [vmem:[#allocation103_spill] sm:$0xff] }
0x2df3   :  { %12106 = vmatprep.subr.bf16.mxu0 %v15970_v10  ;;  %v16490_v10 = vld [vmem:[#allocation104_spill] sm:$0xff] }
0x2df6   :  { %12108 = vmatpush1.bf16.msra.mxu0 %v16381_v7  ;;  %v16500_v7 = vld [vmem:[#allocation114_spill] sm:$0xff] }
0x2df7   :  { %12110 = vmatprep.subr.bf16.mxu0 %v16382_v37  ;;  %v16501_v37 = vld [vmem:[#allocation115_spill] sm:$0xff] }
0x2dfa   :  { %12112 = vmatpush1.bf16.msra.mxu0 %v16383_v11  ;;  %v16502_v11 = vld [vmem:[#allocation116_spill] sm:$0xff] }
0x2dfb   :  { %12114 = vmatprep.subr.bf16.mxu0 %v16384_v44  ;;  %v16503_v44 = vld [vmem:[#allocation117_spill] sm:$0xff] }
0x2dfe   :  { %12116 = vmatpush1.bf16.msra.mxu0 %v16385_v39  ;;  %v16504_v39 = vld [vmem:[#allocation118_spill] sm:$0xff] }
0x2dff   :  { %12118 = vmatprep.subr.bf16.mxu0 %v16386_v63  ;;  %v16505_v63 = vld [vmem:[#allocation119_spill] sm:$0xff] }
0x2e02   :  { %12120 = vmatpush1.bf16.msra.mxu0 %v16481_v13 }
0x2e03   :  { %12122 = vmatprep.subr.bf16.mxu0 %v16482_v28 }
0x2e06   :  { %12124 = vmatpush1.bf16.msra.mxu0 %v16483_v59 }
0x2e07   :  { %12126 = vmatprep.subr.bf16.mxu0 %v16484_v12 }
0x2e0a   :  { %12128 = vmatpush1.bf16.msra.mxu0 %v16485_v29 }
0x2e0b   :  { %12162 = vmatprep.subr.bf16.mxu0 %v16486_v26 }
0x2ec0   :  { %v7765_v48 = vpop.f32.mrb[104].mxu0 }
0x2ec1   :  { %v7766_v23 = vadd.f32 %v7765_v48, %v15149_v40  ;;  %v9973_v32 = vpop.f32.mrb[105].mxu0  ;;  %v16506_v40 = vld [vmem:[#allocation120_spill] sm:$0xff] }
0x2ec3   :  { %v7769_v33 = vadd.f32 %v16487_v46, %v7766_v23 }
0x2ec5   :  { %8161 = vst [vmem:[#allocation13 + $0x38] sm:$0xff] %v7769_v33  ;;  %7835 = vmatmul.mubr.f32.vlgmr.msra.gmra.mrb[140].mxu1 %v7769_v33  ;;  %7906 = vmatmul.mubr.f32.vlgmr.msra.gmra.mrb[106].mxu0 %v7769_v33 }
0x2ec6   :  { %12132 = vmatpush1.bf16.msra.mxu1 %v16488_v45  ;;  %12164 = vmatpush1.bf16.msra.mxu0 %v16489_v62 }
0x2ec7   :  { %12134 = vmatprep.subr.bf16.mxu1 %v16490_v10  ;;  %12166 = vmatprep.subr.bf16.mxu0 %v16491_v38 }
0x2ec8   :  { %7976 = vmatprep.mubr.f32.mxu1 %v15739_v51  ;;  %8047 = vmatprep.mubr.f32.mxu0 %v15739_v51 }
0x2eca   :  { %12136 = vmatpush1.bf16.msra.mxu1 %v16492_v2  ;;  %12168 = vmatpush1.bf16.msra.mxu0 %v16493_v6 }
0x2ecb   :  { %12138 = vmatprep.subr.bf16.mxu1 %v16494_v52  ;;  %12170 = vmatprep.subr.bf16.mxu0 %v16495_v49 }
0x2ece   :  { %12140 = vmatpush1.bf16.msra.mxu1 %v16496_v19  ;;  %12172 = vmatpush1.bf16.msra.mxu0 %v16497_v0 }
0x2ecf   :  { %12142 = vmatprep.subr.bf16.mxu1 %v16498_v42  ;;  %12174 = vmatprep.subr.bf16.mxu0 %v16499_v5 }
0x2ed2   :  { %12144 = vmatpush1.bf16.msra.mxu1 %v16500_v7  ;;  %12176 = vmatpush1.bf16.msra.mxu0 %v16501_v37 }
0x2ed3   :  { %12146 = vmatprep.subr.bf16.mxu1 %v16502_v11  ;;  %12178 = vmatprep.subr.bf16.mxu0 %v16503_v44 }
0x2ed6   :  { %12148 = vmatpush1.bf16.msra.mxu1 %v16504_v39  ;;  %12180 = vmatpush1.bf16.msra.mxu0 %v16505_v63 }
0x2ed7   :  { %12150 = vmatprep.subr.bf16.mxu1 %v16506_v40  ;;  %12182 = vmatprep.subr.bf16.mxu0 %v16507_v54 }
0x2eda   :  { %12152 = vmatpush1.bf16.msra.mxu1 %v16508_v47  ;;  %12184 = vmatpush1.bf16.msra.mxu0 %v16509_v56 }
0x2edb   :  { %12154 = vmatprep.subr.bf16.mxu1 %v16510_v34  ;;  %12186 = vmatprep.subr.bf16.mxu0 %v16511_v14 }
0x2ede   :  { %12156 = vmatpush1.bf16.msra.mxu1 %v16512_v57  ;;  %12188 = vmatpush1.bf16.msra.mxu0 %v16513_v1 }
0x2edf   :  { %12158 = vmatprep.subr.bf16.mxu1 %v16514_v3  ;;  %12190 = vmatprep.subr.bf16.mxu0 %v16515_v15 }
0x2ee2   :  { %12160 = vmatpush1.bf16.msra.mxu1 %v16516_v58  ;;  %12192 = vmatpush1.bf16.msra.mxu0 %v16517_v22 }
0x2ee3   :  { %12193 = vmatprep.subr.bf16.mxu1 %v15738_v31 }
0x2ee5   :  { %7977 = vmatmul.mubr.f32.vlgmr.msra.gmra.mrb[142].mxu1 %v7769_v33  ;;  %8048 = vmatmul.mubr.f32.vlgmr.msra.gmra.mrb[108].mxu0 %v7769_v33 }
0x2ee6   :  { %12195 = vmatpush3.bf16.msra.mxu1 %v16518_v25  ;;  %10006 = vmatprep.mubr.msk.f32.mxu1 %vm12751_vm0, %v15739_v51  ;;  %v16524_v51 = vld [vmem:[#allocation138_spill] sm:$0xff] }
0x2ee7   :  { %12196 = vmatprep.subr.bf16.mxu1 %v15738_v31 }
0x2eea   :  { %12198 = vmatpush3.bf16.msra.mxu1 %v16519_v24 }
0x2eeb   :  { %12199 = vmatprep.subr.bf16.mxu1 %v15738_v31 }
0x2eee   :  { %12201 = vmatpush3.bf16.msra.mxu1 %v16520_v36 }
0x2eef   :  { %12202 = vmatprep.subr.bf16.mxu1 %v15738_v31 }
0x2ef2   :  { %12204 = vmatpush3.bf16.msra.mxu1 %v16521_v16 }
0x2ef3   :  { %12205 = vmatprep.subr.bf16.mxu1 %v15738_v31 }
0x2ef6   :  { %12207 = vmatpush3.bf16.msra.mxu1 %v16522_v18 }
0x2ef7   :  { %12208 = vmatprep.subr.bf16.mxu1 %v15738_v31 }
0x2efa   :  { %12210 = vmatpush3.bf16.msra.mxu1 %v16523_v4 }
0x2efb   :  { %12211 = vmatprep.subr.bf16.mxu1 %v15738_v31 }
0x2efe   :  { %12213 = vmatpush3.bf16.msra.mxu1 %v16524_v51 }
0x2eff   :  { %12214 = vmatprep.subr.bf16.mxu1 %v15738_v31 }
0x2f02   :  { %12216 = vmatpush3.bf16.msra.mxu1 %v16525_v8 }
0x2f05   :  { %10007 = vmatmul.mubr.f32.vlgmr.msra.gmra.mrb[144].mxu1 %v7769_v33 }
0x2f06   :  { %12693 = shalt.err (!%p12690_p2)
}
0x2f07   :  { %s12694_s22 = scalar_lea.hbm %s15370_s14, 1024 }
0x2f08   :  { %p12695_p3 = scmp.ne.s32.totalorder %s15370_s14, %s12694_s22  ;;  %p12698_p4 = scmp.lt.u32.totalorder %s12694_s22, %s15370_s14 }
0x2f0a   :  { %p12700_p5 = pnand %p12698_p4, %p12695_p3 }
0x2f0c   :  { %12703 = shalt.err (!%p12700_p5)
}
0x2f0d   :  { %8186 = dma.vmem_to_hbm [thread:$0]  %s8181_s4, 1024, %s15370_s14, [#allocation14], %s12741_s30, %s12741_s30, %s12742_s23   ;;  %v16526_v31 = vld [vmem:[#allocation140_spill] sm:$0xff]  ;;  %v8125_v35 = vld [vmem:[#allocation6 + $0xa8] sm:$0xff]  ;;  %v8126_v55 = vld [vmem:[#allocation6 + $0xb0] sm:$0xff] }
0x2f0e   :  { %v7409_v9 = vadd.f32 %v15144_v20, %v16526_v31  ;;  %v16527_v61 = vld [vmem:[#allocation141_spill] sm:$0xff]  ;;  %v16529_v30 = vld [vmem:[#allocation142_spill] sm:$0xff]  ;;  %v8127_v49 = vld [vmem:[#allocation6 + $0xb8] sm:$0xff]  ;;  %s12754_s14 = smov [#allocation12]  }
0x2f0f   :  { %v16528_v27 = vld [vmem:[#allocation145_spill] sm:$0xff]  ;;  %v16530_v13 = vld [vmem:[#allocation146_spill] sm:$0xff]  ;;  %s8168_s18 = sshll.u32 %s12754_s14, 4  ;;  %v16531_v40 = vld [vmem:[#allocation144_spill] sm:$0xff]  ;;  %s8169_s18 = int_to_ptr.vmem [resolvable:$true] %s8168_s18 }
0x2f10   :  { %v7410_v60 = vadd.f32 %v16528_v27, %v16527_v61  ;;  %v7411_v28 = vadd.f32 %v16530_v13, %v16529_v30  ;;  %s12704_s5 = scalar_lea.vmem %s8169_s18, 1024  ;;  %p12709_p7 = scmp.lt.s32.totalorder %s8169_s18, %s8169_s18 }
0x2f11   :  { %p12705_p6 = scmp.ne.s32.totalorder %s8169_s18, %s12704_s5  ;;  %p12710_p8 = scmp.lt.s32.totalorder %s12704_s5, %s12704_s5 }
0x2f13   :  { %p12711_p9 = por %p12710_p8, %p12709_p7 }
0x2f15   :  { %p12712_p10 = pnand %p12711_p9, %p12705_p6 }
0x2f98   :  { %v7836_v41 = vpop.f32.mrb[140].mxu1  ;;  %v7907_v50 = vpop.f32.mrb[106].mxu0 }
0x2f99   :  { %v7838_v17 = vpop.f32.mrb[141].mxu1  ;;  %v7909_v53 = vpop.f32.mrb[107].mxu0  ;;  %v8128_v43 = vmul.f32 %v8125_v35, %v7836_v41  ;;  %v8130_v0 = vmul.f32 %v8127_v49, %v7907_v50 }
0x2f9a   :  { %v8134_v21 = vmul.f32 %v7909_v53, %v7409_v9  ;;  %v8129_v59 = vmul.f32 %v8126_v55, %v7838_v17 }
0x2fb8   :  { %v7978_v12 = vpop.f32.mrb[142].mxu1  ;;  %v8049_v29 = vpop.f32.mrb[108].mxu0 }
0x2fb9   :  { %v8135_v26 = vmul.f32 %v7978_v12, %v7410_v60  ;;  %v8131_v48 = vadd.f32 %v8128_v43, %v8049_v29  ;;  %v7980_v20 = vpop.f32.mrb[143].mxu1  ;;  %v8051_v23 = vpop.f32.mrb[109].mxu0 }
0x2fba   :  { %v8136_v32 = vmul.f32 %v7980_v20, %v7411_v28  ;;  %v8132_v46 = vadd.f32 %v8129_v59, %v8051_v23 }
0x2fbb   :  { %v8137_v33 = vadd.f32 %v8134_v21, %v8131_v48 }
0x2fbc   :  { %v8144_v45 = vadd.f32 %v8135_v26, %v8132_v46 }
0x2fbd   :  { %v8271_v62 = vmul.f32 -1.442695, %v8137_v33 }
0x2fbe   :  { %v8272_v10 = vmul.f32 -1.442695, %v8144_v45 }
0x2fbf   :  { %12486 = vpow2.f32 %v8271_v62 }
0x2fc0   :  { %12488 = vpow2.f32 %v8272_v10 }
0x2fc9   :  { %v12487_v38 = vpop.eup %12486 }
0x2fca   :  { %v8141_v2 = vadd.f32 1.0, %v12487_v38  ;;  %v12489_v6 = vpop.eup %12488 }
0x2fcb   :  { %v8148_v52 = vadd.f32 1.0, %v12489_v6 }
0x2fcc   :  { %12490 = vrcp.f32 %v8141_v2 }
0x2fcd   :  { %12492 = vrcp.f32 %v8148_v52 }
0x2fd6   :  { %v12491_v19 = vpop.eup %12490 }
0x2fd7   :  { %v8151_v42 = vmul.f32 %v12491_v19, %v8136_v32  ;;  %v12493_v44 = vpop.eup %12492 }
0x2fd8   :  { %v8120_v5 = vpop.f32.mrb[144].mxu1  ;;  %v8154_v39 = vsub.f32 1.0, %v12493_v44 }
0x2fd9   :  { %v8133_v7 = vadd.f32 %v8130_v0, %v8120_v5  ;;  %v10008_v37 = vpop.f32.mrb[145].mxu1 }
0x2fda   :  { %v8155_v54 = vmul.f32 %v8154_v39, %v16531_v40 }
0x2fdb   :  { %v8152_v11 = vadd.f32 %v8151_v42, %v8133_v7 }
0x2fdd   :  { %12494 = vtanh.f32 %v8152_v11 }
0x2fe7   :  { %v12495_v63 = vpop.eup %12494 }
0x2fe8   :  { %v8156_v47 = vmul.f32 %v12495_v63, %v12493_v44 }
0x2fea   :  { %v8157_v56 = vadd.f32 %v8156_v47, %v8155_v54 }
0x2fec   :  { %8159 = vst [vmem:[#allocation12 + $0x38] sm:$0xff] %v8157_v56 }
0x2fed   :  { %12715 = shalt.err (!%p12712_p10)
}
0x2fee   :  { %s12716_s20 = scalar_lea.hbm %s15369_s13, 1024 }
0x2fef   :  { %p12717_p11 = scmp.ne.s32.totalorder %s15369_s13, %s12716_s20  ;;  %p12720_p12 = scmp.lt.u32.totalorder %s12716_s20, %s15369_s13 }
0x2ff1   :  { %p12722_p13 = pnand %p12720_p12, %p12717_p11 }
0x2ff3   :  { %12725 = shalt.err (!%p12722_p13)
}
0x2ff4   :  { %8174 = dma.vmem_to_hbm [thread:$0]  %s8169_s18, 1024, %s15369_s13, [#allocation5], %s12741_s30, %s12741_s30, %s12742_s23  }
0x2ff5   :  { %12732 = dma.done.wait [#allocation5], 1024  }
0x2ff6   :  { %12733 = vsyncadd [#allocation5], 4294966272 }
0x2ff7   :  { %12734 = dma.done.wait [#allocation14], 1024  }
0x2ff8   :  { %12735 = vsyncadd [#allocation14], 4294966272 }
0x2ff9   :  { %8193 = vsyncpa [#allocation4], 1 }
0x2ffa   :  { %8194 = vsyncpa [#allocation7], 1 }
0x2ffb   :  { %8195 = vsyncpa [#allocation10], 1 }
0x2ffc   :  { %8196 = vsyncpa [#allocation5], 1 }
0x2ffd   :  { %8197 = vsyncpa [#allocation14], 1 }

</bundles_post_ra>
